<compile_context>
chip_gen: v5e
topology: v5e:2x2
jax: 0.10.0
libtpu: 0.0.40
codegen_flags: <defaults>
</compile_context>

<pallas_src>
import functools

import jax
import jax.numpy as jnp
from jax.experimental import pallas as pl
from jax.experimental.pallas import tpu as pltpu


def spatial_attention_kernel(b2_ref, cols_ref, xg_ref, w1_ref, b1_ref, m2_ref, out_ref,
                             *, H, W, K, C, Cmid, Bb):
    """One batch block (Bb images) per grid step.

    b2_ref  : SMEM (1,)              conv2 bias
    cols_ref: (Bb, Hp, W, K*C)       kw-fused zero-padded rows: cols[b,h',w,kw*C+c] = xpad[b,h',w+kw,c]
    xg_ref  : (Bb, C, H*W)           input in NCHW-flat form (lane dense), for the final gate
    w1_ref  : (K, Cmid, K*C)         conv1 weights, one (Cmid, K*C) matrix per kh (resident)
    b1_ref  : (Cmid, 1)              conv1 bias (resident)
    m2_ref  : (Cmid, H*W, H*W)       conv2 dense stencil matrices (zero rows = 'same' padding, resident)
    out_ref : (Bb, C, H*W)           sigmoid(conv2(relu(conv1(x)))) * x
    """
    HW = H * W
    KC = K * C

    # ---- conv1 (C -> Cmid, KxK, 'same'): per image, K fused-tap MXU matmuls, contraction K*C ----
    # The kh-slice of cols is contiguous within one image, so the reshape below is a free view
    # (no relayout copy).  Accumulator kept as (Cmid, HW): lane dense, ~2 vregs.
    h1_imgs = []
    for b in range(Bb):
        acc = jnp.zeros((Cmid, HW), dtype=jnp.float32)
        for kh in range(K):
            lhs = cols_ref[b, kh:kh + H, :, :].reshape(HW, KC)             # (HW, K*C) view
            acc = acc + jax.lax.dot_general(
                w1_ref[kh], lhs, (((1,), (1,)), ((), ())),
                preferred_element_type=jnp.float32)                        # (Cmid, HW)
        h1_imgs.append(jnp.maximum(acc + b1_ref[...], 0.0))                # bias + ReLU

    # ---- conv2 (Cmid -> 1, KxK, 'same') on the MXU via dense stencil matmuls ----
    # attn_pre[b, p] = sum_m sum_q h1[b, m, q] * M2[m, q, p]; M2 already encodes the taps
    # AND the zero 'same' padding at the borders, so no scratch / halo handling is needed.
    acc2 = jnp.zeros((Bb, HW), dtype=jnp.float32)
    for m in range(Cmid):
        h1_m = jnp.concatenate([h1_imgs[b][m:m + 1, :] for b in range(Bb)], axis=0)  # (Bb, HW)
        acc2 = acc2 + jnp.dot(h1_m, m2_ref[m], preferred_element_type=jnp.float32)
    attn = jax.nn.sigmoid(acc2 + b2_ref[0])                                # (Bb, HW)

    # ---- gate: broadcast attention over channels (sublane broadcast) and scale the input ----
    out_ref[...] = attn[:, None, :] * xg_ref[...]                          # (Bb, C, H*W)


def precompute_spatial_attention_params(w1, b1, w2, b2, H, W, kernel_size=7):
    """Weight-only prep, hoisted so it is computed once and reused across forward calls."""
    K = kernel_size
    P = (K - 1) // 2
    Cmid, C = w1.shape[0], w1.shape[1]
    HW = H * W

    # conv1 weights: one (Cmid, K*C) matrix per kh, large dim last (lane dense).
    w1_r = jnp.transpose(w1, (2, 0, 3, 1)).reshape(K, Cmid, K * C).astype(jnp.float32)
    b1_r = b1.reshape(Cmid, 1).astype(jnp.float32)

    # conv2 as a dense (HW, HW) stencil matrix per mid-channel.
    # M2[m, q, p] = w2[0, m, kh, kw] with kh = h_q - h_p + P, kw = w_q - w_p + P when the tap
    # is inside the kernel window, else 0 (this also zeroes out-of-image taps -> correct edges).
    h_idx = jnp.arange(HW) // W
    w_idx = jnp.arange(HW) % W
    dh = h_idx[:, None] - h_idx[None, :] + P
    dw = w_idx[:, None] - w_idx[None, :] + P
    valid = (dh >= 0) & (dh < K) & (dw >= 0) & (dw < K)
    taps = w2[0].astype(jnp.float32)[:, jnp.clip(dh, 0, K - 1), jnp.clip(dw, 0, K - 1)]
    m2 = jnp.where(valid[None, :, :], taps, 0.0)                           # (Cmid, HW, HW)

    b2_r = b2.reshape(1).astype(jnp.float32)
    return w1_r, b1_r, m2, b2_r


def _pick_block_b(B, max_bb=16):
    """Largest divisor of B (<= max_bb) that still leaves >= 2 grid steps when possible,
    so both v7x TensorCores get work under the 'parallel' batch axis."""
    upper = min(max_bb, B)
    if B >= 2:
        upper = min(upper, B // 2)
    for bb in range(max(upper, 1), 0, -1):
        if B % bb == 0:
            return bb
    return 1


def spatial_attention_apply(x_nchw, w1_r, b1_r, m2, b2_r, kernel_size=7, block_b=None):
    """Pallas SpatialAttention forward. Input/output are NCHW; weights already precomputed."""
    B, C, H, W = x_nchw.shape
    K = kernel_size
    P = (K - 1) // 2
    Cmid = w1_r.shape[1]
    Hp = H + 2 * P
    KC = K * C
    HW = H * W
    Bb = block_b if block_b is not None else _pick_block_b(B)
    assert B % Bb == 0, (B, Bb)

    x_f32 = x_nchw.astype(jnp.float32)

    # kw-fused, zero-padded rows for conv1: cols[b, h', w, kw*C + c] = xpad[b, h', w + kw, c]
    x_nhwc = jnp.transpose(x_f32, (0, 2, 3, 1))                            # (B,H,W,C)
    xp = jnp.pad(x_nhwc, ((0, 0), (P, P), (P, P), (0, 0)))                 # (B,Hp,Wp,C)
    cols = jnp.concatenate([xp[:, :, kw:kw + W, :] for kw in range(K)], axis=-1)  # (B,Hp,W,K*C)

    # Gate input / output stay NCHW-flat: lane dense (HW = 256 lanes) and no output transpose.
    x_gate = x_f32.reshape(B, C, HW)

    kern = functools.partial(spatial_attention_kernel,
                             H=H, W=W, K=K, C=C, Cmid=Cmid, Bb=Bb)

    out_flat = pl.pallas_call(
        kern,
        out_shape=jax.ShapeDtypeStruct((B, C, HW), jnp.float32),
        grid_spec=pltpu.PrefetchScalarGridSpec(
            num_scalar_prefetch=0,
            grid=(B // Bb,),
            in_specs=[
                pl.BlockSpec(memory_space=pltpu.MemorySpace.SMEM),         # b2 (scalar)
                pl.BlockSpec((Bb, Hp, W, KC), lambda i: (i, 0, 0, 0)),     # cols   (per-step DMA)
                pl.BlockSpec((Bb, C, HW), lambda i: (i, 0, 0)),            # x_gate (per-step DMA)
                pl.BlockSpec((K, Cmid, KC), lambda i: (0, 0, 0)),          # w1     (resident)
                pl.BlockSpec((Cmid, 1), lambda i: (0, 0)),                 # b1     (resident)
                pl.BlockSpec((Cmid, HW, HW), lambda i: (0, 0, 0)),         # conv2 stencil (resident)
            ],
            out_specs=pl.BlockSpec((Bb, C, HW), lambda i: (i, 0, 0)),
            # no scratch_shapes: the conv2 scratch / memset from the previous version is gone
        ),
        compiler_params=pltpu.CompilerParams(
            dimension_semantics=("parallel",),                             # batch blocks across TCs
            allow_input_fusion=[False, True, True, False, False, False],   # fuse cols/x_gate producers
        ),
    )(b2_r, cols, x_gate, w1_r, b1_r, m2)

    return out_flat.reshape(B, C, H, W)


def spatial_attention(x_nchw, w1, b1, w2, b2, kernel_size=7, block_b=None):
    """Convenience one-shot entry point (prep + apply)."""
    H, W = x_nchw.shape[2], x_nchw.shape[3]
    prepped = precompute_spatial_attention_params(w1, b1, w2, b2, H, W, kernel_size)
    return spatial_attention_apply(x_nchw, *prepped, kernel_size=kernel_size, block_b=block_b)


def reference(x, w1, b1, w2, b2, kernel_size=7):
    """Pure-JAX reference matching the PyTorch module (NCHW), full f32 precision."""
    P = (kernel_size - 1) // 2
    dn = ('NCHW', 'OIHW', 'NCHW')
    prec = jax.lax.Precision.HIGHEST
    h = jax.lax.conv_general_dilated(x, w1, (1, 1), [(P, P), (P, P)],
                                     dimension_numbers=dn,
                                     precision=prec) + b1[None, :, None, None]
    h = jnp.maximum(h, 0.0)
    h2 = jax.lax.conv_general_dilated(h, w2, (1, 1), [(P, P), (P, P)],
                                      dimension_numbers=dn,
                                      precision=prec) + b2[None, :, None, None]
    return jax.nn.sigmoid(h2) * x


if __name__ == "__main__":
    # Module config: SpatialAttention(dim=32, kernel_size=7)  -> Cmid = dim // 16 = 2.
    # B=8 so the batch-blocked grid has 2 steps of Bb=4 images each.
    B, C, H, W = 8, 32, 16, 16
    K = 7
    Cmid = C // 16

    key = jax.random.PRNGKey(0)
    k1, k2, k3, k4, k5 = jax.random.split(key, 5)

    x = jax.random.normal(k1, (B, C, H, W), jnp.float32)

    # Deterministic PyTorch-style uniform(-1/sqrt(fan_in), 1/sqrt(fan_in)) init.
    fan1 = C * K * K
    w1 = jax.random.uniform(k2, (Cmid, C, K, K), jnp.float32, -1.0, 1.0) / jnp.sqrt(fan1)
    b1 = jax.random.uniform(k3, (Cmid,), jnp.float32, -1.0, 1.0) / jnp.sqrt(fan1)
    fan2 = Cmid * K * K
    w2 = jax.random.uniform(k4, (1, Cmid, K, K), jnp.float32, -1.0, 1.0) / jnp.sqrt(fan2)
    b2 = jax.random.uniform(k5, (1,), jnp.float32, -1.0, 1.0) / jnp.sqrt(fan2)

    # Weight-only prep computed once (hoisted), then the jitted apply is reused per forward.
    prepped = precompute_spatial_attention_params(w1, b1, w2, b2, H, W, kernel_size=K)
    apply_fn = jax.jit(functools.partial(spatial_attention_apply, kernel_size=K))

    out = apply_fn(x, *prepped)
    out = jax.block_until_ready(out)

    ref = reference(x, w1, b1, w2, b2, kernel_size=K)
    assert out.shape == x.shape and out.dtype == jnp.float32
    max_err = float(jnp.max(jnp.abs(out - ref)))
    assert jnp.allclose(out, ref, atol=1e-3, rtol=1e-3), max_err

    print("KERNEL_OK")
</pallas_src>

<mosaic_0001>
module attributes {stable_mosaic.version = 11 : i64} {
  func.func @spatial_attention_kernel(%arg0: i32, %arg1: memref<1xf32, #tpu.memory_space<smem>>, %arg2: memref<4x22x16x224xf32, #tpu.memory_space<vmem>>, %arg3: memref<4x32x256xf32, #tpu.memory_space<vmem>>, %arg4: memref<7x2x224xf32, #tpu.memory_space<vmem>>, %arg5: memref<2x1xf32, #tpu.memory_space<vmem>>, %arg6: memref<2x256x256xf32, #tpu.memory_space<vmem>>, %arg7: memref<4x32x256xf32, #tpu.memory_space<vmem>>) attributes {dimension_semantics = [#tpu.dimension_semantics<parallel>], iteration_bounds = array<i64: 2>, scalar_prefetch = 0 : i64, scratch_operands = 0 : i64, tpu.core_type = #tpu.core_type<tc>, window_params = [{transform_indices = @transform_0, window_bounds = array<i64: 1>}, {transform_indices = @transform_1, window_bounds = array<i64: 4, 22, 16, 224>}, {transform_indices = @transform_2, window_bounds = array<i64: 4, 32, 256>}, {pipeline_mode = #tpu.pipeline_mode<synchronous>, transform_indices = @transform_3, window_bounds = array<i64: 7, 2, 224>}, {pipeline_mode = #tpu.pipeline_mode<synchronous>, transform_indices = @transform_4, window_bounds = array<i64: 2, 1>}, {pipeline_mode = #tpu.pipeline_mode<synchronous>, transform_indices = @transform_5, window_bounds = array<i64: 2, 256, 256>}, {transform_indices = @transform_6, window_bounds = array<i64: 4, 32, 256>}]} {
    %cst = arith.constant 0.000000e+00 : f32
    %0 = vector.broadcast %cst : f32 to vector<2x256xf32>
    %c0 = arith.constant 0 : index
    %c0_0 = arith.constant 0 : index
    %c0_1 = arith.constant 0 : index
    %c0_2 = arith.constant 0 : index
    %1 = vector.load %arg2[%c0, %c0_0, %c0_1, %c0_2] : memref<4x22x16x224xf32, #tpu.memory_space<vmem>>, vector<1x16x16x224xf32>
    %2 = vector.shape_cast %1 : vector<1x16x16x224xf32> to vector<16x16x224xf32>
    %3 = vector.shape_cast %2 : vector<16x16x224xf32> to vector<256x224xf32>
    %c0_3 = arith.constant 0 : index
    %c0_4 = arith.constant 0 : index
    %c0_5 = arith.constant 0 : index
    %4 = vector.load %arg4[%c0_3, %c0_4, %c0_5] : memref<7x2x224xf32, #tpu.memory_space<vmem>>, vector<1x2x224xf32>
    %5 = vector.shape_cast %4 : vector<1x2x224xf32> to vector<2x224xf32>
    %cst_6 = arith.constant dense<0.000000e+00> : vector<2x256xf32>
    %6 = tpu.matmul %5, %3, %cst_6 {dimension_numbers = #tpu.dot_dimension_numbers<[1], [1], [0], [0], [0, 0, 1, 0], [], []>} : vector<2x224xf32>, vector<256x224xf32>, vector<2x256xf32> -> vector<2x256xf32>
    %7 = arith.addf %0, %6 : vector<2x256xf32>
    %c0_7 = arith.constant 0 : index
    %c1 = arith.constant 1 : index
    %c0_8 = arith.constant 0 : index
    %c0_9 = arith.constant 0 : index
    %8 = vector.load %arg2[%c0_7, %c1, %c0_8, %c0_9] : memref<4x22x16x224xf32, #tpu.memory_space<vmem>>, vector<1x16x16x224xf32>
    %9 = vector.shape_cast %8 : vector<1x16x16x224xf32> to vector<16x16x224xf32>
    %10 = vector.shape_cast %9 : vector<16x16x224xf32> to vector<256x224xf32>
    %c1_10 = arith.constant 1 : index
    %c0_11 = arith.constant 0 : index
    %c0_12 = arith.constant 0 : index
    %11 = vector.load %arg4[%c1_10, %c0_11, %c0_12] : memref<7x2x224xf32, #tpu.memory_space<vmem>>, vector<1x2x224xf32>
    %12 = vector.shape_cast %11 : vector<1x2x224xf32> to vector<2x224xf32>
    %cst_13 = arith.constant dense<0.000000e+00> : vector<2x256xf32>
    %13 = tpu.matmul %12, %10, %cst_13 {dimension_numbers = #tpu.dot_dimension_numbers<[1], [1], [0], [0], [0, 0, 1, 0], [], []>} : vector<2x224xf32>, vector<256x224xf32>, vector<2x256xf32> -> vector<2x256xf32>
    %14 = arith.addf %7, %13 : vector<2x256xf32>
    %c0_14 = arith.constant 0 : index
    %c2 = arith.constant 2 : index
    %c0_15 = arith.constant 0 : index
    %c0_16 = arith.constant 0 : index
    %15 = vector.load %arg2[%c0_14, %c2, %c0_15, %c0_16] : memref<4x22x16x224xf32, #tpu.memory_space<vmem>>, vector<1x16x16x224xf32>
    %16 = vector.shape_cast %15 : vector<1x16x16x224xf32> to vector<16x16x224xf32>
    %17 = vector.shape_cast %16 : vector<16x16x224xf32> to vector<256x224xf32>
    %c2_17 = arith.constant 2 : index
    %c0_18 = arith.constant 0 : index
    %c0_19 = arith.constant 0 : index
    %18 = vector.load %arg4[%c2_17, %c0_18, %c0_19] : memref<7x2x224xf32, #tpu.memory_space<vmem>>, vector<1x2x224xf32>
    %19 = vector.shape_cast %18 : vector<1x2x224xf32> to vector<2x224xf32>
    %cst_20 = arith.constant dense<0.000000e+00> : vector<2x256xf32>
    %20 = tpu.matmul %19, %17, %cst_20 {dimension_numbers = #tpu.dot_dimension_numbers<[1], [1], [0], [0], [0, 0, 1, 0], [], []>} : vector<2x224xf32>, vector<256x224xf32>, vector<2x256xf32> -> vector<2x256xf32>
    %21 = arith.addf %14, %20 : vector<2x256xf32>
    %c0_21 = arith.constant 0 : index
    %c3 = arith.constant 3 : index
    %c0_22 = arith.constant 0 : index
    %c0_23 = arith.constant 0 : index
    %22 = vector.load %arg2[%c0_21, %c3, %c0_22, %c0_23] : memref<4x22x16x224xf32, #tpu.memory_space<vmem>>, vector<1x16x16x224xf32>
    %23 = vector.shape_cast %22 : vector<1x16x16x224xf32> to vector<16x16x224xf32>
    %24 = vector.shape_cast %23 : vector<16x16x224xf32> to vector<256x224xf32>
    %c3_24 = arith.constant 3 : index
    %c0_25 = arith.constant 0 : index
    %c0_26 = arith.constant 0 : index
    %25 = vector.load %arg4[%c3_24, %c0_25, %c0_26] : memref<7x2x224xf32, #tpu.memory_space<vmem>>, vector<1x2x224xf32>
    %26 = vector.shape_cast %25 : vector<1x2x224xf32> to vector<2x224xf32>
    %cst_27 = arith.constant dense<0.000000e+00> : vector<2x256xf32>
    %27 = tpu.matmul %26, %24, %cst_27 {dimension_numbers = #tpu.dot_dimension_numbers<[1], [1], [0], [0], [0, 0, 1, 0], [], []>} : vector<2x224xf32>, vector<256x224xf32>, vector<2x256xf32> -> vector<2x256xf32>
    %28 = arith.addf %21, %27 : vector<2x256xf32>
    %c0_28 = arith.constant 0 : index
    %c4 = arith.constant 4 : index
    %c0_29 = arith.constant 0 : index
    %c0_30 = arith.constant 0 : index
    %29 = vector.load %arg2[%c0_28, %c4, %c0_29, %c0_30] : memref<4x22x16x224xf32, #tpu.memory_space<vmem>>, vector<1x16x16x224xf32>
    %30 = vector.shape_cast %29 : vector<1x16x16x224xf32> to vector<16x16x224xf32>
    %31 = vector.shape_cast %30 : vector<16x16x224xf32> to vector<256x224xf32>
    %c4_31 = arith.constant 4 : index
    %c0_32 = arith.constant 0 : index
    %c0_33 = arith.constant 0 : index
    %32 = vector.load %arg4[%c4_31, %c0_32, %c0_33] : memref<7x2x224xf32, #tpu.memory_space<vmem>>, vector<1x2x224xf32>
    %33 = vector.shape_cast %32 : vector<1x2x224xf32> to vector<2x224xf32>
    %cst_34 = arith.constant dense<0.000000e+00> : vector<2x256xf32>
    %34 = tpu.matmul %33, %31, %cst_34 {dimension_numbers = #tpu.dot_dimension_numbers<[1], [1], [0], [0], [0, 0, 1, 0], [], []>} : vector<2x224xf32>, vector<256x224xf32>, vector<2x256xf32> -> vector<2x256xf32>
    %35 = arith.addf %28, %34 : vector<2x256xf32>
    %c0_35 = arith.constant 0 : index
    %c5 = arith.constant 5 : index
    %c0_36 = arith.constant 0 : index
    %c0_37 = arith.constant 0 : index
    %36 = vector.load %arg2[%c0_35, %c5, %c0_36, %c0_37] : memref<4x22x16x224xf32, #tpu.memory_space<vmem>>, vector<1x16x16x224xf32>
    %37 = vector.shape_cast %36 : vector<1x16x16x224xf32> to vector<16x16x224xf32>
    %38 = vector.shape_cast %37 : vector<16x16x224xf32> to vector<256x224xf32>
    %c5_38 = arith.constant 5 : index
    %c0_39 = arith.constant 0 : index
    %c0_40 = arith.constant 0 : index
    %39 = vector.load %arg4[%c5_38, %c0_39, %c0_40] : memref<7x2x224xf32, #tpu.memory_space<vmem>>, vector<1x2x224xf32>
    %40 = vector.shape_cast %39 : vector<1x2x224xf32> to vector<2x224xf32>
    %cst_41 = arith.constant dense<0.000000e+00> : vector<2x256xf32>
    %41 = tpu.matmul %40, %38, %cst_41 {dimension_numbers = #tpu.dot_dimension_numbers<[1], [1], [0], [0], [0, 0, 1, 0], [], []>} : vector<2x224xf32>, vector<256x224xf32>, vector<2x256xf32> -> vector<2x256xf32>
    %42 = arith.addf %35, %41 : vector<2x256xf32>
    %c0_42 = arith.constant 0 : index
    %c6 = arith.constant 6 : index
    %c0_43 = arith.constant 0 : index
    %c0_44 = arith.constant 0 : index
    %43 = vector.load %arg2[%c0_42, %c6, %c0_43, %c0_44] : memref<4x22x16x224xf32, #tpu.memory_space<vmem>>, vector<1x16x16x224xf32>
    %44 = vector.shape_cast %43 : vector<1x16x16x224xf32> to vector<16x16x224xf32>
    %45 = vector.shape_cast %44 : vector<16x16x224xf32> to vector<256x224xf32>
    %c6_45 = arith.constant 6 : index
    %c0_46 = arith.constant 0 : index
    %c0_47 = arith.constant 0 : index
    %46 = vector.load %arg4[%c6_45, %c0_46, %c0_47] : memref<7x2x224xf32, #tpu.memory_space<vmem>>, vector<1x2x224xf32>
    %47 = vector.shape_cast %46 : vector<1x2x224xf32> to vector<2x224xf32>
    %cst_48 = arith.constant dense<0.000000e+00> : vector<2x256xf32>
    %48 = tpu.matmul %47, %45, %cst_48 {dimension_numbers = #tpu.dot_dimension_numbers<[1], [1], [0], [0], [0, 0, 1, 0], [], []>} : vector<2x224xf32>, vector<256x224xf32>, vector<2x256xf32> -> vector<2x256xf32>
    %49 = arith.addf %42, %48 : vector<2x256xf32>
    %c0_49 = arith.constant 0 : index
    %c0_50 = arith.constant 0 : index
    %50 = vector.load %arg5[%c0_49, %c0_50] : memref<2x1xf32, #tpu.memory_space<vmem>>, vector<2x1xf32>
    %51 = vector.broadcast %50 : vector<2x1xf32> to vector<2x256xf32>
    %52 = arith.addf %49, %51 : vector<2x256xf32>
    %cst_51 = arith.constant 0.000000e+00 : f32
    %53 = vector.broadcast %cst_51 : f32 to vector<2x256xf32>
    %54 = arith.maximumf %52, %53 : vector<2x256xf32>
    %cst_52 = arith.constant 0.000000e+00 : f32
    %55 = vector.broadcast %cst_52 : f32 to vector<2x256xf32>
    %c1_53 = arith.constant 1 : index
    %c0_54 = arith.constant 0 : index
    %c0_55 = arith.constant 0 : index
    %c0_56 = arith.constant 0 : index
    %56 = vector.load %arg2[%c1_53, %c0_54, %c0_55, %c0_56] : memref<4x22x16x224xf32, #tpu.memory_space<vmem>>, vector<1x16x16x224xf32>
    %57 = vector.shape_cast %56 : vector<1x16x16x224xf32> to vector<16x16x224xf32>
    %58 = vector.shape_cast %57 : vector<16x16x224xf32> to vector<256x224xf32>
    %c0_57 = arith.constant 0 : index
    %c0_58 = arith.constant 0 : index
    %c0_59 = arith.constant 0 : index
    %59 = vector.load %arg4[%c0_57, %c0_58, %c0_59] : memref<7x2x224xf32, #tpu.memory_space<vmem>>, vector<1x2x224xf32>
    %60 = vector.shape_cast %59 : vector<1x2x224xf32> to vector<2x224xf32>
    %cst_60 = arith.constant dense<0.000000e+00> : vector<2x256xf32>
    %61 = tpu.matmul %60, %58, %cst_60 {dimension_numbers = #tpu.dot_dimension_numbers<[1], [1], [0], [0], [0, 0, 1, 0], [], []>} : vector<2x224xf32>, vector<256x224xf32>, vector<2x256xf32> -> vector<2x256xf32>
    %62 = arith.addf %55, %61 : vector<2x256xf32>
    %c1_61 = arith.constant 1 : index
    %c1_62 = arith.constant 1 : index
    %c0_63 = arith.constant 0 : index
    %c0_64 = arith.constant 0 : index
    %63 = vector.load %arg2[%c1_61, %c1_62, %c0_63, %c0_64] : memref<4x22x16x224xf32, #tpu.memory_space<vmem>>, vector<1x16x16x224xf32>
    %64 = vector.shape_cast %63 : vector<1x16x16x224xf32> to vector<16x16x224xf32>
    %65 = vector.shape_cast %64 : vector<16x16x224xf32> to vector<256x224xf32>
    %c1_65 = arith.constant 1 : index
    %c0_66 = arith.constant 0 : index
    %c0_67 = arith.constant 0 : index
    %66 = vector.load %arg4[%c1_65, %c0_66, %c0_67] : memref<7x2x224xf32, #tpu.memory_space<vmem>>, vector<1x2x224xf32>
    %67 = vector.shape_cast %66 : vector<1x2x224xf32> to vector<2x224xf32>
    %cst_68 = arith.constant dense<0.000000e+00> : vector<2x256xf32>
    %68 = tpu.matmul %67, %65, %cst_68 {dimension_numbers = #tpu.dot_dimension_numbers<[1], [1], [0], [0], [0, 0, 1, 0], [], []>} : vector<2x224xf32>, vector<256x224xf32>, vector<2x256xf32> -> vector<2x256xf32>
    %69 = arith.addf %62, %68 : vector<2x256xf32>
    %c1_69 = arith.constant 1 : index
    %c2_70 = arith.constant 2 : index
    %c0_71 = arith.constant 0 : index
    %c0_72 = arith.constant 0 : index
    %70 = vector.load %arg2[%c1_69, %c2_70, %c0_71, %c0_72] : memref<4x22x16x224xf32, #tpu.memory_space<vmem>>, vector<1x16x16x224xf32>
    %71 = vector.shape_cast %70 : vector<1x16x16x224xf32> to vector<16x16x224xf32>
    %72 = vector.shape_cast %71 : vector<16x16x224xf32> to vector<256x224xf32>
    %c2_73 = arith.constant 2 : index
    %c0_74 = arith.constant 0 : index
    %c0_75 = arith.constant 0 : index
    %73 = vector.load %arg4[%c2_73, %c0_74, %c0_75] : memref<7x2x224xf32, #tpu.memory_space<vmem>>, vector<1x2x224xf32>
    %74 = vector.shape_cast %73 : vector<1x2x224xf32> to vector<2x224xf32>
    %cst_76 = arith.constant dense<0.000000e+00> : vector<2x256xf32>
    %75 = tpu.matmul %74, %72, %cst_76 {dimension_numbers = #tpu.dot_dimension_numbers<[1], [1], [0], [0], [0, 0, 1, 0], [], []>} : vector<2x224xf32>, vector<256x224xf32>, vector<2x256xf32> -> vector<2x256xf32>
    %76 = arith.addf %69, %75 : vector<2x256xf32>
    %c1_77 = arith.constant 1 : index
    %c3_78 = arith.constant 3 : index
    %c0_79 = arith.constant 0 : index
    %c0_80 = arith.constant 0 : index
    %77 = vector.load %arg2[%c1_77, %c3_78, %c0_79, %c0_80] : memref<4x22x16x224xf32, #tpu.memory_space<vmem>>, vector<1x16x16x224xf32>
    %78 = vector.shape_cast %77 : vector<1x16x16x224xf32> to vector<16x16x224xf32>
    %79 = vector.shape_cast %78 : vector<16x16x224xf32> to vector<256x224xf32>
    %c3_81 = arith.constant 3 : index
    %c0_82 = arith.constant 0 : index
    %c0_83 = arith.constant 0 : index
    %80 = vector.load %arg4[%c3_81, %c0_82, %c0_83] : memref<7x2x224xf32, #tpu.memory_space<vmem>>, vector<1x2x224xf32>
    %81 = vector.shape_cast %80 : vector<1x2x224xf32> to vector<2x224xf32>
    %cst_84 = arith.constant dense<0.000000e+00> : vector<2x256xf32>
    %82 = tpu.matmul %81, %79, %cst_84 {dimension_numbers = #tpu.dot_dimension_numbers<[1], [1], [0], [0], [0, 0, 1, 0], [], []>} : vector<2x224xf32>, vector<256x224xf32>, vector<2x256xf32> -> vector<2x256xf32>
    %83 = arith.addf %76, %82 : vector<2x256xf32>
    %c1_85 = arith.constant 1 : index
    %c4_86 = arith.constant 4 : index
    %c0_87 = arith.constant 0 : index
    %c0_88 = arith.constant 0 : index
    %84 = vector.load %arg2[%c1_85, %c4_86, %c0_87, %c0_88] : memref<4x22x16x224xf32, #tpu.memory_space<vmem>>, vector<1x16x16x224xf32>
    %85 = vector.shape_cast %84 : vector<1x16x16x224xf32> to vector<16x16x224xf32>
    %86 = vector.shape_cast %85 : vector<16x16x224xf32> to vector<256x224xf32>
    %c4_89 = arith.constant 4 : index
    %c0_90 = arith.constant 0 : index
    %c0_91 = arith.constant 0 : index
    %87 = vector.load %arg4[%c4_89, %c0_90, %c0_91] : memref<7x2x224xf32, #tpu.memory_space<vmem>>, vector<1x2x224xf32>
    %88 = vector.shape_cast %87 : vector<1x2x224xf32> to vector<2x224xf32>
    %cst_92 = arith.constant dense<0.000000e+00> : vector<2x256xf32>
    %89 = tpu.matmul %88, %86, %cst_92 {dimension_numbers = #tpu.dot_dimension_numbers<[1], [1], [0], [0], [0, 0, 1, 0], [], []>} : vector<2x224xf32>, vector<256x224xf32>, vector<2x256xf32> -> vector<2x256xf32>
    %90 = arith.addf %83, %89 : vector<2x256xf32>
    %c1_93 = arith.constant 1 : index
    %c5_94 = arith.constant 5 : index
    %c0_95 = arith.constant 0 : index
    %c0_96 = arith.constant 0 : index
    %91 = vector.load %arg2[%c1_93, %c5_94, %c0_95, %c0_96] : memref<4x22x16x224xf32, #tpu.memory_space<vmem>>, vector<1x16x16x224xf32>
    %92 = vector.shape_cast %91 : vector<1x16x16x224xf32> to vector<16x16x224xf32>
    %93 = vector.shape_cast %92 : vector<16x16x224xf32> to vector<256x224xf32>
    %c5_97 = arith.constant 5 : index
    %c0_98 = arith.constant 0 : index
    %c0_99 = arith.constant 0 : index
    %94 = vector.load %arg4[%c5_97, %c0_98, %c0_99] : memref<7x2x224xf32, #tpu.memory_space<vmem>>, vector<1x2x224xf32>
    %95 = vector.shape_cast %94 : vector<1x2x224xf32> to vector<2x224xf32>
    %cst_100 = arith.constant dense<0.000000e+00> : vector<2x256xf32>
    %96 = tpu.matmul %95, %93, %cst_100 {dimension_numbers = #tpu.dot_dimension_numbers<[1], [1], [0], [0], [0, 0, 1, 0], [], []>} : vector<2x224xf32>, vector<256x224xf32>, vector<2x256xf32> -> vector<2x256xf32>
    %97 = arith.addf %90, %96 : vector<2x256xf32>
    %c1_101 = arith.constant 1 : index
    %c6_102 = arith.constant 6 : index
    %c0_103 = arith.constant 0 : index
    %c0_104 = arith.constant 0 : index
    %98 = vector.load %arg2[%c1_101, %c6_102, %c0_103, %c0_104] : memref<4x22x16x224xf32, #tpu.memory_space<vmem>>, vector<1x16x16x224xf32>
    %99 = vector.shape_cast %98 : vector<1x16x16x224xf32> to vector<16x16x224xf32>
    %100 = vector.shape_cast %99 : vector<16x16x224xf32> to vector<256x224xf32>
    %c6_105 = arith.constant 6 : index
    %c0_106 = arith.constant 0 : index
    %c0_107 = arith.constant 0 : index
    %101 = vector.load %arg4[%c6_105, %c0_106, %c0_107] : memref<7x2x224xf32, #tpu.memory_space<vmem>>, vector<1x2x224xf32>
    %102 = vector.shape_cast %101 : vector<1x2x224xf32> to vector<2x224xf32>
    %cst_108 = arith.constant dense<0.000000e+00> : vector<2x256xf32>
    %103 = tpu.matmul %102, %100, %cst_108 {dimension_numbers = #tpu.dot_dimension_numbers<[1], [1], [0], [0], [0, 0, 1, 0], [], []>} : vector<2x224xf32>, vector<256x224xf32>, vector<2x256xf32> -> vector<2x256xf32>
    %104 = arith.addf %97, %103 : vector<2x256xf32>
    %c0_109 = arith.constant 0 : index
    %c0_110 = arith.constant 0 : index
    %105 = vector.load %arg5[%c0_109, %c0_110] : memref<2x1xf32, #tpu.memory_space<vmem>>, vector<2x1xf32>
    %106 = vector.broadcast %105 : vector<2x1xf32> to vector<2x256xf32>
    %107 = arith.addf %104, %106 : vector<2x256xf32>
    %cst_111 = arith.constant 0.000000e+00 : f32
    %108 = vector.broadcast %cst_111 : f32 to vector<2x256xf32>
    %109 = arith.maximumf %107, %108 : vector<2x256xf32>
    %cst_112 = arith.constant 0.000000e+00 : f32
    %110 = vector.broadcast %cst_112 : f32 to vector<2x256xf32>
    %c2_113 = arith.constant 2 : index
    %c0_114 = arith.constant 0 : index
    %c0_115 = arith.constant 0 : index
    %c0_116 = arith.constant 0 : index
    %111 = vector.load %arg2[%c2_113, %c0_114, %c0_115, %c0_116] : memref<4x22x16x224xf32, #tpu.memory_space<vmem>>, vector<1x16x16x224xf32>
    %112 = vector.shape_cast %111 : vector<1x16x16x224xf32> to vector<16x16x224xf32>
    %113 = vector.shape_cast %112 : vector<16x16x224xf32> to vector<256x224xf32>
    %c0_117 = arith.constant 0 : index
    %c0_118 = arith.constant 0 : index
    %c0_119 = arith.constant 0 : index
    %114 = vector.load %arg4[%c0_117, %c0_118, %c0_119] : memref<7x2x224xf32, #tpu.memory_space<vmem>>, vector<1x2x224xf32>
    %115 = vector.shape_cast %114 : vector<1x2x224xf32> to vector<2x224xf32>
    %cst_120 = arith.constant dense<0.000000e+00> : vector<2x256xf32>
    %116 = tpu.matmul %115, %113, %cst_120 {dimension_numbers = #tpu.dot_dimension_numbers<[1], [1], [0], [0], [0, 0, 1, 0], [], []>} : vector<2x224xf32>, vector<256x224xf32>, vector<2x256xf32> -> vector<2x256xf32>
    %117 = arith.addf %110, %116 : vector<2x256xf32>
    %c2_121 = arith.constant 2 : index
    %c1_122 = arith.constant 1 : index
    %c0_123 = arith.constant 0 : index
    %c0_124 = arith.constant 0 : index
    %118 = vector.load %arg2[%c2_121, %c1_122, %c0_123, %c0_124] : memref<4x22x16x224xf32, #tpu.memory_space<vmem>>, vector<1x16x16x224xf32>
    %119 = vector.shape_cast %118 : vector<1x16x16x224xf32> to vector<16x16x224xf32>
    %120 = vector.shape_cast %119 : vector<16x16x224xf32> to vector<256x224xf32>
    %c1_125 = arith.constant 1 : index
    %c0_126 = arith.constant 0 : index
    %c0_127 = arith.constant 0 : index
    %121 = vector.load %arg4[%c1_125, %c0_126, %c0_127] : memref<7x2x224xf32, #tpu.memory_space<vmem>>, vector<1x2x224xf32>
    %122 = vector.shape_cast %121 : vector<1x2x224xf32> to vector<2x224xf32>
    %cst_128 = arith.constant dense<0.000000e+00> : vector<2x256xf32>
    %123 = tpu.matmul %122, %120, %cst_128 {dimension_numbers = #tpu.dot_dimension_numbers<[1], [1], [0], [0], [0, 0, 1, 0], [], []>} : vector<2x224xf32>, vector<256x224xf32>, vector<2x256xf32> -> vector<2x256xf32>
    %124 = arith.addf %117, %123 : vector<2x256xf32>
    %c2_129 = arith.constant 2 : index
    %c2_130 = arith.constant 2 : index
    %c0_131 = arith.constant 0 : index
    %c0_132 = arith.constant 0 : index
    %125 = vector.load %arg2[%c2_129, %c2_130, %c0_131, %c0_132] : memref<4x22x16x224xf32, #tpu.memory_space<vmem>>, vector<1x16x16x224xf32>
    %126 = vector.shape_cast %125 : vector<1x16x16x224xf32> to vector<16x16x224xf32>
    %127 = vector.shape_cast %126 : vector<16x16x224xf32> to vector<256x224xf32>
    %c2_133 = arith.constant 2 : index
    %c0_134 = arith.constant 0 : index
    %c0_135 = arith.constant 0 : index
    %128 = vector.load %arg4[%c2_133, %c0_134, %c0_135] : memref<7x2x224xf32, #tpu.memory_space<vmem>>, vector<1x2x224xf32>
    %129 = vector.shape_cast %128 : vector<1x2x224xf32> to vector<2x224xf32>
    %cst_136 = arith.constant dense<0.000000e+00> : vector<2x256xf32>
    %130 = tpu.matmul %129, %127, %cst_136 {dimension_numbers = #tpu.dot_dimension_numbers<[1], [1], [0], [0], [0, 0, 1, 0], [], []>} : vector<2x224xf32>, vector<256x224xf32>, vector<2x256xf32> -> vector<2x256xf32>
    %131 = arith.addf %124, %130 : vector<2x256xf32>
    %c2_137 = arith.constant 2 : index
    %c3_138 = arith.constant 3 : index
    %c0_139 = arith.constant 0 : index
    %c0_140 = arith.constant 0 : index
    %132 = vector.load %arg2[%c2_137, %c3_138, %c0_139, %c0_140] : memref<4x22x16x224xf32, #tpu.memory_space<vmem>>, vector<1x16x16x224xf32>
    %133 = vector.shape_cast %132 : vector<1x16x16x224xf32> to vector<16x16x224xf32>
    %134 = vector.shape_cast %133 : vector<16x16x224xf32> to vector<256x224xf32>
    %c3_141 = arith.constant 3 : index
    %c0_142 = arith.constant 0 : index
    %c0_143 = arith.constant 0 : index
    %135 = vector.load %arg4[%c3_141, %c0_142, %c0_143] : memref<7x2x224xf32, #tpu.memory_space<vmem>>, vector<1x2x224xf32>
    %136 = vector.shape_cast %135 : vector<1x2x224xf32> to vector<2x224xf32>
    %cst_144 = arith.constant dense<0.000000e+00> : vector<2x256xf32>
    %137 = tpu.matmul %136, %134, %cst_144 {dimension_numbers = #tpu.dot_dimension_numbers<[1], [1], [0], [0], [0, 0, 1, 0], [], []>} : vector<2x224xf32>, vector<256x224xf32>, vector<2x256xf32> -> vector<2x256xf32>
    %138 = arith.addf %131, %137 : vector<2x256xf32>
    %c2_145 = arith.constant 2 : index
    %c4_146 = arith.constant 4 : index
    %c0_147 = arith.constant 0 : index
    %c0_148 = arith.constant 0 : index
    %139 = vector.load %arg2[%c2_145, %c4_146, %c0_147, %c0_148] : memref<4x22x16x224xf32, #tpu.memory_space<vmem>>, vector<1x16x16x224xf32>
    %140 = vector.shape_cast %139 : vector<1x16x16x224xf32> to vector<16x16x224xf32>
    %141 = vector.shape_cast %140 : vector<16x16x224xf32> to vector<256x224xf32>
    %c4_149 = arith.constant 4 : index
    %c0_150 = arith.constant 0 : index
    %c0_151 = arith.constant 0 : index
    %142 = vector.load %arg4[%c4_149, %c0_150, %c0_151] : memref<7x2x224xf32, #tpu.memory_space<vmem>>, vector<1x2x224xf32>
    %143 = vector.shape_cast %142 : vector<1x2x224xf32> to vector<2x224xf32>
    %cst_152 = arith.constant dense<0.000000e+00> : vector<2x256xf32>
    %144 = tpu.matmul %143, %141, %cst_152 {dimension_numbers = #tpu.dot_dimension_numbers<[1], [1], [0], [0], [0, 0, 1, 0], [], []>} : vector<2x224xf32>, vector<256x224xf32>, vector<2x256xf32> -> vector<2x256xf32>
    %145 = arith.addf %138, %144 : vector<2x256xf32>
    %c2_153 = arith.constant 2 : index
    %c5_154 = arith.constant 5 : index
    %c0_155 = arith.constant 0 : index
    %c0_156 = arith.constant 0 : index
    %146 = vector.load %arg2[%c2_153, %c5_154, %c0_155, %c0_156] : memref<4x22x16x224xf32, #tpu.memory_space<vmem>>, vector<1x16x16x224xf32>
    %147 = vector.shape_cast %146 : vector<1x16x16x224xf32> to vector<16x16x224xf32>
    %148 = vector.shape_cast %147 : vector<16x16x224xf32> to vector<256x224xf32>
    %c5_157 = arith.constant 5 : index
    %c0_158 = arith.constant 0 : index
    %c0_159 = arith.constant 0 : index
    %149 = vector.load %arg4[%c5_157, %c0_158, %c0_159] : memref<7x2x224xf32, #tpu.memory_space<vmem>>, vector<1x2x224xf32>
    %150 = vector.shape_cast %149 : vector<1x2x224xf32> to vector<2x224xf32>
    %cst_160 = arith.constant dense<0.000000e+00> : vector<2x256xf32>
    %151 = tpu.matmul %150, %148, %cst_160 {dimension_numbers = #tpu.dot_dimension_numbers<[1], [1], [0], [0], [0, 0, 1, 0], [], []>} : vector<2x224xf32>, vector<256x224xf32>, vector<2x256xf32> -> vector<2x256xf32>
    %152 = arith.addf %145, %151 : vector<2x256xf32>
    %c2_161 = arith.constant 2 : index
    %c6_162 = arith.constant 6 : index
    %c0_163 = arith.constant 0 : index
    %c0_164 = arith.constant 0 : index
    %153 = vector.load %arg2[%c2_161, %c6_162, %c0_163, %c0_164] : memref<4x22x16x224xf32, #tpu.memory_space<vmem>>, vector<1x16x16x224xf32>
    %154 = vector.shape_cast %153 : vector<1x16x16x224xf32> to vector<16x16x224xf32>
    %155 = vector.shape_cast %154 : vector<16x16x224xf32> to vector<256x224xf32>
    %c6_165 = arith.constant 6 : index
    %c0_166 = arith.constant 0 : index
    %c0_167 = arith.constant 0 : index
    %156 = vector.load %arg4[%c6_165, %c0_166, %c0_167] : memref<7x2x224xf32, #tpu.memory_space<vmem>>, vector<1x2x224xf32>
    %157 = vector.shape_cast %156 : vector<1x2x224xf32> to vector<2x224xf32>
    %cst_168 = arith.constant dense<0.000000e+00> : vector<2x256xf32>
    %158 = tpu.matmul %157, %155, %cst_168 {dimension_numbers = #tpu.dot_dimension_numbers<[1], [1], [0], [0], [0, 0, 1, 0], [], []>} : vector<2x224xf32>, vector<256x224xf32>, vector<2x256xf32> -> vector<2x256xf32>
    %159 = arith.addf %152, %158 : vector<2x256xf32>
    %c0_169 = arith.constant 0 : index
    %c0_170 = arith.constant 0 : index
    %160 = vector.load %arg5[%c0_169, %c0_170] : memref<2x1xf32, #tpu.memory_space<vmem>>, vector<2x1xf32>
    %161 = vector.broadcast %160 : vector<2x1xf32> to vector<2x256xf32>
    %162 = arith.addf %159, %161 : vector<2x256xf32>
    %cst_171 = arith.constant 0.000000e+00 : f32
    %163 = vector.broadcast %cst_171 : f32 to vector<2x256xf32>
    %164 = arith.maximumf %162, %163 : vector<2x256xf32>
    %cst_172 = arith.constant 0.000000e+00 : f32
    %165 = vector.broadcast %cst_172 : f32 to vector<2x256xf32>
    %c3_173 = arith.constant 3 : index
    %c0_174 = arith.constant 0 : index
    %c0_175 = arith.constant 0 : index
    %c0_176 = arith.constant 0 : index
    %166 = vector.load %arg2[%c3_173, %c0_174, %c0_175, %c0_176] : memref<4x22x16x224xf32, #tpu.memory_space<vmem>>, vector<1x16x16x224xf32>
    %167 = vector.shape_cast %166 : vector<1x16x16x224xf32> to vector<16x16x224xf32>
    %168 = vector.shape_cast %167 : vector<16x16x224xf32> to vector<256x224xf32>
    %c0_177 = arith.constant 0 : index
    %c0_178 = arith.constant 0 : index
    %c0_179 = arith.constant 0 : index
    %169 = vector.load %arg4[%c0_177, %c0_178, %c0_179] : memref<7x2x224xf32, #tpu.memory_space<vmem>>, vector<1x2x224xf32>
    %170 = vector.shape_cast %169 : vector<1x2x224xf32> to vector<2x224xf32>
    %cst_180 = arith.constant dense<0.000000e+00> : vector<2x256xf32>
    %171 = tpu.matmul %170, %168, %cst_180 {dimension_numbers = #tpu.dot_dimension_numbers<[1], [1], [0], [0], [0, 0, 1, 0], [], []>} : vector<2x224xf32>, vector<256x224xf32>, vector<2x256xf32> -> vector<2x256xf32>
    %172 = arith.addf %165, %171 : vector<2x256xf32>
    %c3_181 = arith.constant 3 : index
    %c1_182 = arith.constant 1 : index
    %c0_183 = arith.constant 0 : index
    %c0_184 = arith.constant 0 : index
    %173 = vector.load %arg2[%c3_181, %c1_182, %c0_183, %c0_184] : memref<4x22x16x224xf32, #tpu.memory_space<vmem>>, vector<1x16x16x224xf32>
    %174 = vector.shape_cast %173 : vector<1x16x16x224xf32> to vector<16x16x224xf32>
    %175 = vector.shape_cast %174 : vector<16x16x224xf32> to vector<256x224xf32>
    %c1_185 = arith.constant 1 : index
    %c0_186 = arith.constant 0 : index
    %c0_187 = arith.constant 0 : index
    %176 = vector.load %arg4[%c1_185, %c0_186, %c0_187] : memref<7x2x224xf32, #tpu.memory_space<vmem>>, vector<1x2x224xf32>
    %177 = vector.shape_cast %176 : vector<1x2x224xf32> to vector<2x224xf32>
    %cst_188 = arith.constant dense<0.000000e+00> : vector<2x256xf32>
    %178 = tpu.matmul %177, %175, %cst_188 {dimension_numbers = #tpu.dot_dimension_numbers<[1], [1], [0], [0], [0, 0, 1, 0], [], []>} : vector<2x224xf32>, vector<256x224xf32>, vector<2x256xf32> -> vector<2x256xf32>
    %179 = arith.addf %172, %178 : vector<2x256xf32>
    %c3_189 = arith.constant 3 : index
    %c2_190 = arith.constant 2 : index
    %c0_191 = arith.constant 0 : index
    %c0_192 = arith.constant 0 : index
    %180 = vector.load %arg2[%c3_189, %c2_190, %c0_191, %c0_192] : memref<4x22x16x224xf32, #tpu.memory_space<vmem>>, vector<1x16x16x224xf32>
    %181 = vector.shape_cast %180 : vector<1x16x16x224xf32> to vector<16x16x224xf32>
    %182 = vector.shape_cast %181 : vector<16x16x224xf32> to vector<256x224xf32>
    %c2_193 = arith.constant 2 : index
    %c0_194 = arith.constant 0 : index
    %c0_195 = arith.constant 0 : index
    %183 = vector.load %arg4[%c2_193, %c0_194, %c0_195] : memref<7x2x224xf32, #tpu.memory_space<vmem>>, vector<1x2x224xf32>
    %184 = vector.shape_cast %183 : vector<1x2x224xf32> to vector<2x224xf32>
    %cst_196 = arith.constant dense<0.000000e+00> : vector<2x256xf32>
    %185 = tpu.matmul %184, %182, %cst_196 {dimension_numbers = #tpu.dot_dimension_numbers<[1], [1], [0], [0], [0, 0, 1, 0], [], []>} : vector<2x224xf32>, vector<256x224xf32>, vector<2x256xf32> -> vector<2x256xf32>
    %186 = arith.addf %179, %185 : vector<2x256xf32>
    %c3_197 = arith.constant 3 : index
    %c3_198 = arith.constant 3 : index
    %c0_199 = arith.constant 0 : index
    %c0_200 = arith.constant 0 : index
    %187 = vector.load %arg2[%c3_197, %c3_198, %c0_199, %c0_200] : memref<4x22x16x224xf32, #tpu.memory_space<vmem>>, vector<1x16x16x224xf32>
    %188 = vector.shape_cast %187 : vector<1x16x16x224xf32> to vector<16x16x224xf32>
    %189 = vector.shape_cast %188 : vector<16x16x224xf32> to vector<256x224xf32>
    %c3_201 = arith.constant 3 : index
    %c0_202 = arith.constant 0 : index
    %c0_203 = arith.constant 0 : index
    %190 = vector.load %arg4[%c3_201, %c0_202, %c0_203] : memref<7x2x224xf32, #tpu.memory_space<vmem>>, vector<1x2x224xf32>
    %191 = vector.shape_cast %190 : vector<1x2x224xf32> to vector<2x224xf32>
    %cst_204 = arith.constant dense<0.000000e+00> : vector<2x256xf32>
    %192 = tpu.matmul %191, %189, %cst_204 {dimension_numbers = #tpu.dot_dimension_numbers<[1], [1], [0], [0], [0, 0, 1, 0], [], []>} : vector<2x224xf32>, vector<256x224xf32>, vector<2x256xf32> -> vector<2x256xf32>
    %193 = arith.addf %186, %192 : vector<2x256xf32>
    %c3_205 = arith.constant 3 : index
    %c4_206 = arith.constant 4 : index
    %c0_207 = arith.constant 0 : index
    %c0_208 = arith.constant 0 : index
    %194 = vector.load %arg2[%c3_205, %c4_206, %c0_207, %c0_208] : memref<4x22x16x224xf32, #tpu.memory_space<vmem>>, vector<1x16x16x224xf32>
    %195 = vector.shape_cast %194 : vector<1x16x16x224xf32> to vector<16x16x224xf32>
    %196 = vector.shape_cast %195 : vector<16x16x224xf32> to vector<256x224xf32>
    %c4_209 = arith.constant 4 : index
    %c0_210 = arith.constant 0 : index
    %c0_211 = arith.constant 0 : index
    %197 = vector.load %arg4[%c4_209, %c0_210, %c0_211] : memref<7x2x224xf32, #tpu.memory_space<vmem>>, vector<1x2x224xf32>
    %198 = vector.shape_cast %197 : vector<1x2x224xf32> to vector<2x224xf32>
    %cst_212 = arith.constant dense<0.000000e+00> : vector<2x256xf32>
    %199 = tpu.matmul %198, %196, %cst_212 {dimension_numbers = #tpu.dot_dimension_numbers<[1], [1], [0], [0], [0, 0, 1, 0], [], []>} : vector<2x224xf32>, vector<256x224xf32>, vector<2x256xf32> -> vector<2x256xf32>
    %200 = arith.addf %193, %199 : vector<2x256xf32>
    %c3_213 = arith.constant 3 : index
    %c5_214 = arith.constant 5 : index
    %c0_215 = arith.constant 0 : index
    %c0_216 = arith.constant 0 : index
    %201 = vector.load %arg2[%c3_213, %c5_214, %c0_215, %c0_216] : memref<4x22x16x224xf32, #tpu.memory_space<vmem>>, vector<1x16x16x224xf32>
    %202 = vector.shape_cast %201 : vector<1x16x16x224xf32> to vector<16x16x224xf32>
    %203 = vector.shape_cast %202 : vector<16x16x224xf32> to vector<256x224xf32>
    %c5_217 = arith.constant 5 : index
    %c0_218 = arith.constant 0 : index
    %c0_219 = arith.constant 0 : index
    %204 = vector.load %arg4[%c5_217, %c0_218, %c0_219] : memref<7x2x224xf32, #tpu.memory_space<vmem>>, vector<1x2x224xf32>
    %205 = vector.shape_cast %204 : vector<1x2x224xf32> to vector<2x224xf32>
    %cst_220 = arith.constant dense<0.000000e+00> : vector<2x256xf32>
    %206 = tpu.matmul %205, %203, %cst_220 {dimension_numbers = #tpu.dot_dimension_numbers<[1], [1], [0], [0], [0, 0, 1, 0], [], []>} : vector<2x224xf32>, vector<256x224xf32>, vector<2x256xf32> -> vector<2x256xf32>
    %207 = arith.addf %200, %206 : vector<2x256xf32>
    %c3_221 = arith.constant 3 : index
    %c6_222 = arith.constant 6 : index
    %c0_223 = arith.constant 0 : index
    %c0_224 = arith.constant 0 : index
    %208 = vector.load %arg2[%c3_221, %c6_222, %c0_223, %c0_224] : memref<4x22x16x224xf32, #tpu.memory_space<vmem>>, vector<1x16x16x224xf32>
    %209 = vector.shape_cast %208 : vector<1x16x16x224xf32> to vector<16x16x224xf32>
    %210 = vector.shape_cast %209 : vector<16x16x224xf32> to vector<256x224xf32>
    %c6_225 = arith.constant 6 : index
    %c0_226 = arith.constant 0 : index
    %c0_227 = arith.constant 0 : index
    %211 = vector.load %arg4[%c6_225, %c0_226, %c0_227] : memref<7x2x224xf32, #tpu.memory_space<vmem>>, vector<1x2x224xf32>
    %212 = vector.shape_cast %211 : vector<1x2x224xf32> to vector<2x224xf32>
    %cst_228 = arith.constant dense<0.000000e+00> : vector<2x256xf32>
    %213 = tpu.matmul %212, %210, %cst_228 {dimension_numbers = #tpu.dot_dimension_numbers<[1], [1], [0], [0], [0, 0, 1, 0], [], []>} : vector<2x224xf32>, vector<256x224xf32>, vector<2x256xf32> -> vector<2x256xf32>
    %214 = arith.addf %207, %213 : vector<2x256xf32>
    %c0_229 = arith.constant 0 : index
    %c0_230 = arith.constant 0 : index
    %215 = vector.load %arg5[%c0_229, %c0_230] : memref<2x1xf32, #tpu.memory_space<vmem>>, vector<2x1xf32>
    %216 = vector.broadcast %215 : vector<2x1xf32> to vector<2x256xf32>
    %217 = arith.addf %214, %216 : vector<2x256xf32>
    %cst_231 = arith.constant 0.000000e+00 : f32
    %218 = vector.broadcast %cst_231 : f32 to vector<2x256xf32>
    %219 = arith.maximumf %217, %218 : vector<2x256xf32>
    %cst_232 = arith.constant 0.000000e+00 : f32
    %220 = vector.broadcast %cst_232 : f32 to vector<4x256xf32>
    %221 = vector.extract_strided_slice %54 {offsets = [0, 0], sizes = [1, 256], strides = [1, 1]} : vector<2x256xf32> to vector<1x256xf32>
    %222 = vector.extract_strided_slice %109 {offsets = [0, 0], sizes = [1, 256], strides = [1, 1]} : vector<2x256xf32> to vector<1x256xf32>
    %223 = vector.extract_strided_slice %164 {offsets = [0, 0], sizes = [1, 256], strides = [1, 1]} : vector<2x256xf32> to vector<1x256xf32>
    %224 = vector.extract_strided_slice %219 {offsets = [0, 0], sizes = [1, 256], strides = [1, 1]} : vector<2x256xf32> to vector<1x256xf32>
    %225 = tpu.concatenate %221, %222, %223, %224 in 0 : vector<1x256xf32>, vector<1x256xf32>, vector<1x256xf32>, vector<1x256xf32> -> vector<4x256xf32>
    %c0_233 = arith.constant 0 : index
    %c0_234 = arith.constant 0 : index
    %c0_235 = arith.constant 0 : index
    %226 = vector.load %arg6[%c0_233, %c0_234, %c0_235] : memref<2x256x256xf32, #tpu.memory_space<vmem>>, vector<1x256x256xf32>
    %227 = vector.shape_cast %226 : vector<1x256x256xf32> to vector<256x256xf32>
    %cst_236 = arith.constant dense<0.000000e+00> : vector<4x256xf32>
    %228 = tpu.matmul %225, %227, %cst_236 {dimension_numbers = #tpu.dot_dimension_numbers<[1], [0], [0], [1], [0, 0, 1, 1], [], []>} : vector<4x256xf32>, vector<256x256xf32>, vector<4x256xf32> -> vector<4x256xf32>
    %229 = arith.addf %220, %228 : vector<4x256xf32>
    %230 = vector.extract_strided_slice %54 {offsets = [1, 0], sizes = [1, 256], strides = [1, 1]} : vector<2x256xf32> to vector<1x256xf32>
    %231 = vector.extract_strided_slice %109 {offsets = [1, 0], sizes = [1, 256], strides = [1, 1]} : vector<2x256xf32> to vector<1x256xf32>
    %232 = vector.extract_strided_slice %164 {offsets = [1, 0], sizes = [1, 256], strides = [1, 1]} : vector<2x256xf32> to vector<1x256xf32>
    %233 = vector.extract_strided_slice %219 {offsets = [1, 0], sizes = [1, 256], strides = [1, 1]} : vector<2x256xf32> to vector<1x256xf32>
    %234 = tpu.concatenate %230, %231, %232, %233 in 0 : vector<1x256xf32>, vector<1x256xf32>, vector<1x256xf32>, vector<1x256xf32> -> vector<4x256xf32>
    %c1_237 = arith.constant 1 : index
    %c0_238 = arith.constant 0 : index
    %c0_239 = arith.constant 0 : index
    %235 = vector.load %arg6[%c1_237, %c0_238, %c0_239] : memref<2x256x256xf32, #tpu.memory_space<vmem>>, vector<1x256x256xf32>
    %236 = vector.shape_cast %235 : vector<1x256x256xf32> to vector<256x256xf32>
    %cst_240 = arith.constant dense<0.000000e+00> : vector<4x256xf32>
    %237 = tpu.matmul %234, %236, %cst_240 {dimension_numbers = #tpu.dot_dimension_numbers<[1], [0], [0], [1], [0, 0, 1, 1], [], []>} : vector<4x256xf32>, vector<256x256xf32>, vector<4x256xf32> -> vector<4x256xf32>
    %238 = arith.addf %229, %237 : vector<4x256xf32>
    %c0_241 = arith.constant 0 : index
    %239 = memref.load %arg1[%c0_241] : memref<1xf32, #tpu.memory_space<smem>>
    %240 = vector.broadcast %239 : f32 to vector<4x256xf32>
    %241 = arith.addf %238, %240 : vector<4x256xf32>
    %242 = arith.negf %241 : vector<4x256xf32>
    %243 = math.exp %242 : vector<4x256xf32>
    %cst_242 = arith.constant 1.000000e+00 : f32
    %244 = vector.broadcast %cst_242 : f32 to vector<4x256xf32>
    %245 = arith.addf %244, %243 : vector<4x256xf32>
    %246 = arith.divf %244, %245 : vector<4x256xf32>
    %247 = vector.shape_cast %246 : vector<4x256xf32> to vector<4x1x256xf32>
    %c0_243 = arith.constant 0 : index
    %c0_244 = arith.constant 0 : index
    %c0_245 = arith.constant 0 : index
    %248 = vector.load %arg3[%c0_243, %c0_244, %c0_245] : memref<4x32x256xf32, #tpu.memory_space<vmem>>, vector<4x32x256xf32>
    %249 = vector.broadcast %247 : vector<4x1x256xf32> to vector<4x32x256xf32>
    %250 = arith.mulf %249, %248 : vector<4x32x256xf32>
    %c0_246 = arith.constant 0 : index
    %c0_247 = arith.constant 0 : index
    %c0_248 = arith.constant 0 : index
    %251 = vector.load %arg7[%c0_246, %c0_247, %c0_248] : memref<4x32x256xf32, #tpu.memory_space<vmem>>, vector<4x32x256xf32>
    tpu.vector_store %arg7[%c0_246, %c0_247, %c0_248], %250 {strides = array<i32>} : memref<4x32x256xf32, #tpu.memory_space<vmem>>, vector<4x32x256xf32>,
    return
  }
  func.func @transform_0(%arg0: i32) -> i32 {
    %c0_i32 = arith.constant 0 : i32
    %c0_i32_0 = arith.constant 0 : i32
    return %c0_i32 : i32
  }
  func.func @transform_1(%arg0: i32) -> (i32, i32, i32, i32) {
    %c0_i32 = arith.constant 0 : i32
    %c0_i32_0 = arith.constant 0 : i32
    %c0_i32_1 = arith.constant 0 : i32
    %c0_i32_2 = arith.constant 0 : i32
    return %arg0, %c0_i32, %c0_i32_0, %c0_i32_1 : i32, i32, i32, i32
  }
  func.func @transform_2(%arg0: i32) -> (i32, i32, i32) {
    %c0_i32 = arith.constant 0 : i32
    %c0_i32_0 = arith.constant 0 : i32
    %c0_i32_1 = arith.constant 0 : i32
    return %arg0, %c0_i32, %c0_i32_0 : i32, i32, i32
  }
  func.func @transform_3(%arg0: i32) -> (i32, i32, i32) {
    %c0_i32 = arith.constant 0 : i32
    %c0_i32_0 = arith.constant 0 : i32
    %c0_i32_1 = arith.constant 0 : i32
    %c0_i32_2 = arith.constant 0 : i32
    return %c0_i32, %c0_i32_0, %c0_i32_1 : i32, i32, i32
  }
  func.func @transform_4(%arg0: i32) -> (i32, i32) {
    %c0_i32 = arith.constant 0 : i32
    %c0_i32_0 = arith.constant 0 : i32
    %c0_i32_1 = arith.constant 0 : i32
    return %c0_i32, %c0_i32_0 : i32, i32
  }
  func.func @transform_5(%arg0: i32) -> (i32, i32, i32) {
    %c0_i32 = arith.constant 0 : i32
    %c0_i32_0 = arith.constant 0 : i32
    %c0_i32_1 = arith.constant 0 : i32
    %c0_i32_2 = arith.constant 0 : i32
    return %c0_i32, %c0_i32_0, %c0_i32_1 : i32, i32, i32
  }
  func.func @transform_6(%arg0: i32) -> (i32, i32, i32) {
    %c0_i32 = arith.constant 0 : i32
    %c0_i32_0 = arith.constant 0 : i32
    %c0_i32_1 = arith.constant 0 : i32
    return %arg0, %c0_i32, %c0_i32_0 : i32, i32, i32
  }
}

</mosaic_0001>

<bundles_post_ra>
// kernel: spatial_attention_apply.1
= control target key start
LH: loop header
LB: loop body
LE: loop exit
PB: predicated region body
PF: predicated region fallthrough
CT: control target
= control target key end

     0   :  { %s10692_s23 = smov 0   ;;  %s15781_s0 = inlined_call_operand.<no memory space> [shape: f32[1], index: 0, kind: input, shape index: {}]   ;;  %s15782_s1 = inlined_call_operand.vmem [shape: f32[8,22,16,224], index: 1, kind: input, shape index: {}]   ;;  %s15783_s2 = inlined_call_operand.vmem [shape: f32[8,32,256], index: 2, kind: input, shape index: {}]   ;;  %s15784_s3 = inlined_call_operand.vmem [shape: f32[7,2,224], index: 3, kind: input, shape index: {}]   ;;  %s15785_s4 = inlined_call_operand.vmem [shape: f32[2,1], index: 4, kind: input, shape index: {}]   ;;  %s15786_s5 = inlined_call_operand.vmem [shape: f32[2,256,256], index: 5, kind: input, shape index: {}]   ;;  %s15787_s6 = inlined_call_operand.vmem [shape: f32[8,32,256], index: 6, kind: output, shape index: {}]  }
   0x1   :  { %11 = sst [smem:[#allocation2]] %s15781_s0 }
   0x2 LB: > { %s7857_s24 = sadd.s32 4294967295, %s10651_s23   ;;  %p7861_p0 = scmp.ge.s32.totalorder %s10651_s23, 1  ;;  %s10651_s23 = sphi %s10692_s23, %s17_s23  }
   0x3   : > { %p227_p1 = scmp.lt.s32.totalorder %s10651_s23, 3 }
   0x5   : > { %p228_p2 = pnand %p7861_p0, %p227_p1 }
   0x7   : > { %231 = sbr.rel (%p228_p2) target bundleno = 2166 (0x876), region = 44 }
   0xc   : > { %s7862_s25 = sshll.u32 %s7857_s24, 2  ;;  %vm423_vm0 = vcmask 785408   ;;  %vm7302_vm1 = vcmask 1040384   ;;  %vm7305_vm2 = vcmask 1041408   ;;  %vm7308_vm3 = vcmask 1042432  }
   0xd   : > { %p266_p3 = scmp.lt.s32.totalorder %s7862_s25, 7  ;;  %vm7666_vm11 = vcmask 1041409   ;;  %vm7669_vm13 = vcmask 1042434   ;;  %vm7672_vm14 = vcmask 1043459  }
   0xf   : > { %s16126_s25 = smov (!%p266_p3, %s7862_s25), 7 }
  0x10   : > { %s10626_s0 = smul.u32 704, %s16126_s25  ;;  %s10624_s26 = sshll.u32 %s16126_s25, 6 }
  0x11   : > { %s15706_s29 = scalar_lea.vmem %s15783_s2, %s10624_s26  ;;  %s15716_s7 = scalar_lea.vmem %s15787_s6, %s10624_s26 }
  0x12   : > { %s10706_s28 = scalar_lea.vmem %s15782_s1, %s10626_s0  ;;  %s7620_s0 = sld [smem:[#allocation2]] }
  0x13   : > { %v10709_v0 = vld [vmem:[%s10706_s28 + $0x110] sm:$0xff]  ;;  %v10712_v1 = vld [vmem:[%s10706_s28 + $0x118] sm:$0xff]  ;;  %v10727_v4 = vld [vmem:[%s10706_s28 + $0x100] sm:$0xff] }
  0x14   : > { %v10715_v2 = vld [vmem:[%s10706_s28 + $0x210] sm:$0xff]  ;;  %522 = vmatpush.xpose.msra.mxu0 %v10709_v0  ;;  %7935 = vmatpush.xpose.msk.msra.mxu1 %vm423_vm0, %v10712_v1  ;;  %v10721_v3 = vld [vmem:[%s10706_s28 + $0x218] sm:$0xff]  ;;  %v10730_v5 = vld [vmem:[%s10706_s28 + $0x108] sm:$0xff] }
  0x15   : > { %562 = vmatpush.xpose.msra.mxu2 %v10715_v2  ;;  %7952 = vmatpush.xpose.msk.msra.mxu3 %vm423_vm0, %v10721_v3  ;;  %v10733_v6 = vld [vmem:[%s10706_s28 + $0x200] sm:$0xff]  ;;  %v10736_v7 = vld [vmem:[%s10706_s28 + $0x208] sm:$0xff]  ;;  %v10745_v8 = vld [vmem:[%s10706_s28 + $0xf0] sm:$0xff] }
  0x16   : > { %v10748_v9 = vld [vmem:[%s10706_s28 + $0xf8] sm:$0xff]  ;;  %v10751_v10 = vld [vmem:[%s10706_s28 + $0x1f0] sm:$0xff]  ;;  %v10763_v12 = vld [vmem:[%s10706_s28 + $0xe0] sm:$0xff] }
  0x17   : > { %v10754_v11 = vld [vmem:[%s10706_s28 + $0x1f8] sm:$0xff]  ;;  %v10766_v13 = vld [vmem:[%s10706_s28 + $0xe8] sm:$0xff]  ;;  %v10769_v14 = vld [vmem:[%s10706_s28 + $0x1e0] sm:$0xff] }
  0x18   : > { %523 = vmatpush.xpose.msra.mxu0 %v10727_v4  ;;  %7936 = vmatpush.xpose.msk.msra.mxu1 %vm423_vm0, %v10730_v5  ;;  %v10772_v15 = vld [vmem:[%s10706_s28 + $0x1e8] sm:$0xff]  ;;  %v10781_v16 = vld [vmem:[%s10706_s28 + $0xd0] sm:$0xff]  ;;  %v10784_v17 = vld [vmem:[%s10706_s28 + $0xd8] sm:$0xff] }
  0x19   : > { %563 = vmatpush.xpose.msra.mxu2 %v10733_v6  ;;  %7953 = vmatpush.xpose.msk.msra.mxu3 %vm423_vm0, %v10736_v7  ;;  %15898 = vst [vmem:[#allocation3_spill] sm:$0xff] %v10781_v16  ;;  %v10787_v18 = vld [vmem:[%s10706_s28 + $0x1d0] sm:$0xff]  ;;  %v10790_v19 = vld [vmem:[%s10706_s28 + $0x1d8] sm:$0xff]  ;;  %v10799_v20 = vld [vmem:[%s10706_s28 + $0xc0] sm:$0xff] }
  0x1a   : > { %15899 = vst [vmem:[#allocation4_spill] sm:$0xff] %v10784_v17  ;;  %v10802_v21 = vld [vmem:[%s10706_s28 + $0xc8] sm:$0xff]  ;;  %v10805_v22 = vld [vmem:[%s10706_s28 + $0x1c0] sm:$0xff]  ;;  %v10817_v24 = vld [vmem:[%s10706_s28 + $0xb0] sm:$0xff] }
  0x1b   : > { %v10808_v23 = vld [vmem:[%s10706_s28 + $0x1c8] sm:$0xff]  ;;  %15901 = vst [vmem:[#allocation6_spill] sm:$0xff] %v10817_v24  ;;  %v10820_v25 = vld [vmem:[%s10706_s28 + $0xb8] sm:$0xff]  ;;  %v10823_v26 = vld [vmem:[%s10706_s28 + $0x1b0] sm:$0xff] }
  0x1c   : > { %524 = vmatpush.xpose.msra.mxu0 %v10745_v8  ;;  %7937 = vmatpush.xpose.msk.msra.mxu1 %vm423_vm0, %v10748_v9  ;;  %15900 = vst [vmem:[#allocation5_spill] sm:$0xff] %v10808_v23  ;;  %v10826_v27 = vld [vmem:[%s10706_s28 + $0x1b8] sm:$0xff]  ;;  %v10835_v28 = vld [vmem:[%s10706_s28 + $0xa0] sm:$0xff]  ;;  %v10838_v29 = vld [vmem:[%s10706_s28 + $0xa8] sm:$0xff] }
  0x1d   : > { %564 = vmatpush.xpose.msra.mxu2 %v10751_v10  ;;  %7954 = vmatpush.xpose.msk.msra.mxu3 %vm423_vm0, %v10754_v11  ;;  %v10841_v30 = vld [vmem:[%s10706_s28 + $0x1a0] sm:$0xff]  ;;  %v10844_v31 = vld [vmem:[%s10706_s28 + $0x1a8] sm:$0xff]  ;;  %v10853_v32 = vld [vmem:[%s10706_s28 + $0x90] sm:$0xff] }
  0x1e   : > { %v10856_v33 = vld [vmem:[%s10706_s28 + $0x98] sm:$0xff]  ;;  %v10859_v34 = vld [vmem:[%s10706_s28 + $0x190] sm:$0xff]  ;;  %v10871_v36 = vld [vmem:[%s10706_s28 + $0x80] sm:$0xff] }
  0x1f   : > { %v10862_v35 = vld [vmem:[%s10706_s28 + $0x198] sm:$0xff]  ;;  %v10874_v37 = vld [vmem:[%s10706_s28 + $0x88] sm:$0xff]  ;;  %v10877_v38 = vld [vmem:[%s10706_s28 + $0x180] sm:$0xff] }
  0x20   : > { %525 = vmatpush.xpose.msra.mxu0 %v10763_v12  ;;  %7938 = vmatpush.xpose.msk.msra.mxu1 %vm423_vm0, %v10766_v13  ;;  %v10880_v39 = vld [vmem:[%s10706_s28 + $0x188] sm:$0xff]  ;;  %v10889_v40 = vld [vmem:[%s10706_s28 + $0x70] sm:$0xff]  ;;  %v10892_v41 = vld [vmem:[%s10706_s28 + $0x78] sm:$0xff] }
  0x21   : > { %565 = vmatpush.xpose.msra.mxu2 %v10769_v14  ;;  %7955 = vmatpush.xpose.msk.msra.mxu3 %vm423_vm0, %v10772_v15  ;;  %v10895_v42 = vld [vmem:[%s10706_s28 + $0x170] sm:$0xff]  ;;  %v10898_v43 = vld [vmem:[%s10706_s28 + $0x178] sm:$0xff]  ;;  %v10907_v44 = vld [vmem:[%s10706_s28 + $0x60] sm:$0xff] }
  0x22   : > { %v10910_v45 = vld [vmem:[%s10706_s28 + $0x68] sm:$0xff]  ;;  %v10913_v46 = vld [vmem:[%s10706_s28 + $0x160] sm:$0xff]  ;;  %v10925_v48 = vld [vmem:[%s10706_s28 + $0x50] sm:$0xff] }
  0x23   : > { %v10916_v47 = vld [vmem:[%s10706_s28 + $0x168] sm:$0xff]  ;;  %v10928_v49 = vld [vmem:[%s10706_s28 + $0x58] sm:$0xff]  ;;  %v10931_v50 = vld [vmem:[%s10706_s28 + $0x150] sm:$0xff] }
  0x24   : > { %526 = vmatpush.xpose.msra.mxu0 %v10781_v16  ;;  %7939 = vmatpush.xpose.msk.msra.mxu1 %vm423_vm0, %v10784_v17  ;;  %15902 = vst [vmem:[#allocation7_spill] sm:$0xff] %v10916_v47  ;;  %v10934_v51 = vld [vmem:[%s10706_s28 + $0x158] sm:$0xff]  ;;  %v10943_v52 = vld [vmem:[%s10706_s28 + $0x40] sm:$0xff]  ;;  %v10946_v53 = vld [vmem:[%s10706_s28 + $0x48] sm:$0xff] }
  0x25   : > { %566 = vmatpush.xpose.msra.mxu2 %v10787_v18  ;;  %7956 = vmatpush.xpose.msk.msra.mxu3 %vm423_vm0, %v10790_v19  ;;  %v10949_v54 = vld [vmem:[%s10706_s28 + $0x140] sm:$0xff]  ;;  %v10952_v55 = vld [vmem:[%s10706_s28 + $0x148] sm:$0xff]  ;;  %v10961_v56 = vld [vmem:[%s10706_s28 + $0x30] sm:$0xff] }
  0x26   : > { %v10964_v57 = vld [vmem:[%s10706_s28 + $0x38] sm:$0xff]  ;;  %v10967_v58 = vld [vmem:[%s10706_s28 + $0x130] sm:$0xff]  ;;  %v10979_v60 = vld [vmem:[%s10706_s28 + $0x20] sm:$0xff] }
  0x27   : > { %v10970_v59 = vld [vmem:[%s10706_s28 + $0x138] sm:$0xff]  ;;  %v10982_v61 = vld [vmem:[%s10706_s28 + $0x28] sm:$0xff]  ;;  %v10985_v62 = vld [vmem:[%s10706_s28 + $0x120] sm:$0xff] }
  0x28   : > { %527 = vmatpush.xpose.msra.mxu0 %v10799_v20  ;;  %7940 = vmatpush.xpose.msk.msra.mxu1 %vm423_vm0, %v10802_v21  ;;  %v10988_v63 = vld [vmem:[%s10706_s28 + $0x128] sm:$0xff] }
  0x29   : > { %567 = vmatpush.xpose.msra.mxu2 %v10805_v22  ;;  %7957 = vmatpush.xpose.msk.msra.mxu3 %vm423_vm0, %v10808_v23 }
  0x2c   : > { %528 = vmatpush.xpose.msra.mxu0 %v10817_v24  ;;  %7941 = vmatpush.xpose.msk.msra.mxu1 %vm423_vm0, %v10820_v25 }
  0x2d   : > { %568 = vmatpush.xpose.msra.mxu2 %v10823_v26  ;;  %7958 = vmatpush.xpose.msk.msra.mxu3 %vm423_vm0, %v10826_v27 }
  0x30   : > { %529 = vmatpush.xpose.msra.mxu0 %v10835_v28  ;;  %7942 = vmatpush.xpose.msk.msra.mxu1 %vm423_vm0, %v10838_v29 }
  0x31   : > { %569 = vmatpush.xpose.msra.mxu2 %v10841_v30  ;;  %7959 = vmatpush.xpose.msk.msra.mxu3 %vm423_vm0, %v10844_v31 }
  0x34   : > { %530 = vmatpush.xpose.msra.mxu0 %v10853_v32  ;;  %7943 = vmatpush.xpose.msk.msra.mxu1 %vm423_vm0, %v10856_v33 }
  0x35   : > { %570 = vmatpush.xpose.msra.mxu2 %v10859_v34  ;;  %7960 = vmatpush.xpose.msk.msra.mxu3 %vm423_vm0, %v10862_v35 }
  0x38   : > { %531 = vmatpush.xpose.msra.mxu0 %v10871_v36  ;;  %7944 = vmatpush.xpose.msk.msra.mxu1 %vm423_vm0, %v10874_v37 }
  0x39   : > { %571 = vmatpush.xpose.msra.mxu2 %v10877_v38  ;;  %7961 = vmatpush.xpose.msk.msra.mxu3 %vm423_vm0, %v10880_v39 }
  0x3c   : > { %532 = vmatpush.xpose.msra.mxu0 %v10889_v40  ;;  %7945 = vmatpush.xpose.msk.msra.mxu1 %vm423_vm0, %v10892_v41 }
  0x3d   : > { %572 = vmatpush.xpose.msra.mxu2 %v10895_v42  ;;  %7962 = vmatpush.xpose.msk.msra.mxu3 %vm423_vm0, %v10898_v43 }
  0x40   : > { %533 = vmatpush.xpose.msra.mxu0 %v10907_v44  ;;  %7946 = vmatpush.xpose.msk.msra.mxu1 %vm423_vm0, %v10910_v45 }
  0x41   : > { %573 = vmatpush.xpose.msra.mxu2 %v10913_v46  ;;  %7963 = vmatpush.xpose.msk.msra.mxu3 %vm423_vm0, %v10916_v47 }
  0x44   : > { %534 = vmatpush.xpose.msra.mxu0 %v10925_v48  ;;  %7947 = vmatpush.xpose.msk.msra.mxu1 %vm423_vm0, %v10928_v49 }
  0x45   : > { %574 = vmatpush.xpose.msra.mxu2 %v10931_v50  ;;  %7964 = vmatpush.xpose.msk.msra.mxu3 %vm423_vm0, %v10934_v51 }
  0x48   : > { %535 = vmatpush.xpose.msra.mxu0 %v10943_v52  ;;  %7948 = vmatpush.xpose.msk.msra.mxu1 %vm423_vm0, %v10946_v53 }
  0x49   : > { %575 = vmatpush.xpose.msra.mxu2 %v10949_v54  ;;  %7965 = vmatpush.xpose.msk.msra.mxu3 %vm423_vm0, %v10952_v55 }
  0x4c   : > { %536 = vmatpush.xpose.msra.mxu0 %v10961_v56  ;;  %7949 = vmatpush.xpose.msk.msra.mxu1 %vm423_vm0, %v10964_v57 }
  0x4d   : > { %576 = vmatpush.xpose.msra.mxu2 %v10967_v58  ;;  %7966 = vmatpush.xpose.msk.msra.mxu3 %vm423_vm0, %v10970_v59 }
  0x50   : > { %537 = vmatpush.xpose.msra.mxu0 %v10979_v60  ;;  %7950 = vmatpush.xpose.msk.msra.mxu1 %vm423_vm0, %v10982_v61 }
  0x51   : > { %577 = vmatpush.xpose.msra.mxu2 %v10985_v62  ;;  %7967 = vmatpush.xpose.msk.msra.mxu3 %vm423_vm0, %v10988_v63 }
  0x54   : > { %705 = vmatpush.xpose.msrb.mxu0 %v10745_v8  ;;  %7969 = vmatpush.xpose.msk.msrb.mxu1 %vm423_vm0, %v10748_v9 }
  0x55   : > { %745 = vmatpush.xpose.msrb.mxu2 %v10751_v10  ;;  %7986 = vmatpush.xpose.msk.msrb.mxu3 %vm423_vm0, %v10754_v11 }
  0x58   : > { %706 = vmatpush.xpose.msrb.mxu0 %v10763_v12  ;;  %7970 = vmatpush.xpose.msk.msrb.mxu1 %vm423_vm0, %v10766_v13 }
  0x59   : > { %746 = vmatpush.xpose.msrb.mxu2 %v10769_v14  ;;  %7987 = vmatpush.xpose.msk.msrb.mxu3 %vm423_vm0, %v10772_v15 }
  0x5c   : > { %707 = vmatpush.xpose.msrb.mxu0 %v10781_v16  ;;  %7971 = vmatpush.xpose.msk.msrb.mxu1 %vm423_vm0, %v10784_v17  ;;  %v11023_v16 = vld [vmem:[%s15784_s3 + $0x4] sm:$0xf] }
  0x5d   : > { %747 = vmatpush.xpose.msrb.mxu2 %v10787_v18  ;;  %7988 = vmatpush.xpose.msk.msrb.mxu3 %vm423_vm0, %v10790_v19  ;;  %15903 = vst [vmem:[#allocation8_spill] sm:$0xff] %v11023_v16 }
  0x5e   : > { %419 = vst [vmem:[#allocation1] ss:$4 sm:$0xff] %v11023_v16  ;;  %v11044_v16 = vld [vmem:[%s15784_s3] sm:$0xf] }
  0x5f   : > { %15904 = vst [vmem:[#allocation9_spill] sm:$0xff] %v11044_v16 }
  0x60   : > { %708 = vmatpush.xpose.msrb.mxu0 %v10799_v20  ;;  %7972 = vmatpush.xpose.msk.msrb.mxu1 %vm423_vm0, %v10802_v21 }
  0x61   : > { %748 = vmatpush.xpose.msrb.mxu2 %v10805_v22  ;;  %7989 = vmatpush.xpose.msk.msrb.mxu3 %vm423_vm0, %v10808_v23 }
  0x64   : > { %709 = vmatpush.xpose.msrb.mxu0 %v10817_v24  ;;  %7973 = vmatpush.xpose.msk.msrb.mxu1 %vm423_vm0, %v10820_v25 }
  0x65   : > { %749 = vmatpush.xpose.msrb.mxu2 %v10823_v26  ;;  %7990 = vmatpush.xpose.msk.msrb.mxu3 %vm423_vm0, %v10826_v27  ;;  %v420_v24 = vld.sshfl [vmem:[#allocation1] sm:$0xff pattern:$0x73625140]  ;;  %v421_v23 = vld.sshfl [vmem:[#allocation1 + $0x8] sm:$0xff pattern:$0x73625140] }
  0x66   : > { %603 = vst [vmem:[#allocation1] ss:$4 sm:$0xff] %v11044_v16  ;;  %578 = vmatmul.f32.vlgmr.msra.gmra.mxu2 %v420_v24  ;;  %7968 = vmatmul.msk.f32.vlgmr.msra.gmra.mxu3 %vm423_vm0, %v421_v23  ;;  %v15907_v16 = vld [vmem:[#allocation5_spill] sm:$0xff] }
  0x67   : > { %538 = vmatmul.f32.vlgmr.msra.gmra.mxu0 %v420_v24  ;;  %7951 = vmatmul.msk.f32.vlgmr.msra.gmra.mxu1 %vm423_vm0, %v421_v23  ;;  %v288_v23 = vld [vmem:[%s10706_s28 + $0x10] sm:$0xff]  ;;  %v289_v24 = vld [vmem:[%s10706_s28 + $0x18] sm:$0xff] }
  0x68   : > { %710 = vmatpush.xpose.msrb.mxu0 %v10835_v28  ;;  %7974 = vmatpush.xpose.msk.msrb.mxu1 %vm423_vm0, %v10838_v29 }
  0x69   : > { %750 = vmatpush.xpose.msrb.mxu2 %v10841_v30  ;;  %7991 = vmatpush.xpose.msk.msrb.mxu3 %vm423_vm0, %v10844_v31 }
  0x6c   : > { %711 = vmatpush.xpose.msrb.mxu0 %v10853_v32  ;;  %7975 = vmatpush.xpose.msk.msrb.mxu1 %vm423_vm0, %v10856_v33 }
  0x6d   : > { %751 = vmatpush.xpose.msrb.mxu2 %v10859_v34  ;;  %7992 = vmatpush.xpose.msk.msrb.mxu3 %vm423_vm0, %v10862_v35 }
  0x70   : > { %712 = vmatpush.xpose.msrb.mxu0 %v10871_v36  ;;  %7976 = vmatpush.xpose.msk.msrb.mxu1 %vm423_vm0, %v10874_v37 }
  0x71   : > { %752 = vmatpush.xpose.msrb.mxu2 %v10877_v38  ;;  %7993 = vmatpush.xpose.msk.msrb.mxu3 %vm423_vm0, %v10880_v39 }
  0x74   : > { %713 = vmatpush.xpose.msrb.mxu0 %v10889_v40  ;;  %7977 = vmatpush.xpose.msk.msrb.mxu1 %vm423_vm0, %v10892_v41 }
  0x75   : > { %753 = vmatpush.xpose.msrb.mxu2 %v10895_v42  ;;  %7994 = vmatpush.xpose.msk.msrb.mxu3 %vm423_vm0, %v10898_v43 }
  0x78   : > { %714 = vmatpush.xpose.msrb.mxu0 %v10907_v44  ;;  %7978 = vmatpush.xpose.msk.msrb.mxu1 %vm423_vm0, %v10910_v45 }
  0x79   : > { %754 = vmatpush.xpose.msrb.mxu2 %v10913_v46  ;;  %7995 = vmatpush.xpose.msk.msrb.mxu3 %vm423_vm0, %v10916_v47 }
  0x7c   : > { %715 = vmatpush.xpose.msrb.mxu0 %v10925_v48  ;;  %7979 = vmatpush.xpose.msk.msrb.mxu1 %vm423_vm0, %v10928_v49 }
  0x7d   : > { %755 = vmatpush.xpose.msrb.mxu2 %v10931_v50  ;;  %7996 = vmatpush.xpose.msk.msrb.mxu3 %vm423_vm0, %v10934_v51 }
  0x80   : > { %716 = vmatpush.xpose.msrb.mxu0 %v10943_v52  ;;  %7980 = vmatpush.xpose.msk.msrb.mxu1 %vm423_vm0, %v10946_v53 }
  0x81   : > { %756 = vmatpush.xpose.msrb.mxu2 %v10949_v54  ;;  %7997 = vmatpush.xpose.msk.msrb.mxu3 %vm423_vm0, %v10952_v55 }
  0x84   : > { %717 = vmatpush.xpose.msrb.mxu0 %v10961_v56  ;;  %7981 = vmatpush.xpose.msk.msrb.mxu1 %vm423_vm0, %v10964_v57  ;;  %v286_v56 = vld [vmem:[%s10706_s28] sm:$0xff]  ;;  %v287_v57 = vld [vmem:[%s10706_s28 + $0x8] sm:$0xff] }
  0x85   : > { %757 = vmatpush.xpose.msrb.mxu2 %v10967_v58  ;;  %7998 = vmatpush.xpose.msk.msrb.mxu3 %vm423_vm0, %v10970_v59 }
  0x88   : > { %718 = vmatpush.xpose.msrb.mxu0 %v10979_v60  ;;  %7982 = vmatpush.xpose.msk.msrb.mxu1 %vm423_vm0, %v10982_v61  ;;  %v11104_v60 = vld [vmem:[%s10706_s28 + $0x230] sm:$0xff]  ;;  %v11107_v61 = vld [vmem:[%s10706_s28 + $0x238] sm:$0xff] }
  0x89   : > { %758 = vmatpush.xpose.msrb.mxu2 %v10985_v62  ;;  %7999 = vmatpush.xpose.msk.msrb.mxu3 %vm423_vm0, %v10988_v63 }
  0x8c   : > { %719 = vmatpush.xpose.msrb.mxu0 %v288_v23  ;;  %7983 = vmatpush.xpose.msk.msrb.mxu1 %vm423_vm0, %v289_v24  ;;  %v604_v23 = vld.sshfl [vmem:[#allocation1] sm:$0xff pattern:$0x73625140]  ;;  %v605_v24 = vld.sshfl [vmem:[#allocation1 + $0x8] sm:$0xff pattern:$0x73625140] }
  0x8d   : > { %759 = vmatpush.xpose.msrb.mxu2 %v10709_v0  ;;  %8000 = vmatpush.xpose.msk.msrb.mxu3 %vm423_vm0, %v10712_v1 }
  0x90   : > { %720 = vmatpush.xpose.msrb.mxu0 %v286_v56  ;;  %7984 = vmatpush.xpose.msk.msrb.mxu1 %vm423_vm0, %v287_v57  ;;  %v11120_v56 = vld [vmem:[%s10706_s28 + $0x220] sm:$0xff]  ;;  %v11123_v57 = vld [vmem:[%s10706_s28 + $0x228] sm:$0xff] }
  0x91   : > { %760 = vmatpush.xpose.msrb.mxu2 %v10727_v4  ;;  %8001 = vmatpush.xpose.msk.msrb.mxu3 %vm423_vm0, %v10730_v5 }
  0x93   : > { %721 = vmatmul.f32.vlgmr.msrb.gmra.mxu0 %v604_v23  ;;  %7985 = vmatmul.msk.f32.vlgmr.msrb.gmra.mxu1 %vm423_vm0, %v605_v24 }
  0x94   : > { %955 = vmatpush.xpose.msra.mxu0 %v10967_v58  ;;  %8068 = vmatpush.xpose.msk.msra.mxu1 %vm423_vm0, %v10970_v59 }
  0x95   : > { %995 = vmatpush.xpose.msra.mxu2 %v11104_v60  ;;  %8085 = vmatpush.xpose.msk.msra.mxu3 %vm423_vm0, %v11107_v61 }
  0x96   : > { %761 = vmatmul.f32.vlgmr.msrb.gmra.mxu2 %v604_v23  ;;  %8002 = vmatmul.msk.f32.vlgmr.msrb.gmra.mxu3 %vm423_vm0, %v605_v24  ;;  %v15905_v23 = vld [vmem:[#allocation3_spill] sm:$0xff] }
  0x97   : > { %v11162_v24 = vld [vmem:[%s15784_s3 + $0x8] sm:$0xf] }
  0x98   : > { %956 = vmatpush.xpose.msra.mxu0 %v10985_v62  ;;  %8069 = vmatpush.xpose.msk.msra.mxu1 %vm423_vm0, %v10988_v63  ;;  %15906 = vst [vmem:[#allocation3_spill] sm:$0xff] %v11162_v24 }
  0x99   : > { %996 = vmatpush.xpose.msra.mxu2 %v11120_v56  ;;  %8086 = vmatpush.xpose.msk.msra.mxu3 %vm423_vm0, %v11123_v57  ;;  %853 = vst [vmem:[#allocation1] ss:$4 sm:$0xff] %v11162_v24  ;;  %v11220_v24 = vld [vmem:[%s10706_s28 + $0x250] sm:$0xff] }
  0x9c   : > { %957 = vmatpush.xpose.msra.mxu0 %v10709_v0  ;;  %8070 = vmatpush.xpose.msk.msra.mxu1 %vm423_vm0, %v10712_v1 }
  0x9d   : > { %997 = vmatpush.xpose.msra.mxu2 %v10715_v2  ;;  %8087 = vmatpush.xpose.msk.msra.mxu3 %vm423_vm0, %v10721_v3 }
  0xa0   : > { %958 = vmatpush.xpose.msra.mxu0 %v10727_v4  ;;  %8071 = vmatpush.xpose.msk.msra.mxu1 %vm423_vm0, %v10730_v5 }
  0xa1   : > { %998 = vmatpush.xpose.msra.mxu2 %v10733_v6  ;;  %8088 = vmatpush.xpose.msk.msra.mxu3 %vm423_vm0, %v10736_v7 }
  0xa4   : > { %959 = vmatpush.xpose.msra.mxu0 %v10745_v8  ;;  %8072 = vmatpush.xpose.msk.msra.mxu1 %vm423_vm0, %v10748_v9 }
  0xa5   : > { %999 = vmatpush.xpose.msra.mxu2 %v10751_v10  ;;  %8089 = vmatpush.xpose.msk.msra.mxu3 %vm423_vm0, %v10754_v11 }
  0xa8   : > { %960 = vmatpush.xpose.msra.mxu0 %v10763_v12  ;;  %8073 = vmatpush.xpose.msk.msra.mxu1 %vm423_vm0, %v10766_v13 }
  0xa9   : > { %1000 = vmatpush.xpose.msra.mxu2 %v10769_v14  ;;  %8090 = vmatpush.xpose.msk.msra.mxu3 %vm423_vm0, %v10772_v15 }
  0xac   : > { %961 = vmatpush.xpose.msra.mxu0 %v15905_v23  ;;  %8074 = vmatpush.xpose.msk.msra.mxu1 %vm423_vm0, %v10784_v17  ;;  %v15908_v17 = vld [vmem:[#allocation6_spill] sm:$0xff] }
  0xad   : > { %1001 = vmatpush.xpose.msra.mxu2 %v10787_v18  ;;  %8091 = vmatpush.xpose.msk.msra.mxu3 %vm423_vm0, %v10790_v19 }
  0xb0   : > { %962 = vmatpush.xpose.msra.mxu0 %v10799_v20  ;;  %8075 = vmatpush.xpose.msk.msra.mxu1 %vm423_vm0, %v10802_v21 }
  0xb1   : > { %1002 = vmatpush.xpose.msra.mxu2 %v10805_v22  ;;  %8092 = vmatpush.xpose.msk.msra.mxu3 %vm423_vm0, %v15907_v16 }
  0xb4   : > { %963 = vmatpush.xpose.msra.mxu0 %v15908_v17  ;;  %8076 = vmatpush.xpose.msk.msra.mxu1 %vm423_vm0, %v10820_v25 }
  0xb5   : > { %1003 = vmatpush.xpose.msra.mxu2 %v10823_v26  ;;  %8093 = vmatpush.xpose.msk.msra.mxu3 %vm423_vm0, %v10826_v27 }
  0xb8   : > { %964 = vmatpush.xpose.msra.mxu0 %v10835_v28  ;;  %8077 = vmatpush.xpose.msk.msra.mxu1 %vm423_vm0, %v10838_v29 }
  0xb9   : > { %1004 = vmatpush.xpose.msra.mxu2 %v10841_v30  ;;  %8094 = vmatpush.xpose.msk.msra.mxu3 %vm423_vm0, %v10844_v31 }
  0xbc   : > { %965 = vmatpush.xpose.msra.mxu0 %v10853_v32  ;;  %8078 = vmatpush.xpose.msk.msra.mxu1 %vm423_vm0, %v10856_v33 }
  0xbd   : > { %1005 = vmatpush.xpose.msra.mxu2 %v10859_v34  ;;  %8095 = vmatpush.xpose.msk.msra.mxu3 %vm423_vm0, %v10862_v35 }
  0xc0   : > { %966 = vmatpush.xpose.msra.mxu0 %v10871_v36  ;;  %8079 = vmatpush.xpose.msk.msra.mxu1 %vm423_vm0, %v10874_v37 }
  0xc1   : > { %1006 = vmatpush.xpose.msra.mxu2 %v10877_v38  ;;  %8096 = vmatpush.xpose.msk.msra.mxu3 %vm423_vm0, %v10880_v39 }
  0xc4   : > { %967 = vmatpush.xpose.msra.mxu0 %v10889_v40  ;;  %8080 = vmatpush.xpose.msk.msra.mxu1 %vm423_vm0, %v10892_v41 }
  0xc5   : > { %1007 = vmatpush.xpose.msra.mxu2 %v10895_v42  ;;  %8097 = vmatpush.xpose.msk.msra.mxu3 %vm423_vm0, %v10898_v43 }
  0xc8   : > { %968 = vmatpush.xpose.msra.mxu0 %v10907_v44  ;;  %8081 = vmatpush.xpose.msk.msra.mxu1 %vm423_vm0, %v10910_v45 }
  0xc9   : > { %1008 = vmatpush.xpose.msra.mxu2 %v10913_v46  ;;  %8098 = vmatpush.xpose.msk.msra.mxu3 %vm423_vm0, %v10916_v47  ;;  %v11223_v47 = vld [vmem:[%s10706_s28 + $0x258] sm:$0xff] }
  0xcc   : > { %969 = vmatpush.xpose.msra.mxu0 %v10925_v48  ;;  %8082 = vmatpush.xpose.msk.msra.mxu1 %vm423_vm0, %v10928_v49  ;;  %v854_v48 = vld.sshfl [vmem:[#allocation1] sm:$0xff pattern:$0x73625140]  ;;  %v855_v49 = vld.sshfl [vmem:[#allocation1 + $0x8] sm:$0xff pattern:$0x73625140] }
  0xcd   : > { %1009 = vmatpush.xpose.msra.mxu2 %v10931_v50  ;;  %8099 = vmatpush.xpose.msk.msra.mxu3 %vm423_vm0, %v10934_v51 }
  0xd0   : > { %970 = vmatpush.xpose.msra.mxu0 %v10943_v52  ;;  %8083 = vmatpush.xpose.msk.msra.mxu1 %vm423_vm0, %v10946_v53  ;;  %v11236_v52 = vld [vmem:[%s10706_s28 + $0x240] sm:$0xff]  ;;  %v11239_v53 = vld [vmem:[%s10706_s28 + $0x248] sm:$0xff] }
  0xd1   : > { %1010 = vmatpush.xpose.msra.mxu2 %v10949_v54  ;;  %8100 = vmatpush.xpose.msk.msra.mxu3 %vm423_vm0, %v10952_v55  ;;  %15909 = vst [vmem:[#allocation5_spill] sm:$0xff] %v11239_v53 }
  0xd3   : > { %971 = vmatmul.f32.vlgmr.msra.gmra.mxu0 %v854_v48  ;;  %8084 = vmatmul.msk.f32.vlgmr.msra.gmra.mxu1 %vm423_vm0, %v855_v49 }
  0xd4   : > { %1207 = vmatpush.xpose.msrb.mxu0 %v10931_v50  ;;  %8167 = vmatpush.xpose.msk.msrb.mxu1 %vm423_vm0, %v10934_v51 }
  0xd5   : > { %1247 = vmatpush.xpose.msrb.mxu2 %v11220_v24  ;;  %8184 = vmatpush.xpose.msk.msrb.mxu3 %vm423_vm0, %v11223_v47 }
  0xd6   : > { %1011 = vmatmul.f32.vlgmr.msra.gmra.mxu2 %v854_v48  ;;  %8101 = vmatmul.msk.f32.vlgmr.msra.gmra.mxu3 %vm423_vm0, %v855_v49  ;;  %v11576_v48 = vld [vmem:[%s10706_s28 + $0x280] sm:$0xff]  ;;  %v11579_v49 = vld [vmem:[%s10706_s28 + $0x288] sm:$0xff] }
  0xd8   : > { %1208 = vmatpush.xpose.msrb.mxu0 %v10949_v54  ;;  %8168 = vmatpush.xpose.msk.msrb.mxu1 %vm423_vm0, %v10952_v55 }
  0xd9   : > { %1248 = vmatpush.xpose.msrb.mxu2 %v11236_v52  ;;  %8185 = vmatpush.xpose.msk.msrb.mxu3 %vm423_vm0, %v11239_v53 }
  0xdc   : > { %1209 = vmatpush.xpose.msrb.mxu0 %v10967_v58  ;;  %8169 = vmatpush.xpose.msk.msrb.mxu1 %vm423_vm0, %v10970_v59 }
  0xdd   : > { %1249 = vmatpush.xpose.msrb.mxu2 %v11104_v60  ;;  %8186 = vmatpush.xpose.msk.msrb.mxu3 %vm423_vm0, %v11107_v61 }
  0xe0   : > { %1210 = vmatpush.xpose.msrb.mxu0 %v10985_v62  ;;  %8170 = vmatpush.xpose.msk.msrb.mxu1 %vm423_vm0, %v10988_v63 }
  0xe1   : > { %1250 = vmatpush.xpose.msrb.mxu2 %v11120_v56  ;;  %8187 = vmatpush.xpose.msk.msrb.mxu3 %vm423_vm0, %v11123_v57 }
  0xe4   : > { %1211 = vmatpush.xpose.msrb.mxu0 %v10709_v0  ;;  %8171 = vmatpush.xpose.msk.msrb.mxu1 %vm423_vm0, %v10712_v1  ;;  %v11278_v0 = vld [vmem:[%s15784_s3 + $0xc] sm:$0xf]  ;;  %v15911_v1 = vld [vmem:[#allocation4_spill] sm:$0xff] }
  0xe5   : > { %1251 = vmatpush.xpose.msrb.mxu2 %v10715_v2  ;;  %8188 = vmatpush.xpose.msk.msrb.mxu3 %vm423_vm0, %v10721_v3  ;;  %15910 = vst [vmem:[#allocation6_spill] sm:$0xff] %v11278_v0  ;;  %v11336_v2 = vld [vmem:[%s10706_s28 + $0x270] sm:$0xff]  ;;  %v11339_v3 = vld [vmem:[%s10706_s28 + $0x278] sm:$0xff] }
  0xe6   : > { %1105 = vst [vmem:[#allocation1] ss:$4 sm:$0xff] %v11278_v0  ;;  %v11654_v0 = vld [vmem:[%s10706_s28 + $0x120] sm:$0xff] }
  0xe8   : > { %1212 = vmatpush.xpose.msrb.mxu0 %v10727_v4  ;;  %8172 = vmatpush.xpose.msk.msrb.mxu1 %vm423_vm0, %v10730_v5  ;;  %v15912_v4 = vld [vmem:[#allocation7_spill] sm:$0xff] }
  0xe9   : > { %1252 = vmatpush.xpose.msrb.mxu2 %v10733_v6  ;;  %8189 = vmatpush.xpose.msk.msrb.mxu3 %vm423_vm0, %v10736_v7  ;;  %v11352_v7 = vld [vmem:[%s10706_s28 + $0x260] sm:$0xff] }
  0xec   : > { %1213 = vmatpush.xpose.msrb.mxu0 %v10745_v8  ;;  %8173 = vmatpush.xpose.msk.msrb.mxu1 %vm423_vm0, %v10748_v9  ;;  %v11355_v8 = vld [vmem:[%s10706_s28 + $0x268] sm:$0xff]  ;;  %v11389_v9 = vld [vmem:[%s10706_s28 + $0x110] sm:$0xff] }
  0xed   : > { %1253 = vmatpush.xpose.msrb.mxu2 %v10751_v10  ;;  %8190 = vmatpush.xpose.msk.msrb.mxu3 %vm423_vm0, %v10754_v11  ;;  %v1106_v5 = vld.sshfl [vmem:[#allocation1] sm:$0xff pattern:$0x73625140]  ;;  %v1107_v6 = vld.sshfl [vmem:[#allocation1 + $0x8] sm:$0xff pattern:$0x73625140] }
  0xee   : > { %v11392_v10 = vld [vmem:[%s10706_s28 + $0x118] sm:$0xff]  ;;  %v11395_v11 = vld [vmem:[%s10706_s28 + $0x210] sm:$0xff] }
  0xf0   : > { %1214 = vmatpush.xpose.msrb.mxu0 %v10763_v12  ;;  %8174 = vmatpush.xpose.msk.msrb.mxu1 %vm423_vm0, %v10766_v13  ;;  %v11398_v12 = vld [vmem:[%s10706_s28 + $0x218] sm:$0xff]  ;;  %v11407_v13 = vld [vmem:[%s10706_s28 + $0x100] sm:$0xff] }
  0xf1   : > { %1254 = vmatpush.xpose.msrb.mxu2 %v10769_v14  ;;  %8191 = vmatpush.xpose.msk.msrb.mxu3 %vm423_vm0, %v10772_v15  ;;  %v11410_v14 = vld [vmem:[%s10706_s28 + $0x108] sm:$0xff]  ;;  %v11415_v15 = vld [vmem:[%s15784_s3 + $0x10] sm:$0xf] }
  0xf2   : > { %15913 = vst [vmem:[#allocation4_spill] sm:$0xff] %v11415_v15 }
  0xf3   : > { %1357 = vst [vmem:[#allocation1] ss:$4 sm:$0xff] %v11415_v15  ;;  %v11648_v15 = vld [vmem:[%s15784_s3 + $0x14] sm:$0xf] }
  0xf4   : > { %1215 = vmatpush.xpose.msrb.mxu0 %v15905_v23  ;;  %8175 = vmatpush.xpose.msk.msrb.mxu1 %vm423_vm0, %v15911_v1  ;;  %v11589_v1 = vld [vmem:[%s10706_s28 + $0x170] sm:$0xff]  ;;  %15914 = vst [vmem:[#allocation7_spill] sm:$0xff] %v11648_v15 }
  0xf5   : > { %1255 = vmatpush.xpose.msrb.mxu2 %v10787_v18  ;;  %8192 = vmatpush.xpose.msk.msrb.mxu3 %vm423_vm0, %v10790_v19  ;;  %v11431_v18 = vld [vmem:[%s10706_s28 + $0xf0] sm:$0xff]  ;;  %v11434_v19 = vld [vmem:[%s10706_s28 + $0xf8] sm:$0xff] }
  0xf8   : > { %1216 = vmatpush.xpose.msrb.mxu0 %v10799_v20  ;;  %8176 = vmatpush.xpose.msk.msrb.mxu1 %vm423_vm0, %v10802_v21  ;;  %v11437_v20 = vld [vmem:[%s10706_s28 + $0x1f0] sm:$0xff]  ;;  %v11440_v21 = vld [vmem:[%s10706_s28 + $0x1f8] sm:$0xff] }
  0xf9   : > { %1256 = vmatpush.xpose.msrb.mxu2 %v10805_v22  ;;  %8193 = vmatpush.xpose.msk.msrb.mxu3 %vm423_vm0, %v15907_v16  ;;  %v11418_v16 = vld [vmem:[%s10706_s28 + $0x200] sm:$0xff] }
  0xfa   : > { %v11449_v22 = vld [vmem:[%s10706_s28 + $0xe0] sm:$0xff]  ;;  %v1359_v23 = vld.sshfl [vmem:[#allocation1 + $0x8] sm:$0xff pattern:$0x73625140] }
  0xfc   : > { %1217 = vmatpush.xpose.msrb.mxu0 %v15908_v17  ;;  %8177 = vmatpush.xpose.msk.msrb.mxu1 %vm423_vm0, %v10820_v25  ;;  %v11421_v17 = vld [vmem:[%s10706_s28 + $0x208] sm:$0xff] }
  0xfd   : > { %1257 = vmatpush.xpose.msrb.mxu2 %v10823_v26  ;;  %8194 = vmatpush.xpose.msk.msrb.mxu3 %vm423_vm0, %v10826_v27  ;;  %v11452_v25 = vld [vmem:[%s10706_s28 + $0xe8] sm:$0xff]  ;;  %v11455_v26 = vld [vmem:[%s10706_s28 + $0x1e0] sm:$0xff] }
  0xfe   : > { %v11458_v27 = vld [vmem:[%s10706_s28 + $0x1e8] sm:$0xff] }
 0x100   : > { %1218 = vmatpush.xpose.msrb.mxu0 %v10835_v28  ;;  %8178 = vmatpush.xpose.msk.msrb.mxu1 %vm423_vm0, %v10838_v29  ;;  %v11467_v28 = vld [vmem:[%s10706_s28 + $0xd0] sm:$0xff]  ;;  %v11470_v29 = vld [vmem:[%s10706_s28 + $0xd8] sm:$0xff] }
 0x101   : > { %1258 = vmatpush.xpose.msrb.mxu2 %v10841_v30  ;;  %8195 = vmatpush.xpose.msk.msrb.mxu3 %vm423_vm0, %v10844_v31  ;;  %v11473_v30 = vld [vmem:[%s10706_s28 + $0x1d0] sm:$0xff]  ;;  %v11476_v31 = vld [vmem:[%s10706_s28 + $0x1d8] sm:$0xff] }
 0x104   : > { %1219 = vmatpush.xpose.msrb.mxu0 %v10853_v32  ;;  %8179 = vmatpush.xpose.msk.msrb.mxu1 %vm423_vm0, %v10856_v33  ;;  %v11485_v32 = vld [vmem:[%s10706_s28 + $0xc0] sm:$0xff]  ;;  %v11488_v33 = vld [vmem:[%s10706_s28 + $0xc8] sm:$0xff] }
 0x105   : > { %1259 = vmatpush.xpose.msrb.mxu2 %v10859_v34  ;;  %8196 = vmatpush.xpose.msk.msrb.mxu3 %vm423_vm0, %v10862_v35  ;;  %v11491_v34 = vld [vmem:[%s10706_s28 + $0x1c0] sm:$0xff]  ;;  %v11494_v35 = vld [vmem:[%s10706_s28 + $0x1c8] sm:$0xff] }
 0x108   : > { %1220 = vmatpush.xpose.msrb.mxu0 %v10871_v36  ;;  %8180 = vmatpush.xpose.msk.msrb.mxu1 %vm423_vm0, %v10874_v37  ;;  %v11503_v36 = vld [vmem:[%s10706_s28 + $0xb0] sm:$0xff]  ;;  %v11506_v37 = vld [vmem:[%s10706_s28 + $0xb8] sm:$0xff] }
 0x109   : > { %1260 = vmatpush.xpose.msrb.mxu2 %v10877_v38  ;;  %8197 = vmatpush.xpose.msk.msrb.mxu3 %vm423_vm0, %v10880_v39  ;;  %v11509_v38 = vld [vmem:[%s10706_s28 + $0x1b0] sm:$0xff]  ;;  %v11512_v39 = vld [vmem:[%s10706_s28 + $0x1b8] sm:$0xff] }
 0x10c   : > { %1221 = vmatpush.xpose.msrb.mxu0 %v10889_v40  ;;  %8181 = vmatpush.xpose.msk.msrb.mxu1 %vm423_vm0, %v10892_v41  ;;  %v11521_v40 = vld [vmem:[%s10706_s28 + $0xa0] sm:$0xff]  ;;  %v11524_v41 = vld [vmem:[%s10706_s28 + $0xa8] sm:$0xff] }
 0x10d   : > { %1261 = vmatpush.xpose.msrb.mxu2 %v10895_v42  ;;  %8198 = vmatpush.xpose.msk.msrb.mxu3 %vm423_vm0, %v10898_v43 }
 0x110   : > { %1222 = vmatpush.xpose.msrb.mxu0 %v10907_v44  ;;  %8182 = vmatpush.xpose.msk.msrb.mxu1 %vm423_vm0, %v10910_v45  ;;  %v8203_v44 = vld [vmem:[%s10706_s28 + $0x90] sm:$0xff]  ;;  %v8204_v45 = vld [vmem:[%s10706_s28 + $0x98] sm:$0xff] }
 0x111   : > { %1262 = vmatpush.xpose.msrb.mxu2 %v10913_v46  ;;  %8199 = vmatpush.xpose.msk.msrb.mxu3 %vm423_vm0, %v15912_v4 }
 0x113   : > { %1223 = vmatmul.f32.vlgmr.msrb.gmra.mxu0 %v1106_v5  ;;  %8183 = vmatmul.msk.f32.vlgmr.msrb.gmra.mxu1 %vm423_vm0, %v1107_v6 }
 0x114   : > { %1459 = vmatpush.xpose.msra.mxu0 %v10895_v42  ;;  %8266 = vmatpush.xpose.msk.msra.mxu1 %vm423_vm0, %v10898_v43  ;;  %v11527_v42 = vld [vmem:[%s10706_s28 + $0x1a0] sm:$0xff]  ;;  %v11530_v43 = vld [vmem:[%s10706_s28 + $0x1a8] sm:$0xff] }
 0x115   : > { %1499 = vmatpush.xpose.msra.mxu2 %v11336_v2  ;;  %8283 = vmatpush.xpose.msk.msra.mxu3 %vm423_vm0, %v11339_v3 }
 0x116   : > { %1263 = vmatmul.f32.vlgmr.msrb.gmra.mxu2 %v1106_v5  ;;  %8200 = vmatmul.msk.f32.vlgmr.msrb.gmra.mxu3 %vm423_vm0, %v1107_v6  ;;  %v11601_v5 = vld [vmem:[%s10706_s28 + $0x160] sm:$0xff]  ;;  %v11604_v6 = vld [vmem:[%s10706_s28 + $0x168] sm:$0xff] }
 0x118   : > { %1460 = vmatpush.xpose.msra.mxu0 %v10913_v46  ;;  %8267 = vmatpush.xpose.msk.msra.mxu1 %vm423_vm0, %v15912_v4  ;;  %v11541_v46 = vld [vmem:[%s10706_s28 + $0x190] sm:$0xff]  ;;  %v11592_v4 = vld [vmem:[%s10706_s28 + $0x178] sm:$0xff] }
 0x119   : > { %1500 = vmatpush.xpose.msra.mxu2 %v11352_v7  ;;  %8284 = vmatpush.xpose.msk.msra.mxu3 %vm423_vm0, %v11355_v8 }
 0x11c   : > { %1461 = vmatpush.xpose.msra.mxu0 %v10931_v50  ;;  %8268 = vmatpush.xpose.msk.msra.mxu1 %vm423_vm0, %v10934_v51  ;;  %v11544_v50 = vld [vmem:[%s10706_s28 + $0x198] sm:$0xff]  ;;  %v8201_v51 = vld [vmem:[%s10706_s28 + $0x80] sm:$0xff] }
 0x11d   : > { %1501 = vmatpush.xpose.msra.mxu2 %v11220_v24  ;;  %8285 = vmatpush.xpose.msk.msra.mxu3 %vm423_vm0, %v11223_v47 }
 0x120   : > { %1462 = vmatpush.xpose.msra.mxu0 %v10949_v54  ;;  %8269 = vmatpush.xpose.msk.msra.mxu1 %vm423_vm0, %v10952_v55  ;;  %v8202_v54 = vld [vmem:[%s10706_s28 + $0x88] sm:$0xff]  ;;  %v11553_v55 = vld [vmem:[%s10706_s28 + $0x180] sm:$0xff] }
 0x121   : > { %1502 = vmatpush.xpose.msra.mxu2 %v11236_v52  ;;  %8286 = vmatpush.xpose.msk.msra.mxu3 %vm423_vm0, %v11239_v53 }
 0x124   : > { %1463 = vmatpush.xpose.msra.mxu0 %v10967_v58  ;;  %8270 = vmatpush.xpose.msk.msra.mxu1 %vm423_vm0, %v10970_v59  ;;  %v11556_v58 = vld [vmem:[%s10706_s28 + $0x188] sm:$0xff]  ;;  %v11560_v59 = vld [vmem:[%s10706_s28 + $0x290] sm:$0xff] }
 0x125   : > { %1503 = vmatpush.xpose.msra.mxu2 %v11104_v60  ;;  %8287 = vmatpush.xpose.msk.msra.mxu3 %vm423_vm0, %v11107_v61 }
 0x128   : > { %1464 = vmatpush.xpose.msra.mxu0 %v10985_v62  ;;  %8271 = vmatpush.xpose.msk.msra.mxu1 %vm423_vm0, %v10988_v63  ;;  %v11563_v62 = vld [vmem:[%s10706_s28 + $0x298] sm:$0xff]  ;;  %v1358_v63 = vld.sshfl [vmem:[#allocation1] sm:$0xff pattern:$0x73625140] }
 0x129   : > { %1504 = vmatpush.xpose.msra.mxu2 %v11120_v56  ;;  %8288 = vmatpush.xpose.msk.msra.mxu3 %vm423_vm0, %v11123_v57  ;;  %1609 = vst [vmem:[#allocation1] ss:$4 sm:$0xff] %v11648_v15  ;;  %v12104_v15 = vld [vmem:[%s10706_s28 + $0x3e8] sm:$0xff] }
 0x12c   : > { %1465 = vmatpush.xpose.msra.mxu0 %v11389_v9  ;;  %8272 = vmatpush.xpose.msk.msra.mxu1 %vm423_vm0, %v11392_v10 }
 0x12d   : > { %1505 = vmatpush.xpose.msra.mxu2 %v11395_v11  ;;  %8289 = vmatpush.xpose.msk.msra.mxu3 %vm423_vm0, %v11398_v12 }
 0x130   : > { %1466 = vmatpush.xpose.msra.mxu0 %v11407_v13  ;;  %8273 = vmatpush.xpose.msk.msra.mxu1 %vm423_vm0, %v11410_v14 }
 0x131   : > { %1506 = vmatpush.xpose.msra.mxu2 %v11418_v16  ;;  %8290 = vmatpush.xpose.msk.msra.mxu3 %vm423_vm0, %v11421_v17 }
 0x134   : > { %1467 = vmatpush.xpose.msra.mxu0 %v11431_v18  ;;  %8274 = vmatpush.xpose.msk.msra.mxu1 %vm423_vm0, %v11434_v19 }
 0x135   : > { %1507 = vmatpush.xpose.msra.mxu2 %v11437_v20  ;;  %8291 = vmatpush.xpose.msk.msra.mxu3 %vm423_vm0, %v11440_v21 }
 0x138   : > { %1468 = vmatpush.xpose.msra.mxu0 %v11449_v22  ;;  %8275 = vmatpush.xpose.msk.msra.mxu1 %vm423_vm0, %v11452_v25 }
 0x139   : > { %1508 = vmatpush.xpose.msra.mxu2 %v11455_v26  ;;  %8292 = vmatpush.xpose.msk.msra.mxu3 %vm423_vm0, %v11458_v27 }
 0x13c   : > { %1469 = vmatpush.xpose.msra.mxu0 %v11467_v28  ;;  %8276 = vmatpush.xpose.msk.msra.mxu1 %vm423_vm0, %v11470_v29 }
 0x13d   : > { %1509 = vmatpush.xpose.msra.mxu2 %v11473_v30  ;;  %8293 = vmatpush.xpose.msk.msra.mxu3 %vm423_vm0, %v11476_v31 }
 0x140   : > { %1470 = vmatpush.xpose.msra.mxu0 %v11485_v32  ;;  %8277 = vmatpush.xpose.msk.msra.mxu1 %vm423_vm0, %v11488_v33 }
 0x141   : > { %1510 = vmatpush.xpose.msra.mxu2 %v11491_v34  ;;  %8294 = vmatpush.xpose.msk.msra.mxu3 %vm423_vm0, %v11494_v35 }
 0x144   : > { %1471 = vmatpush.xpose.msra.mxu0 %v11503_v36  ;;  %8278 = vmatpush.xpose.msk.msra.mxu1 %vm423_vm0, %v11506_v37 }
 0x145   : > { %1511 = vmatpush.xpose.msra.mxu2 %v11509_v38  ;;  %8295 = vmatpush.xpose.msk.msra.mxu3 %vm423_vm0, %v11512_v39 }
 0x148   : > { %1472 = vmatpush.xpose.msra.mxu0 %v11521_v40  ;;  %8279 = vmatpush.xpose.msk.msra.mxu1 %vm423_vm0, %v11524_v41 }
 0x149   : > { %1512 = vmatpush.xpose.msra.mxu2 %v11527_v42  ;;  %8296 = vmatpush.xpose.msk.msra.mxu3 %vm423_vm0, %v11530_v43 }
 0x14c   : > { %1473 = vmatpush.xpose.msra.mxu0 %v8203_v44  ;;  %8280 = vmatpush.xpose.msk.msra.mxu1 %vm423_vm0, %v8204_v45  ;;  %v11613_v44 = vld [vmem:[%s10706_s28 + $0x150] sm:$0xff]  ;;  %v11616_v45 = vld [vmem:[%s10706_s28 + $0x158] sm:$0xff] }
 0x14d   : > { %1513 = vmatpush.xpose.msra.mxu2 %v11541_v46  ;;  %8297 = vmatpush.xpose.msk.msra.mxu3 %vm423_vm0, %v11544_v50 }
 0x150   : > { %1474 = vmatpush.xpose.msra.mxu0 %v8201_v51  ;;  %8281 = vmatpush.xpose.msk.msra.mxu1 %vm423_vm0, %v8202_v54  ;;  %v11625_v51 = vld [vmem:[%s10706_s28 + $0x140] sm:$0xff]  ;;  %v11628_v54 = vld [vmem:[%s10706_s28 + $0x148] sm:$0xff] }
 0x151   : > { %1514 = vmatpush.xpose.msra.mxu2 %v11553_v55  ;;  %8298 = vmatpush.xpose.msk.msra.mxu3 %vm423_vm0, %v11556_v58 }
 0x153   : > { %1475 = vmatmul.f32.vlgmr.msra.gmra.mxu0 %v1358_v63  ;;  %8282 = vmatmul.msk.f32.vlgmr.msra.gmra.mxu1 %vm423_vm0, %v1359_v23 }
 0x154   : > { %1711 = vmatpush.xpose.msrb.mxu0 %v11541_v46  ;;  %8365 = vmatpush.xpose.msk.msrb.mxu1 %vm423_vm0, %v11544_v50 }
 0x155   : > { %1751 = vmatpush.xpose.msrb.mxu2 %v11560_v59  ;;  %8382 = vmatpush.xpose.msk.msrb.mxu3 %vm423_vm0, %v11563_v62 }
 0x156   : > { %1515 = vmatmul.f32.vlgmr.msra.gmra.mxu2 %v1358_v63  ;;  %8299 = vmatmul.msk.f32.vlgmr.msra.gmra.mxu3 %vm423_vm0, %v1359_v23  ;;  %v11637_v63 = vld [vmem:[%s10706_s28 + $0x130] sm:$0xff]  ;;  %v11640_v23 = vld [vmem:[%s10706_s28 + $0x138] sm:$0xff] }
 0x158   : > { %1712 = vmatpush.xpose.msrb.mxu0 %v11553_v55  ;;  %8366 = vmatpush.xpose.msk.msrb.mxu1 %vm423_vm0, %v11556_v58 }
 0x159   : > { %1752 = vmatpush.xpose.msrb.mxu2 %v11576_v48  ;;  %8383 = vmatpush.xpose.msk.msrb.mxu3 %vm423_vm0, %v11579_v49 }
 0x15c   : > { %1713 = vmatpush.xpose.msrb.mxu0 %v11589_v1  ;;  %8367 = vmatpush.xpose.msk.msrb.mxu1 %vm423_vm0, %v11592_v4 }
 0x15d   : > { %1753 = vmatpush.xpose.msrb.mxu2 %v11336_v2  ;;  %8384 = vmatpush.xpose.msk.msrb.mxu3 %vm423_vm0, %v11339_v3 }
 0x160   : > { %1714 = vmatpush.xpose.msrb.mxu0 %v11601_v5  ;;  %8368 = vmatpush.xpose.msk.msrb.mxu1 %vm423_vm0, %v11604_v6 }
 0x161   : > { %1754 = vmatpush.xpose.msrb.mxu2 %v11352_v7  ;;  %8385 = vmatpush.xpose.msk.msrb.mxu3 %vm423_vm0, %v11355_v8 }
 0x164   : > { %1715 = vmatpush.xpose.msrb.mxu0 %v11613_v44  ;;  %8369 = vmatpush.xpose.msk.msrb.mxu1 %vm423_vm0, %v11616_v45 }
 0x165   : > { %1755 = vmatpush.xpose.msrb.mxu2 %v11220_v24  ;;  %8386 = vmatpush.xpose.msk.msrb.mxu3 %vm423_vm0, %v11223_v47 }
 0x168   : > { %1716 = vmatpush.xpose.msrb.mxu0 %v11625_v51  ;;  %8370 = vmatpush.xpose.msk.msrb.mxu1 %vm423_vm0, %v11628_v54 }
 0x169   : > { %1756 = vmatpush.xpose.msrb.mxu2 %v11236_v52  ;;  %8387 = vmatpush.xpose.msk.msrb.mxu3 %vm423_vm0, %v11239_v53  ;;  %v11657_v53 = vld [vmem:[%s10706_s28 + $0x128] sm:$0xff] }
 0x16c   : > { %1717 = vmatpush.xpose.msrb.mxu0 %v11637_v63  ;;  %8371 = vmatpush.xpose.msk.msrb.mxu1 %vm423_vm0, %v11640_v23 }
 0x16d   : > { %1757 = vmatpush.xpose.msrb.mxu2 %v11104_v60  ;;  %8388 = vmatpush.xpose.msk.msrb.mxu3 %vm423_vm0, %v11107_v61  ;;  %v8461_v60 = vld [vmem:[%s10706_s28 + $0x2b0] sm:$0xff]  ;;  %v8462_v61 = vld [vmem:[%s10706_s28 + $0x2b8] sm:$0xff] }
 0x170   : > { %1718 = vmatpush.xpose.msrb.mxu0 %v11654_v0  ;;  %8372 = vmatpush.xpose.msk.msrb.mxu1 %vm423_vm0, %v11657_v53 }
 0x171   : > { %1758 = vmatpush.xpose.msrb.mxu2 %v11120_v56  ;;  %8389 = vmatpush.xpose.msk.msrb.mxu3 %vm423_vm0, %v11123_v57  ;;  %v1610_v56 = vld.sshfl [vmem:[#allocation1] sm:$0xff pattern:$0x73625140]  ;;  %v1611_v57 = vld.sshfl [vmem:[#allocation1 + $0x8] sm:$0xff pattern:$0x73625140] }
 0x174   : > { %1719 = vmatpush.xpose.msrb.mxu0 %v11389_v9  ;;  %8373 = vmatpush.xpose.msk.msrb.mxu1 %vm423_vm0, %v11392_v10 }
 0x175   : > { %1759 = vmatpush.xpose.msrb.mxu2 %v11395_v11  ;;  %8390 = vmatpush.xpose.msk.msrb.mxu3 %vm423_vm0, %v11398_v12 }
 0x178   : > { %1720 = vmatpush.xpose.msrb.mxu0 %v11407_v13  ;;  %8374 = vmatpush.xpose.msk.msrb.mxu1 %vm423_vm0, %v11410_v14 }
 0x179   : > { %1760 = vmatpush.xpose.msrb.mxu2 %v11418_v16  ;;  %8391 = vmatpush.xpose.msk.msrb.mxu3 %vm423_vm0, %v11421_v17 }
 0x17c   : > { %1721 = vmatpush.xpose.msrb.mxu0 %v11431_v18  ;;  %8375 = vmatpush.xpose.msk.msrb.mxu1 %vm423_vm0, %v11434_v19 }
 0x17d   : > { %1761 = vmatpush.xpose.msrb.mxu2 %v11437_v20  ;;  %8392 = vmatpush.xpose.msk.msrb.mxu3 %vm423_vm0, %v11440_v21 }
 0x180   : > { %1722 = vmatpush.xpose.msrb.mxu0 %v11449_v22  ;;  %8376 = vmatpush.xpose.msk.msrb.mxu1 %vm423_vm0, %v11452_v25 }
 0x181   : > { %1762 = vmatpush.xpose.msrb.mxu2 %v11455_v26  ;;  %8393 = vmatpush.xpose.msk.msrb.mxu3 %vm423_vm0, %v11458_v27 }
 0x184   : > { %1723 = vmatpush.xpose.msrb.mxu0 %v11467_v28  ;;  %8377 = vmatpush.xpose.msk.msrb.mxu1 %vm423_vm0, %v11470_v29 }
 0x185   : > { %1763 = vmatpush.xpose.msrb.mxu2 %v11473_v30  ;;  %8394 = vmatpush.xpose.msk.msrb.mxu3 %vm423_vm0, %v11476_v31 }
 0x188   : > { %1724 = vmatpush.xpose.msrb.mxu0 %v11485_v32  ;;  %8378 = vmatpush.xpose.msk.msrb.mxu1 %vm423_vm0, %v11488_v33 }
 0x189   : > { %1764 = vmatpush.xpose.msrb.mxu2 %v11491_v34  ;;  %8395 = vmatpush.xpose.msk.msrb.mxu3 %vm423_vm0, %v11494_v35 }
 0x18c   : > { %1725 = vmatpush.xpose.msrb.mxu0 %v11503_v36  ;;  %8379 = vmatpush.xpose.msk.msrb.mxu1 %vm423_vm0, %v11506_v37  ;;  %v8459_v36 = vld [vmem:[%s10706_s28 + $0x2a0] sm:$0xff]  ;;  %v8460_v37 = vld [vmem:[%s10706_s28 + $0x2a8] sm:$0xff] }
 0x18d   : > { %1765 = vmatpush.xpose.msrb.mxu2 %v11509_v38  ;;  %8396 = vmatpush.xpose.msk.msrb.mxu3 %vm423_vm0, %v11512_v39 }
 0x190   : > { %1726 = vmatpush.xpose.msrb.mxu0 %v11521_v40  ;;  %8380 = vmatpush.xpose.msk.msrb.mxu1 %vm423_vm0, %v11524_v41  ;;  %v8444_v40 = vld [vmem:[%s10706_s28 + $0x228] sm:$0xff]  ;;  %v11936_v41 = vld [vmem:[%s10706_s28 + $0x378] sm:$0xff] }
 0x191   : > { %1766 = vmatpush.xpose.msrb.mxu2 %v11527_v42  ;;  %8397 = vmatpush.xpose.msk.msrb.mxu3 %vm423_vm0, %v11530_v43  ;;  %15922 = vst [vmem:[#allocation14_spill] sm:$0xff] %v11936_v41 }
 0x193   : > { %1727 = vmatmul.f32.vlgmr.msrb.gmra.mxu0 %v1610_v56  ;;  %8381 = vmatmul.msk.f32.vlgmr.msrb.gmra.mxu1 %vm423_vm0, %v1611_v57 }
 0x194   : > { %1963 = vmatpush.xpose.msra.mxu0 %v11509_v38  ;;  %8464 = vmatpush.xpose.msk.msra.mxu1 %vm423_vm0, %v11512_v39  ;;  %v15917_v38 = vld [vmem:[#allocation8_spill] sm:$0xff]  ;;  %v8443_v39 = vld [vmem:[%s10706_s28 + $0x220] sm:$0xff] }
 0x195   : > { %2003 = vmatpush.xpose.msra.mxu2 %v8461_v60  ;;  %8481 = vmatpush.xpose.msk.msra.mxu3 %vm423_vm0, %v8462_v61  ;;  %v12029_v60 = vld [vmem:[%s10706_s28 + $0x420] sm:$0xff]  ;;  %v12032_v61 = vld [vmem:[%s10706_s28 + $0x428] sm:$0xff] }
 0x196   : > { %1767 = vmatmul.f32.vlgmr.msrb.gmra.mxu2 %v1610_v56  ;;  %8398 = vmatmul.msk.f32.vlgmr.msrb.gmra.mxu3 %vm423_vm0, %v1611_v57  ;;  %v12041_v56 = vld [vmem:[%s10706_s28 + $0x310] sm:$0xff]  ;;  %v12044_v57 = vld [vmem:[%s10706_s28 + $0x318] sm:$0xff] }
 0x198   : > { %1964 = vmatpush.xpose.msra.mxu0 %v11527_v42  ;;  %8465 = vmatpush.xpose.msk.msra.mxu1 %vm423_vm0, %v11530_v43  ;;  %v11939_v42 = vld [vmem:[%s10706_s28 + $0x470] sm:$0xff]  ;;  %v11942_v43 = vld [vmem:[%s10706_s28 + $0x478] sm:$0xff] }
 0x199   : > { %2004 = vmatpush.xpose.msra.mxu2 %v8459_v36  ;;  %8482 = vmatpush.xpose.msk.msra.mxu3 %vm423_vm0, %v8460_v37  ;;  %15923 = vst [vmem:[#allocation15_spill] sm:$0xff] %v11939_v42  ;;  %v12047_v36 = vld [vmem:[%s10706_s28 + $0x410] sm:$0xff]  ;;  %v12050_v37 = vld [vmem:[%s10706_s28 + $0x418] sm:$0xff] }
 0x19a   : > { %15924 = vst [vmem:[#allocation16_spill] sm:$0xff] %v11942_v43 }
 0x19c   : > { %1965 = vmatpush.xpose.msra.mxu0 %v11541_v46  ;;  %8466 = vmatpush.xpose.msk.msra.mxu1 %vm423_vm0, %v11544_v50  ;;  %v11951_v46 = vld [vmem:[%s10706_s28 + $0x360] sm:$0xff]  ;;  %v11954_v50 = vld [vmem:[%s10706_s28 + $0x368] sm:$0xff] }
 0x19d   : > { %2005 = vmatpush.xpose.msra.mxu2 %v11560_v59  ;;  %8483 = vmatpush.xpose.msk.msra.mxu3 %vm423_vm0, %v11563_v62  ;;  %v11969_v59 = vld [vmem:[%s10706_s28 + $0x350] sm:$0xff]  ;;  %v11972_v62 = vld [vmem:[%s10706_s28 + $0x358] sm:$0xff] }
 0x1a0   : > { %1966 = vmatpush.xpose.msra.mxu0 %v11553_v55  ;;  %8467 = vmatpush.xpose.msk.msra.mxu1 %vm423_vm0, %v11556_v58  ;;  %v11957_v55 = vld [vmem:[%s10706_s28 + $0x460] sm:$0xff]  ;;  %v11960_v58 = vld [vmem:[%s10706_s28 + $0x468] sm:$0xff] }
 0x1a1   : > { %2006 = vmatpush.xpose.msra.mxu2 %v11576_v48  ;;  %8484 = vmatpush.xpose.msk.msra.mxu3 %vm423_vm0, %v11579_v49  ;;  %v11975_v48 = vld [vmem:[%s10706_s28 + $0x450] sm:$0xff]  ;;  %v11978_v49 = vld [vmem:[%s10706_s28 + $0x458] sm:$0xff] }
 0x1a4   : > { %1967 = vmatpush.xpose.msra.mxu0 %v11589_v1  ;;  %8468 = vmatpush.xpose.msk.msra.mxu1 %vm423_vm0, %v11592_v4  ;;  %v11987_v1 = vld [vmem:[%s10706_s28 + $0x340] sm:$0xff]  ;;  %v11990_v4 = vld [vmem:[%s10706_s28 + $0x348] sm:$0xff] }
 0x1a5   : > { %2007 = vmatpush.xpose.msra.mxu2 %v11336_v2  ;;  %8485 = vmatpush.xpose.msk.msra.mxu3 %vm423_vm0, %v11339_v3  ;;  %v11758_v2 = vld [vmem:[%s15784_s3 + $0x18] sm:$0xf] }
 0x1a6   : > { %15915 = vst [vmem:[#allocation10_spill] sm:$0xff] %v11758_v2  ;;  %v15916_v3 = vld [vmem:[#allocation5_spill] sm:$0xff] }
 0x1a7   : > { %1861 = vst [vmem:[#allocation1] ss:$4 sm:$0xff] %v11758_v2  ;;  %v12101_v2 = vld [vmem:[%s10706_s28 + $0x3e0] sm:$0xff] }
 0x1a8   : > { %1968 = vmatpush.xpose.msra.mxu0 %v11601_v5  ;;  %8469 = vmatpush.xpose.msk.msra.mxu1 %vm423_vm0, %v11604_v6  ;;  %v11993_v5 = vld [vmem:[%s10706_s28 + $0x440] sm:$0xff]  ;;  %v11996_v6 = vld [vmem:[%s10706_s28 + $0x448] sm:$0xff] }
 0x1a9   : > { %2008 = vmatpush.xpose.msra.mxu2 %v11352_v7  ;;  %8486 = vmatpush.xpose.msk.msra.mxu3 %vm423_vm0, %v11355_v8  ;;  %v8445_v7 = vld [vmem:[%s10706_s28 + $0x230] sm:$0xff]  ;;  %v8446_v8 = vld [vmem:[%s10706_s28 + $0x238] sm:$0xff] }
 0x1ac   : > { %1969 = vmatpush.xpose.msra.mxu0 %v11613_v44  ;;  %8470 = vmatpush.xpose.msk.msra.mxu1 %vm423_vm0, %v11616_v45  ;;  %v12005_v44 = vld [vmem:[%s10706_s28 + $0x330] sm:$0xff]  ;;  %v12008_v45 = vld [vmem:[%s10706_s28 + $0x338] sm:$0xff] }
 0x1ad   : > { %2009 = vmatpush.xpose.msra.mxu2 %v11220_v24  ;;  %8487 = vmatpush.xpose.msk.msra.mxu3 %vm423_vm0, %v11223_v47 }
 0x1ae   : > { %v1862_v47 = vld.sshfl [vmem:[#allocation1] sm:$0xff pattern:$0x73625140]  ;;  %v1863_v24 = vld.sshfl [vmem:[#allocation1 + $0x8] sm:$0xff pattern:$0x73625140] }
 0x1af   : > { %2185 = vst [vmem:[#allocation1] ss:$4 sm:$0xff] %v15917_v38  ;;  %v12098_v38 = vld [vmem:[%s10706_s28 + $0x2e8] sm:$0xff] }
 0x1b0   : > { %1970 = vmatpush.xpose.msra.mxu0 %v11625_v51  ;;  %8471 = vmatpush.xpose.msk.msra.mxu1 %vm423_vm0, %v11628_v54  ;;  %v12011_v51 = vld [vmem:[%s10706_s28 + $0x430] sm:$0xff]  ;;  %v12014_v54 = vld [vmem:[%s10706_s28 + $0x438] sm:$0xff] }
 0x1b1   : > { %2010 = vmatpush.xpose.msra.mxu2 %v11236_v52  ;;  %8488 = vmatpush.xpose.msk.msra.mxu3 %vm423_vm0, %v15916_v3  ;;  %v10653_v52 = vmov 0   ;;  %v12059_v3 = vld [vmem:[%s10706_s28 + $0x300] sm:$0xff] }
 0x1b2   : > { %10636 = vset.pattern.permute.xlu0 %v10653_v52  ;;  %v12086_v52 = vld [vmem:[%s10706_s28 + $0x3f8] sm:$0xff] }
 0x1b4   : > { %1971 = vmatpush.xpose.msra.mxu0 %v11637_v63  ;;  %8472 = vmatpush.xpose.msk.msra.mxu1 %vm423_vm0, %v11640_v23  ;;  %v12023_v63 = vld [vmem:[%s10706_s28 + $0x320] sm:$0xff]  ;;  %v12026_v23 = vld [vmem:[%s10706_s28 + $0x328] sm:$0xff] }
 0x1b5   : > { %2011 = vmatpush.xpose.msra.mxu2 %v8445_v7  ;;  %8489 = vmatpush.xpose.msk.msra.mxu3 %vm423_vm0, %v8446_v8  ;;  %v12062_v7 = vld [vmem:[%s10706_s28 + $0x308] sm:$0xff]  ;;  %v12065_v8 = vld [vmem:[%s10706_s28 + $0x400] sm:$0xff] }
 0x1b8   : > { %1972 = vmatpush.xpose.msra.mxu0 %v11654_v0  ;;  %8473 = vmatpush.xpose.msk.msra.mxu1 %vm423_vm0, %v11657_v53  ;;  %v2045_v53 = vld [vmem:[%s15785_s4] sm:$0x3]  ;;  %v11817_v0 = vld [vmem:[%s10706_s28 + $0x3d0] sm:$0xff] }
 0x1b9   : > { %2012 = vmatpush.xpose.msra.mxu2 %v8443_v39  ;;  %8490 = vmatpush.xpose.msk.msra.mxu3 %vm423_vm0, %v8444_v40  ;;  %v12080_v39 = vld [vmem:[%s10706_s28 + $0x2f8] sm:$0xff]  ;;  %v12083_v40 = vld [vmem:[%s10706_s28 + $0x3f0] sm:$0xff] }
 0x1ba   : > { %2048 = vperm.xlu0 %10636, %v2045_v53   ;;  %v12095_v53 = vld [vmem:[%s10706_s28 + $0x2e0] sm:$0xff] }
 0x1bc   : > { %1973 = vmatpush.xpose.msra.mxu0 %v11389_v9  ;;  %8474 = vmatpush.xpose.msk.msra.mxu1 %vm423_vm0, %v11392_v10  ;;  %v11820_v9 = vld [vmem:[%s10706_s28 + $0x3d8] sm:$0xff]  ;;  %v11826_v10 = vld [vmem:[%s10706_s28 + $0x4d0] sm:$0xff] }
 0x1bd   : > { %2013 = vmatpush.xpose.msra.mxu2 %v11395_v11  ;;  %8491 = vmatpush.xpose.msk.msra.mxu3 %vm423_vm0, %v11398_v12  ;;  %v11829_v11 = vld [vmem:[%s10706_s28 + $0x4d8] sm:$0xff]  ;;  %v11841_v12 = vld [vmem:[%s10706_s28 + $0x3c0] sm:$0xff] }
 0x1c0   : > { %1974 = vmatpush.xpose.msra.mxu0 %v11407_v13  ;;  %8475 = vmatpush.xpose.msk.msra.mxu1 %vm423_vm0, %v11410_v14  ;;  %v11844_v13 = vld [vmem:[%s10706_s28 + $0x3c8] sm:$0xff]  ;;  %v11848_v14 = vld [vmem:[%s10706_s28 + $0x4c0] sm:$0xff] }
 0x1c1   : > { %2014 = vmatpush.xpose.msra.mxu2 %v11418_v16  ;;  %8492 = vmatpush.xpose.msk.msra.mxu3 %vm423_vm0, %v11421_v17  ;;  %v11851_v16 = vld [vmem:[%s10706_s28 + $0x4c8] sm:$0xff]  ;;  %v11861_v17 = vld [vmem:[%s10706_s28 + $0x3b0] sm:$0xff] }
 0x1c4   : > { %1975 = vmatpush.xpose.msra.mxu0 %v11431_v18  ;;  %8476 = vmatpush.xpose.msk.msra.mxu1 %vm423_vm0, %v11434_v19  ;;  %v11864_v18 = vld [vmem:[%s10706_s28 + $0x3b8] sm:$0xff]  ;;  %v11867_v19 = vld [vmem:[%s10706_s28 + $0x4b0] sm:$0xff] }
 0x1c5   : > { %2015 = vmatpush.xpose.msra.mxu2 %v11437_v20  ;;  %8493 = vmatpush.xpose.msk.msra.mxu3 %vm423_vm0, %v11440_v21  ;;  %v11870_v20 = vld [vmem:[%s10706_s28 + $0x4b8] sm:$0xff]  ;;  %v11879_v21 = vld [vmem:[%s10706_s28 + $0x3a0] sm:$0xff] }
 0x1c8   : > { %1976 = vmatpush.xpose.msra.mxu0 %v11449_v22  ;;  %8477 = vmatpush.xpose.msk.msra.mxu1 %vm423_vm0, %v11452_v25  ;;  %v11882_v22 = vld [vmem:[%s10706_s28 + $0x3a8] sm:$0xff]  ;;  %v11885_v25 = vld [vmem:[%s10706_s28 + $0x4a0] sm:$0xff] }
 0x1c9   : > { %2016 = vmatpush.xpose.msra.mxu2 %v11455_v26  ;;  %8494 = vmatpush.xpose.msk.msra.mxu3 %vm423_vm0, %v11458_v27  ;;  %v11888_v26 = vld [vmem:[%s10706_s28 + $0x4a8] sm:$0xff]  ;;  %v11897_v27 = vld [vmem:[%s10706_s28 + $0x390] sm:$0xff] }
 0x1cc   : > { %1977 = vmatpush.xpose.msra.mxu0 %v11467_v28  ;;  %8478 = vmatpush.xpose.msk.msra.mxu1 %vm423_vm0, %v11470_v29  ;;  %v11900_v28 = vld [vmem:[%s10706_s28 + $0x398] sm:$0xff]  ;;  %v11903_v29 = vld [vmem:[%s10706_s28 + $0x490] sm:$0xff] }
 0x1cd   : > { %2017 = vmatpush.xpose.msra.mxu2 %v11473_v30  ;;  %8495 = vmatpush.xpose.msk.msra.mxu3 %vm423_vm0, %v11476_v31  ;;  %v11906_v30 = vld [vmem:[%s10706_s28 + $0x498] sm:$0xff]  ;;  %v11915_v31 = vld [vmem:[%s10706_s28 + $0x380] sm:$0xff] }
 0x1ce   : > { %15918 = vst [vmem:[#allocation5_spill] sm:$0xff] %v11906_v30 }
 0x1cf   : > { %15919 = vst [vmem:[#allocation11_spill] sm:$0xff] %v11915_v31 }
 0x1d0   : > { %1978 = vmatpush.xpose.msra.mxu0 %v11485_v32  ;;  %8479 = vmatpush.xpose.msk.msra.mxu1 %vm423_vm0, %v11488_v33  ;;  %v11918_v32 = vld [vmem:[%s10706_s28 + $0x388] sm:$0xff]  ;;  %v11921_v33 = vld [vmem:[%s10706_s28 + $0x480] sm:$0xff] }
 0x1d1   : > { %2018 = vmatpush.xpose.msra.mxu2 %v11491_v34  ;;  %8496 = vmatpush.xpose.msk.msra.mxu3 %vm423_vm0, %v11494_v35  ;;  %v11924_v34 = vld [vmem:[%s10706_s28 + $0x488] sm:$0xff]  ;;  %v11933_v35 = vld [vmem:[%s10706_s28 + $0x370] sm:$0xff] }
 0x1d2   : > { %15920 = vst [vmem:[#allocation12_spill] sm:$0xff] %v11924_v34 }
 0x1d3   : > { %1979 = vmatmul.f32.vlgmr.msra.gmra.mxu0 %v1862_v47  ;;  %8480 = vmatmul.msk.f32.vlgmr.msra.gmra.mxu1 %vm423_vm0, %v1863_v24  ;;  %15921 = vst [vmem:[#allocation13_spill] sm:$0xff] %v11933_v35 }
 0x1d4   : > { %2287 = vmatpush.xpose.msrb.mxu0 %v11817_v0  ;;  %8626 = vmatpush.xpose.msk.msrb.mxu1 %vm423_vm0, %v11820_v9 }
 0x1d5   : > { %2327 = vmatpush.xpose.msrb.mxu2 %v11826_v10  ;;  %8643 = vmatpush.xpose.msk.msrb.mxu3 %vm423_vm0, %v11829_v11 }
 0x1d6   : > { %2019 = vmatmul.f32.vlgmr.msra.gmra.mxu2 %v1862_v47  ;;  %8497 = vmatmul.msk.f32.vlgmr.msra.gmra.mxu3 %vm423_vm0, %v1863_v24  ;;  %v12068_v47 = vld [vmem:[%s10706_s28 + $0x408] sm:$0xff]  ;;  %v12077_v24 = vld [vmem:[%s10706_s28 + $0x2f0] sm:$0xff] }
 0x1d7   : > { %15925 = vst [vmem:[#allocation17_spill] sm:$0xff] %v12068_v47 }
 0x1d8   : > { %2288 = vmatpush.xpose.msrb.mxu0 %v11841_v12  ;;  %8627 = vmatpush.xpose.msk.msrb.mxu1 %vm423_vm0, %v11844_v13 }
 0x1d9   : > { %2328 = vmatpush.xpose.msrb.mxu2 %v11848_v14  ;;  %8644 = vmatpush.xpose.msk.msrb.mxu3 %vm423_vm0, %v11851_v16 }
 0x1dc   : > { %2289 = vmatpush.xpose.msrb.mxu0 %v11861_v17  ;;  %8628 = vmatpush.xpose.msk.msrb.mxu1 %vm423_vm0, %v11864_v18 }
 0x1dd   : > { %2329 = vmatpush.xpose.msrb.mxu2 %v11867_v19  ;;  %8645 = vmatpush.xpose.msk.msrb.mxu3 %vm423_vm0, %v11870_v20 }
 0x1e0   : > { %2290 = vmatpush.xpose.msrb.mxu0 %v11879_v21  ;;  %8629 = vmatpush.xpose.msk.msrb.mxu1 %vm423_vm0, %v11882_v22 }
 0x1e1   : > { %2330 = vmatpush.xpose.msrb.mxu2 %v11885_v25  ;;  %8646 = vmatpush.xpose.msk.msrb.mxu3 %vm423_vm0, %v11888_v26 }
 0x1e4   : > { %2291 = vmatpush.xpose.msrb.mxu0 %v11897_v27  ;;  %8630 = vmatpush.xpose.msk.msrb.mxu1 %vm423_vm0, %v11900_v28 }
 0x1e5   : > { %2331 = vmatpush.xpose.msrb.mxu2 %v11903_v29  ;;  %8647 = vmatpush.xpose.msk.msrb.mxu3 %vm423_vm0, %v11906_v30 }
 0x1e8   : > { %2292 = vmatpush.xpose.msrb.mxu0 %v11915_v31  ;;  %8631 = vmatpush.xpose.msk.msrb.mxu1 %vm423_vm0, %v11918_v32 }
 0x1e9   : > { %2332 = vmatpush.xpose.msrb.mxu2 %v11921_v33  ;;  %8648 = vmatpush.xpose.msk.msrb.mxu3 %vm423_vm0, %v11924_v34 }
 0x1ec   : > { %2293 = vmatpush.xpose.msrb.mxu0 %v11933_v35  ;;  %8632 = vmatpush.xpose.msk.msrb.mxu1 %vm423_vm0, %v11936_v41 }
 0x1ed   : > { %2333 = vmatpush.xpose.msrb.mxu2 %v11939_v42  ;;  %8649 = vmatpush.xpose.msk.msrb.mxu3 %vm423_vm0, %v11942_v43 }
 0x1f0   : > { %2294 = vmatpush.xpose.msrb.mxu0 %v11951_v46  ;;  %8633 = vmatpush.xpose.msk.msrb.mxu1 %vm423_vm0, %v11954_v50 }
 0x1f1   : > { %2334 = vmatpush.xpose.msrb.mxu2 %v11957_v55  ;;  %8650 = vmatpush.xpose.msk.msrb.mxu3 %vm423_vm0, %v11960_v58 }
 0x1f4   : > { %2295 = vmatpush.xpose.msrb.mxu0 %v11969_v59  ;;  %8634 = vmatpush.xpose.msk.msrb.mxu1 %vm423_vm0, %v11972_v62 }
 0x1f5   : > { %2335 = vmatpush.xpose.msrb.mxu2 %v11975_v48  ;;  %8651 = vmatpush.xpose.msk.msrb.mxu3 %vm423_vm0, %v11978_v49 }
 0x1f8   : > { %2296 = vmatpush.xpose.msrb.mxu0 %v11987_v1  ;;  %8635 = vmatpush.xpose.msk.msrb.mxu1 %vm423_vm0, %v11990_v4 }
 0x1f9   : > { %2336 = vmatpush.xpose.msrb.mxu2 %v11993_v5  ;;  %8652 = vmatpush.xpose.msk.msrb.mxu3 %vm423_vm0, %v11996_v6 }
 0x1fc   : > { %2297 = vmatpush.xpose.msrb.mxu0 %v12005_v44  ;;  %8636 = vmatpush.xpose.msk.msrb.mxu1 %vm423_vm0, %v12008_v45 }
 0x1fd   : > { %2337 = vmatpush.xpose.msrb.mxu2 %v12011_v51  ;;  %8653 = vmatpush.xpose.msk.msrb.mxu3 %vm423_vm0, %v12014_v54 }
 0x200   : > { %2298 = vmatpush.xpose.msrb.mxu0 %v12023_v63  ;;  %8637 = vmatpush.xpose.msk.msrb.mxu1 %vm423_vm0, %v12026_v23 }
 0x201   : > { %2338 = vmatpush.xpose.msrb.mxu2 %v12029_v60  ;;  %8654 = vmatpush.xpose.msk.msrb.mxu3 %vm423_vm0, %v12032_v61 }
 0x204   : > { %2299 = vmatpush.xpose.msrb.mxu0 %v12041_v56  ;;  %8638 = vmatpush.xpose.msk.msrb.mxu1 %vm423_vm0, %v12044_v57 }
 0x205   : > { %2339 = vmatpush.xpose.msrb.mxu2 %v12047_v36  ;;  %8655 = vmatpush.xpose.msk.msrb.mxu3 %vm423_vm0, %v12050_v37 }
 0x208   : > { %2300 = vmatpush.xpose.msrb.mxu0 %v12059_v3  ;;  %8639 = vmatpush.xpose.msk.msrb.mxu1 %vm423_vm0, %v12062_v7 }
 0x209   : > { %2340 = vmatpush.xpose.msrb.mxu2 %v12065_v8  ;;  %8656 = vmatpush.xpose.msk.msrb.mxu3 %vm423_vm0, %v12068_v47 }
 0x20c   : > { %2301 = vmatpush.xpose.msrb.mxu0 %v12077_v24  ;;  %8640 = vmatpush.xpose.msk.msrb.mxu1 %vm423_vm0, %v12080_v39 }
 0x20d   : > { %2341 = vmatpush.xpose.msrb.mxu2 %v12083_v40  ;;  %8657 = vmatpush.xpose.msk.msrb.mxu3 %vm423_vm0, %v12086_v52 }
 0x210   : > { %2302 = vmatpush.xpose.msrb.mxu0 %v12095_v53  ;;  %8641 = vmatpush.xpose.msk.msrb.mxu1 %vm423_vm0, %v12098_v38 }
 0x211   : > { %2342 = vmatpush.xpose.msrb.mxu2 %v12101_v2  ;;  %8658 = vmatpush.xpose.msk.msrb.mxu3 %vm423_vm0, %v12104_v15 }
 0x214   : > { %2469 = vmatpush.xpose.msra.mxu0 %v11861_v17  ;;  %8660 = vmatpush.xpose.msk.msra.mxu1 %vm423_vm0, %v11864_v18 }
 0x215   : > { %2509 = vmatpush.xpose.msra.mxu2 %v11867_v19  ;;  %8677 = vmatpush.xpose.msk.msra.mxu3 %vm423_vm0, %v11870_v20 }
 0x218   : > { %2470 = vmatpush.xpose.msra.mxu0 %v11879_v21  ;;  %8661 = vmatpush.xpose.msk.msra.mxu1 %vm423_vm0, %v11882_v22 }
 0x219   : > { %2510 = vmatpush.xpose.msra.mxu2 %v11885_v25  ;;  %8678 = vmatpush.xpose.msk.msra.mxu3 %vm423_vm0, %v11888_v26 }
 0x21c   : > { %2471 = vmatpush.xpose.msra.mxu0 %v11897_v27  ;;  %8662 = vmatpush.xpose.msk.msra.mxu1 %vm423_vm0, %v11900_v28 }
 0x21d   : > { %2511 = vmatpush.xpose.msra.mxu2 %v11903_v29  ;;  %8679 = vmatpush.xpose.msk.msra.mxu3 %vm423_vm0, %v11906_v30 }
 0x220   : > { %2472 = vmatpush.xpose.msra.mxu0 %v11915_v31  ;;  %8663 = vmatpush.xpose.msk.msra.mxu1 %vm423_vm0, %v11918_v32 }
 0x221   : > { %2512 = vmatpush.xpose.msra.mxu2 %v11921_v33  ;;  %8680 = vmatpush.xpose.msk.msra.mxu3 %vm423_vm0, %v11924_v34  ;;  %v2186_v34 = vld.sshfl [vmem:[#allocation1] sm:$0xff pattern:$0x73625140] }
 0x222   : > { %2343 = vmatmul.f32.vlgmr.msrb.gmra.mxu2 %v2186_v34  ;;  %2303 = vmatmul.f32.vlgmr.msrb.gmra.mxu0 %v2186_v34 }
 0x224   : > { %2473 = vmatpush.xpose.msra.mxu0 %v11933_v35  ;;  %8664 = vmatpush.xpose.msk.msra.mxu1 %vm423_vm0, %v11936_v41  ;;  %v2187_v35 = vld.sshfl [vmem:[#allocation1 + $0x8] sm:$0xff pattern:$0x73625140] }
 0x225   : > { %2513 = vmatpush.xpose.msra.mxu2 %v11939_v42  ;;  %8681 = vmatpush.xpose.msk.msra.mxu3 %vm423_vm0, %v11942_v43  ;;  %v15926_v43 = vld [vmem:[#allocation9_spill] sm:$0xff] }
 0x226   : > { %2367 = vst [vmem:[#allocation1] ss:$4 sm:$0xff] %v15926_v43  ;;  %8659 = vmatmul.msk.f32.vlgmr.msrb.gmra.mxu3 %vm423_vm0, %v2187_v35  ;;  %8642 = vmatmul.msk.f32.vlgmr.msrb.gmra.mxu1 %vm423_vm0, %v2187_v35  ;;  %v15927_v35 = vld [vmem:[#allocation3_spill] sm:$0xff] }
 0x228   : > { %2474 = vmatpush.xpose.msra.mxu0 %v11951_v46  ;;  %8665 = vmatpush.xpose.msk.msra.mxu1 %vm423_vm0, %v11954_v50 }
 0x229   : > { %2514 = vmatpush.xpose.msra.mxu2 %v11957_v55  ;;  %8682 = vmatpush.xpose.msk.msra.mxu3 %vm423_vm0, %v11960_v58 }
 0x22c   : > { %2475 = vmatpush.xpose.msra.mxu0 %v11969_v59  ;;  %8666 = vmatpush.xpose.msk.msra.mxu1 %vm423_vm0, %v11972_v62 }
 0x22d   : > { %2515 = vmatpush.xpose.msra.mxu2 %v11975_v48  ;;  %8683 = vmatpush.xpose.msk.msra.mxu3 %vm423_vm0, %v11978_v49  ;;  %v2368_v34 = vld.sshfl [vmem:[#allocation1] sm:$0xff pattern:$0x73625140]  ;;  %v2369_v43 = vld.sshfl [vmem:[#allocation1 + $0x8] sm:$0xff pattern:$0x73625140] }
 0x22e   : > { %2614 = vst [vmem:[#allocation1] ss:$4 sm:$0xff] %v15927_v35  ;;  %v8501_v35 = vld [vmem:[%s10706_s28 + $0x2d8] sm:$0xff] }
 0x230   : > { %2476 = vmatpush.xpose.msra.mxu0 %v11987_v1  ;;  %8667 = vmatpush.xpose.msk.msra.mxu1 %vm423_vm0, %v11990_v4 }
 0x231   : > { %2516 = vmatpush.xpose.msra.mxu2 %v11993_v5  ;;  %8684 = vmatpush.xpose.msk.msra.mxu3 %vm423_vm0, %v11996_v6 }
 0x234   : > { %2477 = vmatpush.xpose.msra.mxu0 %v12005_v44  ;;  %8668 = vmatpush.xpose.msk.msra.mxu1 %vm423_vm0, %v12008_v45 }
 0x235   : > { %2517 = vmatpush.xpose.msra.mxu2 %v12011_v51  ;;  %8685 = vmatpush.xpose.msk.msra.mxu3 %vm423_vm0, %v12014_v54 }
 0x238   : > { %2478 = vmatpush.xpose.msra.mxu0 %v12023_v63  ;;  %8669 = vmatpush.xpose.msk.msra.mxu1 %vm423_vm0, %v12026_v23 }
 0x239   : > { %2518 = vmatpush.xpose.msra.mxu2 %v12029_v60  ;;  %8686 = vmatpush.xpose.msk.msra.mxu3 %vm423_vm0, %v12032_v61 }
 0x23c   : > { %2479 = vmatpush.xpose.msra.mxu0 %v12041_v56  ;;  %8670 = vmatpush.xpose.msk.msra.mxu1 %vm423_vm0, %v12044_v57 }
 0x23d   : > { %2519 = vmatpush.xpose.msra.mxu2 %v12047_v36  ;;  %8687 = vmatpush.xpose.msk.msra.mxu3 %vm423_vm0, %v12050_v37 }
 0x240   : > { %2480 = vmatpush.xpose.msra.mxu0 %v12059_v3  ;;  %8671 = vmatpush.xpose.msk.msra.mxu1 %vm423_vm0, %v12062_v7 }
 0x241   : > { %2520 = vmatpush.xpose.msra.mxu2 %v12065_v8  ;;  %8688 = vmatpush.xpose.msk.msra.mxu3 %vm423_vm0, %v12068_v47  ;;  %v12213_v47 = vld [vmem:[%s10706_s28 + $0x4f8] sm:$0xff] }
 0x244   : > { %2481 = vmatpush.xpose.msra.mxu0 %v12077_v24  ;;  %8672 = vmatpush.xpose.msk.msra.mxu1 %vm423_vm0, %v12080_v39  ;;  %v8500_v24 = vld [vmem:[%s10706_s28 + $0x2d0] sm:$0xff]  ;;  %v8498_v39 = vld [vmem:[%s10706_s28 + $0x2c0] sm:$0xff] }
 0x245   : > { %2521 = vmatpush.xpose.msra.mxu2 %v12083_v40  ;;  %8689 = vmatpush.xpose.msk.msra.mxu3 %vm423_vm0, %v12086_v52 }
 0x248   : > { %2482 = vmatpush.xpose.msra.mxu0 %v12095_v53  ;;  %8673 = vmatpush.xpose.msk.msra.mxu1 %vm423_vm0, %v12098_v38  ;;  %v8499_v53 = vld [vmem:[%s10706_s28 + $0x2c8] sm:$0xff]  ;;  %v12210_v38 = vld [vmem:[%s10706_s28 + $0x4f0] sm:$0xff] }
 0x249   : > { %2522 = vmatpush.xpose.msra.mxu2 %v12101_v2  ;;  %8690 = vmatpush.xpose.msk.msra.mxu3 %vm423_vm0, %v12104_v15 }
 0x24c   : > { %2483 = vmatpush.xpose.msra.mxu0 %v8500_v24  ;;  %8674 = vmatpush.xpose.msk.msra.mxu1 %vm423_vm0, %v8501_v35  ;;  %v12226_v35 = vld [vmem:[%s10706_s28 + $0x4e0] sm:$0xff]  ;;  %v12229_v24 = vld [vmem:[%s10706_s28 + $0x4e8] sm:$0xff] }
 0x24d   : > { %2523 = vmatpush.xpose.msra.mxu2 %v11817_v0  ;;  %8691 = vmatpush.xpose.msk.msra.mxu3 %vm423_vm0, %v11820_v9 }
 0x250   : > { %2484 = vmatpush.xpose.msra.mxu0 %v8498_v39  ;;  %8675 = vmatpush.xpose.msk.msra.mxu1 %vm423_vm0, %v8499_v53  ;;  %v2615_v39 = vld.sshfl [vmem:[#allocation1] sm:$0xff pattern:$0x73625140]  ;;  %v2616_v53 = vld.sshfl [vmem:[#allocation1 + $0x8] sm:$0xff pattern:$0x73625140] }
 0x251   : > { %2524 = vmatpush.xpose.msra.mxu2 %v11841_v12  ;;  %8692 = vmatpush.xpose.msk.msra.mxu3 %vm423_vm0, %v11844_v13 }
 0x253   : > { %2485 = vmatmul.f32.vlgmr.msra.gmra.mxu0 %v2368_v34  ;;  %8676 = vmatmul.msk.f32.vlgmr.msra.gmra.mxu1 %vm423_vm0, %v2369_v43 }
 0x254   : > { %2716 = vmatpush.xpose.msrb.mxu0 %v12083_v40  ;;  %8758 = vmatpush.xpose.msk.msrb.mxu1 %vm423_vm0, %v12086_v52 }
 0x255   : > { %2756 = vmatpush.xpose.msrb.mxu2 %v12210_v38  ;;  %8775 = vmatpush.xpose.msk.msrb.mxu3 %vm423_vm0, %v12213_v47 }
 0x256   : > { %2525 = vmatmul.f32.vlgmr.msra.gmra.mxu2 %v2368_v34  ;;  %8693 = vmatmul.msk.f32.vlgmr.msra.gmra.mxu3 %vm423_vm0, %v2369_v43  ;;  %v15928_v43 = vld [vmem:[#allocation12_spill] sm:$0xff]  ;;  %v15929_v34 = vld [vmem:[#allocation13_spill] sm:$0xff] }
 0x258   : > { %2717 = vmatpush.xpose.msrb.mxu0 %v12101_v2  ;;  %8759 = vmatpush.xpose.msk.msrb.mxu1 %vm423_vm0, %v12104_v15 }
 0x259   : > { %2757 = vmatpush.xpose.msrb.mxu2 %v12226_v35  ;;  %8776 = vmatpush.xpose.msk.msrb.mxu3 %vm423_vm0, %v12229_v24 }
 0x25c   : > { %2718 = vmatpush.xpose.msrb.mxu0 %v11817_v0  ;;  %8760 = vmatpush.xpose.msk.msrb.mxu1 %vm423_vm0, %v11820_v9 }
 0x25d   : > { %2758 = vmatpush.xpose.msrb.mxu2 %v11826_v10  ;;  %8777 = vmatpush.xpose.msk.msrb.mxu3 %vm423_vm0, %v11829_v11 }
 0x260   : > { %2719 = vmatpush.xpose.msrb.mxu0 %v11841_v12  ;;  %8761 = vmatpush.xpose.msk.msrb.mxu1 %vm423_vm0, %v11844_v13 }
 0x261   : > { %2759 = vmatpush.xpose.msrb.mxu2 %v11848_v14  ;;  %8778 = vmatpush.xpose.msk.msrb.mxu3 %vm423_vm0, %v11851_v16 }
 0x264   : > { %2720 = vmatpush.xpose.msrb.mxu0 %v11861_v17  ;;  %8762 = vmatpush.xpose.msk.msrb.mxu1 %vm423_vm0, %v11864_v18 }
 0x265   : > { %2760 = vmatpush.xpose.msrb.mxu2 %v11867_v19  ;;  %8779 = vmatpush.xpose.msk.msrb.mxu3 %vm423_vm0, %v11870_v20 }
 0x268   : > { %2721 = vmatpush.xpose.msrb.mxu0 %v11879_v21  ;;  %8763 = vmatpush.xpose.msk.msrb.mxu1 %vm423_vm0, %v11882_v22 }
 0x269   : > { %2761 = vmatpush.xpose.msrb.mxu2 %v11885_v25  ;;  %8780 = vmatpush.xpose.msk.msrb.mxu3 %vm423_vm0, %v11888_v26 }
 0x26c   : > { %2722 = vmatpush.xpose.msrb.mxu0 %v11897_v27  ;;  %8764 = vmatpush.xpose.msk.msrb.mxu1 %vm423_vm0, %v11900_v28 }
 0x26d   : > { %2762 = vmatpush.xpose.msrb.mxu2 %v11903_v29  ;;  %8781 = vmatpush.xpose.msk.msrb.mxu3 %vm423_vm0, %v11906_v30  ;;  %v15930_v30 = vld [vmem:[#allocation16_spill] sm:$0xff] }
 0x270   : > { %2723 = vmatpush.xpose.msrb.mxu0 %v11915_v31  ;;  %8765 = vmatpush.xpose.msk.msrb.mxu1 %vm423_vm0, %v11918_v32  ;;  %v15931_v31 = vld [vmem:[#allocation6_spill] sm:$0xff] }
 0x271   : > { %2763 = vmatpush.xpose.msrb.mxu2 %v11921_v33  ;;  %8782 = vmatpush.xpose.msk.msrb.mxu3 %vm423_vm0, %v15928_v43  ;;  %2863 = vst [vmem:[#allocation1] ss:$4 sm:$0xff] %v15931_v31  ;;  %v12284_v43 = vpop.f32.mrf.mxu0 }
 0x272   : > { %15932 = vst [vmem:[#allocation16_spill] sm:$0xff] %v12284_v43 }
 0x274   : > { %2724 = vmatpush.xpose.msrb.mxu0 %v15929_v34  ;;  %8766 = vmatpush.xpose.msk.msrb.mxu1 %vm423_vm0, %v11936_v41  ;;  %v12286_v34 = vpop.f32.mrf.mxu1  ;;  %v12293_v41 = vpop.f32.mrf.mxu3 }
 0x275   : > { %2764 = vmatpush.xpose.msrb.mxu2 %v11939_v42  ;;  %8783 = vmatpush.xpose.msk.msrb.mxu3 %vm423_vm0, %v15930_v30  ;;  %15933 = vst [vmem:[#allocation18_spill] sm:$0xff] %v12286_v34  ;;  %v12291_v42 = vpop.f32.mrf.mxu2 }
 0x276   : > { %15934 = vst [vmem:[#allocation19_spill] sm:$0xff] %v12291_v42 }
 0x277   : > { %15935 = vst [vmem:[#allocation20_spill] sm:$0xff] %v12293_v41 }
 0x278   : > { %2725 = vmatpush.xpose.msrb.mxu0 %v11951_v46  ;;  %8767 = vmatpush.xpose.msk.msrb.mxu1 %vm423_vm0, %v11954_v50 }
 0x279   : > { %2765 = vmatpush.xpose.msrb.mxu2 %v11957_v55  ;;  %8784 = vmatpush.xpose.msk.msrb.mxu3 %vm423_vm0, %v11960_v58  ;;  %v12307_v41 = vpop.f32.mrf.mxu0 }
 0x27a   : > { %15936 = vst [vmem:[#allocation21_spill] sm:$0xff] %v12307_v41 }
 0x27c   : > { %2726 = vmatpush.xpose.msrb.mxu0 %v11969_v59  ;;  %8768 = vmatpush.xpose.msk.msrb.mxu1 %vm423_vm0, %v11972_v62  ;;  %v12309_v42 = vpop.f32.mrf.mxu1  ;;  %v12316_v43 = vpop.f32.mrf.mxu3 }
 0x27d   : > { %2766 = vmatpush.xpose.msrb.mxu2 %v11975_v48  ;;  %8785 = vmatpush.xpose.msk.msrb.mxu3 %vm423_vm0, %v11978_v49  ;;  %15937 = vst [vmem:[#allocation22_spill] sm:$0xff] %v12309_v42  ;;  %v12314_v34 = vpop.f32.mrf.mxu2 }
 0x27e   : > { %15938 = vst [vmem:[#allocation23_spill] sm:$0xff] %v12314_v34 }
 0x27f   : > { %15939 = vst [vmem:[#allocation24_spill] sm:$0xff] %v12316_v43 }
 0x280   : > { %2727 = vmatpush.xpose.msrb.mxu0 %v11987_v1  ;;  %8769 = vmatpush.xpose.msk.msrb.mxu1 %vm423_vm0, %v11990_v4 }
 0x281   : > { %2767 = vmatpush.xpose.msrb.mxu2 %v11993_v5  ;;  %8786 = vmatpush.xpose.msk.msrb.mxu3 %vm423_vm0, %v11996_v6  ;;  %v12327_v34 = vpop.f32.mrf.mxu0 }
 0x282   : > { %15940 = vst [vmem:[#allocation25_spill] sm:$0xff] %v12327_v34 }
 0x284   : > { %2728 = vmatpush.xpose.msrb.mxu0 %v12005_v44  ;;  %8770 = vmatpush.xpose.msk.msrb.mxu1 %vm423_vm0, %v12008_v45  ;;  %v12329_v43 = vpop.f32.mrf.mxu1  ;;  %v12336_v41 = vpop.f32.mrf.mxu3 }
 0x285   : > { %2768 = vmatpush.xpose.msrb.mxu2 %v12011_v51  ;;  %8787 = vmatpush.xpose.msk.msrb.mxu3 %vm423_vm0, %v12014_v54  ;;  %15941 = vst [vmem:[#allocation26_spill] sm:$0xff] %v12329_v43  ;;  %v12334_v42 = vpop.f32.mrf.mxu2  ;;  %v12348_v43 = vld [vmem:[%s10706_s28 + $0x518] sm:$0xff] }
 0x286   : > { %15942 = vst [vmem:[#allocation27_spill] sm:$0xff] %v12334_v42  ;;  %v12368_v42 = vld [vmem:[%s10706_s28 + $0x508] sm:$0xff] }
 0x287   : > { %15943 = vst [vmem:[#allocation28_spill] sm:$0xff] %v12336_v41 }
 0x288   : > { %2729 = vmatpush.xpose.msrb.mxu0 %v12023_v63  ;;  %8771 = vmatpush.xpose.msk.msrb.mxu1 %vm423_vm0, %v12026_v23 }
 0x289   : > { %2769 = vmatpush.xpose.msrb.mxu2 %v12029_v60  ;;  %8788 = vmatpush.xpose.msk.msrb.mxu3 %vm423_vm0, %v12032_v61  ;;  %v12356_v41 = vpop.f32.mrf.mxu0 }
 0x28c   : > { %2730 = vmatpush.xpose.msrb.mxu0 %v12041_v56  ;;  %8772 = vmatpush.xpose.msk.msrb.mxu1 %vm423_vm0, %v12044_v57  ;;  %v12345_v56 = vld [vmem:[%s10706_s28 + $0x510] sm:$0xff]  ;;  %v15944_v57 = vld [vmem:[#allocation17_spill] sm:$0xff]  ;;  %v12372_v31 = vpop.f32.mrf.mxu3 }
 0x28d   : > { %2770 = vmatpush.xpose.msrb.mxu2 %v12047_v36  ;;  %8789 = vmatpush.xpose.msk.msrb.mxu3 %vm423_vm0, %v12050_v37  ;;  %15945 = vst [vmem:[#allocation17_spill] sm:$0xff] %v12356_v41  ;;  %v12370_v34 = vpop.f32.mrf.mxu2 }
 0x28e   : > { %15948 = vst [vmem:[#allocation31_spill] sm:$0xff] %v12370_v34 }
 0x28f   : > { %15949 = vst [vmem:[#allocation32_spill] sm:$0xff] %v12372_v31 }
 0x290   : > { %2731 = vmatpush.xpose.msrb.mxu0 %v12059_v3  ;;  %8773 = vmatpush.xpose.msk.msrb.mxu1 %vm423_vm0, %v12062_v7  ;;  %v12358_v3 = vpop.f32.mrf.mxu1  ;;  %v12365_v7 = vld [vmem:[%s10706_s28 + $0x500] sm:$0xff] }
 0x291   : > { %2771 = vmatpush.xpose.msrb.mxu2 %v12065_v8  ;;  %8790 = vmatpush.xpose.msk.msrb.mxu3 %vm423_vm0, %v15944_v57  ;;  %15946 = vst [vmem:[#allocation29_spill] sm:$0xff] %v12358_v3  ;;  %v12384_v34 = vpop.f32.mrf.mxu0 }
 0x292   : > { %15947 = vst [vmem:[#allocation30_spill] sm:$0xff] %v12365_v7 }
 0x293   : > { %2732 = vmatmul.f32.vlgmr.msrb.gmra.mxu0 %v2615_v39  ;;  %8774 = vmatmul.msk.f32.vlgmr.msrb.gmra.mxu1 %vm423_vm0, %v2616_v53  ;;  %15950 = vst [vmem:[#allocation33_spill] sm:$0xff] %v12384_v34 }
 0x294   : > { %2965 = vmatpush.xpose.msra.mxu0 %v12047_v36  ;;  %8856 = vmatpush.xpose.msk.msra.mxu1 %vm423_vm0, %v12050_v37  ;;  %v12393_v31 = vpop.f32.mrf.mxu3 }
 0x295   : > { %3005 = vmatpush.xpose.msra.mxu2 %v12345_v56  ;;  %8873 = vmatpush.xpose.msk.msra.mxu3 %vm423_vm0, %v12348_v43  ;;  %15953 = vst [vmem:[#allocation36_spill] sm:$0xff] %v12393_v31 }
 0x296   : > { %2772 = vmatmul.f32.vlgmr.msrb.gmra.mxu2 %v2615_v39  ;;  %8791 = vmatmul.msk.f32.vlgmr.msrb.gmra.mxu3 %vm423_vm0, %v2616_v53  ;;  %v12391_v53 = vpop.f32.mrf.mxu2 }
 0x297   : > { %15952 = vst [vmem:[#allocation35_spill] sm:$0xff] %v12391_v53 }
 0x298   : > { %2966 = vmatpush.xpose.msra.mxu0 %v12065_v8  ;;  %8857 = vmatpush.xpose.msk.msra.mxu1 %vm423_vm0, %v15944_v57  ;;  %v12386_v39 = vpop.f32.mrf.mxu1 }
 0x299   : > { %3006 = vmatpush.xpose.msra.mxu2 %v12365_v7  ;;  %8874 = vmatpush.xpose.msk.msra.mxu3 %vm423_vm0, %v12368_v42  ;;  %15951 = vst [vmem:[#allocation34_spill] sm:$0xff] %v12386_v39  ;;  %v12404_v39 = vpop.f32.mrf.mxu0 }
 0x29a   : > { %15954 = vst [vmem:[#allocation37_spill] sm:$0xff] %v12404_v39  ;;  %v12748_v39 = vld [vmem:[%s10706_s28 + $0x430] sm:$0xff] }
 0x29c   : > { %2967 = vmatpush.xpose.msra.mxu0 %v12083_v40  ;;  %8858 = vmatpush.xpose.msk.msra.mxu1 %vm423_vm0, %v12086_v52  ;;  %v12413_v34 = vpop.f32.mrf.mxu3 }
 0x29d   : > { %3007 = vmatpush.xpose.msra.mxu2 %v12210_v38  ;;  %8875 = vmatpush.xpose.msk.msra.mxu3 %vm423_vm0, %v12213_v47  ;;  %15957 = vst [vmem:[#allocation40_spill] sm:$0xff] %v12413_v34  ;;  %v12708_v34 = vld [vmem:[%s10706_s28 + $0x440] sm:$0xff] }
 0x29e   : > { %v12411_v31 = vpop.f32.mrf.mxu2 }
 0x29f   : > { %15956 = vst [vmem:[#allocation39_spill] sm:$0xff] %v12411_v31  ;;  %v12711_v31 = vld [vmem:[%s10706_s28 + $0x448] sm:$0xff] }
 0x2a0   : > { %2968 = vmatpush.xpose.msra.mxu0 %v12101_v2  ;;  %8859 = vmatpush.xpose.msk.msra.mxu1 %vm423_vm0, %v12104_v15  ;;  %v12406_v53 = vpop.f32.mrf.mxu1 }
 0x2a1   : > { %3008 = vmatpush.xpose.msra.mxu2 %v12226_v35  ;;  %8876 = vmatpush.xpose.msk.msra.mxu3 %vm423_vm0, %v12229_v24  ;;  %15955 = vst [vmem:[#allocation38_spill] sm:$0xff] %v12406_v53 }
 0x2a4   : > { %2969 = vmatpush.xpose.msra.mxu0 %v11817_v0  ;;  %8860 = vmatpush.xpose.msk.msra.mxu1 %vm423_vm0, %v11820_v9  ;;  %v12424_v0 = vpop.f32.mrf.mxu0 }
 0x2a5   : > { %3009 = vmatpush.xpose.msra.mxu2 %v11826_v10  ;;  %8877 = vmatpush.xpose.msk.msra.mxu3 %vm423_vm0, %v11829_v11  ;;  %15958 = vst [vmem:[#allocation41_spill] sm:$0xff] %v12424_v0  ;;  %v12433_v11 = vpop.f32.mrf.mxu3 }
 0x2a6   : > { %v12431_v10 = vpop.f32.mrf.mxu2  ;;  %15961 = vst [vmem:[#allocation44_spill] sm:$0xff] %v12433_v11  ;;  %v8890_v11 = vld [vmem:[%s10706_s28 + $0x340] sm:$0xff] }
 0x2a7   : > { %15960 = vst [vmem:[#allocation43_spill] sm:$0xff] %v12431_v10  ;;  %v8891_v10 = vld [vmem:[%s10706_s28 + $0x348] sm:$0xff] }
 0x2a8   : > { %2970 = vmatpush.xpose.msra.mxu0 %v11841_v12  ;;  %8861 = vmatpush.xpose.msk.msra.mxu1 %vm423_vm0, %v11844_v13  ;;  %v12426_v9 = vpop.f32.mrf.mxu1  ;;  %v2864_v12 = vld.sshfl [vmem:[#allocation1] sm:$0xff pattern:$0x73625140]  ;;  %v2865_v13 = vld.sshfl [vmem:[#allocation1 + $0x8] sm:$0xff pattern:$0x73625140] }
 0x2a9   : > { %3010 = vmatpush.xpose.msra.mxu2 %v11848_v14  ;;  %8878 = vmatpush.xpose.msk.msra.mxu3 %vm423_vm0, %v11851_v16  ;;  %15959 = vst [vmem:[#allocation42_spill] sm:$0xff] %v12426_v9  ;;  %v15962_v14 = vld [vmem:[#allocation5_spill] sm:$0xff]  ;;  %v12715_v9 = vld [vmem:[%s10706_s28 + $0x550] sm:$0xff] }
 0x2ac   : > { %2971 = vmatpush.xpose.msra.mxu0 %v11861_v17  ;;  %8862 = vmatpush.xpose.msk.msra.mxu1 %vm423_vm0, %v11864_v18  ;;  %v2304_v16 = vpop.f32.mrf.mxu0  ;;  %v15963_v17 = vld [vmem:[#allocation4_spill] sm:$0xff] }
 0x2ad   : > { %3011 = vmatpush.xpose.msra.mxu2 %v11867_v19  ;;  %8879 = vmatpush.xpose.msk.msra.mxu3 %vm423_vm0, %v11870_v20  ;;  %3112 = vst [vmem:[#allocation1] ss:$4 sm:$0xff] %v15963_v17  ;;  %v12781_v17 = vld [vmem:[%s10706_s28 + $0x418] sm:$0xff] }
 0x2ae   : > { %v2344_v20 = vpop.f32.mrf.mxu2 }
 0x2b0   : > { %2972 = vmatpush.xpose.msra.mxu0 %v11879_v21  ;;  %8863 = vmatpush.xpose.msk.msra.mxu1 %vm423_vm0, %v11882_v22  ;;  %v2324_v18 = vpop.f32.mrf.mxu1  ;;  %v2364_v21 = vpop.f32.mrf.mxu3  ;;  %v15964_v22 = vld [vmem:[#allocation11_spill] sm:$0xff] }
 0x2b1   : > { %3012 = vmatpush.xpose.msra.mxu2 %v11885_v25  ;;  %8880 = vmatpush.xpose.msk.msra.mxu3 %vm423_vm0, %v11888_v26  ;;  %v2325_v19 = vadd.f32 %v2324_v18, %v2304_v16  ;;  %v2365_v25 = vadd.f32 %v2364_v21, %v2344_v20  ;;  %v15965_v26 = vld [vmem:[#allocation12_spill] sm:$0xff]  ;;  %v12631_v16 = vld [vmem:[%s10706_s28 + $0x498] sm:$0xff]  ;;  %v12640_v18 = vld [vmem:[%s10706_s28 + $0x380] sm:$0xff] }
 0x2b2   : > { %v12646_v20 = vld [vmem:[%s10706_s28 + $0x480] sm:$0xff]  ;;  %v12649_v21 = vld [vmem:[%s10706_s28 + $0x488] sm:$0xff] }
 0x2b4   : > { %2973 = vmatpush.xpose.msra.mxu0 %v11897_v27  ;;  %8864 = vmatpush.xpose.msk.msra.mxu1 %vm423_vm0, %v11900_v28  ;;  %v15966_v27 = vld [vmem:[#allocation13_spill] sm:$0xff]  ;;  %v15967_v28 = vld [vmem:[#allocation14_spill] sm:$0xff] }
 0x2b5   : > { %3013 = vmatpush.xpose.msra.mxu2 %v11903_v29  ;;  %8881 = vmatpush.xpose.msk.msra.mxu3 %vm423_vm0, %v15962_v14  ;;  %v15968_v29 = vld [vmem:[#allocation15_spill] sm:$0xff]  ;;  %v12628_v14 = vld [vmem:[%s10706_s28 + $0x490] sm:$0xff] }
 0x2b8   : > { %2974 = vmatpush.xpose.msra.mxu0 %v15964_v22  ;;  %8865 = vmatpush.xpose.msk.msra.mxu1 %vm423_vm0, %v11918_v32  ;;  %v12491_v32 = vld [vmem:[%s10706_s28 + $0x538] sm:$0xff]  ;;  %v12658_v22 = vld [vmem:[%s10706_s28 + $0x370] sm:$0xff] }
 0x2b9   : > { %3014 = vmatpush.xpose.msra.mxu2 %v11921_v33  ;;  %8882 = vmatpush.xpose.msk.msra.mxu3 %vm423_vm0, %v15965_v26  ;;  %v12504_v33 = vld [vmem:[%s10706_s28 + $0x520] sm:$0xff]  ;;  %v12664_v26 = vld [vmem:[%s10706_s28 + $0x470] sm:$0xff] }
 0x2bc   : > { %2975 = vmatpush.xpose.msra.mxu0 %v15966_v27  ;;  %8866 = vmatpush.xpose.msk.msra.mxu1 %vm423_vm0, %v15967_v28  ;;  %v12667_v27 = vld [vmem:[%s10706_s28 + $0x478] sm:$0xff]  ;;  %v12676_v28 = vld [vmem:[%s10706_s28 + $0x360] sm:$0xff] }
 0x2bd   : > { %3015 = vmatpush.xpose.msra.mxu2 %v15968_v29  ;;  %8883 = vmatpush.xpose.msk.msra.mxu3 %vm423_vm0, %v15930_v30  ;;  %v12488_v30 = vld [vmem:[%s10706_s28 + $0x530] sm:$0xff]  ;;  %v12679_v29 = vld [vmem:[%s10706_s28 + $0x368] sm:$0xff] }
 0x2c0   : > { %2976 = vmatpush.xpose.msra.mxu0 %v11951_v46  ;;  %8867 = vmatpush.xpose.msk.msra.mxu1 %vm423_vm0, %v11954_v50  ;;  %v12507_v46 = vld [vmem:[%s10706_s28 + $0x528] sm:$0xff] }
 0x2c1   : > { %3016 = vmatpush.xpose.msra.mxu2 %v11957_v55  ;;  %8884 = vmatpush.xpose.msk.msra.mxu3 %vm423_vm0, %v11960_v58 }
 0x2c4   : > { %2977 = vmatpush.xpose.msra.mxu0 %v11969_v59  ;;  %8868 = vmatpush.xpose.msk.msra.mxu1 %vm423_vm0, %v11972_v62 }
 0x2c5   : > { %3017 = vmatpush.xpose.msra.mxu2 %v11975_v48  ;;  %8885 = vmatpush.xpose.msk.msra.mxu3 %vm423_vm0, %v11978_v49 }
 0x2c8   : > { %2978 = vmatpush.xpose.msra.mxu0 %v11987_v1  ;;  %8869 = vmatpush.xpose.msk.msra.mxu1 %vm423_vm0, %v11990_v4  ;;  %v12545_v4 = vld [vmem:[%s10706_s28 + $0x3d0] sm:$0xff] }
 0x2c9   : > { %3018 = vmatpush.xpose.msra.mxu2 %v11993_v5  ;;  %8886 = vmatpush.xpose.msk.msra.mxu3 %vm423_vm0, %v11996_v6  ;;  %v12548_v5 = vld [vmem:[%s10706_s28 + $0x3d8] sm:$0xff]  ;;  %v12551_v6 = vld [vmem:[%s10706_s28 + $0x4d0] sm:$0xff] }
 0x2cc   : > { %2979 = vmatpush.xpose.msra.mxu0 %v12005_v44  ;;  %8870 = vmatpush.xpose.msk.msra.mxu1 %vm423_vm0, %v12008_v45  ;;  %v12554_v44 = vld [vmem:[%s10706_s28 + $0x4d8] sm:$0xff]  ;;  %v12569_v45 = vld [vmem:[%s10706_s28 + $0x4c0] sm:$0xff] }
 0x2cd   : > { %3019 = vmatpush.xpose.msra.mxu2 %v12011_v51  ;;  %8887 = vmatpush.xpose.msk.msra.mxu3 %vm423_vm0, %v12014_v54 }
 0x2d0   : > { %2980 = vmatpush.xpose.msra.mxu0 %v12023_v63  ;;  %8871 = vmatpush.xpose.msk.msra.mxu1 %vm423_vm0, %v12026_v23  ;;  %v2486_v50 = vpop.f32.mrf.mxu0  ;;  %v2506_v55 = vpop.f32.mrf.mxu1  ;;  %v12584_v63 = vld [vmem:[%s10706_s28 + $0x3b8] sm:$0xff]  ;;  %v12587_v23 = vld [vmem:[%s10706_s28 + $0x4b0] sm:$0xff] }
 0x2d1   : > { %3020 = vmatpush.xpose.msra.mxu2 %v12029_v60  ;;  %8888 = vmatpush.xpose.msk.msra.mxu3 %vm423_vm0, %v12032_v61  ;;  %v2487_v58 = vadd.f32 %v2486_v50, %v2325_v19  ;;  %v12643_v19 = vld [vmem:[%s10706_s28 + $0x388] sm:$0xff]  ;;  %v12682_v50 = vld [vmem:[%s10706_s28 + $0x460] sm:$0xff] }
 0x2d3   : > { %2981 = vmatmul.f32.vlgmr.msra.gmra.mxu0 %v2864_v12  ;;  %8872 = vmatmul.msk.f32.vlgmr.msra.gmra.mxu1 %vm423_vm0, %v2865_v13  ;;  %v12516_v59 = vadd.f32 %v2506_v55, %v2487_v58  ;;  %v12685_v55 = vld [vmem:[%s10706_s28 + $0x468] sm:$0xff]  ;;  %v8892_v58 = vld [vmem:[%s10706_s28 + $0x350] sm:$0xff] }
 0x2d4   : > { %3214 = vmatpush.xpose.msrb.mxu0 %v12011_v51  ;;  %8954 = vmatpush.xpose.msk.msrb.mxu1 %vm423_vm0, %v12014_v54  ;;  %v12572_v51 = vld [vmem:[%s10706_s28 + $0x4c8] sm:$0xff]  ;;  %v12581_v54 = vld [vmem:[%s10706_s28 + $0x3b0] sm:$0xff] }
 0x2d5   : > { %3254 = vmatpush.xpose.msrb.mxu2 %v12488_v30  ;;  %8971 = vmatpush.xpose.msk.msrb.mxu3 %vm423_vm0, %v12491_v32 }
 0x2d6   : > { %3021 = vmatmul.f32.vlgmr.msra.gmra.mxu2 %v2864_v12  ;;  %8889 = vmatmul.msk.f32.vlgmr.msra.gmra.mxu3 %vm423_vm0, %v2865_v13  ;;  %v12622_v12 = vld [vmem:[%s10706_s28 + $0x390] sm:$0xff]  ;;  %v12625_v13 = vld [vmem:[%s10706_s28 + $0x398] sm:$0xff] }
 0x2d8   : > { %3215 = vmatpush.xpose.msrb.mxu0 %v12029_v60  ;;  %8955 = vmatpush.xpose.msk.msrb.mxu1 %vm423_vm0, %v12032_v61  ;;  %v12590_v60 = vld [vmem:[%s10706_s28 + $0x4b8] sm:$0xff]  ;;  %v12595_v61 = vld.sshfl [vmem:[#allocation1] sm:$0xff pattern:$0x73625140] }
 0x2d9   : > { %3255 = vmatpush.xpose.msrb.mxu2 %v12504_v33  ;;  %8972 = vmatpush.xpose.msk.msrb.mxu3 %vm423_vm0, %v12507_v46  ;;  %v2526_v62 = vpop.f32.mrf.mxu2  ;;  %v2546_v48 = vpop.f32.mrf.mxu3 }
 0x2da   : > { %v2527_v49 = vadd.f32 %v2526_v62, %v2365_v25  ;;  %v12661_v25 = vld [vmem:[%s10706_s28 + $0x378] sm:$0xff] }
 0x2db   : > { %v8893_v62 = vld [vmem:[%s10706_s28 + $0x358] sm:$0xff] }
 0x2dc   : > { %3216 = vmatpush.xpose.msrb.mxu0 %v12047_v36  ;;  %8956 = vmatpush.xpose.msk.msrb.mxu1 %vm423_vm0, %v12050_v37  ;;  %v12527_v1 = vadd.f32 %v2546_v48, %v2527_v49  ;;  %v12597_v36 = vld.sshfl [vmem:[#allocation1 + $0x8] sm:$0xff pattern:$0x73625140]  ;;  %v12603_v37 = vld [vmem:[%s10706_s28 + $0x3a0] sm:$0xff]  ;;  %v12696_v48 = vld [vmem:[%s10706_s28 + $0x450] sm:$0xff] }
 0x2dd   : > { %3256 = vmatpush.xpose.msrb.mxu2 %v12345_v56  ;;  %8973 = vmatpush.xpose.msk.msrb.mxu3 %vm423_vm0, %v12348_v43  ;;  %v12699_v49 = vld [vmem:[%s10706_s28 + $0x458] sm:$0xff] }
 0x2e0   : > { %3217 = vmatpush.xpose.msrb.mxu0 %v12065_v8  ;;  %8957 = vmatpush.xpose.msk.msrb.mxu1 %vm423_vm0, %v15944_v57  ;;  %v12606_v8 = vld [vmem:[%s10706_s28 + $0x3a8] sm:$0xff] }
 0x2e1   : > { %3257 = vmatpush.xpose.msrb.mxu2 %v12365_v7  ;;  %8974 = vmatpush.xpose.msk.msrb.mxu3 %vm423_vm0, %v12368_v42  ;;  %v12613_v57 = vld [vmem:[%s10706_s28 + $0x4a8] sm:$0xff] }
 0x2e4   : > { %3218 = vmatpush.xpose.msrb.mxu0 %v12083_v40  ;;  %8958 = vmatpush.xpose.msk.msrb.mxu1 %vm423_vm0, %v12086_v52  ;;  %v15969_v40 = vld [vmem:[#allocation7_spill] sm:$0xff]  ;;  %v12610_v52 = vld [vmem:[%s10706_s28 + $0x4a0] sm:$0xff] }
 0x2e5   : > { %3258 = vmatpush.xpose.msrb.mxu2 %v12210_v38  ;;  %8975 = vmatpush.xpose.msk.msrb.mxu3 %vm423_vm0, %v12213_v47  ;;  %3361 = vst [vmem:[#allocation1] ss:$4 sm:$0xff] %v15969_v40  ;;  %v12778_v40 = vld [vmem:[%s10706_s28 + $0x410] sm:$0xff] }
 0x2e8   : > { %3219 = vmatpush.xpose.msrb.mxu0 %v12101_v2  ;;  %8959 = vmatpush.xpose.msk.msrb.mxu1 %vm423_vm0, %v12104_v15  ;;  %v12563_v15 = vld [vmem:[%s10706_s28 + $0x3c0] sm:$0xff]  ;;  %v12566_v2 = vld [vmem:[%s10706_s28 + $0x3c8] sm:$0xff] }
 0x2e9   : > { %3259 = vmatpush.xpose.msrb.mxu2 %v12226_v35  ;;  %8976 = vmatpush.xpose.msk.msrb.mxu3 %vm423_vm0, %v12229_v24 }
 0x2ec   : > { %3220 = vmatpush.xpose.msrb.mxu0 %v12545_v4  ;;  %8960 = vmatpush.xpose.msk.msrb.mxu1 %vm423_vm0, %v12548_v5 }
 0x2ed   : > { %3260 = vmatpush.xpose.msrb.mxu2 %v12551_v6  ;;  %8977 = vmatpush.xpose.msk.msrb.mxu3 %vm423_vm0, %v12554_v44 }
 0x2f0   : > { %3221 = vmatpush.xpose.msrb.mxu0 %v12563_v15  ;;  %8961 = vmatpush.xpose.msk.msrb.mxu1 %vm423_vm0, %v12566_v2 }
 0x2f1   : > { %3261 = vmatpush.xpose.msrb.mxu2 %v12569_v45  ;;  %8978 = vmatpush.xpose.msk.msrb.mxu3 %vm423_vm0, %v12572_v51 }
 0x2f4   : > { %3222 = vmatpush.xpose.msrb.mxu0 %v12581_v54  ;;  %8962 = vmatpush.xpose.msk.msrb.mxu1 %vm423_vm0, %v12584_v63 }
 0x2f5   : > { %3262 = vmatpush.xpose.msrb.mxu2 %v12587_v23  ;;  %8979 = vmatpush.xpose.msk.msrb.mxu3 %vm423_vm0, %v12590_v60 }
 0x2f8   : > { %3223 = vmatpush.xpose.msrb.mxu0 %v12603_v37  ;;  %8963 = vmatpush.xpose.msk.msrb.mxu1 %vm423_vm0, %v12606_v8 }
 0x2f9   : > { %3263 = vmatpush.xpose.msrb.mxu2 %v12610_v52  ;;  %8980 = vmatpush.xpose.msk.msrb.mxu3 %vm423_vm0, %v12613_v57 }
 0x2fc   : > { %3224 = vmatpush.xpose.msrb.mxu0 %v12622_v12  ;;  %8964 = vmatpush.xpose.msk.msrb.mxu1 %vm423_vm0, %v12625_v13 }
 0x2fd   : > { %3264 = vmatpush.xpose.msrb.mxu2 %v12628_v14  ;;  %8981 = vmatpush.xpose.msk.msrb.mxu3 %vm423_vm0, %v12631_v16 }
 0x300   : > { %3225 = vmatpush.xpose.msrb.mxu0 %v12640_v18  ;;  %8965 = vmatpush.xpose.msk.msrb.mxu1 %vm423_vm0, %v12643_v19 }
 0x301   : > { %3265 = vmatpush.xpose.msrb.mxu2 %v12646_v20  ;;  %8982 = vmatpush.xpose.msk.msrb.mxu3 %vm423_vm0, %v12649_v21 }
 0x304   : > { %3226 = vmatpush.xpose.msrb.mxu0 %v12658_v22  ;;  %8966 = vmatpush.xpose.msk.msrb.mxu1 %vm423_vm0, %v12661_v25 }
 0x305   : > { %3266 = vmatpush.xpose.msrb.mxu2 %v12664_v26  ;;  %8983 = vmatpush.xpose.msk.msrb.mxu3 %vm423_vm0, %v12667_v27 }
 0x308   : > { %3227 = vmatpush.xpose.msrb.mxu0 %v12676_v28  ;;  %8967 = vmatpush.xpose.msk.msrb.mxu1 %vm423_vm0, %v12679_v29 }
 0x309   : > { %3267 = vmatpush.xpose.msrb.mxu2 %v12682_v50  ;;  %8984 = vmatpush.xpose.msk.msrb.mxu3 %vm423_vm0, %v12685_v55 }
 0x30c   : > { %3228 = vmatpush.xpose.msrb.mxu0 %v8892_v58  ;;  %8968 = vmatpush.xpose.msk.msrb.mxu1 %vm423_vm0, %v8893_v62  ;;  %v12718_v58 = vld [vmem:[%s10706_s28 + $0x558] sm:$0xff] }
 0x30d   : > { %3268 = vmatpush.xpose.msrb.mxu2 %v12696_v48  ;;  %8985 = vmatpush.xpose.msk.msrb.mxu3 %vm423_vm0, %v12699_v49 }
 0x310   : > { %3229 = vmatpush.xpose.msrb.mxu0 %v8890_v11  ;;  %8969 = vmatpush.xpose.msk.msrb.mxu1 %vm423_vm0, %v8891_v10  ;;  %v12733_v10 = vld [vmem:[%s10706_s28 + $0x540] sm:$0xff]  ;;  %v12736_v11 = vld [vmem:[%s10706_s28 + $0x548] sm:$0xff]  ;;  %v2733_v62 = vpop.f32.mrf.mxu0  ;;  %v2753_v0 = vpop.f32.mrf.mxu1 }
 0x311   : > { %3269 = vmatpush.xpose.msrb.mxu2 %v12708_v34  ;;  %8986 = vmatpush.xpose.msk.msrb.mxu3 %vm423_vm0, %v12711_v31  ;;  %v2754_v53 = vadd.f32 %v2753_v0, %v2733_v62  ;;  %v12763_v0 = vld [vmem:[%s10706_s28 + $0x420] sm:$0xff]  ;;  %v12766_v62 = vld [vmem:[%s10706_s28 + $0x428] sm:$0xff] }
 0x313   : > { %3230 = vmatmul.f32.vlgmr.msrb.gmra.mxu0 %v12595_v61  ;;  %8970 = vmatmul.msk.f32.vlgmr.msrb.gmra.mxu1 %vm423_vm0, %v12597_v36 }
 0x314   : > { %3463 = vmatpush.xpose.msra.mxu0 %v12696_v48  ;;  %9052 = vmatpush.xpose.msk.msra.mxu1 %vm423_vm0, %v12699_v49 }
 0x315   : > { %3503 = vmatpush.xpose.msra.mxu2 %v12715_v9  ;;  %9069 = vmatpush.xpose.msk.msra.mxu3 %vm423_vm0, %v12718_v58 }
 0x316   : > { %3270 = vmatmul.f32.vlgmr.msrb.gmra.mxu2 %v12595_v61  ;;  %8987 = vmatmul.msk.f32.vlgmr.msrb.gmra.mxu3 %vm423_vm0, %v12597_v36  ;;  %v12751_v61 = vld [vmem:[%s10706_s28 + $0x438] sm:$0xff]  ;;  %v12754_v36 = vadd.f32 %v2754_v53, %v12516_v59 }
 0x318   : > { %3464 = vmatpush.xpose.msra.mxu0 %v12708_v34  ;;  %9053 = vmatpush.xpose.msk.msra.mxu1 %vm423_vm0, %v12711_v31 }
 0x319   : > { %3504 = vmatpush.xpose.msra.mxu2 %v12733_v10  ;;  %9070 = vmatpush.xpose.msk.msra.mxu3 %vm423_vm0, %v12736_v11  ;;  %v2773_v3 = vpop.f32.mrf.mxu2  ;;  %v2793_v53 = vpop.f32.mrf.mxu3 }
 0x31a   : > { %v2794_v59 = vadd.f32 %v2793_v53, %v2773_v3  ;;  %v12790_v3 = vld [vmem:[%s10706_s28 + $0x400] sm:$0xff]  ;;  %v12802_v53 = vld [vmem:[%s10706_s28 + $0x3f0] sm:$0xff] }
 0x31c   : > { %3465 = vmatpush.xpose.msra.mxu0 %v12748_v39  ;;  %9054 = vmatpush.xpose.msk.msra.mxu1 %vm423_vm0, %v12751_v61  ;;  %v12772_v41 = vadd.f32 %v2794_v59, %v12527_v1  ;;  %v12793_v1 = vld [vmem:[%s10706_s28 + $0x408] sm:$0xff]  ;;  %v12805_v59 = vld [vmem:[%s10706_s28 + $0x3f8] sm:$0xff] }
 0x31d   : > { %3505 = vmatpush.xpose.msra.mxu2 %v12488_v30  ;;  %9071 = vmatpush.xpose.msk.msra.mxu3 %vm423_vm0, %v12491_v32  ;;  %15970 = vst [vmem:[#allocation5_spill] sm:$0xff] %v12793_v1 }
 0x320   : > { %3466 = vmatpush.xpose.msra.mxu0 %v12763_v0  ;;  %9055 = vmatpush.xpose.msk.msra.mxu1 %vm423_vm0, %v12766_v62 }
 0x321   : > { %3506 = vmatpush.xpose.msra.mxu2 %v12504_v33  ;;  %9072 = vmatpush.xpose.msk.msra.mxu3 %vm423_vm0, %v12507_v46 }
 0x324   : > { %3467 = vmatpush.xpose.msra.mxu0 %v12778_v40  ;;  %9056 = vmatpush.xpose.msk.msra.mxu1 %vm423_vm0, %v12781_v17 }
 0x325   : > { %3507 = vmatpush.xpose.msra.mxu2 %v12345_v56  ;;  %9073 = vmatpush.xpose.msk.msra.mxu3 %vm423_vm0, %v12348_v43 }
 0x328   : > { %3468 = vmatpush.xpose.msra.mxu0 %v12790_v3  ;;  %9057 = vmatpush.xpose.msk.msra.mxu1 %vm423_vm0, %v12793_v1  ;;  %v12814_v1 = vld [vmem:[%s10706_s28 + $0x3e0] sm:$0xff] }
 0x329   : > { %3508 = vmatpush.xpose.msra.mxu2 %v12365_v7  ;;  %9074 = vmatpush.xpose.msk.msra.mxu3 %vm423_vm0, %v12368_v42  ;;  %15971 = vst [vmem:[#allocation11_spill] sm:$0xff] %v12814_v1  ;;  %v12817_v7 = vld [vmem:[%s10706_s28 + $0x3e8] sm:$0xff] }
 0x32c   : > { %3469 = vmatpush.xpose.msra.mxu0 %v12802_v53  ;;  %9058 = vmatpush.xpose.msk.msra.mxu1 %vm423_vm0, %v12805_v59 }
 0x32d   : > { %3509 = vmatpush.xpose.msra.mxu2 %v12210_v38  ;;  %9075 = vmatpush.xpose.msk.msra.mxu3 %vm423_vm0, %v12213_v47  ;;  %v3362_v47 = vld.sshfl [vmem:[#allocation1] sm:$0xff pattern:$0x73625140]  ;;  %v3363_v38 = vld.sshfl [vmem:[#allocation1 + $0x8] sm:$0xff pattern:$0x73625140] }
 0x330   : > { %3470 = vmatpush.xpose.msra.mxu0 %v12814_v1  ;;  %9059 = vmatpush.xpose.msk.msra.mxu1 %vm423_vm0, %v12817_v7  ;;  %v15972_v1 = vld [vmem:[#allocation10_spill] sm:$0xff] }
 0x331   : > { %3510 = vmatpush.xpose.msra.mxu2 %v12226_v35  ;;  %9076 = vmatpush.xpose.msk.msra.mxu3 %vm423_vm0, %v12229_v24  ;;  %3610 = vst [vmem:[#allocation1] ss:$4 sm:$0xff] %v15972_v1  ;;  %v9148_v35 = vld [vmem:[%s10706_s28 + $0x570] sm:$0xff]  ;;  %v9149_v24 = vld [vmem:[%s10706_s28 + $0x578] sm:$0xff]  ;;  %v13261_v1 = vld [vmem:[%s10706_s28 + $0x5a8] sm:$0xff] }
 0x334   : > { %3471 = vmatpush.xpose.msra.mxu0 %v12545_v4  ;;  %9060 = vmatpush.xpose.msk.msra.mxu1 %vm423_vm0, %v12548_v5 }
 0x335   : > { %3511 = vmatpush.xpose.msra.mxu2 %v12551_v6  ;;  %9077 = vmatpush.xpose.msk.msra.mxu3 %vm423_vm0, %v12554_v44 }
 0x338   : > { %3472 = vmatpush.xpose.msra.mxu0 %v12563_v15  ;;  %9061 = vmatpush.xpose.msk.msra.mxu1 %vm423_vm0, %v12566_v2 }
 0x339   : > { %3512 = vmatpush.xpose.msra.mxu2 %v12569_v45  ;;  %9078 = vmatpush.xpose.msk.msra.mxu3 %vm423_vm0, %v12572_v51 }
 0x33c   : > { %3473 = vmatpush.xpose.msra.mxu0 %v12581_v54  ;;  %9062 = vmatpush.xpose.msk.msra.mxu1 %vm423_vm0, %v12584_v63 }
 0x33d   : > { %3513 = vmatpush.xpose.msra.mxu2 %v12587_v23  ;;  %9079 = vmatpush.xpose.msk.msra.mxu3 %vm423_vm0, %v12590_v60 }
 0x340   : > { %3474 = vmatpush.xpose.msra.mxu0 %v12603_v37  ;;  %9063 = vmatpush.xpose.msk.msra.mxu1 %vm423_vm0, %v12606_v8 }
 0x341   : > { %3514 = vmatpush.xpose.msra.mxu2 %v12610_v52  ;;  %9080 = vmatpush.xpose.msk.msra.mxu3 %vm423_vm0, %v12613_v57 }
 0x344   : > { %3475 = vmatpush.xpose.msra.mxu0 %v12622_v12  ;;  %9064 = vmatpush.xpose.msk.msra.mxu1 %vm423_vm0, %v12625_v13 }
 0x345   : > { %3515 = vmatpush.xpose.msra.mxu2 %v12628_v14  ;;  %9081 = vmatpush.xpose.msk.msra.mxu3 %vm423_vm0, %v12631_v16 }
 0x348   : > { %3476 = vmatpush.xpose.msra.mxu0 %v12640_v18  ;;  %9065 = vmatpush.xpose.msk.msra.mxu1 %vm423_vm0, %v12643_v19 }
 0x349   : > { %3516 = vmatpush.xpose.msra.mxu2 %v12646_v20  ;;  %9082 = vmatpush.xpose.msk.msra.mxu3 %vm423_vm0, %v12649_v21 }
 0x34c   : > { %3477 = vmatpush.xpose.msra.mxu0 %v12658_v22  ;;  %9066 = vmatpush.xpose.msk.msra.mxu1 %vm423_vm0, %v12661_v25  ;;  %v9146_v22 = vld [vmem:[%s10706_s28 + $0x560] sm:$0xff]  ;;  %v9147_v25 = vld [vmem:[%s10706_s28 + $0x568] sm:$0xff] }
 0x34d   : > { %3517 = vmatpush.xpose.msra.mxu2 %v12664_v26  ;;  %9083 = vmatpush.xpose.msk.msra.mxu3 %vm423_vm0, %v12667_v27 }
 0x350   : > { %3478 = vmatpush.xpose.msra.mxu0 %v12676_v28  ;;  %9067 = vmatpush.xpose.msk.msra.mxu1 %vm423_vm0, %v12679_v29  ;;  %v2982_v28 = vpop.f32.mrf.mxu0  ;;  %v3002_v29 = vpop.f32.mrf.mxu1 }
 0x351   : > { %3518 = vmatpush.xpose.msra.mxu2 %v12682_v50  ;;  %9084 = vmatpush.xpose.msk.msra.mxu3 %vm423_vm0, %v12685_v55 }
 0x353   : > { %3479 = vmatmul.f32.vlgmr.msra.gmra.mxu0 %v3362_v47  ;;  %9068 = vmatmul.msk.f32.vlgmr.msra.gmra.mxu1 %vm423_vm0, %v3363_v38 }
 0x354   : > { %3712 = vmatpush.xpose.msrb.mxu0 %v12664_v26  ;;  %9150 = vmatpush.xpose.msk.msrb.mxu1 %vm423_vm0, %v12667_v27  ;;  %v3003_v26 = vadd.f32 %v3002_v29, %v2982_v28  ;;  %v13153_v28 = vld [vmem:[%s10706_s28 + $0x608] sm:$0xff]  ;;  %v13156_v29 = vld [vmem:[%s10706_s28 + $0x700] sm:$0xff] }
 0x355   : > { %3752 = vmatpush.xpose.msrb.mxu2 %v9148_v35  ;;  %9167 = vmatpush.xpose.msk.msrb.mxu3 %vm423_vm0, %v9149_v24  ;;  %v13135_v35 = vld [vmem:[%s10706_s28 + $0x618] sm:$0xff]  ;;  %v13138_v24 = vld [vmem:[%s10706_s28 + $0x710] sm:$0xff] }
 0x356   : > { %3519 = vmatmul.f32.vlgmr.msra.gmra.mxu2 %v3362_v47  ;;  %9085 = vmatmul.msk.f32.vlgmr.msra.gmra.mxu3 %vm423_vm0, %v3363_v38  ;;  %v12889_v27 = vadd.f32 %v3003_v26, %v12754_v36  ;;  %v13132_v38 = vld [vmem:[%s10706_s28 + $0x610] sm:$0xff]  ;;  %v13159_v26 = vld [vmem:[%s10706_s28 + $0x708] sm:$0xff] }
 0x358   : > { %3713 = vmatpush.xpose.msrb.mxu0 %v12682_v50  ;;  %9151 = vmatpush.xpose.msk.msrb.mxu1 %vm423_vm0, %v12685_v55 }
 0x359   : > { %3753 = vmatpush.xpose.msrb.mxu2 %v9146_v22  ;;  %9168 = vmatpush.xpose.msk.msrb.mxu3 %vm423_vm0, %v9147_v25  ;;  %v3022_v50 = vpop.f32.mrf.mxu2  ;;  %v3042_v47 = vpop.f32.mrf.mxu3  ;;  %v13141_v22 = vld [vmem:[%s10706_s28 + $0x718] sm:$0xff]  ;;  %v13150_v25 = vld [vmem:[%s10706_s28 + $0x600] sm:$0xff] }
 0x35a   : > { %v3043_v55 = vadd.f32 %v3042_v47, %v3022_v50  ;;  %v13171_v50 = vld [vmem:[%s10706_s28 + $0x5f8] sm:$0xff]  ;;  %v13174_v47 = vld [vmem:[%s10706_s28 + $0x6f0] sm:$0xff] }
 0x35c   : > { %3714 = vmatpush.xpose.msrb.mxu0 %v12696_v48  ;;  %9152 = vmatpush.xpose.msk.msrb.mxu1 %vm423_vm0, %v12699_v49  ;;  %v12901_v36 = vadd.f32 %v3043_v55, %v12772_v41  ;;  %v15974_v41 = vld [vmem:[#allocation30_spill] sm:$0xff]  ;;  %v13081_v48 = vld [vmem:[%s10706_s28 + $0x648] sm:$0xff]  ;;  %v13177_v55 = vld [vmem:[%s10706_s28 + $0x6f8] sm:$0xff] }
 0x35d   : > { %3754 = vmatpush.xpose.msrb.mxu2 %v12715_v9  ;;  %9169 = vmatpush.xpose.msk.msrb.mxu3 %vm423_vm0, %v12718_v58  ;;  %v3612_v9 = vld.sshfl [vmem:[#allocation1 + $0x8] sm:$0xff pattern:$0x73625140]  ;;  %v13084_v49 = vld [vmem:[%s10706_s28 + $0x740] sm:$0xff] }
 0x35e   : > { %v13087_v58 = vld [vmem:[%s10706_s28 + $0x748] sm:$0xff] }
 0x360   : > { %3715 = vmatpush.xpose.msrb.mxu0 %v12708_v34  ;;  %9153 = vmatpush.xpose.msk.msrb.mxu1 %vm423_vm0, %v12711_v31  ;;  %v15973_v31 = vld [vmem:[#allocation5_spill] sm:$0xff]  ;;  %v9132_v34 = vld [vmem:[%s10706_s28 + $0x4f0] sm:$0xff] }
 0x361   : > { %3755 = vmatpush.xpose.msrb.mxu2 %v12733_v10  ;;  %9170 = vmatpush.xpose.msk.msrb.mxu3 %vm423_vm0, %v12736_v11  ;;  %v13096_v10 = vld [vmem:[%s10706_s28 + $0x630] sm:$0xff]  ;;  %v13099_v11 = vld [vmem:[%s10706_s28 + $0x638] sm:$0xff] }
 0x364   : > { %3716 = vmatpush.xpose.msrb.mxu0 %v12748_v39  ;;  %9154 = vmatpush.xpose.msk.msrb.mxu1 %vm423_vm0, %v12751_v61  ;;  %v9133_v39 = vld [vmem:[%s10706_s28 + $0x4f8] sm:$0xff]  ;;  %v13102_v61 = vld [vmem:[%s10706_s28 + $0x730] sm:$0xff] }
 0x365   : > { %3756 = vmatpush.xpose.msrb.mxu2 %v12488_v30  ;;  %9171 = vmatpush.xpose.msk.msrb.mxu3 %vm423_vm0, %v12491_v32  ;;  %v9131_v30 = vld [vmem:[%s10706_s28 + $0x4e8] sm:$0xff] }
 0x366   : > { %v15976_v32 = vld [vmem:[#allocation11_spill] sm:$0xff] }
 0x368   : > { %3717 = vmatpush.xpose.msrb.mxu0 %v12763_v0  ;;  %9155 = vmatpush.xpose.msk.msrb.mxu1 %vm423_vm0, %v12766_v62  ;;  %v13105_v0 = vld [vmem:[%s10706_s28 + $0x738] sm:$0xff]  ;;  %v13114_v62 = vld [vmem:[%s10706_s28 + $0x620] sm:$0xff] }
 0x369   : > { %3757 = vmatpush.xpose.msrb.mxu2 %v12504_v33  ;;  %9172 = vmatpush.xpose.msk.msrb.mxu3 %vm423_vm0, %v12507_v46  ;;  %v12983_v33 = vld [vmem:[%s10706_s28 + $0x790] sm:$0xff]  ;;  %v12986_v46 = vld [vmem:[%s10706_s28 + $0x798] sm:$0xff] }
 0x36a   : > { %15977 = vst [vmem:[#allocation12_spill] sm:$0xff] %v12983_v33 }
 0x36b   : > { %15978 = vst [vmem:[#allocation13_spill] sm:$0xff] %v12986_v46 }
 0x36c   : > { %3718 = vmatpush.xpose.msrb.mxu0 %v12778_v40  ;;  %9156 = vmatpush.xpose.msk.msrb.mxu1 %vm423_vm0, %v12781_v17  ;;  %v9130_v17 = vld [vmem:[%s10706_s28 + $0x4e0] sm:$0xff] }
 0x36d   : > { %3758 = vmatpush.xpose.msrb.mxu2 %v12345_v56  ;;  %9173 = vmatpush.xpose.msk.msrb.mxu3 %vm423_vm0, %v12348_v43  ;;  %v3611_v56 = vld.sshfl [vmem:[#allocation1] sm:$0xff pattern:$0x73625140]  ;;  %v15975_v43 = vld [vmem:[#allocation8_spill] sm:$0xff] }
 0x36e   : > { %3928 = vst [vmem:[#allocation1] ss:$4 sm:$0xff] %v15975_v43  ;;  %v13258_v43 = vld [vmem:[%s10706_s28 + $0x5a0] sm:$0xff] }
 0x370   : > { %3719 = vmatpush.xpose.msrb.mxu0 %v12790_v3  ;;  %9157 = vmatpush.xpose.msk.msrb.mxu1 %vm423_vm0, %v15973_v31  ;;  %v13117_v3 = vld [vmem:[%s10706_s28 + $0x628] sm:$0xff] }
 0x371   : > { %3759 = vmatpush.xpose.msrb.mxu2 %v15974_v41  ;;  %9174 = vmatpush.xpose.msk.msrb.mxu3 %vm423_vm0, %v12368_v42  ;;  %v12974_v42 = vld [vmem:[%s10706_s28 + $0x690] sm:$0xff]  ;;  %v13189_v31 = vld [vmem:[%s10706_s28 + $0x5e8] sm:$0xff]  ;;  %v13192_v41 = vld [vmem:[%s10706_s28 + $0x6e0] sm:$0xff] }
 0x374   : > { %3720 = vmatpush.xpose.msrb.mxu0 %v12802_v53  ;;  %9158 = vmatpush.xpose.msk.msrb.mxu1 %vm423_vm0, %v12805_v59  ;;  %v13120_v53 = vld [vmem:[%s10706_s28 + $0x720] sm:$0xff]  ;;  %v13123_v59 = vld [vmem:[%s10706_s28 + $0x728] sm:$0xff] }
 0x375   : > { %3760 = vmatpush.xpose.msrb.mxu2 %v9132_v34  ;;  %9175 = vmatpush.xpose.msk.msrb.mxu3 %vm423_vm0, %v9133_v39  ;;  %v13195_v34 = vld [vmem:[%s10706_s28 + $0x6e8] sm:$0xff]  ;;  %v13204_v39 = vld [vmem:[%s10706_s28 + $0x5d0] sm:$0xff] }
 0x376   : > { %15987 = vst [vmem:[#allocation48_spill] sm:$0xff] %v13195_v34 }
 0x378   : > { %3721 = vmatpush.xpose.msrb.mxu0 %v15976_v32  ;;  %9159 = vmatpush.xpose.msk.msrb.mxu1 %vm423_vm0, %v12817_v7  ;;  %v12977_v7 = vld [vmem:[%s10706_s28 + $0x698] sm:$0xff]  ;;  %v13225_v32 = vld [vmem:[%s10706_s28 + $0x5c8] sm:$0xff] }
 0x379   : > { %3761 = vmatpush.xpose.msrb.mxu2 %v9130_v17  ;;  %9176 = vmatpush.xpose.msk.msrb.mxu3 %vm423_vm0, %v9131_v30  ;;  %v13213_v17 = vld [vmem:[%s10706_s28 + $0x6d8] sm:$0xff]  ;;  %v13222_v30 = vld [vmem:[%s10706_s28 + $0x5c0] sm:$0xff] }
 0x37c   : > { %3722 = vmatpush.xpose.msrb.mxu0 %v12545_v4  ;;  %9160 = vmatpush.xpose.msk.msrb.mxu1 %vm423_vm0, %v12548_v5  ;;  %v12998_v4 = vld [vmem:[%s10706_s28 + $0x680] sm:$0xff]  ;;  %v13001_v5 = vld [vmem:[%s10706_s28 + $0x688] sm:$0xff] }
 0x37d   : > { %3762 = vmatpush.xpose.msrb.mxu2 %v12551_v6  ;;  %9177 = vmatpush.xpose.msk.msrb.mxu3 %vm423_vm0, %v12554_v44  ;;  %15979 = vst [vmem:[#allocation14_spill] sm:$0xff] %v13001_v5  ;;  %v13005_v6 = vld [vmem:[%s10706_s28 + $0x780] sm:$0xff]  ;;  %v13008_v44 = vld [vmem:[%s10706_s28 + $0x788] sm:$0xff] }
 0x37e   : > { %15980 = vst [vmem:[#allocation15_spill] sm:$0xff] %v13005_v6 }
 0x37f   : > { %15981 = vst [vmem:[#allocation5_spill] sm:$0xff] %v13008_v44 }
 0x380   : > { %3723 = vmatpush.xpose.msrb.mxu0 %v12563_v15  ;;  %9161 = vmatpush.xpose.msk.msrb.mxu1 %vm423_vm0, %v12566_v2 }
 0x381   : > { %3763 = vmatpush.xpose.msrb.mxu2 %v12569_v45  ;;  %9178 = vmatpush.xpose.msk.msrb.mxu3 %vm423_vm0, %v12572_v51  ;;  %v13018_v51 = vld [vmem:[%s10706_s28 + $0x670] sm:$0xff] }
 0x384   : > { %3724 = vmatpush.xpose.msrb.mxu0 %v12581_v54  ;;  %9162 = vmatpush.xpose.msk.msrb.mxu1 %vm423_vm0, %v12584_v63  ;;  %v13021_v54 = vld [vmem:[%s10706_s28 + $0x678] sm:$0xff] }
 0x385   : > { %3764 = vmatpush.xpose.msrb.mxu2 %v12587_v23  ;;  %9179 = vmatpush.xpose.msk.msrb.mxu3 %vm423_vm0, %v12590_v60  ;;  %15982 = vst [vmem:[#allocation30_spill] sm:$0xff] %v13021_v54  ;;  %v13027_v23 = vld [vmem:[%s10706_s28 + $0x770] sm:$0xff]  ;;  %v13030_v60 = vld [vmem:[%s10706_s28 + $0x778] sm:$0xff] }
 0x388   : > { %3725 = vmatpush.xpose.msrb.mxu0 %v12603_v37  ;;  %9163 = vmatpush.xpose.msk.msrb.mxu1 %vm423_vm0, %v12606_v8  ;;  %v13039_v37 = vld [vmem:[%s10706_s28 + $0x660] sm:$0xff]  ;;  %v13042_v8 = vld [vmem:[%s10706_s28 + $0x668] sm:$0xff] }
 0x389   : > { %3765 = vmatpush.xpose.msrb.mxu2 %v12610_v52  ;;  %9180 = vmatpush.xpose.msk.msrb.mxu3 %vm423_vm0, %v12613_v57  ;;  %15983 = vst [vmem:[#allocation11_spill] sm:$0xff] %v13042_v8  ;;  %v13045_v57 = vld [vmem:[%s10706_s28 + $0x760] sm:$0xff] }
 0x38c   : > { %3726 = vmatpush.xpose.msrb.mxu0 %v12622_v12  ;;  %9164 = vmatpush.xpose.msk.msrb.mxu1 %vm423_vm0, %v12625_v13  ;;  %v13048_v12 = vld [vmem:[%s10706_s28 + $0x768] sm:$0xff] }
 0x38d   : > { %3766 = vmatpush.xpose.msrb.mxu2 %v12628_v14  ;;  %9181 = vmatpush.xpose.msk.msrb.mxu3 %vm423_vm0, %v12631_v16  ;;  %v13060_v16 = vld [vmem:[%s10706_s28 + $0x650] sm:$0xff] }
 0x390   : > { %3727 = vmatpush.xpose.msrb.mxu0 %v12640_v18  ;;  %9165 = vmatpush.xpose.msk.msrb.mxu1 %vm423_vm0, %v12643_v19  ;;  %v3231_v15 = vpop.f32.mrf.mxu0  ;;  %v3251_v2 = vpop.f32.mrf.mxu1  ;;  %v13063_v18 = vld [vmem:[%s10706_s28 + $0x658] sm:$0xff]  ;;  %v13066_v19 = vld [vmem:[%s10706_s28 + $0x750] sm:$0xff] }
 0x391   : > { %3767 = vmatpush.xpose.msrb.mxu2 %v12646_v20  ;;  %9182 = vmatpush.xpose.msk.msrb.mxu3 %vm423_vm0, %v12649_v21  ;;  %v3252_v45 = vadd.f32 %v3251_v2, %v3231_v15  ;;  %15984 = vst [vmem:[#allocation45_spill] sm:$0xff] %v13063_v18  ;;  %v13069_v20 = vld [vmem:[%s10706_s28 + $0x758] sm:$0xff]  ;;  %v13078_v21 = vld [vmem:[%s10706_s28 + $0x640] sm:$0xff]  ;;  %v13231_v2 = vld [vmem:[%s10706_s28 + $0x6c8] sm:$0xff] }
 0x392   : > { %15985 = vst [vmem:[#allocation46_spill] sm:$0xff] %v13066_v19  ;;  %v13228_v15 = vld [vmem:[%s10706_s28 + $0x6c0] sm:$0xff] }
 0x393   : > { %3728 = vmatmul.f32.vlgmr.msrb.gmra.mxu0 %v3611_v56  ;;  %9166 = vmatmul.msk.f32.vlgmr.msrb.gmra.mxu1 %vm423_vm0, %v3612_v9  ;;  %v13024_v63 = vadd.f32 %v3252_v45, %v12889_v27  ;;  %15986 = vst [vmem:[#allocation47_spill] sm:$0xff] %v13078_v21  ;;  %v13168_v27 = vld [vmem:[%s10706_s28 + $0x5f0] sm:$0xff] }
 0x394   : > { %4030 = vmatpush.xpose.msra.mxu0 %v12974_v42  ;;  %9312 = vmatpush.xpose.msk.msra.mxu1 %vm423_vm0, %v12977_v7  ;;  %v13240_v45 = vld [vmem:[%s10706_s28 + $0x5b0] sm:$0xff] }
 0x395   : > { %4070 = vmatpush.xpose.msra.mxu2 %v12983_v33  ;;  %9329 = vmatpush.xpose.msk.msra.mxu3 %vm423_vm0, %v12986_v46 }
 0x396   : > { %3768 = vmatmul.f32.vlgmr.msrb.gmra.mxu2 %v3611_v56  ;;  %9183 = vmatmul.msk.f32.vlgmr.msrb.gmra.mxu3 %vm423_vm0, %v3612_v9  ;;  %v13207_v56 = vld [vmem:[%s10706_s28 + $0x5d8] sm:$0xff]  ;;  %v13210_v9 = vld [vmem:[%s10706_s28 + $0x6d0] sm:$0xff] }
 0x398   : > { %4031 = vmatpush.xpose.msra.mxu0 %v12998_v4  ;;  %9313 = vmatpush.xpose.msk.msra.mxu1 %vm423_vm0, %v13001_v5 }
 0x399   : > { %4071 = vmatpush.xpose.msra.mxu2 %v13005_v6  ;;  %9330 = vmatpush.xpose.msk.msra.mxu3 %vm423_vm0, %v13008_v44  ;;  %v3271_v40 = vpop.f32.mrf.mxu2  ;;  %v3291_v52 = vpop.f32.mrf.mxu3  ;;  %v13264_v44 = vld [vmem:[%s10706_s28 + $0x6a0] sm:$0xff]  ;;  %v13267_v6 = vld [vmem:[%s10706_s28 + $0x6a8] sm:$0xff] }
 0x39a   : > { %v3292_v13 = vadd.f32 %v3291_v52, %v3271_v40  ;;  %v13243_v40 = vld [vmem:[%s10706_s28 + $0x5b8] sm:$0xff]  ;;  %v13246_v52 = vld [vmem:[%s10706_s28 + $0x6b0] sm:$0xff] }
 0x39c   : > { %4032 = vmatpush.xpose.msra.mxu0 %v13018_v51  ;;  %9314 = vmatpush.xpose.msk.msra.mxu1 %vm423_vm0, %v13021_v54  ;;  %v13054_v14 = vadd.f32 %v3292_v13, %v12901_v36  ;;  %v13186_v36 = vld [vmem:[%s10706_s28 + $0x5e0] sm:$0xff]  ;;  %v13249_v13 = vld [vmem:[%s10706_s28 + $0x6b8] sm:$0xff] }
 0x39d   : > { %4072 = vmatpush.xpose.msra.mxu2 %v13027_v23  ;;  %9331 = vmatpush.xpose.msk.msra.mxu3 %vm423_vm0, %v13030_v60 }
 0x3a0   : > { %4033 = vmatpush.xpose.msra.mxu0 %v13039_v37  ;;  %9315 = vmatpush.xpose.msk.msra.mxu1 %vm423_vm0, %v13042_v8 }
 0x3a1   : > { %4073 = vmatpush.xpose.msra.mxu2 %v13045_v57  ;;  %9332 = vmatpush.xpose.msk.msra.mxu3 %vm423_vm0, %v13048_v12 }
 0x3a4   : > { %4034 = vmatpush.xpose.msra.mxu0 %v13060_v16  ;;  %9316 = vmatpush.xpose.msk.msra.mxu1 %vm423_vm0, %v13063_v18 }
 0x3a5   : > { %4074 = vmatpush.xpose.msra.mxu2 %v13066_v19  ;;  %9333 = vmatpush.xpose.msk.msra.mxu3 %vm423_vm0, %v13069_v20 }
 0x3a8   : > { %4035 = vmatpush.xpose.msra.mxu0 %v13078_v21  ;;  %9317 = vmatpush.xpose.msk.msra.mxu1 %vm423_vm0, %v13081_v48 }
 0x3a9   : > { %4075 = vmatpush.xpose.msra.mxu2 %v13084_v49  ;;  %9334 = vmatpush.xpose.msk.msra.mxu3 %vm423_vm0, %v13087_v58 }
 0x3ac   : > { %4036 = vmatpush.xpose.msra.mxu0 %v13096_v10  ;;  %9318 = vmatpush.xpose.msk.msra.mxu1 %vm423_vm0, %v13099_v11 }
 0x3ad   : > { %4076 = vmatpush.xpose.msra.mxu2 %v13102_v61  ;;  %9335 = vmatpush.xpose.msk.msra.mxu3 %vm423_vm0, %v13105_v0 }
 0x3b0   : > { %4037 = vmatpush.xpose.msra.mxu0 %v13114_v62  ;;  %9319 = vmatpush.xpose.msk.msra.mxu1 %vm423_vm0, %v13117_v3 }
 0x3b1   : > { %4077 = vmatpush.xpose.msra.mxu2 %v13120_v53  ;;  %9336 = vmatpush.xpose.msk.msra.mxu3 %vm423_vm0, %v13123_v59 }
 0x3b4   : > { %4038 = vmatpush.xpose.msra.mxu0 %v13132_v38  ;;  %9320 = vmatpush.xpose.msk.msra.mxu1 %vm423_vm0, %v13135_v35 }
 0x3b5   : > { %4078 = vmatpush.xpose.msra.mxu2 %v13138_v24  ;;  %9337 = vmatpush.xpose.msk.msra.mxu3 %vm423_vm0, %v13141_v22 }
 0x3b8   : > { %4039 = vmatpush.xpose.msra.mxu0 %v13150_v25  ;;  %9321 = vmatpush.xpose.msk.msra.mxu1 %vm423_vm0, %v13153_v28 }
 0x3b9   : > { %4079 = vmatpush.xpose.msra.mxu2 %v13156_v29  ;;  %9338 = vmatpush.xpose.msk.msra.mxu3 %vm423_vm0, %v13159_v26 }
 0x3bc   : > { %4040 = vmatpush.xpose.msra.mxu0 %v13168_v27  ;;  %9322 = vmatpush.xpose.msk.msra.mxu1 %vm423_vm0, %v13171_v50 }
 0x3bd   : > { %4080 = vmatpush.xpose.msra.mxu2 %v13174_v47  ;;  %9339 = vmatpush.xpose.msk.msra.mxu3 %vm423_vm0, %v13177_v55 }
 0x3c0   : > { %4041 = vmatpush.xpose.msra.mxu0 %v13186_v36  ;;  %9323 = vmatpush.xpose.msk.msra.mxu1 %vm423_vm0, %v13189_v31 }
 0x3c1   : > { %4081 = vmatpush.xpose.msra.mxu2 %v13192_v41  ;;  %9340 = vmatpush.xpose.msk.msra.mxu3 %vm423_vm0, %v13195_v34 }
 0x3c4   : > { %4042 = vmatpush.xpose.msra.mxu0 %v13204_v39  ;;  %9324 = vmatpush.xpose.msk.msra.mxu1 %vm423_vm0, %v13207_v56 }
 0x3c5   : > { %4082 = vmatpush.xpose.msra.mxu2 %v13210_v9  ;;  %9341 = vmatpush.xpose.msk.msra.mxu3 %vm423_vm0, %v13213_v17 }
 0x3c8   : > { %4043 = vmatpush.xpose.msra.mxu0 %v13222_v30  ;;  %9325 = vmatpush.xpose.msk.msra.mxu1 %vm423_vm0, %v13225_v32 }
 0x3c9   : > { %4083 = vmatpush.xpose.msra.mxu2 %v13228_v15  ;;  %9342 = vmatpush.xpose.msk.msra.mxu3 %vm423_vm0, %v13231_v2 }
 0x3cc   : > { %4044 = vmatpush.xpose.msra.mxu0 %v13240_v45  ;;  %9326 = vmatpush.xpose.msk.msra.mxu1 %vm423_vm0, %v13243_v40 }
 0x3cd   : > { %4084 = vmatpush.xpose.msra.mxu2 %v13246_v52  ;;  %9343 = vmatpush.xpose.msk.msra.mxu3 %vm423_vm0, %v13249_v13 }
 0x3d0   : > { %4045 = vmatpush.xpose.msra.mxu0 %v13258_v43  ;;  %9327 = vmatpush.xpose.msk.msra.mxu1 %vm423_vm0, %v13261_v1  ;;  %v3480_v46 = vpop.f32.mrf.mxu0  ;;  %v3500_v33 = vpop.f32.mrf.mxu1 }
 0x3d1   : > { %4085 = vmatpush.xpose.msra.mxu2 %v13264_v44  ;;  %9344 = vmatpush.xpose.msk.msra.mxu3 %vm423_vm0, %v13267_v6  ;;  %v3501_v5 = vadd.f32 %v3500_v33, %v3480_v46 }
 0x3d4   : > { %4212 = vmatpush.xpose.msrb.mxu0 %v13018_v51  ;;  %9346 = vmatpush.xpose.msk.msrb.mxu1 %vm423_vm0, %v13021_v54  ;;  %v13288_v54 = vadd.f32 %v3501_v5, %v13024_v63  ;;  %v3929_v63 = vld.sshfl [vmem:[#allocation1] sm:$0xff pattern:$0x73625140] }
 0x3d5   : > { %4252 = vmatpush.xpose.msrb.mxu2 %v13027_v23  ;;  %9363 = vmatpush.xpose.msk.msrb.mxu3 %vm423_vm0, %v13030_v60 }
 0x3d6   : > { %15988 = vst [vmem:[#allocation49_spill] sm:$0xff] %v13288_v54  ;;  %4086 = vmatmul.f32.vlgmr.msra.gmra.mxu2 %v3929_v63  ;;  %4046 = vmatmul.f32.vlgmr.msra.gmra.mxu0 %v3929_v63  ;;  %v15991_v63 = vld [vmem:[#allocation3_spill] sm:$0xff]  ;;  %v15996_v54 = vld [vmem:[#allocation5_spill] sm:$0xff] }
 0x3d8   : > { %4213 = vmatpush.xpose.msrb.mxu0 %v13039_v37  ;;  %9347 = vmatpush.xpose.msk.msrb.mxu1 %vm423_vm0, %v13042_v8 }
 0x3d9   : > { %4253 = vmatpush.xpose.msrb.mxu2 %v13045_v57  ;;  %9364 = vmatpush.xpose.msk.msrb.mxu3 %vm423_vm0, %v13048_v12  ;;  %v3520_v8 = vpop.f32.mrf.mxu2  ;;  %v3540_v33 = vpop.f32.mrf.mxu3 }
 0x3da   : > { %v3541_v46 = vadd.f32 %v3540_v33, %v3520_v8  ;;  %v3930_v8 = vld.sshfl [vmem:[#allocation1 + $0x8] sm:$0xff pattern:$0x73625140] }
 0x3db   : > { %9345 = vmatmul.msk.f32.vlgmr.msra.gmra.mxu3 %vm423_vm0, %v3930_v8  ;;  %9328 = vmatmul.msk.f32.vlgmr.msra.gmra.mxu1 %vm423_vm0, %v3930_v8  ;;  %v9187_v8 = vld [vmem:[%s10706_s28 + $0x598] sm:$0xff] }
 0x3dc   : > { %4214 = vmatpush.xpose.msrb.mxu0 %v13060_v16  ;;  %9348 = vmatpush.xpose.msk.msrb.mxu1 %vm423_vm0, %v13063_v18  ;;  %v13300_v5 = vadd.f32 %v3541_v46, %v13054_v14  ;;  %v15990_v14 = vld [vmem:[#allocation9_spill] sm:$0xff] }
 0x3dd   : > { %4254 = vmatpush.xpose.msrb.mxu2 %v13066_v19  ;;  %9365 = vmatpush.xpose.msk.msrb.mxu3 %vm423_vm0, %v13069_v20  ;;  %4110 = vst [vmem:[#allocation1] ss:$4 sm:$0xff] %v15990_v14  ;;  %v15998_v14 = vld [vmem:[#allocation11_spill] sm:$0xff] }
 0x3de   : > { %15989 = vst [vmem:[#allocation50_spill] sm:$0xff] %v13300_v5  ;;  %v13382_v5 = vld [vmem:[%s10706_s28 + $0x7b8] sm:$0xff] }
 0x3e0   : > { %4215 = vmatpush.xpose.msrb.mxu0 %v13078_v21  ;;  %9349 = vmatpush.xpose.msk.msrb.mxu1 %vm423_vm0, %v13081_v48 }
 0x3e1   : > { %4255 = vmatpush.xpose.msrb.mxu2 %v13084_v49  ;;  %9366 = vmatpush.xpose.msk.msrb.mxu3 %vm423_vm0, %v13087_v58 }
 0x3e4   : > { %4216 = vmatpush.xpose.msrb.mxu0 %v13096_v10  ;;  %9350 = vmatpush.xpose.msk.msrb.mxu1 %vm423_vm0, %v13099_v11  ;;  %v4111_v33 = vld.sshfl [vmem:[#allocation1] sm:$0xff pattern:$0x73625140]  ;;  %v4112_v46 = vld.sshfl [vmem:[#allocation1 + $0x8] sm:$0xff pattern:$0x73625140] }
 0x3e5   : > { %4256 = vmatpush.xpose.msrb.mxu2 %v13102_v61  ;;  %9367 = vmatpush.xpose.msk.msrb.mxu3 %vm423_vm0, %v13105_v0  ;;  %4357 = vst [vmem:[#allocation1] ss:$4 sm:$0xff] %v15991_v63  ;;  %v15997_v63 = vld [vmem:[#allocation30_spill] sm:$0xff] }
 0x3e8   : > { %4217 = vmatpush.xpose.msrb.mxu0 %v13114_v62  ;;  %9351 = vmatpush.xpose.msk.msrb.mxu1 %vm423_vm0, %v13117_v3 }
 0x3e9   : > { %4257 = vmatpush.xpose.msrb.mxu2 %v13120_v53  ;;  %9368 = vmatpush.xpose.msk.msrb.mxu3 %vm423_vm0, %v13123_v59 }
 0x3ec   : > { %4218 = vmatpush.xpose.msrb.mxu0 %v13132_v38  ;;  %9352 = vmatpush.xpose.msk.msrb.mxu1 %vm423_vm0, %v13135_v35 }
 0x3ed   : > { %4258 = vmatpush.xpose.msrb.mxu2 %v13138_v24  ;;  %9369 = vmatpush.xpose.msk.msrb.mxu3 %vm423_vm0, %v13141_v22 }
 0x3f0   : > { %4219 = vmatpush.xpose.msrb.mxu0 %v13150_v25  ;;  %9353 = vmatpush.xpose.msk.msrb.mxu1 %vm423_vm0, %v13153_v28 }
 0x3f1   : > { %4259 = vmatpush.xpose.msrb.mxu2 %v13156_v29  ;;  %9370 = vmatpush.xpose.msk.msrb.mxu3 %vm423_vm0, %v13159_v26 }
 0x3f4   : > { %4220 = vmatpush.xpose.msrb.mxu0 %v13168_v27  ;;  %9354 = vmatpush.xpose.msk.msrb.mxu1 %vm423_vm0, %v13171_v50 }
 0x3f5   : > { %4260 = vmatpush.xpose.msrb.mxu2 %v13174_v47  ;;  %9371 = vmatpush.xpose.msk.msrb.mxu3 %vm423_vm0, %v13177_v55 }
 0x3f8   : > { %4221 = vmatpush.xpose.msrb.mxu0 %v13186_v36  ;;  %9355 = vmatpush.xpose.msk.msrb.mxu1 %vm423_vm0, %v13189_v31 }
 0x3f9   : > { %4261 = vmatpush.xpose.msrb.mxu2 %v13192_v41  ;;  %9372 = vmatpush.xpose.msk.msrb.mxu3 %vm423_vm0, %v13195_v34 }
 0x3fc   : > { %4222 = vmatpush.xpose.msrb.mxu0 %v13204_v39  ;;  %9356 = vmatpush.xpose.msk.msrb.mxu1 %vm423_vm0, %v13207_v56 }
 0x3fd   : > { %4262 = vmatpush.xpose.msrb.mxu2 %v13210_v9  ;;  %9373 = vmatpush.xpose.msk.msrb.mxu3 %vm423_vm0, %v13213_v17 }
 0x400   : > { %4223 = vmatpush.xpose.msrb.mxu0 %v13222_v30  ;;  %9357 = vmatpush.xpose.msk.msrb.mxu1 %vm423_vm0, %v13225_v32 }
 0x401   : > { %4263 = vmatpush.xpose.msrb.mxu2 %v13228_v15  ;;  %9374 = vmatpush.xpose.msk.msrb.mxu3 %vm423_vm0, %v13231_v2 }
 0x404   : > { %4224 = vmatpush.xpose.msrb.mxu0 %v13240_v45  ;;  %9358 = vmatpush.xpose.msk.msrb.mxu1 %vm423_vm0, %v13243_v40  ;;  %v9186_v45 = vld [vmem:[%s10706_s28 + $0x590] sm:$0xff]  ;;  %v9185_v40 = vld [vmem:[%s10706_s28 + $0x588] sm:$0xff] }
 0x405   : > { %4264 = vmatpush.xpose.msrb.mxu2 %v13246_v52  ;;  %9375 = vmatpush.xpose.msk.msrb.mxu3 %vm423_vm0, %v13249_v13 }
 0x408   : > { %4225 = vmatpush.xpose.msrb.mxu0 %v13258_v43  ;;  %9359 = vmatpush.xpose.msk.msrb.mxu1 %vm423_vm0, %v13261_v1  ;;  %v9184_v43 = vld [vmem:[%s10706_s28 + $0x580] sm:$0xff]  ;;  %v13379_v1 = vld [vmem:[%s10706_s28 + $0x7b0] sm:$0xff] }
 0x409   : > { %4265 = vmatpush.xpose.msrb.mxu2 %v13264_v44  ;;  %9376 = vmatpush.xpose.msk.msrb.mxu3 %vm423_vm0, %v13267_v6 }
 0x40c   : > { %4226 = vmatpush.xpose.msrb.mxu0 %v9186_v45  ;;  %9360 = vmatpush.xpose.msk.msrb.mxu1 %vm423_vm0, %v9187_v8  ;;  %v15992_v45 = vld [vmem:[#allocation14_spill] sm:$0xff] }
 0x40d   : > { %4266 = vmatpush.xpose.msrb.mxu2 %v12974_v42  ;;  %9377 = vmatpush.xpose.msk.msrb.mxu3 %vm423_vm0, %v12977_v7  ;;  %v13395_v8 = vld [vmem:[%s10706_s28 + $0x7a0] sm:$0xff] }
 0x410   : > { %4227 = vmatpush.xpose.msrb.mxu0 %v9184_v43  ;;  %9361 = vmatpush.xpose.msk.msrb.mxu1 %vm423_vm0, %v9185_v40  ;;  %v13398_v43 = vld [vmem:[%s10706_s28 + $0x7a8] sm:$0xff]  ;;  %v15993_v40 = vld [vmem:[#allocation12_spill] sm:$0xff] }
 0x411   : > { %4267 = vmatpush.xpose.msrb.mxu2 %v12998_v4  ;;  %9378 = vmatpush.xpose.msk.msrb.mxu3 %vm423_vm0, %v15992_v45 }
 0x413   : > { %4228 = vmatmul.f32.vlgmr.msrb.gmra.mxu0 %v4111_v33  ;;  %9362 = vmatmul.msk.f32.vlgmr.msrb.gmra.mxu1 %vm423_vm0, %v4112_v46 }
 0x414   : > { %4459 = vmatpush.xpose.msra.mxu0 %v13246_v52  ;;  %9444 = vmatpush.xpose.msk.msra.mxu1 %vm423_vm0, %v13249_v13 }
 0x415   : > { %4499 = vmatpush.xpose.msra.mxu2 %v13379_v1  ;;  %9461 = vmatpush.xpose.msk.msra.mxu3 %vm423_vm0, %v13382_v5 }
 0x416   : > { %4268 = vmatmul.f32.vlgmr.msrb.gmra.mxu2 %v4111_v33  ;;  %9379 = vmatmul.msk.f32.vlgmr.msrb.gmra.mxu3 %vm423_vm0, %v4112_v46  ;;  %v15994_v33 = vld [vmem:[#allocation13_spill] sm:$0xff]  ;;  %v15995_v46 = vld [vmem:[#allocation15_spill] sm:$0xff] }
 0x418   : > { %4460 = vmatpush.xpose.msra.mxu0 %v13264_v44  ;;  %9445 = vmatpush.xpose.msk.msra.mxu1 %vm423_vm0, %v13267_v6 }
 0x419   : > { %4500 = vmatpush.xpose.msra.mxu2 %v13395_v8  ;;  %9462 = vmatpush.xpose.msk.msra.mxu3 %vm423_vm0, %v13398_v43 }
 0x41c   : > { %4461 = vmatpush.xpose.msra.mxu0 %v12974_v42  ;;  %9446 = vmatpush.xpose.msk.msra.mxu1 %vm423_vm0, %v12977_v7 }
 0x41d   : > { %4501 = vmatpush.xpose.msra.mxu2 %v15993_v40  ;;  %9463 = vmatpush.xpose.msk.msra.mxu3 %vm423_vm0, %v15994_v33 }
 0x420   : > { %4462 = vmatpush.xpose.msra.mxu0 %v12998_v4  ;;  %9447 = vmatpush.xpose.msk.msra.mxu1 %vm423_vm0, %v15992_v45 }
 0x421   : > { %4502 = vmatpush.xpose.msra.mxu2 %v15995_v46  ;;  %9464 = vmatpush.xpose.msk.msra.mxu3 %vm423_vm0, %v15996_v54 }
 0x424   : > { %4463 = vmatpush.xpose.msra.mxu0 %v13018_v51  ;;  %9448 = vmatpush.xpose.msk.msra.mxu1 %vm423_vm0, %v15997_v63 }
 0x425   : > { %4503 = vmatpush.xpose.msra.mxu2 %v13027_v23  ;;  %9465 = vmatpush.xpose.msk.msra.mxu3 %vm423_vm0, %v13030_v60 }
 0x428   : > { %4464 = vmatpush.xpose.msra.mxu0 %v13039_v37  ;;  %9449 = vmatpush.xpose.msk.msra.mxu1 %vm423_vm0, %v15998_v14 }
 0x429   : > { %4504 = vmatpush.xpose.msra.mxu2 %v13045_v57  ;;  %9466 = vmatpush.xpose.msk.msra.mxu3 %vm423_vm0, %v13048_v12 }
 0x42c   : > { %4465 = vmatpush.xpose.msra.mxu0 %v13060_v16  ;;  %9450 = vmatpush.xpose.msk.msra.mxu1 %vm423_vm0, %v13063_v18  ;;  %v4358_v18 = vld.sshfl [vmem:[#allocation1] sm:$0xff pattern:$0x73625140] }
 0x42d   : > { %4505 = vmatpush.xpose.msra.mxu2 %v13066_v19  ;;  %9467 = vmatpush.xpose.msk.msra.mxu3 %vm423_vm0, %v13069_v20  ;;  %v4359_v19 = vld.sshfl [vmem:[#allocation1 + $0x8] sm:$0xff pattern:$0x73625140] }
 0x430   : > { %4466 = vmatpush.xpose.msra.mxu0 %v13078_v21  ;;  %9451 = vmatpush.xpose.msk.msra.mxu1 %vm423_vm0, %v13081_v48  ;;  %v15999_v21 = vld [vmem:[#allocation6_spill] sm:$0xff] }
 0x431   : > { %4506 = vmatpush.xpose.msra.mxu2 %v13084_v49  ;;  %9468 = vmatpush.xpose.msk.msra.mxu3 %vm423_vm0, %v13087_v58  ;;  %4606 = vst [vmem:[#allocation1] ss:$4 sm:$0xff] %v15999_v21  ;;  %v13490_v21 = vld [vmem:[%s10706_s28 + $0x7d0] sm:$0xff] }
 0x434   : > { %4467 = vmatpush.xpose.msra.mxu0 %v13096_v10  ;;  %9452 = vmatpush.xpose.msk.msra.mxu1 %vm423_vm0, %v13099_v11 }
 0x435   : > { %4507 = vmatpush.xpose.msra.mxu2 %v13102_v61  ;;  %9469 = vmatpush.xpose.msk.msra.mxu3 %vm423_vm0, %v13105_v0 }
 0x438   : > { %4468 = vmatpush.xpose.msra.mxu0 %v13114_v62  ;;  %9453 = vmatpush.xpose.msk.msra.mxu1 %vm423_vm0, %v13117_v3 }
 0x439   : > { %4508 = vmatpush.xpose.msra.mxu2 %v13120_v53  ;;  %9470 = vmatpush.xpose.msk.msra.mxu3 %vm423_vm0, %v13123_v59 }
 0x43c   : > { %4469 = vmatpush.xpose.msra.mxu0 %v13132_v38  ;;  %9454 = vmatpush.xpose.msk.msra.mxu1 %vm423_vm0, %v13135_v35 }
 0x43d   : > { %4509 = vmatpush.xpose.msra.mxu2 %v13138_v24  ;;  %9471 = vmatpush.xpose.msk.msra.mxu3 %vm423_vm0, %v13141_v22 }
 0x440   : > { %4470 = vmatpush.xpose.msra.mxu0 %v13150_v25  ;;  %9455 = vmatpush.xpose.msk.msra.mxu1 %vm423_vm0, %v13153_v28 }
 0x441   : > { %4510 = vmatpush.xpose.msra.mxu2 %v13156_v29  ;;  %9472 = vmatpush.xpose.msk.msra.mxu3 %vm423_vm0, %v13159_v26 }
 0x444   : > { %4471 = vmatpush.xpose.msra.mxu0 %v13168_v27  ;;  %9456 = vmatpush.xpose.msk.msra.mxu1 %vm423_vm0, %v13171_v50 }
 0x445   : > { %4511 = vmatpush.xpose.msra.mxu2 %v13174_v47  ;;  %9473 = vmatpush.xpose.msk.msra.mxu3 %vm423_vm0, %v13177_v55 }
 0x448   : > { %4472 = vmatpush.xpose.msra.mxu0 %v13186_v36  ;;  %9457 = vmatpush.xpose.msk.msra.mxu1 %vm423_vm0, %v13189_v31 }
 0x449   : > { %4512 = vmatpush.xpose.msra.mxu2 %v13192_v41  ;;  %9474 = vmatpush.xpose.msk.msra.mxu3 %vm423_vm0, %v13195_v34  ;;  %v13493_v34 = vld [vmem:[%s10706_s28 + $0x7d8] sm:$0xff] }
 0x44c   : > { %4473 = vmatpush.xpose.msra.mxu0 %v13204_v39  ;;  %9458 = vmatpush.xpose.msk.msra.mxu1 %vm423_vm0, %v13207_v56  ;;  %v13506_v39 = vld [vmem:[%s10706_s28 + $0x7c0] sm:$0xff]  ;;  %v13509_v56 = vld [vmem:[%s10706_s28 + $0x7c8] sm:$0xff] }
 0x44d   : > { %4513 = vmatpush.xpose.msra.mxu2 %v13210_v9  ;;  %9475 = vmatpush.xpose.msk.msra.mxu3 %vm423_vm0, %v13213_v17  ;;  %16000 = vst [vmem:[#allocation14_spill] sm:$0xff] %v13506_v39 }
 0x450   : > { %4474 = vmatpush.xpose.msra.mxu0 %v13222_v30  ;;  %9459 = vmatpush.xpose.msk.msra.mxu1 %vm423_vm0, %v13225_v32 }
 0x451   : > { %4514 = vmatpush.xpose.msra.mxu2 %v13228_v15  ;;  %9476 = vmatpush.xpose.msk.msra.mxu3 %vm423_vm0, %v13231_v2 }
 0x453   : > { %4475 = vmatmul.f32.vlgmr.msra.gmra.mxu0 %v4358_v18  ;;  %9460 = vmatmul.msk.f32.vlgmr.msra.gmra.mxu1 %vm423_vm0, %v4359_v19 }
 0x454   : > { %4708 = vmatpush.xpose.msrb.mxu0 %v13210_v9  ;;  %9542 = vmatpush.xpose.msk.msrb.mxu1 %vm423_vm0, %v13213_v17 }
 0x455   : > { %4748 = vmatpush.xpose.msrb.mxu2 %v13490_v21  ;;  %9559 = vmatpush.xpose.msk.msrb.mxu3 %vm423_vm0, %v13493_v34 }
 0x456   : > { %4515 = vmatmul.f32.vlgmr.msra.gmra.mxu2 %v4358_v18  ;;  %9477 = vmatmul.msk.f32.vlgmr.msra.gmra.mxu3 %vm423_vm0, %v4359_v19  ;;  %v13554_v18 = vpop.f32.mrf.mxu3  ;;  %v16007_v19 = vld [vmem:[#allocation4_spill] sm:$0xff] }
 0x457   : > { %16004 = vst [vmem:[#allocation5_spill] sm:$0xff] %v13554_v18 }
 0x458   : > { %4709 = vmatpush.xpose.msrb.mxu0 %v13228_v15  ;;  %9543 = vmatpush.xpose.msk.msrb.mxu1 %vm423_vm0, %v13231_v2 }
 0x459   : > { %4749 = vmatpush.xpose.msrb.mxu2 %v13506_v39  ;;  %9560 = vmatpush.xpose.msk.msrb.mxu3 %vm423_vm0, %v13509_v56 }
 0x45c   : > { %4710 = vmatpush.xpose.msrb.mxu0 %v13246_v52  ;;  %9544 = vmatpush.xpose.msk.msrb.mxu1 %vm423_vm0, %v13249_v13 }
 0x45d   : > { %4750 = vmatpush.xpose.msrb.mxu2 %v13379_v1  ;;  %9561 = vmatpush.xpose.msk.msrb.mxu3 %vm423_vm0, %v13382_v5 }
 0x460   : > { %4711 = vmatpush.xpose.msrb.mxu0 %v13264_v44  ;;  %9545 = vmatpush.xpose.msk.msrb.mxu1 %vm423_vm0, %v13267_v6 }
 0x461   : > { %4751 = vmatpush.xpose.msrb.mxu2 %v13395_v8  ;;  %9562 = vmatpush.xpose.msk.msrb.mxu3 %vm423_vm0, %v13398_v43 }
 0x464   : > { %4712 = vmatpush.xpose.msrb.mxu0 %v12974_v42  ;;  %9546 = vmatpush.xpose.msk.msrb.mxu1 %vm423_vm0, %v12977_v7  ;;  %v13545_v42 = vpop.f32.mrf.mxu0  ;;  %v13547_v7 = vpop.f32.mrf.mxu1 }
 0x465   : > { %4752 = vmatpush.xpose.msrb.mxu2 %v15993_v40  ;;  %9563 = vmatpush.xpose.msk.msrb.mxu3 %vm423_vm0, %v15994_v33  ;;  %16001 = vst [vmem:[#allocation12_spill] sm:$0xff] %v13545_v42  ;;  %v13764_v40 = vld [vmem:[%s10706_s28 + $0x648] sm:$0xff]  ;;  %v13767_v33 = vld [vmem:[%s10706_s28 + $0x740] sm:$0xff]  ;;  %v13902_v42 = vld [vmem:[%s10706_s28 + $0x6d8] sm:$0xff] }
 0x466   : > { %16002 = vst [vmem:[#allocation13_spill] sm:$0xff] %v13547_v7  ;;  %v13899_v7 = vld [vmem:[%s10706_s28 + $0x6d0] sm:$0xff] }
 0x468   : > { %4713 = vmatpush.xpose.msrb.mxu0 %v12998_v4  ;;  %9547 = vmatpush.xpose.msk.msrb.mxu1 %vm423_vm0, %v15992_v45  ;;  %v13552_v4 = vpop.f32.mrf.mxu2  ;;  %v13761_v45 = vld [vmem:[%s10706_s28 + $0x640] sm:$0xff] }
 0x469   : > { %4753 = vmatpush.xpose.msrb.mxu2 %v15995_v46  ;;  %9564 = vmatpush.xpose.msk.msrb.mxu3 %vm423_vm0, %v15996_v54  ;;  %16003 = vst [vmem:[#allocation15_spill] sm:$0xff] %v13552_v4  ;;  %v4607_v54 = vld.sshfl [vmem:[#allocation1] sm:$0xff pattern:$0x73625140]  ;;  %v13770_v46 = vld [vmem:[%s10706_s28 + $0x748] sm:$0xff] }
 0x46c   : > { %4714 = vmatpush.xpose.msrb.mxu0 %v13018_v51  ;;  %9548 = vmatpush.xpose.msk.msrb.mxu1 %vm423_vm0, %v15997_v63  ;;  %v16005_v51 = vld [vmem:[#allocation45_spill] sm:$0xff]  ;;  %v4067_v30 = vpop.f32.mrf.mxu1 }
 0x46d   : > { %4754 = vmatpush.xpose.msrb.mxu2 %v13027_v23  ;;  %9565 = vmatpush.xpose.msk.msrb.mxu3 %vm423_vm0, %v13030_v60  ;;  %v4608_v23 = vld.sshfl [vmem:[#allocation1 + $0x8] sm:$0xff pattern:$0x73625140]  ;;  %v16006_v60 = vld [vmem:[#allocation46_spill] sm:$0xff]  ;;  %v13752_v63 = vld [vmem:[%s10706_s28 + $0x758] sm:$0xff] }
 0x46e   : > { %4855 = vst [vmem:[#allocation1] ss:$4 sm:$0xff] %v16007_v19  ;;  %v13869_v19 = vld [vmem:[%s10706_s28 + $0x6f0] sm:$0xff] }
 0x470   : > { %4715 = vmatpush.xpose.msrb.mxu0 %v13039_v37  ;;  %9549 = vmatpush.xpose.msk.msrb.mxu1 %vm423_vm0, %v15998_v14  ;;  %v4047_v37 = vpop.f32.mrf.mxu0  ;;  %v4087_v32 = vpop.f32.mrf.mxu2 }
 0x471   : > { %4755 = vmatpush.xpose.msrb.mxu2 %v13045_v57  ;;  %9566 = vmatpush.xpose.msk.msrb.mxu3 %vm423_vm0, %v13048_v12  ;;  %v4068_v57 = vadd.f32 %v4067_v30, %v4047_v37  ;;  %v4107_v14 = vpop.f32.mrf.mxu3  ;;  %v16008_v12 = vld [vmem:[#allocation47_spill] sm:$0xff]  ;;  %v13797_v37 = vld [vmem:[%s10706_s28 + $0x620] sm:$0xff] }
 0x472   : > { %v13800_v30 = vld [vmem:[%s10706_s28 + $0x628] sm:$0xff] }
 0x474   : > { %4716 = vmatpush.xpose.msrb.mxu0 %v13060_v16  ;;  %9550 = vmatpush.xpose.msk.msrb.mxu1 %vm423_vm0, %v16005_v51  ;;  %v4108_v16 = vadd.f32 %v4107_v14, %v4087_v32  ;;  %v13779_v51 = vld [vmem:[%s10706_s28 + $0x630] sm:$0xff]  ;;  %v13806_v32 = vld [vmem:[%s10706_s28 + $0x728] sm:$0xff] }
 0x475   : > { %4756 = vmatpush.xpose.msrb.mxu2 %v16006_v60  ;;  %9567 = vmatpush.xpose.msk.msrb.mxu3 %vm423_vm0, %v13069_v20  ;;  %v13609_v20 = vld [vmem:[%s10706_s28 + $0x7f0] sm:$0xff]  ;;  %v13788_v60 = vld [vmem:[%s10706_s28 + $0x738] sm:$0xff] }
 0x476   : > { %v9578_v14 = vld [vmem:[%s10706_s28 + $0x610] sm:$0xff] }
 0x478   : > { %4717 = vmatpush.xpose.msrb.mxu0 %v16008_v12  ;;  %9551 = vmatpush.xpose.msk.msrb.mxu1 %vm423_vm0, %v13081_v48  ;;  %v13612_v48 = vld [vmem:[%s10706_s28 + $0x7f8] sm:$0xff] }
 0x479   : > { %4757 = vmatpush.xpose.msrb.mxu2 %v13084_v49  ;;  %9568 = vmatpush.xpose.msk.msrb.mxu3 %vm423_vm0, %v13087_v58  ;;  %v16009_v49 = vld [vmem:[#allocation48_spill] sm:$0xff]  ;;  %v13625_v58 = vld [vmem:[%s10706_s28 + $0x7e0] sm:$0xff]  ;;  %v9579_v12 = vld [vmem:[%s10706_s28 + $0x618] sm:$0xff] }
 0x47c   : > { %4718 = vmatpush.xpose.msrb.mxu0 %v13096_v10  ;;  %9552 = vmatpush.xpose.msk.msrb.mxu1 %vm423_vm0, %v13099_v11  ;;  %v13628_v10 = vld [vmem:[%s10706_s28 + $0x7e8] sm:$0xff] }
 0x47d   : > { %4758 = vmatpush.xpose.msrb.mxu2 %v13102_v61  ;;  %9569 = vmatpush.xpose.msk.msrb.mxu3 %vm423_vm0, %v13105_v0 }
 0x480   : > { %4719 = vmatpush.xpose.msrb.mxu0 %v13114_v62  ;;  %9553 = vmatpush.xpose.msk.msrb.mxu1 %vm423_vm0, %v13117_v3 }
 0x481   : > { %4759 = vmatpush.xpose.msrb.mxu2 %v13120_v53  ;;  %9570 = vmatpush.xpose.msk.msrb.mxu3 %vm423_vm0, %v13123_v59 }
 0x484   : > { %4720 = vmatpush.xpose.msrb.mxu0 %v13132_v38  ;;  %9554 = vmatpush.xpose.msk.msrb.mxu1 %vm423_vm0, %v13135_v35  ;;  %v13666_v35 = vld [vmem:[%s10706_s28 + $0x690] sm:$0xff] }
 0x485   : > { %4760 = vmatpush.xpose.msrb.mxu2 %v13138_v24  ;;  %9571 = vmatpush.xpose.msk.msrb.mxu3 %vm423_vm0, %v13141_v22  ;;  %v13669_v24 = vld [vmem:[%s10706_s28 + $0x698] sm:$0xff]  ;;  %v13672_v22 = vld [vmem:[%s10706_s28 + $0x790] sm:$0xff] }
 0x488   : > { %4721 = vmatpush.xpose.msrb.mxu0 %v13150_v25  ;;  %9555 = vmatpush.xpose.msk.msrb.mxu1 %vm423_vm0, %v13153_v28  ;;  %v13675_v25 = vld [vmem:[%s10706_s28 + $0x798] sm:$0xff]  ;;  %v13690_v28 = vld [vmem:[%s10706_s28 + $0x780] sm:$0xff] }
 0x489   : > { %4761 = vmatpush.xpose.msrb.mxu2 %v13156_v29  ;;  %9572 = vmatpush.xpose.msk.msrb.mxu3 %vm423_vm0, %v13159_v26  ;;  %v13693_v29 = vld [vmem:[%s10706_s28 + $0x788] sm:$0xff]  ;;  %v13702_v26 = vld [vmem:[%s10706_s28 + $0x670] sm:$0xff] }
 0x48c   : > { %4722 = vmatpush.xpose.msrb.mxu0 %v13168_v27  ;;  %9556 = vmatpush.xpose.msk.msrb.mxu1 %vm423_vm0, %v13171_v50  ;;  %v13705_v27 = vld [vmem:[%s10706_s28 + $0x678] sm:$0xff]  ;;  %v13708_v50 = vld [vmem:[%s10706_s28 + $0x770] sm:$0xff] }
 0x48d   : > { %4762 = vmatpush.xpose.msrb.mxu2 %v13174_v47  ;;  %9573 = vmatpush.xpose.msk.msrb.mxu3 %vm423_vm0, %v13177_v55 }
 0x490   : > { %4723 = vmatpush.xpose.msrb.mxu0 %v13186_v36  ;;  %9557 = vmatpush.xpose.msk.msrb.mxu1 %vm423_vm0, %v13189_v31  ;;  %v4229_v11 = vpop.f32.mrf.mxu0  ;;  %v4249_v61 = vpop.f32.mrf.mxu1  ;;  %v13718_v36 = vld.sshfl [vmem:[#allocation1 + $0x8] sm:$0xff pattern:$0x73625140]  ;;  %v13724_v31 = vld [vmem:[%s10706_s28 + $0x660] sm:$0xff] }
 0x491   : > { %4763 = vmatpush.xpose.msrb.mxu2 %v13192_v41  ;;  %9574 = vmatpush.xpose.msk.msrb.mxu3 %vm423_vm0, %v16009_v49  ;;  %v4230_v0 = vadd.f32 %v4229_v11, %v4068_v57  ;;  %v13803_v57 = vld [vmem:[%s10706_s28 + $0x720] sm:$0xff] }
 0x492   : > { %v9576_v11 = vld [vmem:[%s10706_s28 + $0x600] sm:$0xff] }
 0x493   : > { %4724 = vmatmul.f32.vlgmr.msrb.gmra.mxu0 %v4607_v54  ;;  %9558 = vmatmul.msk.f32.vlgmr.msrb.gmra.mxu1 %vm423_vm0, %v4608_v23  ;;  %v13637_v62 = vadd.f32 %v4249_v61, %v4230_v0  ;;  %v9577_v61 = vld [vmem:[%s10706_s28 + $0x608] sm:$0xff]  ;;  %v13829_v0 = vld [vmem:[%s10706_s28 + $0x700] sm:$0xff] }
 0x494   : > { %4957 = vmatpush.xpose.msra.mxu0 %v13174_v47  ;;  %9640 = vmatpush.xpose.msk.msra.mxu1 %vm423_vm0, %v13177_v55  ;;  %v13711_v47 = vld [vmem:[%s10706_s28 + $0x778] sm:$0xff]  ;;  %v13716_v55 = vld.sshfl [vmem:[#allocation1] sm:$0xff pattern:$0x73625140] }
 0x495   : > { %4997 = vmatpush.xpose.msra.mxu2 %v13609_v20  ;;  %9657 = vmatpush.xpose.msk.msra.mxu3 %vm423_vm0, %v13612_v48 }
 0x496   : > { %4764 = vmatmul.f32.vlgmr.msrb.gmra.mxu2 %v4607_v54  ;;  %9575 = vmatmul.msk.f32.vlgmr.msrb.gmra.mxu3 %vm423_vm0, %v4608_v23  ;;  %v13782_v54 = vld [vmem:[%s10706_s28 + $0x638] sm:$0xff]  ;;  %v13785_v23 = vld [vmem:[%s10706_s28 + $0x730] sm:$0xff] }
 0x498   : > { %4958 = vmatpush.xpose.msra.mxu0 %v13192_v41  ;;  %9641 = vmatpush.xpose.msk.msra.mxu1 %vm423_vm0, %v16009_v49  ;;  %v13727_v41 = vld [vmem:[%s10706_s28 + $0x668] sm:$0xff]  ;;  %v13820_v49 = vld [vmem:[%s10706_s28 + $0x718] sm:$0xff] }
 0x499   : > { %4998 = vmatpush.xpose.msra.mxu2 %v13625_v58  ;;  %9658 = vmatpush.xpose.msk.msra.mxu3 %vm423_vm0, %v13628_v10  ;;  %v4269_v3 = vpop.f32.mrf.mxu2  ;;  %v4289_v53 = vpop.f32.mrf.mxu3 }
 0x49a   : > { %v4270_v59 = vadd.f32 %v4269_v3, %v4108_v16  ;;  %v13817_v16 = vld [vmem:[%s10706_s28 + $0x710] sm:$0xff]  ;;  %v13832_v3 = vld [vmem:[%s10706_s28 + $0x708] sm:$0xff] }
 0x49c   : > { %4959 = vmatpush.xpose.msra.mxu0 %v13210_v9  ;;  %9642 = vmatpush.xpose.msk.msra.mxu1 %vm423_vm0, %v13213_v17  ;;  %v13648_v38 = vadd.f32 %v4289_v53, %v4270_v59  ;;  %v16010_v9 = vld [vmem:[#allocation7_spill] sm:$0xff]  ;;  %v13731_v17 = vld [vmem:[%s10706_s28 + $0x760] sm:$0xff]  ;;  %v13836_v53 = vld [vmem:[%s10706_s28 + $0x810] sm:$0xff] }
 0x49d   : > { %4999 = vmatpush.xpose.msra.mxu2 %v13490_v21  ;;  %9659 = vmatpush.xpose.msk.msra.mxu3 %vm423_vm0, %v13493_v34  ;;  %5104 = vst [vmem:[#allocation1] ss:$4 sm:$0xff] %v16010_v9  ;;  %v13839_v59 = vld [vmem:[%s10706_s28 + $0x818] sm:$0xff] }
 0x4a0   : > { %4960 = vmatpush.xpose.msra.mxu0 %v13228_v15  ;;  %9643 = vmatpush.xpose.msk.msra.mxu1 %vm423_vm0, %v13231_v2  ;;  %v13734_v15 = vld [vmem:[%s10706_s28 + $0x768] sm:$0xff]  ;;  %v13743_v2 = vld [vmem:[%s10706_s28 + $0x650] sm:$0xff] }
 0x4a1   : > { %5000 = vmatpush.xpose.msra.mxu2 %v13506_v39  ;;  %9660 = vmatpush.xpose.msk.msra.mxu3 %vm423_vm0, %v13509_v56 }
 0x4a4   : > { %4961 = vmatpush.xpose.msra.mxu0 %v13246_v52  ;;  %9644 = vmatpush.xpose.msk.msra.mxu1 %vm423_vm0, %v13249_v13  ;;  %v13746_v52 = vld [vmem:[%s10706_s28 + $0x658] sm:$0xff]  ;;  %v13749_v13 = vld [vmem:[%s10706_s28 + $0x750] sm:$0xff] }
 0x4a5   : > { %5001 = vmatpush.xpose.msra.mxu2 %v13379_v1  ;;  %9661 = vmatpush.xpose.msk.msra.mxu3 %vm423_vm0, %v13382_v5 }
 0x4a8   : > { %4962 = vmatpush.xpose.msra.mxu0 %v13264_v44  ;;  %9645 = vmatpush.xpose.msk.msra.mxu1 %vm423_vm0, %v13267_v6  ;;  %v13684_v6 = vld [vmem:[%s10706_s28 + $0x680] sm:$0xff]  ;;  %v13687_v44 = vld [vmem:[%s10706_s28 + $0x688] sm:$0xff] }
 0x4a9   : > { %5002 = vmatpush.xpose.msra.mxu2 %v13395_v8  ;;  %9662 = vmatpush.xpose.msk.msra.mxu3 %vm423_vm0, %v13398_v43 }
 0x4ac   : > { %4963 = vmatpush.xpose.msra.mxu0 %v13666_v35  ;;  %9646 = vmatpush.xpose.msk.msra.mxu1 %vm423_vm0, %v13669_v24 }
 0x4ad   : > { %5003 = vmatpush.xpose.msra.mxu2 %v13672_v22  ;;  %9663 = vmatpush.xpose.msk.msra.mxu3 %vm423_vm0, %v13675_v25 }
 0x4b0   : > { %4964 = vmatpush.xpose.msra.mxu0 %v13684_v6  ;;  %9647 = vmatpush.xpose.msk.msra.mxu1 %vm423_vm0, %v13687_v44 }
 0x4b1   : > { %5004 = vmatpush.xpose.msra.mxu2 %v13690_v28  ;;  %9664 = vmatpush.xpose.msk.msra.mxu3 %vm423_vm0, %v13693_v29 }
 0x4b4   : > { %4965 = vmatpush.xpose.msra.mxu0 %v13702_v26  ;;  %9648 = vmatpush.xpose.msk.msra.mxu1 %vm423_vm0, %v13705_v27 }
 0x4b5   : > { %5005 = vmatpush.xpose.msra.mxu2 %v13708_v50  ;;  %9665 = vmatpush.xpose.msk.msra.mxu3 %vm423_vm0, %v13711_v47 }
 0x4b8   : > { %4966 = vmatpush.xpose.msra.mxu0 %v13724_v31  ;;  %9649 = vmatpush.xpose.msk.msra.mxu1 %vm423_vm0, %v13727_v41 }
 0x4b9   : > { %5006 = vmatpush.xpose.msra.mxu2 %v13731_v17  ;;  %9666 = vmatpush.xpose.msk.msra.mxu3 %vm423_vm0, %v13734_v15 }
 0x4bc   : > { %4967 = vmatpush.xpose.msra.mxu0 %v13743_v2  ;;  %9650 = vmatpush.xpose.msk.msra.mxu1 %vm423_vm0, %v13746_v52 }
 0x4bd   : > { %5007 = vmatpush.xpose.msra.mxu2 %v13749_v13  ;;  %9667 = vmatpush.xpose.msk.msra.mxu3 %vm423_vm0, %v13752_v63 }
 0x4c0   : > { %4968 = vmatpush.xpose.msra.mxu0 %v13761_v45  ;;  %9651 = vmatpush.xpose.msk.msra.mxu1 %vm423_vm0, %v13764_v40 }
 0x4c1   : > { %5008 = vmatpush.xpose.msra.mxu2 %v13767_v33  ;;  %9668 = vmatpush.xpose.msk.msra.mxu3 %vm423_vm0, %v13770_v46 }
 0x4c4   : > { %4969 = vmatpush.xpose.msra.mxu0 %v13779_v51  ;;  %9652 = vmatpush.xpose.msk.msra.mxu1 %vm423_vm0, %v13782_v54 }
 0x4c5   : > { %5009 = vmatpush.xpose.msra.mxu2 %v13785_v23  ;;  %9669 = vmatpush.xpose.msk.msra.mxu3 %vm423_vm0, %v13788_v60 }
 0x4c8   : > { %4970 = vmatpush.xpose.msra.mxu0 %v13797_v37  ;;  %9653 = vmatpush.xpose.msk.msra.mxu1 %vm423_vm0, %v13800_v30 }
 0x4c9   : > { %5010 = vmatpush.xpose.msra.mxu2 %v13803_v57  ;;  %9670 = vmatpush.xpose.msk.msra.mxu3 %vm423_vm0, %v13806_v32 }
 0x4cc   : > { %4971 = vmatpush.xpose.msra.mxu0 %v9578_v14  ;;  %9654 = vmatpush.xpose.msk.msra.mxu1 %vm423_vm0, %v9579_v12  ;;  %v13854_v14 = vld [vmem:[%s10706_s28 + $0x800] sm:$0xff]  ;;  %v13857_v12 = vld [vmem:[%s10706_s28 + $0x808] sm:$0xff] }
 0x4cd   : > { %5011 = vmatpush.xpose.msra.mxu2 %v13817_v16  ;;  %9671 = vmatpush.xpose.msk.msra.mxu3 %vm423_vm0, %v13820_v49 }
 0x4d0   : > { %4972 = vmatpush.xpose.msra.mxu0 %v9576_v11  ;;  %9655 = vmatpush.xpose.msk.msra.mxu1 %vm423_vm0, %v9577_v61  ;;  %v4476_v11 = vpop.f32.mrf.mxu0  ;;  %v4496_v61 = vpop.f32.mrf.mxu1 }
 0x4d1   : > { %5012 = vmatpush.xpose.msra.mxu2 %v13829_v0  ;;  %9672 = vmatpush.xpose.msk.msra.mxu3 %vm423_vm0, %v13832_v3  ;;  %v4497_v9 = vadd.f32 %v4496_v61, %v4476_v11  ;;  %v13884_v11 = vld [vmem:[%s10706_s28 + $0x6e0] sm:$0xff]  ;;  %v13887_v61 = vld [vmem:[%s10706_s28 + $0x6e8] sm:$0xff] }
 0x4d3   : > { %4973 = vmatmul.f32.vlgmr.msra.gmra.mxu0 %v13716_v55  ;;  %9656 = vmatmul.msk.f32.vlgmr.msra.gmra.mxu1 %vm423_vm0, %v13718_v36 }
 0x4d4   : > { %5206 = vmatpush.xpose.msrb.mxu0 %v13817_v16  ;;  %9738 = vmatpush.xpose.msk.msrb.mxu1 %vm423_vm0, %v13820_v49 }
 0x4d5   : > { %5246 = vmatpush.xpose.msrb.mxu2 %v13836_v53  ;;  %9755 = vmatpush.xpose.msk.msrb.mxu3 %vm423_vm0, %v13839_v59 }
 0x4d6   : > { %5013 = vmatmul.f32.vlgmr.msra.gmra.mxu2 %v13716_v55  ;;  %9673 = vmatmul.msk.f32.vlgmr.msra.gmra.mxu3 %vm423_vm0, %v13718_v36  ;;  %v13872_v55 = vld [vmem:[%s10706_s28 + $0x6f8] sm:$0xff]  ;;  %v13875_v36 = vadd.f32 %v4497_v9, %v13637_v62 }
 0x4d8   : > { %5207 = vmatpush.xpose.msrb.mxu0 %v13829_v0  ;;  %9739 = vmatpush.xpose.msk.msrb.mxu1 %vm423_vm0, %v13832_v3 }
 0x4d9   : > { %5247 = vmatpush.xpose.msrb.mxu2 %v13854_v14  ;;  %9756 = vmatpush.xpose.msk.msrb.mxu3 %vm423_vm0, %v13857_v12  ;;  %v4516_v18 = vpop.f32.mrf.mxu2  ;;  %v4536_v62 = vpop.f32.mrf.mxu3 }
 0x4da   : > { %v4537_v9 = vadd.f32 %v4536_v62, %v4516_v18  ;;  %v13911_v18 = vld [vmem:[%s10706_s28 + $0x6c0] sm:$0xff]  ;;  %v13923_v62 = vld [vmem:[%s10706_s28 + $0x6b0] sm:$0xff] }
 0x4dc   : > { %5208 = vmatpush.xpose.msrb.mxu0 %v13869_v19  ;;  %9740 = vmatpush.xpose.msk.msrb.mxu1 %vm423_vm0, %v13872_v55  ;;  %v13893_v4 = vadd.f32 %v4537_v9, %v13648_v38  ;;  %v13914_v38 = vld [vmem:[%s10706_s28 + $0x6c8] sm:$0xff]  ;;  %v13926_v9 = vld [vmem:[%s10706_s28 + $0x6b8] sm:$0xff] }
 0x4dd   : > { %5248 = vmatpush.xpose.msrb.mxu2 %v13609_v20  ;;  %9757 = vmatpush.xpose.msk.msrb.mxu3 %vm423_vm0, %v13612_v48  ;;  %16011 = vst [vmem:[#allocation30_spill] sm:$0xff] %v13914_v38 }
 0x4e0   : > { %5209 = vmatpush.xpose.msrb.mxu0 %v13884_v11  ;;  %9741 = vmatpush.xpose.msk.msrb.mxu1 %vm423_vm0, %v13887_v61 }
 0x4e1   : > { %5249 = vmatpush.xpose.msrb.mxu2 %v13625_v58  ;;  %9758 = vmatpush.xpose.msk.msrb.mxu3 %vm423_vm0, %v13628_v10 }
 0x4e4   : > { %5210 = vmatpush.xpose.msrb.mxu0 %v13899_v7  ;;  %9742 = vmatpush.xpose.msk.msrb.mxu1 %vm423_vm0, %v13902_v42 }
 0x4e5   : > { %5250 = vmatpush.xpose.msrb.mxu2 %v13490_v21  ;;  %9759 = vmatpush.xpose.msk.msrb.mxu3 %vm423_vm0, %v13493_v34 }
 0x4e8   : > { %5211 = vmatpush.xpose.msrb.mxu0 %v13911_v18  ;;  %9743 = vmatpush.xpose.msk.msrb.mxu1 %vm423_vm0, %v13914_v38  ;;  %v13935_v38 = vld [vmem:[%s10706_s28 + $0x6a0] sm:$0xff] }
 0x4e9   : > { %5251 = vmatpush.xpose.msrb.mxu2 %v13506_v39  ;;  %9760 = vmatpush.xpose.msk.msrb.mxu3 %vm423_vm0, %v13509_v56  ;;  %16012 = vst [vmem:[#allocation11_spill] sm:$0xff] %v13935_v38  ;;  %v13938_v39 = vld [vmem:[%s10706_s28 + $0x6a8] sm:$0xff] }
 0x4ec   : > { %5212 = vmatpush.xpose.msrb.mxu0 %v13923_v62  ;;  %9744 = vmatpush.xpose.msk.msrb.mxu1 %vm423_vm0, %v13926_v9 }
 0x4ed   : > { %5252 = vmatpush.xpose.msrb.mxu2 %v13379_v1  ;;  %9761 = vmatpush.xpose.msk.msrb.mxu3 %vm423_vm0, %v13382_v5  ;;  %v5105_v5 = vld.sshfl [vmem:[#allocation1] sm:$0xff pattern:$0x73625140]  ;;  %v5106_v1 = vld.sshfl [vmem:[#allocation1 + $0x8] sm:$0xff pattern:$0x73625140] }
 0x4f0   : > { %5213 = vmatpush.xpose.msrb.mxu0 %v13935_v38  ;;  %9745 = vmatpush.xpose.msk.msrb.mxu1 %vm423_vm0, %v13938_v39  ;;  %v16013_v38 = vld [vmem:[#allocation10_spill] sm:$0xff] }
 0x4f1   : > { %5253 = vmatpush.xpose.msrb.mxu2 %v13395_v8  ;;  %9762 = vmatpush.xpose.msk.msrb.mxu3 %vm423_vm0, %v13398_v43  ;;  %5353 = vst [vmem:[#allocation1] ss:$4 sm:$0xff] %v16013_v38  ;;  %v9834_v8 = vld [vmem:[%s10706_s28 + $0x830] sm:$0xff]  ;;  %v9835_v43 = vld [vmem:[%s10706_s28 + $0x838] sm:$0xff]  ;;  %v14382_v38 = vld [vmem:[%s10706_s28 + $0x868] sm:$0xff] }
 0x4f4   : > { %5214 = vmatpush.xpose.msrb.mxu0 %v13666_v35  ;;  %9746 = vmatpush.xpose.msk.msrb.mxu1 %vm423_vm0, %v13669_v24 }
 0x4f5   : > { %5254 = vmatpush.xpose.msrb.mxu2 %v13672_v22  ;;  %9763 = vmatpush.xpose.msk.msrb.mxu3 %vm423_vm0, %v13675_v25 }
 0x4f8   : > { %5215 = vmatpush.xpose.msrb.mxu0 %v13684_v6  ;;  %9747 = vmatpush.xpose.msk.msrb.mxu1 %vm423_vm0, %v13687_v44 }
 0x4f9   : > { %5255 = vmatpush.xpose.msrb.mxu2 %v13690_v28  ;;  %9764 = vmatpush.xpose.msk.msrb.mxu3 %vm423_vm0, %v13693_v29 }
 0x4fc   : > { %5216 = vmatpush.xpose.msrb.mxu0 %v13702_v26  ;;  %9748 = vmatpush.xpose.msk.msrb.mxu1 %vm423_vm0, %v13705_v27 }
 0x4fd   : > { %5256 = vmatpush.xpose.msrb.mxu2 %v13708_v50  ;;  %9765 = vmatpush.xpose.msk.msrb.mxu3 %vm423_vm0, %v13711_v47 }
 0x500   : > { %5217 = vmatpush.xpose.msrb.mxu0 %v13724_v31  ;;  %9749 = vmatpush.xpose.msk.msrb.mxu1 %vm423_vm0, %v13727_v41 }
 0x501   : > { %5257 = vmatpush.xpose.msrb.mxu2 %v13731_v17  ;;  %9766 = vmatpush.xpose.msk.msrb.mxu3 %vm423_vm0, %v13734_v15 }
 0x504   : > { %5218 = vmatpush.xpose.msrb.mxu0 %v13743_v2  ;;  %9750 = vmatpush.xpose.msk.msrb.mxu1 %vm423_vm0, %v13746_v52 }
 0x505   : > { %5258 = vmatpush.xpose.msrb.mxu2 %v13749_v13  ;;  %9767 = vmatpush.xpose.msk.msrb.mxu3 %vm423_vm0, %v13752_v63 }
 0x508   : > { %5219 = vmatpush.xpose.msrb.mxu0 %v13761_v45  ;;  %9751 = vmatpush.xpose.msk.msrb.mxu1 %vm423_vm0, %v13764_v40 }
 0x509   : > { %5259 = vmatpush.xpose.msrb.mxu2 %v13767_v33  ;;  %9768 = vmatpush.xpose.msk.msrb.mxu3 %vm423_vm0, %v13770_v46 }
 0x50c   : > { %5220 = vmatpush.xpose.msrb.mxu0 %v13779_v51  ;;  %9752 = vmatpush.xpose.msk.msrb.mxu1 %vm423_vm0, %v13782_v54  ;;  %v9832_v51 = vld [vmem:[%s10706_s28 + $0x820] sm:$0xff]  ;;  %v9833_v54 = vld [vmem:[%s10706_s28 + $0x828] sm:$0xff] }
 0x50d   : > { %5260 = vmatpush.xpose.msrb.mxu2 %v13785_v23  ;;  %9769 = vmatpush.xpose.msk.msrb.mxu3 %vm423_vm0, %v13788_v60 }
 0x510   : > { %5221 = vmatpush.xpose.msrb.mxu0 %v13797_v37  ;;  %9753 = vmatpush.xpose.msk.msrb.mxu1 %vm423_vm0, %v13800_v30  ;;  %v4725_v37 = vpop.f32.mrf.mxu0  ;;  %v4745_v30 = vpop.f32.mrf.mxu1 }
 0x511   : > { %5261 = vmatpush.xpose.msrb.mxu2 %v13803_v57  ;;  %9770 = vmatpush.xpose.msk.msrb.mxu3 %vm423_vm0, %v13806_v32 }
 0x513   : > { %5222 = vmatmul.f32.vlgmr.msrb.gmra.mxu0 %v5105_v5  ;;  %9754 = vmatmul.msk.f32.vlgmr.msrb.gmra.mxu1 %vm423_vm0, %v5106_v1 }
 0x514   : > { %5455 = vmatpush.xpose.msra.mxu0 %v13785_v23  ;;  %9836 = vmatpush.xpose.msk.msra.mxu1 %vm423_vm0, %v13788_v60  ;;  %v4746_v23 = vadd.f32 %v4745_v30, %v4725_v37  ;;  %v14274_v37 = vld [vmem:[%s10706_s28 + $0x8c8] sm:$0xff]  ;;  %v14277_v30 = vld [vmem:[%s10706_s28 + $0x9c0] sm:$0xff] }
 0x515   : > { %5495 = vmatpush.xpose.msra.mxu2 %v9834_v8  ;;  %9853 = vmatpush.xpose.msk.msra.mxu3 %vm423_vm0, %v9835_v43  ;;  %v14256_v8 = vld [vmem:[%s10706_s28 + $0x8d8] sm:$0xff]  ;;  %v14259_v43 = vld [vmem:[%s10706_s28 + $0x9d0] sm:$0xff] }
 0x516   : > { %5262 = vmatmul.f32.vlgmr.msrb.gmra.mxu2 %v5105_v5  ;;  %9771 = vmatmul.msk.f32.vlgmr.msrb.gmra.mxu3 %vm423_vm0, %v5106_v1  ;;  %v14010_v60 = vadd.f32 %v4746_v23, %v13875_v36  ;;  %v14253_v1 = vld [vmem:[%s10706_s28 + $0x8d0] sm:$0xff]  ;;  %v14280_v23 = vld [vmem:[%s10706_s28 + $0x9c8] sm:$0xff] }
 0x517   : > { %16026 = vst [vmem:[#allocation51_spill] sm:$0xff] %v14280_v23 }
 0x518   : > { %5456 = vmatpush.xpose.msra.mxu0 %v13803_v57  ;;  %9837 = vmatpush.xpose.msk.msra.mxu1 %vm423_vm0, %v13806_v32 }
 0x519   : > { %5496 = vmatpush.xpose.msra.mxu2 %v9832_v51  ;;  %9854 = vmatpush.xpose.msk.msra.mxu3 %vm423_vm0, %v9833_v54  ;;  %v4765_v57 = vpop.f32.mrf.mxu2  ;;  %v4785_v5 = vpop.f32.mrf.mxu3  ;;  %v14262_v51 = vld [vmem:[%s10706_s28 + $0x9d8] sm:$0xff]  ;;  %v14271_v54 = vld [vmem:[%s10706_s28 + $0x8c0] sm:$0xff] }
 0x51a   : > { %v4786_v32 = vadd.f32 %v4785_v5, %v4765_v57  ;;  %v14292_v57 = vld [vmem:[%s10706_s28 + $0x8b8] sm:$0xff]  ;;  %v14295_v5 = vld [vmem:[%s10706_s28 + $0x9b0] sm:$0xff] }
 0x51b   : > { %16028 = vst [vmem:[#allocation53_spill] sm:$0xff] %v14292_v57 }
 0x51c   : > { %5457 = vmatpush.xpose.msra.mxu0 %v13817_v16  ;;  %9838 = vmatpush.xpose.msk.msra.mxu1 %vm423_vm0, %v13820_v49  ;;  %v14022_v36 = vadd.f32 %v4786_v32, %v13893_v4  ;;  %v16014_v4 = vld [vmem:[#allocation30_spill] sm:$0xff]  ;;  %v14187_v16 = vld [vmem:[%s10706_s28 + $0xa10] sm:$0xff]  ;;  %v14190_v49 = vld [vmem:[%s10706_s28 + $0xa18] sm:$0xff]  ;;  %16029 = vst [vmem:[#allocation54_spill] sm:$0xff] %v14295_v5 }
 0x51d   : > { %5497 = vmatpush.xpose.msra.mxu2 %v13836_v53  ;;  %9855 = vmatpush.xpose.msk.msra.mxu3 %vm423_vm0, %v13839_v59  ;;  %v14205_v53 = vld [vmem:[%s10706_s28 + $0xa00] sm:$0xff]  ;;  %v14208_v59 = vld [vmem:[%s10706_s28 + $0xa08] sm:$0xff]  ;;  %v14298_v32 = vld [vmem:[%s10706_s28 + $0x9b8] sm:$0xff] }
 0x51e   : > { %16020 = vst [vmem:[#allocation47_spill] sm:$0xff] %v14208_v59 }
 0x51f   : > { %16030 = vst [vmem:[#allocation55_spill] sm:$0xff] %v14298_v32 }
 0x520   : > { %5458 = vmatpush.xpose.msra.mxu0 %v13829_v0  ;;  %9839 = vmatpush.xpose.msk.msra.mxu1 %vm423_vm0, %v13832_v3  ;;  %v14199_v0 = vld [vmem:[%s10706_s28 + $0x900] sm:$0xff]  ;;  %v14202_v3 = vld [vmem:[%s10706_s28 + $0x908] sm:$0xff] }
 0x521   : > { %5498 = vmatpush.xpose.msra.mxu2 %v13854_v14  ;;  %9856 = vmatpush.xpose.msk.msra.mxu3 %vm423_vm0, %v13857_v12  ;;  %v14217_v14 = vld [vmem:[%s10706_s28 + $0x8f0] sm:$0xff]  ;;  %v14220_v12 = vld [vmem:[%s10706_s28 + $0x8f8] sm:$0xff] }
 0x522   : > { %16021 = vst [vmem:[#allocation48_spill] sm:$0xff] %v14217_v14 }
 0x524   : > { %5459 = vmatpush.xpose.msra.mxu0 %v13869_v19  ;;  %9840 = vmatpush.xpose.msk.msra.mxu1 %vm423_vm0, %v13872_v55  ;;  %v16015_v19 = vld [vmem:[#allocation14_spill] sm:$0xff]  ;;  %v14223_v55 = vld [vmem:[%s10706_s28 + $0x9f0] sm:$0xff] }
 0x525   : > { %5499 = vmatpush.xpose.msra.mxu2 %v13609_v20  ;;  %9857 = vmatpush.xpose.msk.msra.mxu3 %vm423_vm0, %v13612_v48  ;;  %v9819_v20 = vld [vmem:[%s10706_s28 + $0x7b8] sm:$0xff]  ;;  %v9816_v48 = vld [vmem:[%s10706_s28 + $0x7a0] sm:$0xff]  ;;  %16023 = vst [vmem:[#allocation14_spill] sm:$0xff] %v14271_v54 }
 0x528   : > { %5460 = vmatpush.xpose.msra.mxu0 %v13884_v11  ;;  %9841 = vmatpush.xpose.msk.msra.mxu1 %vm423_vm0, %v13887_v61  ;;  %v14226_v11 = vld [vmem:[%s10706_s28 + $0x9f8] sm:$0xff]  ;;  %v14235_v61 = vld [vmem:[%s10706_s28 + $0x8e0] sm:$0xff] }
 0x529   : > { %5500 = vmatpush.xpose.msra.mxu2 %v13625_v58  ;;  %9858 = vmatpush.xpose.msk.msra.mxu3 %vm423_vm0, %v13628_v10  ;;  %v9817_v58 = vld [vmem:[%s10706_s28 + $0x7a8] sm:$0xff]  ;;  %16022 = vst [vmem:[#allocation30_spill] sm:$0xff] %v14226_v11 }
 0x52a   : > { %v16017_v10 = vld [vmem:[#allocation11_spill] sm:$0xff] }
 0x52b   : > { %16025 = vst [vmem:[#allocation11_spill] sm:$0xff] %v14277_v30 }
 0x52c   : > { %5461 = vmatpush.xpose.msra.mxu0 %v13899_v7  ;;  %9842 = vmatpush.xpose.msk.msra.mxu1 %vm423_vm0, %v13902_v42  ;;  %v9818_v7 = vld [vmem:[%s10706_s28 + $0x7b0] sm:$0xff]  ;;  %v5355_v42 = vld.sshfl [vmem:[#allocation1 + $0x8] sm:$0xff pattern:$0x73625140] }
 0x52d   : > { %5501 = vmatpush.xpose.msra.mxu2 %v13490_v21  ;;  %9859 = vmatpush.xpose.msk.msra.mxu3 %vm423_vm0, %v13493_v34  ;;  %v5354_v21 = vld.sshfl [vmem:[#allocation1] sm:$0xff pattern:$0x73625140]  ;;  %v16016_v34 = vld [vmem:[#allocation8_spill] sm:$0xff] }
 0x52e   : > { %5671 = vst [vmem:[#allocation1] ss:$4 sm:$0xff] %v16016_v34  ;;  %v14334_v34 = vld [vmem:[%s10706_s28 + $0x998] sm:$0xff] }
 0x52f   : > { %16024 = vst [vmem:[#allocation8_spill] sm:$0xff] %v14274_v37 }
 0x530   : > { %5462 = vmatpush.xpose.msra.mxu0 %v13911_v18  ;;  %9843 = vmatpush.xpose.msk.msra.mxu1 %vm423_vm0, %v16014_v4  ;;  %v14238_v18 = vld [vmem:[%s10706_s28 + $0x8e8] sm:$0xff]  ;;  %16038 = vst [vmem:[#allocation63_spill] sm:$0xff] %v14334_v34 }
 0x531   : > { %5502 = vmatpush.xpose.msra.mxu2 %v16015_v19  ;;  %9860 = vmatpush.xpose.msk.msra.mxu3 %vm423_vm0, %v13509_v56  ;;  %v14098_v56 = vld [vmem:[%s10706_s28 + $0x958] sm:$0xff]  ;;  %v14310_v4 = vld [vmem:[%s10706_s28 + $0x8a8] sm:$0xff]  ;;  %v14313_v19 = vld [vmem:[%s10706_s28 + $0x9a0] sm:$0xff] }
 0x532   : > { %16032 = vst [vmem:[#allocation57_spill] sm:$0xff] %v14310_v4 }
 0x533   : > { %16033 = vst [vmem:[#allocation58_spill] sm:$0xff] %v14313_v19 }
 0x534   : > { %5463 = vmatpush.xpose.msra.mxu0 %v13923_v62  ;;  %9844 = vmatpush.xpose.msk.msra.mxu1 %vm423_vm0, %v13926_v9  ;;  %v14241_v62 = vld [vmem:[%s10706_s28 + $0x9e0] sm:$0xff]  ;;  %v14244_v9 = vld [vmem:[%s10706_s28 + $0x9e8] sm:$0xff] }
 0x535   : > { %5503 = vmatpush.xpose.msra.mxu2 %v9818_v7  ;;  %9861 = vmatpush.xpose.msk.msra.mxu3 %vm423_vm0, %v9819_v20  ;;  %v14316_v7 = vld [vmem:[%s10706_s28 + $0x9a8] sm:$0xff]  ;;  %v14325_v20 = vld [vmem:[%s10706_s28 + $0x890] sm:$0xff] }
 0x536   : > { %16034 = vst [vmem:[#allocation59_spill] sm:$0xff] %v14316_v7 }
 0x537   : > { %16035 = vst [vmem:[#allocation60_spill] sm:$0xff] %v14325_v20 }
 0x538   : > { %5464 = vmatpush.xpose.msra.mxu0 %v16017_v10  ;;  %9845 = vmatpush.xpose.msk.msra.mxu1 %vm423_vm0, %v13938_v39  ;;  %v14095_v39 = vld [vmem:[%s10706_s28 + $0x950] sm:$0xff]  ;;  %v14349_v10 = vld [vmem:[%s10706_s28 + $0x980] sm:$0xff] }
 0x539   : > { %5504 = vmatpush.xpose.msra.mxu2 %v9816_v48  ;;  %9862 = vmatpush.xpose.msk.msra.mxu3 %vm423_vm0, %v9817_v58  ;;  %v14343_v48 = vld [vmem:[%s10706_s28 + $0x880] sm:$0xff]  ;;  %v14346_v58 = vld [vmem:[%s10706_s28 + $0x888] sm:$0xff]  ;;  %16041 = vst [vmem:[#allocation66_spill] sm:$0xff] %v14349_v10 }
 0x53a   : > { %16039 = vst [vmem:[#allocation64_spill] sm:$0xff] %v14343_v48 }
 0x53b   : > { %16040 = vst [vmem:[#allocation65_spill] sm:$0xff] %v14346_v58 }
 0x53c   : > { %5465 = vmatpush.xpose.msra.mxu0 %v13666_v35  ;;  %9846 = vmatpush.xpose.msk.msra.mxu1 %vm423_vm0, %v13669_v24  ;;  %v14104_v35 = vld [vmem:[%s10706_s28 + $0xa50] sm:$0xff]  ;;  %v14107_v24 = vld [vmem:[%s10706_s28 + $0xa58] sm:$0xff] }
 0x53d   : > { %5505 = vmatpush.xpose.msra.mxu2 %v13672_v22  ;;  %9863 = vmatpush.xpose.msk.msra.mxu3 %vm423_vm0, %v13675_v25  ;;  %v14119_v22 = vld [vmem:[%s10706_s28 + $0x940] sm:$0xff]  ;;  %v14122_v25 = vld [vmem:[%s10706_s28 + $0x948] sm:$0xff] }
 0x540   : > { %5466 = vmatpush.xpose.msra.mxu0 %v13684_v6  ;;  %9847 = vmatpush.xpose.msk.msra.mxu1 %vm423_vm0, %v13687_v44  ;;  %v14126_v6 = vld [vmem:[%s10706_s28 + $0xa40] sm:$0xff]  ;;  %v14129_v44 = vld [vmem:[%s10706_s28 + $0xa48] sm:$0xff] }
 0x541   : > { %5506 = vmatpush.xpose.msra.mxu2 %v13690_v28  ;;  %9864 = vmatpush.xpose.msk.msra.mxu3 %vm423_vm0, %v13693_v29  ;;  %16018 = vst [vmem:[#allocation45_spill] sm:$0xff] %v14126_v6 }
 0x542   : > { %16019 = vst [vmem:[#allocation46_spill] sm:$0xff] %v14129_v44 }
 0x544   : > { %5467 = vmatpush.xpose.msra.mxu0 %v13702_v26  ;;  %9848 = vmatpush.xpose.msk.msra.mxu1 %vm423_vm0, %v13705_v27  ;;  %v14139_v27 = vld [vmem:[%s10706_s28 + $0x930] sm:$0xff] }
 0x545   : > { %5507 = vmatpush.xpose.msra.mxu2 %v13708_v50  ;;  %9865 = vmatpush.xpose.msk.msra.mxu3 %vm423_vm0, %v13711_v47  ;;  %v14142_v50 = vld [vmem:[%s10706_s28 + $0x938] sm:$0xff] }
 0x548   : > { %5468 = vmatpush.xpose.msra.mxu0 %v13724_v31  ;;  %9849 = vmatpush.xpose.msk.msra.mxu1 %vm423_vm0, %v13727_v41  ;;  %v14148_v31 = vld [vmem:[%s10706_s28 + $0xa30] sm:$0xff]  ;;  %v14151_v41 = vld [vmem:[%s10706_s28 + $0xa38] sm:$0xff] }
 0x549   : > { %5508 = vmatpush.xpose.msra.mxu2 %v13731_v17  ;;  %9866 = vmatpush.xpose.msk.msra.mxu3 %vm423_vm0, %v13734_v15  ;;  %v14160_v17 = vld [vmem:[%s10706_s28 + $0x920] sm:$0xff]  ;;  %v14163_v15 = vld [vmem:[%s10706_s28 + $0x928] sm:$0xff] }
 0x54c   : > { %5469 = vmatpush.xpose.msra.mxu0 %v13743_v2  ;;  %9850 = vmatpush.xpose.msk.msra.mxu1 %vm423_vm0, %v13746_v52 }
 0x54d   : > { %5509 = vmatpush.xpose.msra.mxu2 %v13749_v13  ;;  %9867 = vmatpush.xpose.msk.msra.mxu3 %vm423_vm0, %v13752_v63  ;;  %v14166_v13 = vld [vmem:[%s10706_s28 + $0xa20] sm:$0xff]  ;;  %v14169_v63 = vld [vmem:[%s10706_s28 + $0xa28] sm:$0xff] }
 0x550   : > { %5470 = vmatpush.xpose.msra.mxu0 %v13761_v45  ;;  %9851 = vmatpush.xpose.msk.msra.mxu1 %vm423_vm0, %v13764_v40  ;;  %v4974_v28 = vpop.f32.mrf.mxu0  ;;  %v4994_v29 = vpop.f32.mrf.mxu1 }
 0x551   : > { %5510 = vmatpush.xpose.msra.mxu2 %v13767_v33  ;;  %9868 = vmatpush.xpose.msk.msra.mxu3 %vm423_vm0, %v13770_v46  ;;  %v4995_v26 = vadd.f32 %v4994_v29, %v4974_v28  ;;  %v14181_v33 = vld [vmem:[%s10706_s28 + $0x910] sm:$0xff]  ;;  %v14184_v46 = vld [vmem:[%s10706_s28 + $0x918] sm:$0xff]  ;;  %v14352_v28 = vld [vmem:[%s10706_s28 + $0x988] sm:$0xff] }
 0x552   : > { %16042 = vst [vmem:[#allocation67_spill] sm:$0xff] %v14352_v28  ;;  %v14361_v29 = vld [vmem:[%s10706_s28 + $0x870] sm:$0xff] }
 0x553   : > { %5471 = vmatmul.f32.vlgmr.msra.gmra.mxu0 %v5354_v21  ;;  %9852 = vmatmul.msk.f32.vlgmr.msra.gmra.mxu1 %vm423_vm0, %v5355_v42  ;;  %v14145_v47 = vadd.f32 %v4995_v26, %v14010_v60  ;;  %v14289_v60 = vld [vmem:[%s10706_s28 + $0x8b0] sm:$0xff]  ;;  %v14364_v26 = vld [vmem:[%s10706_s28 + $0x878] sm:$0xff] }
 0x554   : > { %5773 = vmatpush.xpose.msrb.mxu0 %v14095_v39  ;;  %9998 = vmatpush.xpose.msk.msrb.mxu1 %vm423_vm0, %v14098_v56  ;;  %16027 = vst [vmem:[#allocation52_spill] sm:$0xff] %v14289_v60 }
 0x555   : > { %5813 = vmatpush.xpose.msrb.mxu2 %v14104_v35  ;;  %10015 = vmatpush.xpose.msk.msrb.mxu3 %vm423_vm0, %v14107_v24 }
 0x556   : > { %5511 = vmatmul.f32.vlgmr.msra.gmra.mxu2 %v5354_v21  ;;  %9869 = vmatmul.msk.f32.vlgmr.msra.gmra.mxu3 %vm423_vm0, %v5355_v42  ;;  %v14328_v21 = vld [vmem:[%s10706_s28 + $0x898] sm:$0xff]  ;;  %v14331_v42 = vld [vmem:[%s10706_s28 + $0x990] sm:$0xff] }
 0x557   : > { %16036 = vst [vmem:[#allocation61_spill] sm:$0xff] %v14328_v21 }
 0x558   : > { %5774 = vmatpush.xpose.msrb.mxu0 %v14119_v22  ;;  %9999 = vmatpush.xpose.msk.msrb.mxu1 %vm423_vm0, %v14122_v25  ;;  %16037 = vst [vmem:[#allocation62_spill] sm:$0xff] %v14331_v42 }
 0x559   : > { %5814 = vmatpush.xpose.msrb.mxu2 %v14126_v6  ;;  %10016 = vmatpush.xpose.msk.msrb.mxu3 %vm423_vm0, %v14129_v44  ;;  %v5014_v2 = vpop.f32.mrf.mxu2  ;;  %v5034_v52 = vpop.f32.mrf.mxu3  ;;  %v14385_v44 = vld [vmem:[%s10706_s28 + $0x960] sm:$0xff]  ;;  %v14388_v6 = vld [vmem:[%s10706_s28 + $0x968] sm:$0xff] }
 0x55a   : > { %v5035_v45 = vadd.f32 %v5034_v52, %v5014_v2  ;;  %v14367_v2 = vld [vmem:[%s10706_s28 + $0x970] sm:$0xff]  ;;  %v14370_v52 = vld [vmem:[%s10706_s28 + $0x978] sm:$0xff] }
 0x55c   : > { %5775 = vmatpush.xpose.msrb.mxu0 %v14139_v27  ;;  %10000 = vmatpush.xpose.msk.msrb.mxu1 %vm423_vm0, %v14142_v50  ;;  %v14175_v40 = vadd.f32 %v5035_v45, %v14022_v36  ;;  %v14307_v36 = vld [vmem:[%s10706_s28 + $0x8a0] sm:$0xff] }
 0x55d   : > { %5815 = vmatpush.xpose.msrb.mxu2 %v14148_v31  ;;  %10017 = vmatpush.xpose.msk.msrb.mxu3 %vm423_vm0, %v14151_v41  ;;  %16031 = vst [vmem:[#allocation56_spill] sm:$0xff] %v14307_v36  ;;  %v14379_v45 = vld [vmem:[%s10706_s28 + $0x860] sm:$0xff] }
 0x560   : > { %5776 = vmatpush.xpose.msrb.mxu0 %v14160_v17  ;;  %10001 = vmatpush.xpose.msk.msrb.mxu1 %vm423_vm0, %v14163_v15 }
 0x561   : > { %5816 = vmatpush.xpose.msrb.mxu2 %v14166_v13  ;;  %10018 = vmatpush.xpose.msk.msrb.mxu3 %vm423_vm0, %v14169_v63 }
 0x564   : > { %5777 = vmatpush.xpose.msrb.mxu0 %v14181_v33  ;;  %10002 = vmatpush.xpose.msk.msrb.mxu1 %vm423_vm0, %v14184_v46 }
 0x565   : > { %5817 = vmatpush.xpose.msrb.mxu2 %v14187_v16  ;;  %10019 = vmatpush.xpose.msk.msrb.mxu3 %vm423_vm0, %v14190_v49 }
 0x568   : > { %5778 = vmatpush.xpose.msrb.mxu0 %v14199_v0  ;;  %10003 = vmatpush.xpose.msk.msrb.mxu1 %vm423_vm0, %v14202_v3 }
 0x569   : > { %5818 = vmatpush.xpose.msrb.mxu2 %v14205_v53  ;;  %10020 = vmatpush.xpose.msk.msrb.mxu3 %vm423_vm0, %v14208_v59 }
 0x56c   : > { %5779 = vmatpush.xpose.msrb.mxu0 %v14217_v14  ;;  %10004 = vmatpush.xpose.msk.msrb.mxu1 %vm423_vm0, %v14220_v12 }
 0x56d   : > { %5819 = vmatpush.xpose.msrb.mxu2 %v14223_v55  ;;  %10021 = vmatpush.xpose.msk.msrb.mxu3 %vm423_vm0, %v14226_v11 }
 0x570   : > { %5780 = vmatpush.xpose.msrb.mxu0 %v14235_v61  ;;  %10005 = vmatpush.xpose.msk.msrb.mxu1 %vm423_vm0, %v14238_v18 }
 0x571   : > { %5820 = vmatpush.xpose.msrb.mxu2 %v14241_v62  ;;  %10022 = vmatpush.xpose.msk.msrb.mxu3 %vm423_vm0, %v14244_v9 }
 0x574   : > { %5781 = vmatpush.xpose.msrb.mxu0 %v14253_v1  ;;  %10006 = vmatpush.xpose.msk.msrb.mxu1 %vm423_vm0, %v14256_v8 }
 0x575   : > { %5821 = vmatpush.xpose.msrb.mxu2 %v14259_v43  ;;  %10023 = vmatpush.xpose.msk.msrb.mxu3 %vm423_vm0, %v14262_v51 }
 0x578   : > { %5782 = vmatpush.xpose.msrb.mxu0 %v14271_v54  ;;  %10007 = vmatpush.xpose.msk.msrb.mxu1 %vm423_vm0, %v14274_v37 }
 0x579   : > { %5822 = vmatpush.xpose.msrb.mxu2 %v14277_v30  ;;  %10024 = vmatpush.xpose.msk.msrb.mxu3 %vm423_vm0, %v14280_v23 }
 0x57c   : > { %5783 = vmatpush.xpose.msrb.mxu0 %v14289_v60  ;;  %10008 = vmatpush.xpose.msk.msrb.mxu1 %vm423_vm0, %v14292_v57 }
 0x57d   : > { %5823 = vmatpush.xpose.msrb.mxu2 %v14295_v5  ;;  %10025 = vmatpush.xpose.msk.msrb.mxu3 %vm423_vm0, %v14298_v32 }
 0x580   : > { %5784 = vmatpush.xpose.msrb.mxu0 %v14307_v36  ;;  %10009 = vmatpush.xpose.msk.msrb.mxu1 %vm423_vm0, %v14310_v4 }
 0x581   : > { %5824 = vmatpush.xpose.msrb.mxu2 %v14313_v19  ;;  %10026 = vmatpush.xpose.msk.msrb.mxu3 %vm423_vm0, %v14316_v7 }
 0x584   : > { %5785 = vmatpush.xpose.msrb.mxu0 %v14325_v20  ;;  %10010 = vmatpush.xpose.msk.msrb.mxu1 %vm423_vm0, %v14328_v21 }
 0x585   : > { %5825 = vmatpush.xpose.msrb.mxu2 %v14331_v42  ;;  %10027 = vmatpush.xpose.msk.msrb.mxu3 %vm423_vm0, %v14334_v34 }
 0x588   : > { %5786 = vmatpush.xpose.msrb.mxu0 %v14343_v48  ;;  %10011 = vmatpush.xpose.msk.msrb.mxu1 %vm423_vm0, %v14346_v58 }
 0x589   : > { %5826 = vmatpush.xpose.msrb.mxu2 %v14349_v10  ;;  %10028 = vmatpush.xpose.msk.msrb.mxu3 %vm423_vm0, %v14352_v28 }
 0x58c   : > { %5787 = vmatpush.xpose.msrb.mxu0 %v14361_v29  ;;  %10012 = vmatpush.xpose.msk.msrb.mxu1 %vm423_vm0, %v14364_v26 }
 0x58d   : > { %5827 = vmatpush.xpose.msrb.mxu2 %v14367_v2  ;;  %10029 = vmatpush.xpose.msk.msrb.mxu3 %vm423_vm0, %v14370_v52 }
 0x590   : > { %5788 = vmatpush.xpose.msrb.mxu0 %v14379_v45  ;;  %10013 = vmatpush.xpose.msk.msrb.mxu1 %vm423_vm0, %v14382_v38 }
 0x591   : > { %5828 = vmatpush.xpose.msrb.mxu2 %v14385_v44  ;;  %10030 = vmatpush.xpose.msk.msrb.mxu3 %vm423_vm0, %v14388_v6 }
 0x594   : > { %5955 = vmatpush.xpose.msra.mxu0 %v14139_v27  ;;  %10032 = vmatpush.xpose.msk.msra.mxu1 %vm423_vm0, %v14142_v50 }
 0x595   : > { %5995 = vmatpush.xpose.msra.mxu2 %v14148_v31  ;;  %10049 = vmatpush.xpose.msk.msra.mxu3 %vm423_vm0, %v14151_v41 }
 0x598   : > { %5956 = vmatpush.xpose.msra.mxu0 %v14160_v17  ;;  %10033 = vmatpush.xpose.msk.msra.mxu1 %vm423_vm0, %v14163_v15 }
 0x599   : > { %5996 = vmatpush.xpose.msra.mxu2 %v14166_v13  ;;  %10050 = vmatpush.xpose.msk.msra.mxu3 %vm423_vm0, %v14169_v63 }
 0x59c   : > { %5957 = vmatpush.xpose.msra.mxu0 %v14181_v33  ;;  %10034 = vmatpush.xpose.msk.msra.mxu1 %vm423_vm0, %v14184_v46 }
 0x59d   : > { %5997 = vmatpush.xpose.msra.mxu2 %v14187_v16  ;;  %10051 = vmatpush.xpose.msk.msra.mxu3 %vm423_vm0, %v14190_v49 }
 0x5a0   : > { %5958 = vmatpush.xpose.msra.mxu0 %v14199_v0  ;;  %10035 = vmatpush.xpose.msk.msra.mxu1 %vm423_vm0, %v14202_v3 }
 0x5a1   : > { %5998 = vmatpush.xpose.msra.mxu2 %v14205_v53  ;;  %10052 = vmatpush.xpose.msk.msra.mxu3 %vm423_vm0, %v14208_v59  ;;  %v5672_v59 = vld.sshfl [vmem:[#allocation1] sm:$0xff pattern:$0x73625140] }
 0x5a2   : > { %5829 = vmatmul.f32.vlgmr.msrb.gmra.mxu2 %v5672_v59  ;;  %5789 = vmatmul.f32.vlgmr.msrb.gmra.mxu0 %v5672_v59 }
 0x5a4   : > { %5959 = vmatpush.xpose.msra.mxu0 %v14217_v14  ;;  %10036 = vmatpush.xpose.msk.msra.mxu1 %vm423_vm0, %v14220_v12  ;;  %v5673_v14 = vld.sshfl [vmem:[#allocation1 + $0x8] sm:$0xff pattern:$0x73625140] }
 0x5a5   : > { %5999 = vmatpush.xpose.msra.mxu2 %v14223_v55  ;;  %10053 = vmatpush.xpose.msk.msra.mxu3 %vm423_vm0, %v14226_v11  ;;  %v16043_v11 = vld [vmem:[#allocation9_spill] sm:$0xff] }
 0x5a6   : > { %5853 = vst [vmem:[#allocation1] ss:$4 sm:$0xff] %v16043_v11  ;;  %10031 = vmatmul.msk.f32.vlgmr.msrb.gmra.mxu3 %vm423_vm0, %v5673_v14  ;;  %10014 = vmatmul.msk.f32.vlgmr.msrb.gmra.mxu1 %vm423_vm0, %v5673_v14  ;;  %v16044_v14 = vld [vmem:[#allocation3_spill] sm:$0xff] }
 0x5a8   : > { %5960 = vmatpush.xpose.msra.mxu0 %v14235_v61  ;;  %10037 = vmatpush.xpose.msk.msra.mxu1 %vm423_vm0, %v14238_v18 }
 0x5a9   : > { %6000 = vmatpush.xpose.msra.mxu2 %v14241_v62  ;;  %10054 = vmatpush.xpose.msk.msra.mxu3 %vm423_vm0, %v14244_v9 }
 0x5ac   : > { %5961 = vmatpush.xpose.msra.mxu0 %v14253_v1  ;;  %10038 = vmatpush.xpose.msk.msra.mxu1 %vm423_vm0, %v14256_v8 }
 0x5ad   : > { %6001 = vmatpush.xpose.msra.mxu2 %v14259_v43  ;;  %10055 = vmatpush.xpose.msk.msra.mxu3 %vm423_vm0, %v14262_v51  ;;  %v14450_v59 = vld.sshfl [vmem:[#allocation1] sm:$0xff pattern:$0x73625140]  ;;  %v14452_v11 = vld.sshfl [vmem:[#allocation1 + $0x8] sm:$0xff pattern:$0x73625140] }
 0x5ae   : > { %6100 = vst [vmem:[#allocation1] ss:$4 sm:$0xff] %v16044_v14  ;;  %v16045_v14 = vld [vmem:[#allocation16_spill] sm:$0xff] }
 0x5b0   : > { %5962 = vmatpush.xpose.msra.mxu0 %v14271_v54  ;;  %10039 = vmatpush.xpose.msk.msra.mxu1 %vm423_vm0, %v14274_v37 }
 0x5b1   : > { %6002 = vmatpush.xpose.msra.mxu2 %v14277_v30  ;;  %10056 = vmatpush.xpose.msk.msra.mxu3 %vm423_vm0, %v14280_v23  ;;  %v16067_v30 = vld [vmem:[#allocation41_spill] sm:$0xff] }
 0x5b4   : > { %5963 = vmatpush.xpose.msra.mxu0 %v14289_v60  ;;  %10040 = vmatpush.xpose.msk.msra.mxu1 %vm423_vm0, %v14292_v57  ;;  %v16066_v57 = vld [vmem:[#allocation32_spill] sm:$0xff] }
 0x5b5   : > { %6003 = vmatpush.xpose.msra.mxu2 %v14295_v5  ;;  %10057 = vmatpush.xpose.msk.msra.mxu3 %vm423_vm0, %v14298_v32  ;;  %v16065_v5 = vld [vmem:[#allocation31_spill] sm:$0xff] }
 0x5b6   : > { %v1285_v60 = vadd.f32 %v16066_v57, %v16065_v5  ;;  %v16071_v57 = vld [vmem:[#allocation49_spill] sm:$0xff] }
 0x5b8   : > { %5964 = vmatpush.xpose.msra.mxu0 %v14307_v36  ;;  %10041 = vmatpush.xpose.msk.msra.mxu1 %vm423_vm0, %v14310_v4  ;;  %v16046_v36 = vld [vmem:[#allocation18_spill] sm:$0xff] }
 0x5b9   : > { %6004 = vmatpush.xpose.msra.mxu2 %v14313_v19  ;;  %10058 = vmatpush.xpose.msk.msra.mxu3 %vm423_vm0, %v14316_v7  ;;  %v560_v32 = vadd.f32 %v16046_v36, %v16045_v14  ;;  %v16048_v7 = vld [vmem:[#allocation19_spill] sm:$0xff]  ;;  %v16050_v36 = vld [vmem:[#allocation25_spill] sm:$0xff]  ;;  %v16051_v14 = vld [vmem:[#allocation26_spill] sm:$0xff] }
 0x5bc   : > { %5965 = vmatpush.xpose.msra.mxu0 %v14325_v20  ;;  %10042 = vmatpush.xpose.msk.msra.mxu1 %vm423_vm0, %v14328_v21  ;;  %v16047_v20 = vld [vmem:[#allocation21_spill] sm:$0xff] }
 0x5bd   : > { %6005 = vmatpush.xpose.msra.mxu2 %v14331_v42  ;;  %10059 = vmatpush.xpose.msk.msra.mxu3 %vm423_vm0, %v14334_v34  ;;  %v723_v21 = vadd.f32 %v16047_v20, %v560_v32  ;;  %v16049_v42 = vld [vmem:[#allocation20_spill] sm:$0xff]  ;;  %v16053_v20 = vld [vmem:[#allocation17_spill] sm:$0xff]  ;;  %v16061_v34 = vld [vmem:[#allocation38_spill] sm:$0xff] }
 0x5be   : > { %v600_v19 = vadd.f32 %v16049_v42, %v16048_v7  ;;  %v16055_v7 = vld [vmem:[#allocation23_spill] sm:$0xff] }
 0x5c0   : > { %5966 = vmatpush.xpose.msra.mxu0 %v14343_v48  ;;  %10043 = vmatpush.xpose.msk.msra.mxu1 %vm423_vm0, %v14346_v58  ;;  %v993_v58 = vadd.f32 %v16051_v14, %v16050_v36  ;;  %v763_v42 = vadd.f32 %v16055_v7, %v600_v19  ;;  %v16057_v36 = vld [vmem:[#allocation34_spill] sm:$0xff]  ;;  %v16060_v7 = vld [vmem:[#allocation37_spill] sm:$0xff] }
 0x5c1   : > { %6006 = vmatpush.xpose.msra.mxu2 %v14349_v10  ;;  %10060 = vmatpush.xpose.msk.msra.mxu3 %vm423_vm0, %v14352_v28  ;;  %v16052_v28 = vld [vmem:[#allocation22_spill] sm:$0xff]  ;;  %v16054_v10 = vld [vmem:[#allocation29_spill] sm:$0xff] }
 0x5c2   : > { %v743_v32 = vadd.f32 %v16052_v28, %v723_v21  ;;  %v1245_v48 = vadd.f32 %v16054_v10, %v16053_v20  ;;  %v9872_v21 = vld [vmem:[%s10706_s28 + $0x850] sm:$0xff]  ;;  %v9873_v28 = vld [vmem:[%s10706_s28 + $0x858] sm:$0xff]  ;;  %v16058_v10 = vld [vmem:[#allocation27_spill] sm:$0xff] }
 0x5c3   : > { %v16059_v20 = vld [vmem:[#allocation28_spill] sm:$0xff] }
 0x5c4   : > { %5967 = vmatpush.xpose.msra.mxu0 %v14361_v29  ;;  %10044 = vmatpush.xpose.msk.msra.mxu1 %vm423_vm0, %v14364_v26  ;;  %v1035_v29 = vadd.f32 %v993_v58, %v743_v32  ;;  %v16056_v26 = vld [vmem:[#allocation33_spill] sm:$0xff]  ;;  %v1033_v19 = vadd.f32 %v16059_v20, %v16058_v10  ;;  %v16062_v58 = vld [vmem:[#allocation12_spill] sm:$0xff]  ;;  %v16068_v10 = vld [vmem:[#allocation42_spill] sm:$0xff]  ;;  %v5243_v20 = vpop.f32.mrf.mxu1 }
 0x5c5   : > { %6007 = vmatpush.xpose.msra.mxu2 %v14367_v2  ;;  %10061 = vmatpush.xpose.msk.msra.mxu3 %vm423_vm0, %v14370_v52  ;;  %v1497_v14 = vadd.f32 %v16057_v36, %v16056_v26  ;;  %v16063_v32 = vld [vmem:[#allocation13_spill] sm:$0xff]  ;;  %v16064_v26 = vld [vmem:[#allocation24_spill] sm:$0xff] }
 0x5c6   : > { %v3750_v4 = vadd.f32 %v16063_v32, %v16062_v58  ;;  %v783_v36 = vadd.f32 %v16064_v26, %v763_v42  ;;  %v9871_v42 = vld [vmem:[%s10706_s28 + $0x848] sm:$0xff] }
 0x5c7   : > { %v16072_v26 = vld [vmem:[#allocation39_spill] sm:$0xff] }
 0x5c8   : > { %5968 = vmatpush.xpose.msra.mxu0 %v14379_v45  ;;  %10045 = vmatpush.xpose.msk.msra.mxu1 %vm423_vm0, %v14382_v38  ;;  %v1287_v45 = vadd.f32 %v1245_v48, %v1035_v29  ;;  %v1749_v38 = vadd.f32 %v16061_v34, %v16060_v7  ;;  %v2001_v48 = vadd.f32 %v16068_v10, %v16067_v30  ;;  %v5223_v29 = vpop.f32.mrf.mxu0  ;;  %v9870_v34 = vld [vmem:[%s10706_s28 + $0x840] sm:$0xff]  ;;  %v16070_v7 = vld [vmem:[#allocation36_spill] sm:$0xff] }
 0x5c9   : > { %6008 = vmatpush.xpose.msra.mxu2 %v14385_v44  ;;  %10062 = vmatpush.xpose.msk.msra.mxu3 %vm423_vm0, %v14388_v6  ;;  %v3792_v5 = vadd.f32 %v3750_v4, %v16071_v57  ;;  %v14525_v30 = vld [vmem:[%s10706_s28 + $0xa70] sm:$0xff]  ;;  %v16075_v4 = vld [vmem:[#allocation15_spill] sm:$0xff] }
 0x5ca   : > { %v1539_v23 = vadd.f32 %v1497_v14, %v1287_v45  ;;  %v14528_v14 = vld [vmem:[%s10706_s28 + $0xa78] sm:$0xff]  ;;  %v16073_v10 = vld [vmem:[#allocation40_spill] sm:$0xff] }
 0x5cb   : > { %v1789_v37 = vadd.f32 %v16073_v10, %v16072_v26 }
 0x5cc   : > { %5969 = vmatpush.xpose.msra.mxu0 %v9872_v21  ;;  %10046 = vmatpush.xpose.msk.msra.mxu1 %vm423_vm0, %v9873_v28  ;;  %v1036_v21 = vadd.f32 %v1033_v19, %v783_v36  ;;  %v16069_v28 = vld [vmem:[#allocation35_spill] sm:$0xff]  ;;  %v1791_v32 = vadd.f32 %v1749_v38, %v1539_v23  ;;  %v14535_v23 = vpop.permute.xlu0 %2048  ;;  %v16076_v19 = vld [vmem:[#allocation5_spill] sm:$0xff]  ;;  %v5244_v36 = vadd.f32 %v5243_v20, %v5223_v29  ;;  %v14552_v29 = vld [vmem:[%s10706_s28 + $0xa60] sm:$0xff] }
 0x5cd   : > { %6009 = vmatpush.xpose.msra.mxu2 %v14095_v39  ;;  %10063 = vmatpush.xpose.msk.msra.mxu3 %vm423_vm0, %v14098_v56  ;;  %v1537_v58 = vadd.f32 %v16070_v7, %v16069_v28  ;;  %16074 = vst [vmem:[#allocation9_spill] sm:$0xff] %v14535_v23  ;;  %v3790_v38 = vadd.f32 %v16076_v19, %v16075_v4  ;;  %v5263_v28 = vpop.f32.mrf.mxu2  ;;  %v5283_v7 = vpop.f32.mrf.mxu3  ;;  %v14555_v20 = vld [vmem:[%s10706_s28 + $0xa68] sm:$0xff] }
 0x5ce   : > { %v1288_v45 = vadd.f32 %v1285_v60, %v1036_v21  ;;  %v2043_v54 = vadd.f32 %v2001_v48, %v1791_v32  ;;  %v3794_v48 = vadd.f32 %v3792_v5, %v14535_v23  ;;  %v5286_v10 = vadd.f32 %v5244_v36, %v14145_v47 }
 0x5d0   : > { %5970 = vmatpush.xpose.msra.mxu0 %v9870_v34  ;;  %10047 = vmatpush.xpose.msk.msra.mxu1 %vm423_vm0, %v9871_v42  ;;  %v1540_v60 = vadd.f32 %v1537_v58, %v1288_v45  ;;  %v16077_v34 = vld [vmem:[#allocation43_spill] sm:$0xff]  ;;  %v16078_v42 = vld [vmem:[#allocation44_spill] sm:$0xff]  ;;  %v2051_v32 = vadd.f32 %v14535_v23, %v2043_v54  ;;  %v5472_v57 = vpop.f32.mrf.mxu0  ;;  %v5492_v5 = vpop.f32.mrf.mxu1  ;;  %v16079_v45 = vld [vmem:[#allocation50_spill] sm:$0xff] }
 0x5d1   : > { %6010 = vmatpush.xpose.msra.mxu2 %v14119_v22  ;;  %10064 = vmatpush.xpose.msk.msra.mxu3 %vm423_vm0, %v14122_v25  ;;  %v2041_v21 = vadd.f32 %v16078_v42, %v16077_v34  ;;  %v3793_v26 = vadd.f32 %v3790_v38, %v16079_v45  ;;  %v5493_v4 = vadd.f32 %v5492_v5, %v5472_v57 }
 0x5d2   : > { %v1792_v58 = vadd.f32 %v1789_v37, %v1540_v60  ;;  %v3796_v37 = vmax.f32 %v3794_v48, 0.0  ;;  %v2053_v19 = vmax.f32 %v2051_v32, 0.0 }
 0x5d3   : > { %5971 = vmatmul.f32.vlgmr.msra.gmra.mxu0 %v14450_v59  ;;  %10048 = vmatmul.msk.f32.vlgmr.msra.gmra.mxu1 %vm423_vm0, %v14452_v11  ;;  %v3795_v38 = vadd.f32 %v3793_v26, %v14535_v23  ;;  %v16080_v26 = vld [vmem:[#allocation45_spill] sm:$0xff] }
 0x5d4   : > { %6202 = vmatpush.xpose.msrb.mxu0 %v14367_v2  ;;  %10130 = vmatpush.xpose.msk.msrb.mxu1 %vm423_vm0, %v14370_v52  ;;  %v2044_v54 = vadd.f32 %v2041_v21, %v1792_v58  ;;  %v7286_v36 = vrot.slane %v3796_v37, 7  ;;  %v7377_v21 = vrot.slane %v2053_v19, 1 }
 0x5d5   : > { %6242 = vmatpush.xpose.msrb.mxu2 %v14525_v30  ;;  %10147 = vmatpush.xpose.msk.msrb.mxu3 %vm423_vm0, %v14528_v14  ;;  %v3797_v58 = vmax.f32 %v3795_v38, 0.0 }
 0x5d6   : > { %6011 = vmatmul.f32.vlgmr.msra.gmra.mxu2 %v14450_v59  ;;  %10065 = vmatmul.msk.f32.vlgmr.msra.gmra.mxu3 %vm423_vm0, %v14452_v11  ;;  %v5535_v59 = vadd.f32 %v5493_v4, %v5286_v10  ;;  %v5284_v11 = vadd.f32 %v5283_v7, %v5263_v28  ;;  %v2052_v60 = vadd.f32 %v14535_v23, %v2044_v54  ;;  %v16081_v10 = vld [vmem:[#allocation46_spill] sm:$0xff] }
 0x5d7   : > { %v7389_v5 = vsel %vm7302_vm1, %v7377_v21, %v3796_v37  ;;  %v7287_v38 = vrot.slane %v3797_v58, 7  ;;  %v16086_v21 = vld [vmem:[#allocation47_spill] sm:$0xff] }
 0x5d8   : > { %6203 = vmatpush.xpose.msrb.mxu0 %v14385_v44  ;;  %10131 = vmatpush.xpose.msk.msrb.mxu1 %vm423_vm0, %v14388_v6  ;;  %v5537_v47 = vadd.f32 %v5535_v59, %v14535_v23  ;;  %v5287_v28 = vadd.f32 %v5284_v11, %v14175_v40  ;;  %v7303_v40 = vsel %vm7302_vm1, %v2053_v19, %v7286_v36  ;;  %v2054_v4 = vmax.f32 %v2052_v60, 0.0 }
 0x5d9   : > { %6243 = vmatpush.xpose.msrb.mxu2 %v14552_v29  ;;  %10148 = vmatpush.xpose.msk.msrb.mxu3 %vm423_vm0, %v14555_v20  ;;  %v5512_v34 = vpop.f32.mrf.mxu2  ;;  %v5532_v42 = vpop.f32.mrf.mxu3 }
 0x5da   : > { %v5539_v48 = vmax.f32 %v5537_v47, 0.0  ;;  %v5533_v7 = vadd.f32 %v5532_v42, %v5512_v34  ;;  %v7378_v19 = vrot.slane %v2054_v4, 1 }
 0x5dc   : > { %6204 = vmatpush.xpose.msrb.mxu0 %v14095_v39  ;;  %10132 = vmatpush.xpose.msk.msrb.mxu1 %vm423_vm0, %v14098_v56  ;;  %v7292_v32 = vrot.slane %v5539_v48, 6  ;;  %v7381_v57 = vrot.slane %v5539_v48, 7  ;;  %v5536_v45 = vadd.f32 %v5533_v7, %v5287_v28  ;;  %v7390_v60 = vsel %vm7302_vm1, %v7378_v19, %v3797_v58  ;;  %v16087_v28 = vld [vmem:[#allocation48_spill] sm:$0xff]  ;;  %v6101_v7 = vld.sshfl [vmem:[#allocation1] sm:$0xff pattern:$0x73625140] }
 0x5dd   : > { %6244 = vmatpush.xpose.msrb.mxu2 %v14104_v35  ;;  %10149 = vmatpush.xpose.msk.msrb.mxu3 %vm423_vm0, %v14107_v24  ;;  %v7304_v48 = vsel %vm7302_vm1, %v2054_v4, %v7287_v38  ;;  %v6102_v58 = vld.sshfl [vmem:[#allocation1 + $0x8] sm:$0xff pattern:$0x73625140]  ;;  %v16095_v38 = vld [vmem:[#allocation53_spill] sm:$0xff] }
 0x5de   : > { %v14588_v54 = vsel %vm7305_vm2, %v7389_v5, %v7381_v57  ;;  %v14591_v59 = vsel %vm7305_vm2, %v7303_v40, %v7292_v32  ;;  %v5538_v11 = vadd.f32 %v5536_v45, %v14535_v23  ;;  %v16088_v32 = vld [vmem:[#allocation30_spill] sm:$0xff]  ;;  %v16091_v45 = vld [vmem:[#allocation8_spill] sm:$0xff]  ;;  %v16092_v40 = vld [vmem:[#allocation11_spill] sm:$0xff] }
 0x5df   : > { %16082 = vst [vmem:[#allocation3_spill] sm:$0xff] %v14588_v54  ;;  %v16089_v57 = vld [vmem:[#allocation6_spill] sm:$0xff]  ;;  %v16093_v4 = vld [vmem:[#allocation51_spill] sm:$0xff]  ;;  %v16106_v54 = vld [vmem:[#allocation64_spill] sm:$0xff] }
 0x5e0   : > { %6205 = vmatpush.xpose.msrb.mxu0 %v14119_v22  ;;  %10133 = vmatpush.xpose.msk.msrb.mxu1 %vm423_vm0, %v14122_v25  ;;  %16083 = vst [vmem:[#allocation16_spill] sm:$0xff] %v14591_v59  ;;  %v5540_v37 = vmax.f32 %v5538_v11, 0.0  ;;  %v16090_v5 = vld [vmem:[#allocation14_spill] sm:$0xff]  ;;  %v16094_v11 = vld [vmem:[#allocation52_spill] sm:$0xff]  ;;  %v16097_v19 = vld [vmem:[#allocation55_spill] sm:$0xff] }
 0x5e1   : > { %6245 = vmatpush.xpose.msrb.mxu2 %v16080_v26  ;;  %10150 = vmatpush.xpose.msk.msrb.mxu3 %vm423_vm0, %v16081_v10  ;;  %6349 = vst [vmem:[#allocation1] ss:$4 sm:$0xff] %v16089_v57  ;;  %v16102_v57 = vld [vmem:[#allocation60_spill] sm:$0xff]  ;;  %v16104_v59 = vld [vmem:[#allocation62_spill] sm:$0xff]  ;;  %v16107_v23 = vld [vmem:[#allocation65_spill] sm:$0xff] }
 0x5e2   : > { %v7293_v47 = vrot.slane %v5540_v37, 6  ;;  %v7382_v36 = vrot.slane %v5540_v37, 7  ;;  %v16096_v37 = vld [vmem:[#allocation54_spill] sm:$0xff] }
 0x5e4   : > { %6206 = vmatpush.xpose.msrb.mxu0 %v14139_v27  ;;  %10134 = vmatpush.xpose.msk.msrb.mxu1 %vm423_vm0, %v14142_v50  ;;  %v14609_v34 = vsel %vm7305_vm2, %v7390_v60, %v7382_v36  ;;  %v14612_v42 = vsel %vm7305_vm2, %v7304_v48, %v7293_v47  ;;  %v16098_v47 = vld [vmem:[#allocation56_spill] sm:$0xff]  ;;  %v16099_v36 = vld [vmem:[#allocation57_spill] sm:$0xff]  ;;  %v16100_v60 = vld [vmem:[#allocation58_spill] sm:$0xff] }
 0x5e5   : > { %6246 = vmatpush.xpose.msrb.mxu2 %v14148_v31  ;;  %10151 = vmatpush.xpose.msk.msrb.mxu3 %vm423_vm0, %v14151_v41  ;;  %16084 = vst [vmem:[#allocation18_spill] sm:$0xff] %v14609_v34  ;;  %v16101_v48 = vld [vmem:[#allocation59_spill] sm:$0xff] }
 0x5e6   : > { %16085 = vst [vmem:[#allocation21_spill] sm:$0xff] %v14612_v42  ;;  %v16103_v42 = vld [vmem:[#allocation61_spill] sm:$0xff]  ;;  %v16105_v34 = vld [vmem:[#allocation63_spill] sm:$0xff] }
 0x5e8   : > { %6207 = vmatpush.xpose.msrb.mxu0 %v14160_v17  ;;  %10135 = vmatpush.xpose.msk.msrb.mxu1 %vm423_vm0, %v14163_v15 }
 0x5e9   : > { %6247 = vmatpush.xpose.msrb.mxu2 %v14166_v13  ;;  %10152 = vmatpush.xpose.msk.msrb.mxu3 %vm423_vm0, %v14169_v63 }
 0x5ec   : > { %6208 = vmatpush.xpose.msrb.mxu0 %v14181_v33  ;;  %10136 = vmatpush.xpose.msk.msrb.mxu1 %vm423_vm0, %v14184_v46 }
 0x5ed   : > { %6248 = vmatpush.xpose.msrb.mxu2 %v14187_v16  ;;  %10153 = vmatpush.xpose.msk.msrb.mxu3 %vm423_vm0, %v14190_v49 }
 0x5f0   : > { %6209 = vmatpush.xpose.msrb.mxu0 %v14199_v0  ;;  %10137 = vmatpush.xpose.msk.msrb.mxu1 %vm423_vm0, %v14202_v3 }
 0x5f1   : > { %6249 = vmatpush.xpose.msrb.mxu2 %v14205_v53  ;;  %10154 = vmatpush.xpose.msk.msrb.mxu3 %vm423_vm0, %v16086_v21 }
 0x5f4   : > { %6210 = vmatpush.xpose.msrb.mxu0 %v16087_v28  ;;  %10138 = vmatpush.xpose.msk.msrb.mxu1 %vm423_vm0, %v14220_v12 }
 0x5f5   : > { %6250 = vmatpush.xpose.msrb.mxu2 %v14223_v55  ;;  %10155 = vmatpush.xpose.msk.msrb.mxu3 %vm423_vm0, %v16088_v32 }
 0x5f8   : > { %6211 = vmatpush.xpose.msrb.mxu0 %v14235_v61  ;;  %10139 = vmatpush.xpose.msk.msrb.mxu1 %vm423_vm0, %v14238_v18 }
 0x5f9   : > { %6251 = vmatpush.xpose.msrb.mxu2 %v14241_v62  ;;  %10156 = vmatpush.xpose.msk.msrb.mxu3 %vm423_vm0, %v14244_v9 }
 0x5fc   : > { %6212 = vmatpush.xpose.msrb.mxu0 %v14253_v1  ;;  %10140 = vmatpush.xpose.msk.msrb.mxu1 %vm423_vm0, %v14256_v8 }
 0x5fd   : > { %6252 = vmatpush.xpose.msrb.mxu2 %v14259_v43  ;;  %10157 = vmatpush.xpose.msk.msrb.mxu3 %vm423_vm0, %v14262_v51 }
 0x600   : > { %6213 = vmatpush.xpose.msrb.mxu0 %v16090_v5  ;;  %10141 = vmatpush.xpose.msk.msrb.mxu1 %vm423_vm0, %v16091_v45 }
 0x601   : > { %6253 = vmatpush.xpose.msrb.mxu2 %v16092_v40  ;;  %10158 = vmatpush.xpose.msk.msrb.mxu3 %vm423_vm0, %v16093_v4 }
 0x604   : > { %6214 = vmatpush.xpose.msrb.mxu0 %v16094_v11  ;;  %10142 = vmatpush.xpose.msk.msrb.mxu1 %vm423_vm0, %v16095_v38 }
 0x605   : > { %6254 = vmatpush.xpose.msrb.mxu2 %v16096_v37  ;;  %10159 = vmatpush.xpose.msk.msrb.mxu3 %vm423_vm0, %v16097_v19 }
 0x608   : > { %6215 = vmatpush.xpose.msrb.mxu0 %v16098_v47  ;;  %10143 = vmatpush.xpose.msk.msrb.mxu1 %vm423_vm0, %v16099_v36  ;;  %v16109_v36 = vld [vmem:[#allocation67_spill] sm:$0xff] }
 0x609   : > { %6255 = vmatpush.xpose.msrb.mxu2 %v16100_v60  ;;  %10160 = vmatpush.xpose.msk.msrb.mxu3 %vm423_vm0, %v16101_v48  ;;  %v14673_v60 = vld [vmem:[%s10706_s28 + $0xa90] sm:$0xff]  ;;  %v14676_v48 = vld [vmem:[%s10706_s28 + $0xa98] sm:$0xff] }
 0x60c   : > { %6216 = vmatpush.xpose.msrb.mxu0 %v16102_v57  ;;  %10144 = vmatpush.xpose.msk.msrb.mxu1 %vm423_vm0, %v16103_v42  ;;  %v16108_v57 = vld [vmem:[#allocation66_spill] sm:$0xff]  ;;  %v14956_v42 = vld [vmem:[%s10706_s28 + $0x9f0] sm:$0xff] }
 0x60d   : > { %6256 = vmatpush.xpose.msrb.mxu2 %v16104_v59  ;;  %10161 = vmatpush.xpose.msk.msrb.mxu3 %vm423_vm0, %v16105_v34 }
 0x610   : > { %6217 = vmatpush.xpose.msrb.mxu0 %v16106_v54  ;;  %10145 = vmatpush.xpose.msk.msrb.mxu1 %vm423_vm0, %v16107_v23  ;;  %v14689_v23 = vld [vmem:[%s10706_s28 + $0xa80] sm:$0xff]  ;;  %v14692_v54 = vld [vmem:[%s10706_s28 + $0xa88] sm:$0xff] }
 0x611   : > { %6257 = vmatpush.xpose.msrb.mxu2 %v16108_v57  ;;  %10162 = vmatpush.xpose.msk.msrb.mxu3 %vm423_vm0, %v16109_v36 }
 0x613   : > { %6218 = vmatmul.f32.vlgmr.msrb.gmra.mxu0 %v6101_v7  ;;  %10146 = vmatmul.msk.f32.vlgmr.msrb.gmra.mxu1 %vm423_vm0, %v6102_v58 }
 0x614   : > { %6451 = vmatpush.xpose.msra.mxu0 %v16104_v59  ;;  %10228 = vmatpush.xpose.msk.msra.mxu1 %vm423_vm0, %v16105_v34 }
 0x615   : > { %6491 = vmatpush.xpose.msra.mxu2 %v14673_v60  ;;  %10245 = vmatpush.xpose.msk.msra.mxu3 %vm423_vm0, %v14676_v48 }
 0x616   : > { %6258 = vmatmul.f32.vlgmr.msrb.gmra.mxu2 %v6101_v7  ;;  %10163 = vmatmul.msk.f32.vlgmr.msrb.gmra.mxu3 %vm423_vm0, %v6102_v58  ;;  %v14971_v7 = vld [vmem:[%s10706_s28 + $0x8e8] sm:$0xff]  ;;  %v14974_v58 = vld [vmem:[%s10706_s28 + $0x9e0] sm:$0xff] }
 0x618   : > { %6452 = vmatpush.xpose.msra.mxu0 %v16108_v57  ;;  %10229 = vmatpush.xpose.msk.msra.mxu1 %vm423_vm0, %v16109_v36 }
 0x619   : > { %6492 = vmatpush.xpose.msra.mxu2 %v14689_v23  ;;  %10246 = vmatpush.xpose.msk.msra.mxu3 %vm423_vm0, %v14692_v54 }
 0x61c   : > { %6453 = vmatpush.xpose.msra.mxu0 %v14367_v2  ;;  %10230 = vmatpush.xpose.msk.msra.mxu1 %vm423_vm0, %v14370_v52 }
 0x61d   : > { %6493 = vmatpush.xpose.msra.mxu2 %v14525_v30  ;;  %10247 = vmatpush.xpose.msk.msra.mxu3 %vm423_vm0, %v14528_v14 }
 0x620   : > { %6454 = vmatpush.xpose.msra.mxu0 %v14385_v44  ;;  %10231 = vmatpush.xpose.msk.msra.mxu1 %vm423_vm0, %v14388_v6 }
 0x621   : > { %6494 = vmatpush.xpose.msra.mxu2 %v14552_v29  ;;  %10248 = vmatpush.xpose.msk.msra.mxu3 %vm423_vm0, %v14555_v20 }
 0x624   : > { %6455 = vmatpush.xpose.msra.mxu0 %v14095_v39  ;;  %10232 = vmatpush.xpose.msk.msra.mxu1 %vm423_vm0, %v14098_v56  ;;  %v6350_v39 = vld.sshfl [vmem:[#allocation1] sm:$0xff pattern:$0x73625140]  ;;  %v6351_v56 = vld.sshfl [vmem:[#allocation1 + $0x8] sm:$0xff pattern:$0x73625140] }
 0x625   : > { %6495 = vmatpush.xpose.msra.mxu2 %v14104_v35  ;;  %10249 = vmatpush.xpose.msk.msra.mxu3 %vm423_vm0, %v14107_v24  ;;  %v16110_v35 = vld [vmem:[#allocation4_spill] sm:$0xff]  ;;  %v16111_v24 = vld [vmem:[#allocation57_spill] sm:$0xff] }
 0x626   : > { %6598 = vst [vmem:[#allocation1] ss:$4 sm:$0xff] %v16110_v35  ;;  %v15043_v35 = vld [vmem:[%s10706_s28 + $0x9b8] sm:$0xff] }
 0x628   : > { %6456 = vmatpush.xpose.msra.mxu0 %v14119_v22  ;;  %10233 = vmatpush.xpose.msk.msra.mxu1 %vm423_vm0, %v14122_v25  ;;  %v14784_v22 = vld [vmem:[%s10706_s28 + $0xab0] sm:$0xff]  ;;  %v14787_v25 = vld [vmem:[%s10706_s28 + $0xab8] sm:$0xff] }
 0x629   : > { %6496 = vmatpush.xpose.msra.mxu2 %v16080_v26  ;;  %10250 = vmatpush.xpose.msk.msra.mxu3 %vm423_vm0, %v16081_v10  ;;  %v14938_v26 = vld [vmem:[%s10706_s28 + $0xa00] sm:$0xff]  ;;  %v14941_v10 = vld [vmem:[%s10706_s28 + $0xa08] sm:$0xff] }
 0x62c   : > { %6457 = vmatpush.xpose.msra.mxu0 %v14139_v27  ;;  %10234 = vmatpush.xpose.msk.msra.mxu1 %vm423_vm0, %v14142_v50  ;;  %v16112_v27 = vld [vmem:[#allocation58_spill] sm:$0xff]  ;;  %v16113_v50 = vld [vmem:[#allocation59_spill] sm:$0xff] }
 0x62d   : > { %6497 = vmatpush.xpose.msra.mxu2 %v14148_v31  ;;  %10251 = vmatpush.xpose.msk.msra.mxu3 %vm423_vm0, %v14151_v41  ;;  %v14800_v31 = vld [vmem:[%s10706_s28 + $0xaa0] sm:$0xff]  ;;  %v14803_v41 = vld [vmem:[%s10706_s28 + $0xaa8] sm:$0xff] }
 0x630   : > { %6458 = vmatpush.xpose.msra.mxu0 %v14160_v17  ;;  %10235 = vmatpush.xpose.msk.msra.mxu1 %vm423_vm0, %v14163_v15  ;;  %v14837_v17 = vld [vmem:[%s10706_s28 + $0x950] sm:$0xff]  ;;  %v14840_v15 = vld [vmem:[%s10706_s28 + $0x958] sm:$0xff] }
 0x631   : > { %6498 = vmatpush.xpose.msra.mxu2 %v14166_v13  ;;  %10252 = vmatpush.xpose.msk.msra.mxu3 %vm423_vm0, %v14169_v63  ;;  %v14843_v13 = vld [vmem:[%s10706_s28 + $0xa50] sm:$0xff]  ;;  %v14846_v63 = vld [vmem:[%s10706_s28 + $0xa58] sm:$0xff] }
 0x634   : > { %6459 = vmatpush.xpose.msra.mxu0 %v14181_v33  ;;  %10236 = vmatpush.xpose.msk.msra.mxu1 %vm423_vm0, %v14184_v46  ;;  %v14861_v33 = vld [vmem:[%s10706_s28 + $0xa40] sm:$0xff]  ;;  %v14864_v46 = vld [vmem:[%s10706_s28 + $0xa48] sm:$0xff] }
 0x635   : > { %6499 = vmatpush.xpose.msra.mxu2 %v14187_v16  ;;  %10253 = vmatpush.xpose.msk.msra.mxu3 %vm423_vm0, %v14190_v49  ;;  %v14873_v16 = vld [vmem:[%s10706_s28 + $0x930] sm:$0xff]  ;;  %v14876_v49 = vld [vmem:[%s10706_s28 + $0x938] sm:$0xff] }
 0x638   : > { %6460 = vmatpush.xpose.msra.mxu0 %v14199_v0  ;;  %10237 = vmatpush.xpose.msk.msra.mxu1 %vm423_vm0, %v14202_v3  ;;  %v14879_v0 = vld [vmem:[%s10706_s28 + $0xa30] sm:$0xff]  ;;  %v14882_v3 = vld [vmem:[%s10706_s28 + $0xa38] sm:$0xff] }
 0x639   : > { %6500 = vmatpush.xpose.msra.mxu2 %v14205_v53  ;;  %10254 = vmatpush.xpose.msk.msra.mxu3 %vm423_vm0, %v16086_v21  ;;  %v14887_v53 = vld.sshfl [vmem:[#allocation1] sm:$0xff pattern:$0x73625140]  ;;  %v14959_v21 = vld [vmem:[%s10706_s28 + $0x9f8] sm:$0xff] }
 0x63c   : > { %6461 = vmatpush.xpose.msra.mxu0 %v16087_v28  ;;  %10238 = vmatpush.xpose.msk.msra.mxu1 %vm423_vm0, %v14220_v12  ;;  %v14889_v12 = vld.sshfl [vmem:[#allocation1 + $0x8] sm:$0xff pattern:$0x73625140]  ;;  %v14968_v28 = vld [vmem:[%s10706_s28 + $0x8e0] sm:$0xff] }
 0x63d   : > { %6501 = vmatpush.xpose.msra.mxu2 %v14223_v55  ;;  %10255 = vmatpush.xpose.msk.msra.mxu3 %vm423_vm0, %v16088_v32  ;;  %v14895_v55 = vld [vmem:[%s10706_s28 + $0x920] sm:$0xff]  ;;  %v14977_v32 = vld [vmem:[%s10706_s28 + $0x9e8] sm:$0xff] }
 0x640   : > { %6462 = vmatpush.xpose.msra.mxu0 %v14235_v61  ;;  %10239 = vmatpush.xpose.msk.msra.mxu1 %vm423_vm0, %v14238_v18  ;;  %v14898_v61 = vld [vmem:[%s10706_s28 + $0x928] sm:$0xff] }
 0x641   : > { %6502 = vmatpush.xpose.msra.mxu2 %v14241_v62  ;;  %10256 = vmatpush.xpose.msk.msra.mxu3 %vm423_vm0, %v14244_v9  ;;  %v16114_v18 = vld [vmem:[#allocation7_spill] sm:$0xff]  ;;  %v14902_v62 = vld [vmem:[%s10706_s28 + $0xa20] sm:$0xff] }
 0x642   : > { %6847 = vst [vmem:[#allocation1] ss:$4 sm:$0xff] %v16114_v18  ;;  %v14905_v9 = vld [vmem:[%s10706_s28 + $0xa28] sm:$0xff] }
 0x643   : > { %v15079_v18 = vld [vmem:[%s10706_s28 + $0x988] sm:$0xff] }
 0x644   : > { %6463 = vmatpush.xpose.msra.mxu0 %v14253_v1  ;;  %10240 = vmatpush.xpose.msk.msra.mxu1 %vm423_vm0, %v14256_v8  ;;  %v14914_v1 = vld [vmem:[%s10706_s28 + $0x910] sm:$0xff]  ;;  %v14917_v8 = vld [vmem:[%s10706_s28 + $0x918] sm:$0xff] }
 0x645   : > { %6503 = vmatpush.xpose.msra.mxu2 %v14259_v43  ;;  %10257 = vmatpush.xpose.msk.msra.mxu3 %vm423_vm0, %v14262_v51  ;;  %v14920_v43 = vld [vmem:[%s10706_s28 + $0xa10] sm:$0xff]  ;;  %v14923_v51 = vld [vmem:[%s10706_s28 + $0xa18] sm:$0xff] }
 0x648   : > { %6464 = vmatpush.xpose.msra.mxu0 %v16090_v5  ;;  %10241 = vmatpush.xpose.msk.msra.mxu1 %vm423_vm0, %v16091_v45  ;;  %v10264_v5 = vld [vmem:[%s10706_s28 + $0x8d0] sm:$0xff]  ;;  %v10265_v45 = vld [vmem:[%s10706_s28 + $0x8d8] sm:$0xff] }
 0x649   : > { %6504 = vmatpush.xpose.msra.mxu2 %v16092_v40  ;;  %10258 = vmatpush.xpose.msk.msra.mxu3 %vm423_vm0, %v16093_v4  ;;  %v14988_v40 = vld [vmem:[%s10706_s28 + $0x9d0] sm:$0xff]  ;;  %v14991_v4 = vld [vmem:[%s10706_s28 + $0x9d8] sm:$0xff] }
 0x64c   : > { %6465 = vmatpush.xpose.msra.mxu0 %v16094_v11  ;;  %10242 = vmatpush.xpose.msk.msra.mxu1 %vm423_vm0, %v16095_v38  ;;  %v10262_v11 = vld [vmem:[%s10706_s28 + $0x8c0] sm:$0xff]  ;;  %v10263_v38 = vld [vmem:[%s10706_s28 + $0x8c8] sm:$0xff] }
 0x64d   : > { %6505 = vmatpush.xpose.msra.mxu2 %v16096_v37  ;;  %10259 = vmatpush.xpose.msk.msra.mxu3 %vm423_vm0, %v16097_v19 }
 0x650   : > { %6466 = vmatpush.xpose.msra.mxu0 %v16098_v47  ;;  %10243 = vmatpush.xpose.msk.msra.mxu1 %vm423_vm0, %v16111_v24  ;;  %v15007_v47 = vld [vmem:[%s10706_s28 + $0xad0] sm:$0xff]  ;;  %v15052_v24 = vld [vmem:[%s10706_s28 + $0x9a0] sm:$0xff] }
 0x651   : > { %6506 = vmatpush.xpose.msra.mxu2 %v16112_v27  ;;  %10260 = vmatpush.xpose.msk.msra.mxu3 %vm423_vm0, %v16113_v50 }
 0x653   : > { %6467 = vmatmul.f32.vlgmr.msra.gmra.mxu0 %v6350_v39  ;;  %10244 = vmatmul.msk.f32.vlgmr.msra.gmra.mxu1 %vm423_vm0, %v6351_v56 }
 0x654   : > { %6700 = vmatpush.xpose.msrb.mxu0 %v16096_v37  ;;  %10326 = vmatpush.xpose.msk.msrb.mxu1 %vm423_vm0, %v16097_v19  ;;  %v15000_v37 = vld [vmem:[%s10706_s28 + $0x9c0] sm:$0xff]  ;;  %v15003_v19 = vld [vmem:[%s10706_s28 + $0x9c8] sm:$0xff] }
 0x655   : > { %6740 = vmatpush.xpose.msrb.mxu2 %v14784_v22  ;;  %10343 = vmatpush.xpose.msk.msrb.mxu3 %vm423_vm0, %v14787_v25 }
 0x656   : > { %6507 = vmatmul.f32.vlgmr.msra.gmra.mxu2 %v6350_v39  ;;  %10261 = vmatmul.msk.f32.vlgmr.msra.gmra.mxu3 %vm423_vm0, %v6351_v56  ;;  %v15028_v39 = vld [vmem:[%s10706_s28 + $0xac8] sm:$0xff]  ;;  %v15040_v56 = vld [vmem:[%s10706_s28 + $0x9b0] sm:$0xff] }
 0x658   : > { %6701 = vmatpush.xpose.msrb.mxu0 %v16112_v27  ;;  %10327 = vmatpush.xpose.msk.msrb.mxu1 %vm423_vm0, %v16113_v50  ;;  %v15055_v27 = vld [vmem:[%s10706_s28 + $0x9a8] sm:$0xff]  ;;  %v15064_v50 = vld [vmem:[%s10706_s28 + $0x990] sm:$0xff] }
 0x659   : > { %6741 = vmatpush.xpose.msrb.mxu2 %v14800_v31  ;;  %10344 = vmatpush.xpose.msk.msrb.mxu3 %vm423_vm0, %v14803_v41 }
 0x65c   : > { %6702 = vmatpush.xpose.msrb.mxu0 %v16104_v59  ;;  %10328 = vmatpush.xpose.msk.msrb.mxu1 %vm423_vm0, %v16105_v34  ;;  %v14950_v59 = vld [vmem:[%s10706_s28 + $0x8f0] sm:$0xff]  ;;  %v14953_v34 = vld [vmem:[%s10706_s28 + $0x8f8] sm:$0xff] }
 0x65d   : > { %6742 = vmatpush.xpose.msrb.mxu2 %v14673_v60  ;;  %10345 = vmatpush.xpose.msk.msrb.mxu3 %vm423_vm0, %v14676_v48 }
 0x660   : > { %6703 = vmatpush.xpose.msrb.mxu0 %v16108_v57  ;;  %10329 = vmatpush.xpose.msk.msrb.mxu1 %vm423_vm0, %v16109_v36  ;;  %v15010_v36 = vld [vmem:[%s10706_s28 + $0xad8] sm:$0xff]  ;;  %v15025_v57 = vld [vmem:[%s10706_s28 + $0xac0] sm:$0xff] }
 0x661   : > { %6743 = vmatpush.xpose.msrb.mxu2 %v14689_v23  ;;  %10346 = vmatpush.xpose.msk.msrb.mxu3 %vm423_vm0, %v14692_v54 }
 0x664   : > { %6704 = vmatpush.xpose.msrb.mxu0 %v14367_v2  ;;  %10330 = vmatpush.xpose.msk.msrb.mxu1 %vm423_vm0, %v14370_v52  ;;  %v14932_v2 = vld [vmem:[%s10706_s28 + $0x900] sm:$0xff]  ;;  %v14935_v52 = vld [vmem:[%s10706_s28 + $0x908] sm:$0xff] }
 0x665   : > { %6744 = vmatpush.xpose.msrb.mxu2 %v14525_v30  ;;  %10347 = vmatpush.xpose.msk.msrb.mxu3 %vm423_vm0, %v14528_v14 }
 0x668   : > { %6705 = vmatpush.xpose.msrb.mxu0 %v14385_v44  ;;  %10331 = vmatpush.xpose.msk.msrb.mxu1 %vm423_vm0, %v14388_v6  ;;  %v14855_v6 = vld [vmem:[%s10706_s28 + $0x940] sm:$0xff]  ;;  %v14858_v44 = vld [vmem:[%s10706_s28 + $0x948] sm:$0xff] }
 0x669   : > { %6745 = vmatpush.xpose.msrb.mxu2 %v14552_v29  ;;  %10348 = vmatpush.xpose.msk.msrb.mxu3 %vm423_vm0, %v14555_v20 }
 0x66c   : > { %6706 = vmatpush.xpose.msrb.mxu0 %v14837_v17  ;;  %10332 = vmatpush.xpose.msk.msrb.mxu1 %vm423_vm0, %v14840_v15 }
 0x66d   : > { %6746 = vmatpush.xpose.msrb.mxu2 %v14843_v13  ;;  %10349 = vmatpush.xpose.msk.msrb.mxu3 %vm423_vm0, %v14846_v63 }
 0x670   : > { %6707 = vmatpush.xpose.msrb.mxu0 %v14855_v6  ;;  %10333 = vmatpush.xpose.msk.msrb.mxu1 %vm423_vm0, %v14858_v44 }
 0x671   : > { %6747 = vmatpush.xpose.msrb.mxu2 %v14861_v33  ;;  %10350 = vmatpush.xpose.msk.msrb.mxu3 %vm423_vm0, %v14864_v46 }
 0x674   : > { %6708 = vmatpush.xpose.msrb.mxu0 %v14873_v16  ;;  %10334 = vmatpush.xpose.msk.msrb.mxu1 %vm423_vm0, %v14876_v49 }
 0x675   : > { %6748 = vmatpush.xpose.msrb.mxu2 %v14879_v0  ;;  %10351 = vmatpush.xpose.msk.msrb.mxu3 %vm423_vm0, %v14882_v3 }
 0x678   : > { %6709 = vmatpush.xpose.msrb.mxu0 %v14895_v55  ;;  %10335 = vmatpush.xpose.msk.msrb.mxu1 %vm423_vm0, %v14898_v61 }
 0x679   : > { %6749 = vmatpush.xpose.msrb.mxu2 %v14902_v62  ;;  %10352 = vmatpush.xpose.msk.msrb.mxu3 %vm423_vm0, %v14905_v9 }
 0x67c   : > { %6710 = vmatpush.xpose.msrb.mxu0 %v14914_v1  ;;  %10336 = vmatpush.xpose.msk.msrb.mxu1 %vm423_vm0, %v14917_v8 }
 0x67d   : > { %6750 = vmatpush.xpose.msrb.mxu2 %v14920_v43  ;;  %10353 = vmatpush.xpose.msk.msrb.mxu3 %vm423_vm0, %v14923_v51 }
 0x680   : > { %6711 = vmatpush.xpose.msrb.mxu0 %v14932_v2  ;;  %10337 = vmatpush.xpose.msk.msrb.mxu1 %vm423_vm0, %v14935_v52 }
 0x681   : > { %6751 = vmatpush.xpose.msrb.mxu2 %v14938_v26  ;;  %10354 = vmatpush.xpose.msk.msrb.mxu3 %vm423_vm0, %v14941_v10 }
 0x684   : > { %6712 = vmatpush.xpose.msrb.mxu0 %v14950_v59  ;;  %10338 = vmatpush.xpose.msk.msrb.mxu1 %vm423_vm0, %v14953_v34 }
 0x685   : > { %6752 = vmatpush.xpose.msrb.mxu2 %v14956_v42  ;;  %10355 = vmatpush.xpose.msk.msrb.mxu3 %vm423_vm0, %v14959_v21 }
 0x688   : > { %6713 = vmatpush.xpose.msrb.mxu0 %v14968_v28  ;;  %10339 = vmatpush.xpose.msk.msrb.mxu1 %vm423_vm0, %v14971_v7 }
 0x689   : > { %6753 = vmatpush.xpose.msrb.mxu2 %v14974_v58  ;;  %10356 = vmatpush.xpose.msk.msrb.mxu3 %vm423_vm0, %v14977_v32 }
 0x68c   : > { %6714 = vmatpush.xpose.msrb.mxu0 %v10264_v5  ;;  %10340 = vmatpush.xpose.msk.msrb.mxu1 %vm423_vm0, %v10265_v45  ;;  %v15088_v5 = vld [vmem:[%s10706_s28 + $0x970] sm:$0xff]  ;;  %v15091_v45 = vld [vmem:[%s10706_s28 + $0x978] sm:$0xff] }
 0x68d   : > { %6754 = vmatpush.xpose.msrb.mxu2 %v14988_v40  ;;  %10357 = vmatpush.xpose.msk.msrb.mxu3 %vm423_vm0, %v14991_v4 }
 0x690   : > { %6715 = vmatpush.xpose.msrb.mxu0 %v10262_v11  ;;  %10341 = vmatpush.xpose.msk.msrb.mxu1 %vm423_vm0, %v10263_v38  ;;  %v15100_v11 = vld [vmem:[%s10706_s28 + $0x960] sm:$0xff]  ;;  %v15103_v38 = vld [vmem:[%s10706_s28 + $0x968] sm:$0xff] }
 0x691   : > { %6755 = vmatpush.xpose.msrb.mxu2 %v15000_v37  ;;  %10358 = vmatpush.xpose.msk.msrb.mxu3 %vm423_vm0, %v15003_v19  ;;  %16115 = vst [vmem:[#allocation19_spill] sm:$0xff] %v15100_v11 }
 0x693   : > { %6716 = vmatmul.f32.vlgmr.msrb.gmra.mxu0 %v14887_v53  ;;  %10342 = vmatmul.msk.f32.vlgmr.msrb.gmra.mxu1 %vm423_vm0, %v14889_v12 }
 0x694   : > { %6949 = vmatpush.xpose.msra.mxu0 %v14988_v40  ;;  %10424 = vmatpush.xpose.msk.msra.mxu1 %vm423_vm0, %v14991_v4 }
 0x695   : > { %6989 = vmatpush.xpose.msra.mxu2 %v15007_v47  ;;  %10441 = vmatpush.xpose.msk.msra.mxu3 %vm423_vm0, %v15010_v36 }
 0x696   : > { %6756 = vmatmul.f32.vlgmr.msrb.gmra.mxu2 %v14887_v53  ;;  %10359 = vmatmul.msk.f32.vlgmr.msrb.gmra.mxu3 %vm423_vm0, %v14889_v12  ;;  %v15067_v53 = vld [vmem:[%s10706_s28 + $0x998] sm:$0xff]  ;;  %v15076_v12 = vld [vmem:[%s10706_s28 + $0x980] sm:$0xff] }
 0x698   : > { %6950 = vmatpush.xpose.msra.mxu0 %v15000_v37  ;;  %10425 = vmatpush.xpose.msk.msra.mxu1 %vm423_vm0, %v15003_v19 }
 0x699   : > { %6990 = vmatpush.xpose.msra.mxu2 %v15025_v57  ;;  %10442 = vmatpush.xpose.msk.msra.mxu3 %vm423_vm0, %v15028_v39 }
 0x69c   : > { %6951 = vmatpush.xpose.msra.mxu0 %v15040_v56  ;;  %10426 = vmatpush.xpose.msk.msra.mxu1 %vm423_vm0, %v15043_v35 }
 0x69d   : > { %6991 = vmatpush.xpose.msra.mxu2 %v14784_v22  ;;  %10443 = vmatpush.xpose.msk.msra.mxu3 %vm423_vm0, %v14787_v25 }
 0x6a0   : > { %6952 = vmatpush.xpose.msra.mxu0 %v15052_v24  ;;  %10427 = vmatpush.xpose.msk.msra.mxu1 %vm423_vm0, %v15055_v27 }
 0x6a1   : > { %6992 = vmatpush.xpose.msra.mxu2 %v14800_v31  ;;  %10444 = vmatpush.xpose.msk.msra.mxu3 %vm423_vm0, %v14803_v41 }
 0x6a4   : > { %6953 = vmatpush.xpose.msra.mxu0 %v15064_v50  ;;  %10428 = vmatpush.xpose.msk.msra.mxu1 %vm423_vm0, %v15067_v53 }
 0x6a5   : > { %6993 = vmatpush.xpose.msra.mxu2 %v14673_v60  ;;  %10445 = vmatpush.xpose.msk.msra.mxu3 %vm423_vm0, %v14676_v48 }
 0x6a8   : > { %6954 = vmatpush.xpose.msra.mxu0 %v15076_v12  ;;  %10429 = vmatpush.xpose.msk.msra.mxu1 %vm423_vm0, %v15079_v18 }
 0x6a9   : > { %6994 = vmatpush.xpose.msra.mxu2 %v14689_v23  ;;  %10446 = vmatpush.xpose.msk.msra.mxu3 %vm423_vm0, %v14692_v54 }
 0x6ac   : > { %6955 = vmatpush.xpose.msra.mxu0 %v15088_v5  ;;  %10430 = vmatpush.xpose.msk.msra.mxu1 %vm423_vm0, %v15091_v45 }
 0x6ad   : > { %6995 = vmatpush.xpose.msra.mxu2 %v14525_v30  ;;  %10447 = vmatpush.xpose.msk.msra.mxu3 %vm423_vm0, %v14528_v14  ;;  %v6848_v30 = vld.sshfl [vmem:[#allocation1] sm:$0xff pattern:$0x73625140]  ;;  %v6849_v14 = vld.sshfl [vmem:[#allocation1 + $0x8] sm:$0xff pattern:$0x73625140] }
 0x6b0   : > { %6956 = vmatpush.xpose.msra.mxu0 %v15100_v11  ;;  %10431 = vmatpush.xpose.msk.msra.mxu1 %vm423_vm0, %v15103_v38  ;;  %v16116_v11 = vld [vmem:[#allocation10_spill] sm:$0xff] }
 0x6b1   : > { %6996 = vmatpush.xpose.msra.mxu2 %v14552_v29  ;;  %10448 = vmatpush.xpose.msk.msra.mxu3 %vm423_vm0, %v14555_v20  ;;  %7096 = vst [vmem:[#allocation1] ss:$4 sm:$0xff] %v16116_v11  ;;  %v10520_v29 = vld [vmem:[%s10706_s28 + $0xaf0] sm:$0xff]  ;;  %v10521_v20 = vld [vmem:[%s10706_s28 + $0xaf8] sm:$0xff]  ;;  %v10597_v11 = vld [vmem:[%s15786_s5 + $0x348] sm:$0xff] }
 0x6b4   : > { %6957 = vmatpush.xpose.msra.mxu0 %v14837_v17  ;;  %10432 = vmatpush.xpose.msk.msra.mxu1 %vm423_vm0, %v14840_v15 }
 0x6b5   : > { %6997 = vmatpush.xpose.msra.mxu2 %v14843_v13  ;;  %10449 = vmatpush.xpose.msk.msra.mxu3 %vm423_vm0, %v14846_v63 }
 0x6b8   : > { %6958 = vmatpush.xpose.msra.mxu0 %v14855_v6  ;;  %10433 = vmatpush.xpose.msk.msra.mxu1 %vm423_vm0, %v14858_v44 }
 0x6b9   : > { %6998 = vmatpush.xpose.msra.mxu2 %v14861_v33  ;;  %10450 = vmatpush.xpose.msk.msra.mxu3 %vm423_vm0, %v14864_v46 }
 0x6bc   : > { %6959 = vmatpush.xpose.msra.mxu0 %v14873_v16  ;;  %10434 = vmatpush.xpose.msk.msra.mxu1 %vm423_vm0, %v14876_v49 }
 0x6bd   : > { %6999 = vmatpush.xpose.msra.mxu2 %v14879_v0  ;;  %10451 = vmatpush.xpose.msk.msra.mxu3 %vm423_vm0, %v14882_v3 }
 0x6c0   : > { %6960 = vmatpush.xpose.msra.mxu0 %v14895_v55  ;;  %10435 = vmatpush.xpose.msk.msra.mxu1 %vm423_vm0, %v14898_v61 }
 0x6c1   : > { %7000 = vmatpush.xpose.msra.mxu2 %v14902_v62  ;;  %10452 = vmatpush.xpose.msk.msra.mxu3 %vm423_vm0, %v14905_v9 }
 0x6c4   : > { %6961 = vmatpush.xpose.msra.mxu0 %v14914_v1  ;;  %10436 = vmatpush.xpose.msk.msra.mxu1 %vm423_vm0, %v14917_v8 }
 0x6c5   : > { %7001 = vmatpush.xpose.msra.mxu2 %v14920_v43  ;;  %10453 = vmatpush.xpose.msk.msra.mxu3 %vm423_vm0, %v14923_v51 }
 0x6c8   : > { %6962 = vmatpush.xpose.msra.mxu0 %v14932_v2  ;;  %10437 = vmatpush.xpose.msk.msra.mxu1 %vm423_vm0, %v14935_v52 }
 0x6c9   : > { %7002 = vmatpush.xpose.msra.mxu2 %v14938_v26  ;;  %10454 = vmatpush.xpose.msk.msra.mxu3 %vm423_vm0, %v14941_v10 }
 0x6cc   : > { %6963 = vmatpush.xpose.msra.mxu0 %v14950_v59  ;;  %10438 = vmatpush.xpose.msk.msra.mxu1 %vm423_vm0, %v14953_v34  ;;  %v10518_v59 = vld [vmem:[%s10706_s28 + $0xae0] sm:$0xff]  ;;  %v10519_v34 = vld [vmem:[%s10706_s28 + $0xae8] sm:$0xff] }
 0x6cd   : > { %7003 = vmatpush.xpose.msra.mxu2 %v14956_v42  ;;  %10455 = vmatpush.xpose.msk.msra.mxu3 %vm423_vm0, %v14959_v21 }
 0x6d0   : > { %6964 = vmatpush.xpose.msra.mxu0 %v14968_v28  ;;  %10439 = vmatpush.xpose.msk.msra.mxu1 %vm423_vm0, %v14971_v7  ;;  %v10573_v28 = vld [vmem:[%s15786_s5 + $0x288] sm:$0xff]  ;;  %v10606_v7 = vld [vmem:[%s15786_s5 + $0x390] sm:$0xff] }
 0x6d1   : > { %7004 = vmatpush.xpose.msra.mxu2 %v14974_v58  ;;  %10456 = vmatpush.xpose.msk.msra.mxu3 %vm423_vm0, %v14977_v32 }
 0x6d3   : > { %6965 = vmatmul.f32.vlgmr.msra.gmra.mxu0 %v6848_v30  ;;  %10440 = vmatmul.msk.f32.vlgmr.msra.gmra.mxu1 %vm423_vm0, %v6849_v14 }
 0x6d4   : > { %7198 = vmatpush.xpose.msrb.mxu0 %v14956_v42  ;;  %10522 = vmatpush.xpose.msk.msrb.mxu1 %vm423_vm0, %v14959_v21  ;;  %v10609_v42 = vld [vmem:[%s15786_s5 + $0x3a8] sm:$0xff]  ;;  %v10572_v21 = vld [vmem:[%s15786_s5 + $0x280] sm:$0xff] }
 0x6d5   : > { %7238 = vmatpush.xpose.msrb.mxu2 %v10520_v29  ;;  %10539 = vmatpush.xpose.msk.msrb.mxu3 %vm423_vm0, %v10521_v20  ;;  %v10595_v29 = vld [vmem:[%s15786_s5 + $0x338] sm:$0xff]  ;;  %v10558_v20 = vld [vmem:[%s15786_s5 + $0x210] sm:$0xff] }
 0x6d6   : > { %7005 = vmatmul.f32.vlgmr.msra.gmra.mxu2 %v6848_v30  ;;  %10457 = vmatmul.msk.f32.vlgmr.msra.gmra.mxu3 %vm423_vm0, %v6849_v14  ;;  %v10561_v30 = vld [vmem:[%s15786_s5 + $0x228] sm:$0xff]  ;;  %v10594_v14 = vld [vmem:[%s15786_s5 + $0x330] sm:$0xff] }
 0x6d8   : > { %7199 = vmatpush.xpose.msrb.mxu0 %v14974_v58  ;;  %10523 = vmatpush.xpose.msk.msrb.mxu1 %vm423_vm0, %v14977_v32  ;;  %v10607_v58 = vld [vmem:[%s15786_s5 + $0x398] sm:$0xff]  ;;  %v10570_v32 = vld [vmem:[%s15786_s5 + $0x270] sm:$0xff] }
 0x6d9   : > { %7239 = vmatpush.xpose.msrb.mxu2 %v10518_v59  ;;  %10540 = vmatpush.xpose.msk.msrb.mxu3 %vm423_vm0, %v10519_v34  ;;  %v10559_v59 = vld [vmem:[%s15786_s5 + $0x218] sm:$0xff]  ;;  %v10592_v34 = vld [vmem:[%s15786_s5 + $0x320] sm:$0xff] }
 0x6dc   : > { %7200 = vmatpush.xpose.msrb.mxu0 %v14988_v40  ;;  %10524 = vmatpush.xpose.msk.msrb.mxu1 %vm423_vm0, %v14991_v4  ;;  %v10571_v40 = vld [vmem:[%s15786_s5 + $0x278] sm:$0xff]  ;;  %v10604_v4 = vld [vmem:[%s15786_s5 + $0x380] sm:$0xff] }
 0x6dd   : > { %7240 = vmatpush.xpose.msrb.mxu2 %v15007_v47  ;;  %10541 = vmatpush.xpose.msk.msrb.mxu3 %vm423_vm0, %v15010_v36  ;;  %v10569_v47 = vld [vmem:[%s15786_s5 + $0x268] sm:$0xff]  ;;  %v10602_v36 = vld [vmem:[%s15786_s5 + $0x370] sm:$0xff] }
 0x6e0   : > { %7201 = vmatpush.xpose.msrb.mxu0 %v15000_v37  ;;  %10525 = vmatpush.xpose.msk.msrb.mxu1 %vm423_vm0, %v15003_v19  ;;  %v10605_v37 = vld [vmem:[%s15786_s5 + $0x388] sm:$0xff]  ;;  %v10568_v19 = vld [vmem:[%s15786_s5 + $0x260] sm:$0xff] }
 0x6e1   : > { %7241 = vmatpush.xpose.msrb.mxu2 %v15025_v57  ;;  %10542 = vmatpush.xpose.msk.msrb.mxu3 %vm423_vm0, %v15028_v39  ;;  %v10603_v57 = vld [vmem:[%s15786_s5 + $0x378] sm:$0xff]  ;;  %v10566_v39 = vld [vmem:[%s15786_s5 + $0x250] sm:$0xff] }
 0x6e4   : > { %7202 = vmatpush.xpose.msrb.mxu0 %v15040_v56  ;;  %10526 = vmatpush.xpose.msk.msrb.mxu1 %vm423_vm0, %v15043_v35  ;;  %v10567_v56 = vld [vmem:[%s15786_s5 + $0x258] sm:$0xff]  ;;  %v10600_v35 = vld [vmem:[%s15786_s5 + $0x360] sm:$0xff] }
 0x6e5   : > { %7242 = vmatpush.xpose.msrb.mxu2 %v14784_v22  ;;  %10543 = vmatpush.xpose.msk.msrb.mxu3 %vm423_vm0, %v14787_v25  ;;  %v10504_v22 = vld [vmem:[%s10706_s28 + $0xa70] sm:$0xff]  ;;  %v10505_v25 = vld [vmem:[%s10706_s28 + $0xa78] sm:$0xff] }
 0x6e8   : > { %7203 = vmatpush.xpose.msrb.mxu0 %v15052_v24  ;;  %10527 = vmatpush.xpose.msk.msrb.mxu1 %vm423_vm0, %v15055_v27  ;;  %v10601_v24 = vld [vmem:[%s15786_s5 + $0x368] sm:$0xff]  ;;  %v10564_v27 = vld [vmem:[%s15786_s5 + $0x240] sm:$0xff] }
 0x6e9   : > { %7243 = vmatpush.xpose.msrb.mxu2 %v14800_v31  ;;  %10544 = vmatpush.xpose.msk.msrb.mxu3 %vm423_vm0, %v14803_v41  ;;  %v16117_v31 = vld [vmem:[#allocation19_spill] sm:$0xff]  ;;  %v10586_v41 = vld [vmem:[%s15786_s5 + $0x2f0] sm:$0xff] }
 0x6ec   : > { %7204 = vmatpush.xpose.msrb.mxu0 %v15064_v50  ;;  %10528 = vmatpush.xpose.msk.msrb.mxu1 %vm423_vm0, %v15067_v53  ;;  %v10565_v50 = vld [vmem:[%s15786_s5 + $0x248] sm:$0xff]  ;;  %v10598_v53 = vld [vmem:[%s15786_s5 + $0x350] sm:$0xff] }
 0x6ed   : > { %7244 = vmatpush.xpose.msrb.mxu2 %v14673_v60  ;;  %10545 = vmatpush.xpose.msk.msrb.mxu3 %vm423_vm0, %v14676_v48  ;;  %v10502_v60 = vld [vmem:[%s10706_s28 + $0xa60] sm:$0xff]  ;;  %v10503_v48 = vld [vmem:[%s10706_s28 + $0xa68] sm:$0xff] }
 0x6f0   : > { %7205 = vmatpush.xpose.msrb.mxu0 %v15076_v12  ;;  %10529 = vmatpush.xpose.msk.msrb.mxu1 %vm423_vm0, %v15079_v18  ;;  %v10599_v12 = vld [vmem:[%s15786_s5 + $0x358] sm:$0xff]  ;;  %v10562_v18 = vld [vmem:[%s15786_s5 + $0x230] sm:$0xff] }
 0x6f1   : > { %7245 = vmatpush.xpose.msrb.mxu2 %v14689_v23  ;;  %10546 = vmatpush.xpose.msk.msrb.mxu3 %vm423_vm0, %v14692_v54  ;;  %v7097_v23 = vld.sshfl [vmem:[#allocation1] sm:$0xff pattern:$0x73625140]  ;;  %v7098_v54 = vld.sshfl [vmem:[#allocation1 + $0x8] sm:$0xff pattern:$0x73625140] }
 0x6f4   : > { %7206 = vmatpush.xpose.msrb.mxu0 %v15088_v5  ;;  %10530 = vmatpush.xpose.msk.msrb.mxu1 %vm423_vm0, %v15091_v45  ;;  %v10563_v5 = vld [vmem:[%s15786_s5 + $0x238] sm:$0xff]  ;;  %v10596_v45 = vld [vmem:[%s15786_s5 + $0x340] sm:$0xff] }
 0x6f5   : > { %7246 = vmatpush.xpose.msrb.mxu2 %v10504_v22  ;;  %10547 = vmatpush.xpose.msk.msrb.mxu3 %vm423_vm0, %v10505_v25  ;;  %v10593_v22 = vld [vmem:[%s15786_s5 + $0x328] sm:$0xff]  ;;  %v10556_v25 = vld [vmem:[%s15786_s5 + $0x200] sm:$0xff] }
 0x6f8   : > { %7207 = vmatpush.xpose.msrb.mxu0 %v16117_v31  ;;  %10531 = vmatpush.xpose.msk.msrb.mxu1 %vm423_vm0, %v15103_v38  ;;  %v10560_v38 = vld [vmem:[%s15786_s5 + $0x220] sm:$0xff]  ;;  %v7342_v31 = vld [vmem:[%s15786_s5 + $0xf8] sm:$0xff] }
 0x6f9   : > { %7247 = vmatpush.xpose.msrb.mxu2 %v10502_v60  ;;  %10548 = vmatpush.xpose.msk.msrb.mxu3 %vm423_vm0, %v10503_v48  ;;  %v10557_v60 = vld [vmem:[%s15786_s5 + $0x208] sm:$0xff]  ;;  %v7341_v48 = vld [vmem:[%s15786_s5 + $0xf0] sm:$0xff] }
 0x6fc   : > { %7208 = vmatpush.xpose.msrb.mxu0 %v14837_v17  ;;  %10532 = vmatpush.xpose.msk.msrb.mxu1 %vm423_vm0, %v14840_v15  ;;  %v10587_v17 = vld [vmem:[%s15786_s5 + $0x2f8] sm:$0xff]  ;;  %v10584_v15 = vld [vmem:[%s15786_s5 + $0x2e0] sm:$0xff] }
 0x6fd   : > { %7248 = vmatpush.xpose.msrb.mxu2 %v14843_v13  ;;  %10549 = vmatpush.xpose.msk.msrb.mxu3 %vm423_vm0, %v14846_v63  ;;  %v10585_v13 = vld [vmem:[%s15786_s5 + $0x2e8] sm:$0xff]  ;;  %v10582_v63 = vld [vmem:[%s15786_s5 + $0x2d0] sm:$0xff] }
 0x700   : > { %7209 = vmatpush.xpose.msrb.mxu0 %v14855_v6  ;;  %10533 = vmatpush.xpose.msk.msrb.mxu1 %vm423_vm0, %v14858_v44  ;;  %v10583_v6 = vld [vmem:[%s15786_s5 + $0x2d8] sm:$0xff]  ;;  %v10618_v44 = vld [vmem:[%s15786_s5 + $0x3f0] sm:$0xff] }
 0x701   : > { %7249 = vmatpush.xpose.msrb.mxu2 %v14861_v33  ;;  %10550 = vmatpush.xpose.msk.msrb.mxu3 %vm423_vm0, %v14864_v46  ;;  %v10619_v33 = vld [vmem:[%s15786_s5 + $0x3f8] sm:$0xff]  ;;  %v10616_v46 = vld [vmem:[%s15786_s5 + $0x3e0] sm:$0xff] }
 0x704   : > { %7210 = vmatpush.xpose.msrb.mxu0 %v14873_v16  ;;  %10534 = vmatpush.xpose.msk.msrb.mxu1 %vm423_vm0, %v14876_v49  ;;  %v10580_v16 = vld [vmem:[%s15786_s5 + $0x2c0] sm:$0xff]  ;;  %v10581_v49 = vld [vmem:[%s15786_s5 + $0x2c8] sm:$0xff] }
 0x705   : > { %7250 = vmatpush.xpose.msrb.mxu2 %v14879_v0  ;;  %10551 = vmatpush.xpose.msk.msrb.mxu3 %vm423_vm0, %v14882_v3  ;;  %v10617_v0 = vld [vmem:[%s15786_s5 + $0x3e8] sm:$0xff]  ;;  %v10614_v3 = vld [vmem:[%s15786_s5 + $0x3d0] sm:$0xff] }
 0x708   : > { %7211 = vmatpush.xpose.msrb.mxu0 %v14895_v55  ;;  %10535 = vmatpush.xpose.msk.msrb.mxu1 %vm423_vm0, %v14898_v61  ;;  %v10615_v55 = vld [vmem:[%s15786_s5 + $0x3d8] sm:$0xff]  ;;  %v10578_v61 = vld [vmem:[%s15786_s5 + $0x2b0] sm:$0xff] }
 0x709   : > { %7251 = vmatpush.xpose.msrb.mxu2 %v14902_v62  ;;  %10552 = vmatpush.xpose.msk.msrb.mxu3 %vm423_vm0, %v14905_v9  ;;  %v10579_v62 = vld [vmem:[%s15786_s5 + $0x2b8] sm:$0xff]  ;;  %v10612_v9 = vld [vmem:[%s15786_s5 + $0x3c0] sm:$0xff] }
 0x70c   : > { %7212 = vmatpush.xpose.msrb.mxu0 %v14914_v1  ;;  %10536 = vmatpush.xpose.msk.msrb.mxu1 %vm423_vm0, %v14917_v8  ;;  %v10613_v1 = vld [vmem:[%s15786_s5 + $0x3c8] sm:$0xff]  ;;  %v10576_v8 = vld [vmem:[%s15786_s5 + $0x2a0] sm:$0xff] }
 0x70d   : > { %7252 = vmatpush.xpose.msrb.mxu2 %v14920_v43  ;;  %10553 = vmatpush.xpose.msk.msrb.mxu3 %vm423_vm0, %v14923_v51  ;;  %v10577_v43 = vld [vmem:[%s15786_s5 + $0x2a8] sm:$0xff]  ;;  %v10610_v51 = vld [vmem:[%s15786_s5 + $0x3b0] sm:$0xff] }
 0x710   : > { %7213 = vmatpush.xpose.msrb.mxu0 %v14932_v2  ;;  %10537 = vmatpush.xpose.msk.msrb.mxu1 %vm423_vm0, %v14935_v52  ;;  %v10611_v2 = vld [vmem:[%s15786_s5 + $0x3b8] sm:$0xff]  ;;  %v10574_v52 = vld [vmem:[%s15786_s5 + $0x290] sm:$0xff] }
 0x711   : > { %7253 = vmatpush.xpose.msrb.mxu2 %v14938_v26  ;;  %10554 = vmatpush.xpose.msk.msrb.mxu3 %vm423_vm0, %v14941_v10  ;;  %v10575_v26 = vld [vmem:[%s15786_s5 + $0x298] sm:$0xff]  ;;  %v10608_v10 = vld [vmem:[%s15786_s5 + $0x3a0] sm:$0xff] }
 0x713   : > { %7214 = vmatmul.f32.vlgmr.msrb.gmra.mxu0 %v7097_v23  ;;  %10538 = vmatmul.msk.f32.vlgmr.msrb.gmra.mxu1 %vm423_vm0, %v7098_v54 }
 0x714   : > { %7254 = vmatmul.f32.vlgmr.msrb.gmra.mxu2 %v7097_v23  ;;  %10555 = vmatmul.msk.f32.vlgmr.msrb.gmra.mxu3 %vm423_vm0, %v7098_v54  ;;  %v10590_v23 = vld [vmem:[%s15786_s5 + $0x310] sm:$0xff]  ;;  %v10591_v54 = vld [vmem:[%s15786_s5 + $0x318] sm:$0xff] }
 0x715   : > { %7460 = vmatpush.msra.mxu0 %v10586_v41  ;;  %7500 = vmatpush.msra.mxu2 %v10587_v17  ;;  %v7339_v41 = vld [vmem:[%s15786_s5 + $0xe0] sm:$0xff]  ;;  %v7340_v17 = vld [vmem:[%s15786_s5 + $0xe8] sm:$0xff] }
 0x716   : > { %7480 = vmatpush.msra.mxu1 %v10618_v44  ;;  %7520 = vmatpush.msra.mxu3 %v10619_v33  ;;  %v7337_v44 = vld [vmem:[%s15786_s5 + $0xd0] sm:$0xff]  ;;  %v7338_v33 = vld [vmem:[%s15786_s5 + $0xd8] sm:$0xff] }
 0x717   : > { %7461 = vmatpush.msra.mxu0 %v10584_v15  ;;  %7501 = vmatpush.msra.mxu2 %v10585_v13  ;;  %v10588_v15 = vld [vmem:[%s15786_s5 + $0x300] sm:$0xff]  ;;  %v10589_v13 = vld [vmem:[%s15786_s5 + $0x308] sm:$0xff] }
 0x718   : > { %7481 = vmatpush.msra.mxu1 %v10616_v46  ;;  %7521 = vmatpush.msra.mxu3 %v10617_v0  ;;  %v7373_v46 = vld [vmem:[%s15786_s5 + $0x1f0] sm:$0xff]  ;;  %v7336_v0 = vld [vmem:[%s15786_s5 + $0xc8] sm:$0xff] }
 0x719   : > { %7462 = vmatpush.msra.mxu0 %v10582_v63  ;;  %7502 = vmatpush.msra.mxu2 %v10583_v6  ;;  %v15464_v63 = vpop.f32.mrf.mxu0  ;;  %v15466_v6 = vpop.f32.mrf.mxu1 }
 0x71a   : > { %7482 = vmatpush.msra.mxu1 %v10614_v3  ;;  %7522 = vmatpush.msra.mxu3 %v10615_v55  ;;  %v7371_v3 = vld [vmem:[%s15786_s5 + $0x1e0] sm:$0xff]  ;;  %v7372_v55 = vld [vmem:[%s15786_s5 + $0x1e8] sm:$0xff] }
 0x71b   : > { %7463 = vmatpush.msra.mxu0 %v10580_v16  ;;  %7503 = vmatpush.msra.mxu2 %v10581_v49  ;;  %v7374_v16 = vld [vmem:[%s15786_s5 + $0x1f8] sm:$0xff]  ;;  %v7335_v49 = vld [vmem:[%s15786_s5 + $0xc0] sm:$0xff] }
 0x71c   : > { %7483 = vmatpush.msra.mxu1 %v10612_v9  ;;  %7523 = vmatpush.msra.mxu3 %v10613_v1  ;;  %v7369_v9 = vld [vmem:[%s15786_s5 + $0x1d0] sm:$0xff]  ;;  %v7370_v1 = vld [vmem:[%s15786_s5 + $0x1d8] sm:$0xff] }
 0x71d   : > { %7464 = vmatpush.msra.mxu0 %v10578_v61  ;;  %7504 = vmatpush.msra.mxu2 %v10579_v62  ;;  %v7333_v61 = vld [vmem:[%s15786_s5 + $0xb0] sm:$0xff]  ;;  %v7334_v62 = vld [vmem:[%s15786_s5 + $0xb8] sm:$0xff] }
 0x71e   : > { %7484 = vmatpush.msra.mxu1 %v10610_v51  ;;  %7524 = vmatpush.msra.mxu3 %v10611_v2  ;;  %v15510_v51 = vpop.f32.mrf.mxu2  ;;  %v15512_v2 = vpop.f32.mrf.mxu3 }
 0x71f   : > { %7465 = vmatpush.msra.mxu0 %v10576_v8  ;;  %7505 = vmatpush.msra.mxu2 %v10577_v43  ;;  %v7331_v8 = vld [vmem:[%s15786_s5 + $0xa0] sm:$0xff]  ;;  %v7332_v43 = vld [vmem:[%s15786_s5 + $0xa8] sm:$0xff] }
 0x720   : > { %7485 = vmatpush.msra.mxu1 %v10608_v10  ;;  %7525 = vmatpush.msra.mxu3 %v10609_v42 }
 0x721   : > { %7466 = vmatpush.msra.mxu0 %v10574_v52  ;;  %7506 = vmatpush.msra.mxu2 %v10575_v26  ;;  %v15514_v52 = vpop.f32.mrf.mxu0  ;;  %v15516_v26 = vpop.f32.mrf.mxu1 }
 0x722   : > { %7486 = vmatpush.msra.mxu1 %v10606_v7  ;;  %7526 = vmatpush.msra.mxu3 %v10607_v58  ;;  %v7329_v7 = vld [vmem:[%s15786_s5 + $0x90] sm:$0xff]  ;;  %v7367_v58 = vld [vmem:[%s15786_s5 + $0x1c0] sm:$0xff] }
 0x723   : > { %7467 = vmatpush.msra.mxu0 %v10572_v21  ;;  %7507 = vmatpush.msra.mxu2 %v10573_v28 }
 0x724   : > { %7487 = vmatpush.msra.mxu1 %v10604_v4  ;;  %7527 = vmatpush.msra.mxu3 %v10605_v37  ;;  %v7327_v4 = vld [vmem:[%s15786_s5 + $0x80] sm:$0xff]  ;;  %v7365_v37 = vld [vmem:[%s15786_s5 + $0x1b0] sm:$0xff] }
 0x725   : > { %7468 = vmatpush.msra.mxu0 %v10570_v32  ;;  %7508 = vmatpush.msra.mxu2 %v10571_v40  ;;  %v7330_v32 = vld [vmem:[%s15786_s5 + $0x98] sm:$0xff]  ;;  %v7368_v40 = vld [vmem:[%s15786_s5 + $0x1c8] sm:$0xff] }
 0x726   : > { %7488 = vmatpush.msra.mxu1 %v10602_v36  ;;  %7528 = vmatpush.msra.mxu3 %v10603_v57  ;;  %v15518_v10 = vpop.f32.mrf.mxu2  ;;  %v15520_v42 = vpop.f32.mrf.mxu3  ;;  %v7325_v36 = vld [vmem:[%s15786_s5 + $0x70] sm:$0xff]  ;;  %v7363_v57 = vld [vmem:[%s15786_s5 + $0x1a0] sm:$0xff] }
 0x727   : > { %7469 = vmatpush.msra.mxu0 %v10568_v19  ;;  %7509 = vmatpush.msra.mxu2 %v10569_v47  ;;  %v7328_v19 = vld [vmem:[%s15786_s5 + $0x88] sm:$0xff]  ;;  %v7366_v47 = vld [vmem:[%s15786_s5 + $0x1b8] sm:$0xff] }
 0x728   : > { %7489 = vmatpush.msra.mxu1 %v10600_v35  ;;  %7529 = vmatpush.msra.mxu3 %v10601_v24 }
 0x729   : > { %7470 = vmatpush.msra.mxu0 %v10566_v39  ;;  %7510 = vmatpush.msra.mxu2 %v10567_v56  ;;  %v15522_v21 = vpop.f32.mrf.mxu0  ;;  %v15524_v28 = vpop.f32.mrf.mxu1  ;;  %v7326_v39 = vld [vmem:[%s15786_s5 + $0x78] sm:$0xff]  ;;  %v7364_v56 = vld [vmem:[%s15786_s5 + $0x1a8] sm:$0xff] }
 0x72a   : > { %7490 = vmatpush.msra.mxu1 %v10598_v53  ;;  %7530 = vmatpush.msra.mxu3 %v10599_v12  ;;  %v7324_v53 = vld [vmem:[%s15786_s5 + $0x68] sm:$0xff] }
 0x72b   : > { %7471 = vmatpush.msra.mxu0 %v10564_v27  ;;  %7511 = vmatpush.msra.mxu2 %v10565_v50  ;;  %v7323_v27 = vld [vmem:[%s15786_s5 + $0x60] sm:$0xff]  ;;  %v7361_v50 = vld [vmem:[%s15786_s5 + $0x190] sm:$0xff] }
 0x72c   : > { %7491 = vmatpush.msra.mxu1 %v10596_v45  ;;  %7531 = vmatpush.msra.mxu3 %v10597_v11  ;;  %v7321_v45 = vld [vmem:[%s15786_s5 + $0x50] sm:$0xff]  ;;  %v7359_v11 = vld [vmem:[%s15786_s5 + $0x180] sm:$0xff] }
 0x72d   : > { %7472 = vmatpush.msra.mxu0 %v10562_v18  ;;  %7512 = vmatpush.msra.mxu2 %v10563_v5  ;;  %v7362_v5 = vld [vmem:[%s15786_s5 + $0x198] sm:$0xff] }
 0x72e   : > { %7492 = vmatpush.msra.mxu1 %v10594_v14  ;;  %7532 = vmatpush.msra.mxu3 %v10595_v29  ;;  %v15562_v35 = vpop.f32.mrf.mxu2  ;;  %v15564_v24 = vpop.f32.mrf.mxu3  ;;  %v7319_v14 = vld [vmem:[%s15786_s5 + $0x40] sm:$0xff]  ;;  %v7357_v29 = vld [vmem:[%s15786_s5 + $0x170] sm:$0xff] }
 0x72f   : > { %7473 = vmatpush.msra.mxu0 %v10560_v38  ;;  %7513 = vmatpush.msra.mxu2 %v10561_v30  ;;  %v7322_v38 = vld [vmem:[%s15786_s5 + $0x58] sm:$0xff]  ;;  %v7360_v30 = vld [vmem:[%s15786_s5 + $0x188] sm:$0xff] }
 0x730   : > { %7493 = vmatpush.msra.mxu1 %v10592_v34  ;;  %7533 = vmatpush.msra.mxu3 %v10593_v22  ;;  %v7317_v34 = vld [vmem:[%s15786_s5 + $0x30] sm:$0xff]  ;;  %v7355_v22 = vld [vmem:[%s15786_s5 + $0x160] sm:$0xff] }
 0x731   : > { %7474 = vmatpush.msra.mxu0 %v10558_v20  ;;  %7514 = vmatpush.msra.mxu2 %v10559_v59  ;;  %v15575_v12 = vpop.f32.mrf.mxu0  ;;  %v15577_v18 = vpop.f32.mrf.mxu1  ;;  %v7320_v20 = vld [vmem:[%s15786_s5 + $0x48] sm:$0xff]  ;;  %v7358_v59 = vld [vmem:[%s15786_s5 + $0x178] sm:$0xff] }
 0x732   : > { %7494 = vmatpush.msra.mxu1 %v10590_v23  ;;  %7534 = vmatpush.msra.mxu3 %v10591_v54  ;;  %v7315_v23 = vld [vmem:[%s15786_s5 + $0x20] sm:$0xff]  ;;  %v7353_v54 = vld [vmem:[%s15786_s5 + $0x150] sm:$0xff] }
 0x733   : > { %7475 = vmatpush.msra.mxu0 %v10556_v25  ;;  %7515 = vmatpush.msra.mxu2 %v10557_v60  ;;  %v7318_v25 = vld [vmem:[%s15786_s5 + $0x38] sm:$0xff]  ;;  %v7356_v60 = vld [vmem:[%s15786_s5 + $0x168] sm:$0xff] }
 0x734   : > { %7495 = vmatpush.msra.mxu1 %v10588_v15  ;;  %7535 = vmatpush.msra.mxu3 %v10589_v13  ;;  %v7354_v13 = vld [vmem:[%s15786_s5 + $0x158] sm:$0xff] }
 0x735   : > { %7540 = vmatpush.msrb.mxu0 %v7341_v48  ;;  %7580 = vmatpush.msrb.mxu2 %v7342_v31 }
 0x736   : > { %7560 = vmatpush.msrb.mxu1 %v7373_v46  ;;  %7600 = vmatpush.msrb.mxu3 %v7374_v16  ;;  %v6508_v48 = vpop.f32.mrf.mxu2  ;;  %v6528_v31 = vpop.f32.mrf.mxu3  ;;  %v5811_v46 = vadd.f32 %v15466_v6, %v15464_v63  ;;  %v7314_v16 = vld [vmem:[%s15786_s5 + $0x18] sm:$0xff]  ;;  %v7349_v63 = vld [vmem:[%s15786_s5 + $0x130] sm:$0xff]  ;;  %v7312_v6 = vld [vmem:[%s15786_s5 + $0x8] sm:$0xff] }
 0x737   : > { %7541 = vmatpush.msrb.mxu0 %v7339_v41  ;;  %7581 = vmatpush.msrb.mxu2 %v7340_v17  ;;  %v7316_v41 = vld [vmem:[%s15786_s5 + $0x28] sm:$0xff] }
 0x738   : > { %7561 = vmatpush.msrb.mxu1 %v7371_v3  ;;  %7601 = vmatpush.msrb.mxu3 %v7372_v55  ;;  %v7350_v3 = vld [vmem:[%s15786_s5 + $0x138] sm:$0xff]  ;;  %v7347_v55 = vld [vmem:[%s15786_s5 + $0x120] sm:$0xff] }
 0x739   : > { %7542 = vmatpush.msrb.mxu0 %v7337_v44  ;;  %7582 = vmatpush.msrb.mxu2 %v7338_v33  ;;  %v6717_v17 = vpop.f32.mrf.mxu0  ;;  %v6737_v15 = vpop.f32.mrf.mxu1  ;;  %v7313_v44 = vld [vmem:[%s15786_s5 + $0x10] sm:$0xff]  ;;  %v7351_v33 = vld [vmem:[%s15786_s5 + $0x140] sm:$0xff] }
 0x73a   : > { %7562 = vmatpush.msrb.mxu1 %v7369_v9  ;;  %7602 = vmatpush.msrb.mxu3 %v7370_v1  ;;  %v7345_v9 = vld [vmem:[%s15786_s5 + $0x110] sm:$0xff]  ;;  %v7346_v1 = vld [vmem:[%s15786_s5 + $0x118] sm:$0xff] }
 0x73b   : > { %7543 = vmatpush.msrb.mxu0 %v7335_v49  ;;  %7583 = vmatpush.msrb.mxu2 %v7336_v0  ;;  %v7352_v49 = vld [vmem:[%s15786_s5 + $0x148] sm:$0xff]  ;;  %v7311_v0 = vld [vmem:[%s15786_s5] sm:$0xff] }
 0x73c   : > { %7563 = vmatpush.msrb.mxu1 %v7367_v58  ;;  %7603 = vmatpush.msrb.mxu3 %v7368_v40  ;;  %v5851_v58 = vadd.f32 %v15512_v2, %v15510_v51 }
 0x73d   : > { %7544 = vmatpush.msrb.mxu0 %v7333_v61  ;;  %7584 = vmatpush.msrb.mxu2 %v7334_v62  ;;  %v7348_v61 = vld [vmem:[%s15786_s5 + $0x128] sm:$0xff]  ;;  %v5973_v62 = vadd.f32 %v15514_v52, %v5811_v46  ;;  %v7343_v52 = vld [vmem:[%s15786_s5 + $0x100] sm:$0xff] }
 0x73e   : > { %7564 = vmatpush.msrb.mxu1 %v7365_v37  ;;  %7604 = vmatpush.msrb.mxu3 %v7366_v47  ;;  %v6013_v47 = vadd.f32 %v15518_v10, %v5851_v58 }
 0x73f   : > { %7545 = vmatpush.msrb.mxu0 %v7331_v8  ;;  %7585 = vmatpush.msrb.mxu2 %v7332_v43  ;;  %v6240_v8 = vadd.f32 %v15524_v28, %v15522_v21  ;;  %v6757_v43 = vpop.f32.mrf.mxu2  ;;  %v5993_v37 = vadd.f32 %v15516_v26, %v5973_v62  ;;  %v6489_v21 = vadd.f32 %v15577_v18, %v15575_v12  ;;  %v7621_v62 = vstv %s7620_s0 }
 0x740   : > { %7565 = vmatpush.msrb.mxu1 %v7363_v57  ;;  %7605 = vmatpush.msrb.mxu3 %v7364_v56  ;;  %v6033_v26 = vadd.f32 %v15520_v42, %v6013_v47 }
 0x741   : > { %7546 = vmatpush.msrb.mxu0 %v7329_v7  ;;  %7586 = vmatpush.msrb.mxu2 %v7330_v32  ;;  %v6777_v7 = vpop.f32.mrf.mxu3  ;;  %v6282_v28 = vadd.f32 %v6240_v8, %v5993_v37 }
 0x742   : > { %7566 = vmatpush.msrb.mxu1 %v7361_v50  ;;  %7606 = vmatpush.msrb.mxu3 %v7362_v5 }
 0x743   : > { %7547 = vmatpush.msrb.mxu0 %v7327_v4  ;;  %7587 = vmatpush.msrb.mxu2 %v7328_v19  ;;  %v7344_v4 = vld [vmem:[%s15786_s5 + $0x108] sm:$0xff]  ;;  %v6738_v19 = vadd.f32 %v6737_v15, %v6717_v17  ;;  %v6531_v51 = vadd.f32 %v6489_v21, %v6282_v28  ;;  %v16121_v15 = vld [vmem:[#allocation16_spill] sm:$0xff] }
 0x744   : > { %7567 = vmatpush.msrb.mxu1 %v7359_v11  ;;  %7607 = vmatpush.msrb.mxu3 %v7360_v30  ;;  %v16118_v30 = vld [vmem:[#allocation9_spill] sm:$0xff] }
 0x745   : > { %7548 = vmatpush.msrb.mxu0 %v7325_v36  ;;  %7588 = vmatpush.msrb.mxu2 %v7326_v39  ;;  %v6280_v36 = vadd.f32 %v15564_v24, %v15562_v35  ;;  %v6780_v57 = vadd.f32 %v6738_v19, %v6531_v51 }
 0x746   : > { %7568 = vmatpush.msrb.mxu1 %v7357_v29  ;;  %7608 = vmatpush.msrb.mxu3 %v7358_v59 }
 0x747   : > { %7549 = vmatpush.msrb.mxu0 %v7323_v27  ;;  %7589 = vmatpush.msrb.mxu2 %v7324_v53  ;;  %v6529_v27 = vadd.f32 %v6528_v31, %v6508_v48  ;;  %v6283_v5 = vadd.f32 %v6280_v36, %v6033_v26 }
 0x748   : > { %7569 = vmatpush.msrb.mxu1 %v7355_v22  ;;  %7609 = vmatpush.msrb.mxu3 %v7356_v60 }
 0x749   : > { %7550 = vmatpush.msrb.mxu0 %v7321_v45  ;;  %7590 = vmatpush.msrb.mxu2 %v7322_v38  ;;  %v6778_v45 = vadd.f32 %v6777_v7, %v6757_v43  ;;  %v6532_v38 = vadd.f32 %v6529_v27, %v6283_v5 }
 0x74a   : > { %7570 = vmatpush.msrb.mxu1 %v7353_v54  ;;  %7610 = vmatpush.msrb.mxu3 %v7354_v13 }
 0x74b   : > { %7551 = vmatpush.msrb.mxu0 %v7319_v14  ;;  %7591 = vmatpush.msrb.mxu2 %v7320_v20  ;;  %v6781_v29 = vadd.f32 %v6778_v45, %v6532_v38 }
 0x74c   : > { %7571 = vmatpush.msrb.mxu1 %v7351_v33  ;;  %7611 = vmatpush.msrb.mxu3 %v7352_v49  ;;  %v16122_v33 = vld [vmem:[#allocation21_spill] sm:$0xff] }
 0x74d   : > { %7552 = vmatpush.msrb.mxu0 %v7317_v34  ;;  %7592 = vmatpush.msrb.mxu2 %v7318_v25  ;;  %v16119_v25 = vld [vmem:[#allocation3_spill] sm:$0xff] }
 0x74e   : > { %7572 = vmatpush.msrb.mxu1 %v7349_v63  ;;  %7612 = vmatpush.msrb.mxu3 %v7350_v3 }
 0x74f   : > { %7553 = vmatpush.msrb.mxu0 %v7315_v23  ;;  %7593 = vmatpush.msrb.mxu2 %v7316_v41  ;;  %v16120_v41 = vld [vmem:[#allocation18_spill] sm:$0xff] }
 0x750   : > { %7573 = vmatpush.msrb.mxu1 %v7347_v55  ;;  %7613 = vmatpush.msrb.mxu3 %v7348_v61  ;;  %v6966_v32 = vpop.f32.mrf.mxu0  ;;  %v6986_v40 = vpop.f32.mrf.mxu1 }
 0x751   : > { %7554 = vmatpush.msrb.mxu0 %v7313_v44  ;;  %7594 = vmatpush.msrb.mxu2 %v7314_v16  ;;  %v6987_v2 = vadd.f32 %v6986_v40, %v6966_v32 }
 0x752   : > { %7574 = vmatpush.msrb.mxu1 %v7345_v9  ;;  %7614 = vmatpush.msrb.mxu3 %v7346_v1 }
 0x753   : > { %7555 = vmatpush.msrb.mxu0 %v7311_v0  ;;  %7595 = vmatpush.msrb.mxu2 %v7312_v6  ;;  %v7029_v12 = vadd.f32 %v6987_v2, %v6780_v57 }
 0x754   : > { %7575 = vmatpush.msrb.mxu1 %v7343_v52  ;;  %7615 = vmatpush.msrb.mxu3 %v7344_v4 }
 0x759   : > { %v7006_v39 = vpop.f32.mrf.mxu2  ;;  %v7026_v56 = vpop.f32.mrf.mxu3 }
 0x75a   : > { %v7027_v10 = vadd.f32 %v7026_v56, %v7006_v39 }
 0x75c   : > { %v7030_v59 = vadd.f32 %v7027_v10, %v6781_v29 }
 0x790   : > { %v7215_v50 = vpop.f32.mrf.mxu0  ;;  %v7235_v53 = vpop.f32.mrf.mxu1 }
 0x791   : > { %v7236_v18 = vadd.f32 %v7235_v53, %v7215_v50 }
 0x793   : > { %v7278_v11 = vadd.f32 %v7236_v18, %v7029_v12  ;;  %v7697_v18 = vld [vmem:[%s15706_s29 + $0xb0] sm:$0xff] }
 0x795   : > { %v7280_v14 = vadd.f32 %v7278_v11, %v16118_v30 }
 0x797   : > { %v7282_v20 = vmax.f32 %v7280_v14, 0.0  ;;  %v7255_v35 = vpop.f32.mrf.mxu2  ;;  %v7275_v24 = vpop.f32.mrf.mxu3 }
 0x798   : > { %v7276_v34 = vadd.f32 %v7275_v24, %v7255_v35 }
 0x799   : > { %v7385_v42 = vrot.slane %v7282_v20, 6  ;;  %v7298_v23 = vrot.slane %v7282_v20, 5 }
 0x79a   : > { %v7279_v22 = vadd.f32 %v7276_v34, %v7030_v59  ;;  %v7675_v59 = vld [vmem:[%s15706_s29] sm:$0xff]  ;;  %v7676_v34 = vld [vmem:[%s15706_s29 + $0x8] sm:$0xff] }
 0x79b   : > { %v7393_v60 = vsel %vm7308_vm3, %v16119_v25, %v7385_v42  ;;  %v7309_v13 = vsel %vm7308_vm3, %v16121_v15, %v7298_v23  ;;  %v7677_v25 = vld [vmem:[%s15706_s29 + $0x10] sm:$0xff]  ;;  %v7680_v23 = vld [vmem:[%s15706_s29 + $0x28] sm:$0xff] }
 0x79c   : > { %v7281_v48 = vadd.f32 %v7279_v22, %v16118_v30  ;;  %7476 = vmatmul.f32.vlgmr.msra.gmra.mxu0 %v7393_v60  ;;  %7516 = vmatmul.f32.vlgmr.msra.gmra.mxu2 %v7393_v60  ;;  %v7678_v60 = vld [vmem:[%s15706_s29 + $0x18] sm:$0xff] }
 0x79e   : > { %v7283_v31 = vmax.f32 %v7281_v48, 0.0 }
 0x7a0   : > { %v7386_v54 = vrot.slane %v7283_v31, 6  ;;  %v7299_v44 = vrot.slane %v7283_v31, 5  ;;  %v7679_v31 = vld [vmem:[%s15706_s29 + $0x20] sm:$0xff] }
 0x7a2   : > { %v7394_v17 = vsel %vm7308_vm3, %v16120_v41, %v7386_v54  ;;  %v7310_v46 = vsel %vm7308_vm3, %v16122_v33, %v7299_v44  ;;  %v7682_v44 = vld [vmem:[%s15706_s29 + $0x38] sm:$0xff] }
 0x7a3   : > { %7496 = vmatmul.f32.vlgmr.msra.gmra.mxu1 %v7394_v17  ;;  %7536 = vmatmul.f32.vlgmr.msra.gmra.mxu3 %v7394_v17  ;;  %v7681_v17 = vld [vmem:[%s15706_s29 + $0x30] sm:$0xff] }
 0x7a4   : > { %7556 = vmatmul.f32.vlgmr.msrb.gmra.mxu0 %v7309_v13  ;;  %7596 = vmatmul.f32.vlgmr.msrb.gmra.mxu2 %v7309_v13 }
 0x7ab   : > { %7576 = vmatmul.f32.vlgmr.msrb.gmra.mxu1 %v7310_v46  ;;  %7616 = vmatmul.f32.vlgmr.msrb.gmra.mxu3 %v7310_v46 }
 0x819   : > { %v7477_v16 = vpop.f32.mrf.mxu0 }
 0x81f   : > { %v7517_v0 = vpop.f32.mrf.mxu2 }
 0x820   : > { %v7497_v49 = vpop.f32.mrf.mxu1 }
 0x821   : > { %v7498_v63 = vadd.f32 %v7497_v49, %v7477_v16  ;;  %v7557_v6 = vpop.f32.mrf.mxu0  ;;  %v7683_v49 = vld [vmem:[%s15706_s29 + $0x40] sm:$0xff] }
 0x823   : > { %v7558_v55 = vadd.f32 %v7557_v6, %v7498_v63  ;;  %v7684_v6 = vld [vmem:[%s15706_s29 + $0x48] sm:$0xff] }
 0x826   : > { %v7537_v3 = vpop.f32.mrf.mxu3 }
 0x827   : > { %v7538_v9 = vadd.f32 %v7537_v3, %v7517_v0  ;;  %v7597_v8 = vpop.f32.mrf.mxu2 }
 0x828   : > { %v7577_v61 = vpop.f32.mrf.mxu1 }
 0x829   : > { %v7578_v1 = vadd.f32 %v7577_v61, %v7558_v55  ;;  %v7598_v52 = vadd.f32 %v7597_v8, %v7538_v9  ;;  %v7685_v55 = vld [vmem:[%s15706_s29 + $0x50] sm:$0xff]  ;;  %v7686_v9 = vld [vmem:[%s15706_s29 + $0x58] sm:$0xff]  ;;  %v7687_v8 = vld [vmem:[%s15706_s29 + $0x60] sm:$0xff] }
 0x82b   : > { %v7622_v43 = vadd.f32 %v7621_v62, %v7578_v1 }
 0x82d   : > { %v10620_v7 = vmul.f32 -1.442695, %v7622_v43 }
 0x82e   : > { %v7617_v58 = vpop.f32.mrf.mxu3 }
 0x82f   : > { %10637 = vpow2.f32 %v10620_v7  ;;  %v7618_v32 = vadd.f32 %v7617_v58, %v7598_v52  ;;  %v7688_v7 = vld [vmem:[%s15706_s29 + $0x68] sm:$0xff]  ;;  %v7689_v58 = vld [vmem:[%s15706_s29 + $0x70] sm:$0xff] }
 0x831   : > { %v7623_v40 = vadd.f32 %v7621_v62, %v7618_v32 }
 0x833   : > { %v10621_v4 = vmul.f32 -1.442695, %v7623_v40  ;;  %v7690_v40 = vld [vmem:[%s15706_s29 + $0x78] sm:$0xff] }
 0x835   : > { %v10638_v37 = vpop.eup %10637  ;;  %10639 = vpow2.f32 %v10621_v4 }
 0x836   : > { %v7630_v21 = vadd.f32 1.0, %v10638_v37 }
 0x838   : > { %10641 = vrcp.f32 %v7630_v21  ;;  %vm7637_vm6 = vweird.f32 %v7630_v21  ;;  %v7643_v12 = vand.u32 2147483648, %v7630_v21  ;;  %v7641_v5 = vand.u32 2147483647, %v7630_v21 }
 0x83a   : > { %v7644_v30 = vor.u32 1.1754944e-38, %v7643_v12  ;;  %vm7642_vm12 = vcmp.eq.f32.partialorder %v7641_v5, 8.507059e+37 }
 0x83b   : > { %v10640_v28 = vpop.eup %10639 }
 0x83c   : > { %v7631_v19 = vadd.f32 1.0, %v10640_v28 }
 0x83e   : > { %v10642_v47 = vpop.eup %10641  ;;  %10643 = vrcp.f32 %v7631_v19  ;;  %v7658_v26 = vand.u32 2147483648, %v7631_v19  ;;  %v7656_v53 = vand.u32 2147483647, %v7631_v19  ;;  %vm7652_vm8 = vweird.f32 %v7631_v19 }
 0x83f   : > { %v7633_v51 = vmul.f32 %v10642_v47, %v7630_v21  ;;  %vm7638_vm4 = vweird.f32 %v10642_v47  ;;  %v7691_v21 = vld [vmem:[%s15706_s29 + $0x80] sm:$0xff] }
 0x840   : > { %vm15696_vm7 = vmor %vm7637_vm6, %vm7638_vm4  ;;  %v7659_v11 = vor.u32 1.1754944e-38, %v7658_v26  ;;  %vm7657_vm10 = vcmp.eq.f32.partialorder %v7656_v53, 8.507059e+37  ;;  %v7695_v26 = vld [vmem:[%s15706_s29 + $0xa0] sm:$0xff]  ;;  %v7696_v53 = vld [vmem:[%s15706_s29 + $0xa8] sm:$0xff] }
 0x841   : > { %v7634_v2 = vsub.f32 1.0, %v7633_v51 }
 0x843   : > { %v7635_v57 = vmul.f32 %v10642_v47, %v7634_v2 }
 0x844   : > { %v10644_v36 = vpop.eup %10643 }
 0x845   : > { %v7648_v39 = vmul.f32 %v10644_v36, %v7631_v19  ;;  %v7636_v27 = vadd.f32 %v10642_v47, %v7635_v57  ;;  %vm7653_vm5 = vweird.f32 %v10644_v36 }
 0x846   : > { %vm7654_vm9 = vmor %vm7652_vm8, %vm7653_vm5 }
 0x847   : > { %v7649_v56 = vsub.f32 1.0, %v7648_v39  ;;  %v7640_v38 = vsel %vm15696_vm7, %v10642_v47, %v7636_v27  ;;  %v7692_v47 = vld [vmem:[%s15706_s29 + $0x88] sm:$0xff]  ;;  %v7694_v39 = vld [vmem:[%s15706_s29 + $0x98] sm:$0xff] }
 0x848   : > { %v7645_v20 = vsel %vm7642_vm12, %v7644_v30, %v7640_v38 }
 0x849   : > { %v7650_v50 = vmul.f32 %v10644_v36, %v7649_v56 }
 0x84b   : > { %v7651_v45 = vadd.f32 %v10644_v36, %v7650_v50 }
 0x84d   : > { %v7655_v10 = vsel %vm7654_vm9, %v10644_v36, %v7651_v45  ;;  %v7693_v36 = vld [vmem:[%s15706_s29 + $0x90] sm:$0xff]  ;;  %v7698_v45 = vld [vmem:[%s15706_s29 + $0xb8] sm:$0xff] }
 0x84e   : > { %v7660_v14 = vsel %vm7657_vm10, %v7659_v11, %v7655_v10 }
 0x84f   : > { %v7664_v29 = vrot.slane %v7660_v14, 7  ;;  %v7699_v14 = vld [vmem:[%s15706_s29 + $0xc0] sm:$0xff] }
 0x851   : > { %v7665_v35 = vsel %vm7302_vm1, %v7645_v20, %v7664_v29  ;;  %v7667_v24 = vsel %vm7666_vm11, %v7645_v20, %v7664_v29  ;;  %v7670_v16 = vsel %vm7669_vm13, %v7645_v20, %v7664_v29  ;;  %v7673_v2 = vsel %vm7672_vm14, %v7645_v20, %v7664_v29 }
 0x852   : > { %v7707_v42 = vperm.slane %v7665_v35, 0  ;;  %v7668_v22 = vrot.slane %v7667_v24, 1  ;;  %v7708_v48 = vperm.slane %v7665_v35, 1  ;;  %v7671_v62 = vrot.slane %v7670_v16, 2  ;;  %v7700_v35 = vld [vmem:[%s15706_s29 + $0xc8] sm:$0xff]  ;;  %v7701_v24 = vld [vmem:[%s15706_s29 + $0xd0] sm:$0xff] }
 0x853   : > { %v7674_v50 = vrot.slane %v7673_v2, 3 }
 0x854   : > { %v7723_v54 = vmul.f32 %v7707_v42, %v7675_v59  ;;  %v7724_v41 = vmul.f32 %v7708_v48, %v7676_v34  ;;  %v7725_v15 = vmul.f32 %v7707_v42, %v7677_v25  ;;  %v7726_v13 = vmul.f32 %v7708_v48, %v7678_v60  ;;  %v7702_v59 = vld [vmem:[%s15706_s29 + $0xd8] sm:$0xff]  ;;  %v7704_v25 = vld [vmem:[%s15706_s29 + $0xe8] sm:$0xff] }
 0x855   : > { %v7709_v33 = vperm.slane %v7668_v22, 0  ;;  %v7727_v46 = vmul.f32 %v7707_v42, %v7679_v31  ;;  %v7710_v0 = vperm.slane %v7668_v22, 1  ;;  %v7728_v63 = vmul.f32 %v7708_v48, %v7680_v23  ;;  %v7706_v23 = vld [vmem:[%s15706_s29 + $0xf8] sm:$0xff] }
 0x856   : > { %7755 = vst [vmem:[%s15716_s7] sm:$0xff] %v7723_v54  ;;  %v7729_v3 = vmul.f32 %v7707_v42, %v7681_v17  ;;  %v7730_v61 = vmul.f32 %v7708_v48, %v7682_v44  ;;  %v7711_v4 = vperm.slane %v7671_v62, 0  ;;  %v7712_v28 = vperm.slane %v7671_v62, 1  ;;  %v7703_v42 = vld [vmem:[%s15706_s29 + $0xe0] sm:$0xff]  ;;  %v7705_v48 = vld [vmem:[%s15706_s29 + $0xf0] sm:$0xff] }
 0x857   : > { %7756 = vst [vmem:[%s15716_s7 + $0x8] sm:$0xff] %v7724_v41  ;;  %v7731_v1 = vmul.f32 %v7709_v33, %v7683_v49  ;;  %v7732_v43 = vmul.f32 %v7710_v0, %v7684_v6  ;;  %v7733_v52 = vmul.f32 %v7709_v33, %v7685_v55  ;;  %v7734_v32 = vmul.f32 %v7710_v0, %v7686_v9 }
 0x858   : > { %7757 = vst [vmem:[%s15716_s7 + $0x10] sm:$0xff] %v7725_v15  ;;  %v7735_v37 = vmul.f32 %v7709_v33, %v7687_v8  ;;  %v7736_v19 = vmul.f32 %v7710_v0, %v7688_v7  ;;  %v7737_v51 = vmul.f32 %v7709_v33, %v7689_v58  ;;  %v7738_v57 = vmul.f32 %v7710_v0, %v7690_v40 }
 0x859   : > { %7758 = vst [vmem:[%s15716_s7 + $0x18] sm:$0xff] %v7726_v13  ;;  %v7739_v56 = vmul.f32 %v7711_v4, %v7691_v21  ;;  %v7740_v27 = vmul.f32 %v7712_v28, %v7692_v47  ;;  %v7741_v12 = vmul.f32 %v7711_v4, %v7693_v36  ;;  %v7742_v5 = vmul.f32 %v7712_v28, %v7694_v39 }
 0x85a   : > { %7759 = vst [vmem:[%s15716_s7 + $0x20] sm:$0xff] %v7727_v46  ;;  %v7743_v11 = vmul.f32 %v7711_v4, %v7695_v26  ;;  %v7744_v38 = vmul.f32 %v7712_v28, %v7696_v53  ;;  %v7713_v10 = vperm.slane %v7674_v50, 0  ;;  %v7745_v30 = vmul.f32 %v7711_v4, %v7697_v18 }
 0x85b   : > { %7760 = vst [vmem:[%s15716_s7 + $0x28] sm:$0xff] %v7728_v63  ;;  %v7714_v29 = vperm.slane %v7674_v50, 1  ;;  %v7746_v20 = vmul.f32 %v7712_v28, %v7698_v45 }
 0x85c   : > { %7761 = vst [vmem:[%s15716_s7 + $0x30] sm:$0xff] %v7729_v3  ;;  %v7747_v34 = vmul.f32 %v7713_v10, %v7699_v14  ;;  %v7749_v60 = vmul.f32 %v7713_v10, %v7701_v24  ;;  %v7751_v54 = vmul.f32 %v7713_v10, %v7703_v42  ;;  %v7753_v17 = vmul.f32 %v7713_v10, %v7705_v48 }
 0x85d   : > { %7762 = vst [vmem:[%s15716_s7 + $0x38] sm:$0xff] %v7730_v61  ;;  %v7748_v22 = vmul.f32 %v7714_v29, %v7700_v35  ;;  %v7750_v31 = vmul.f32 %v7714_v29, %v7702_v59  ;;  %v7752_v41 = vmul.f32 %v7714_v29, %v7704_v25  ;;  %v7754_v15 = vmul.f32 %v7714_v29, %v7706_v23 }
 0x85e   : > { %7763 = vst [vmem:[%s15716_s7 + $0x40] sm:$0xff] %v7731_v1 }
 0x85f   : > { %7764 = vst [vmem:[%s15716_s7 + $0x48] sm:$0xff] %v7732_v43 }
 0x860   : > { %7765 = vst [vmem:[%s15716_s7 + $0x50] sm:$0xff] %v7733_v52 }
 0x861   : > { %7766 = vst [vmem:[%s15716_s7 + $0x58] sm:$0xff] %v7734_v32 }
 0x862   : > { %7767 = vst [vmem:[%s15716_s7 + $0x60] sm:$0xff] %v7735_v37 }
 0x863   : > { %7768 = vst [vmem:[%s15716_s7 + $0x68] sm:$0xff] %v7736_v19 }
 0x864   : > { %7769 = vst [vmem:[%s15716_s7 + $0x70] sm:$0xff] %v7737_v51 }
 0x865   : > { %7770 = vst [vmem:[%s15716_s7 + $0x78] sm:$0xff] %v7738_v57 }
 0x866   : > { %7771 = vst [vmem:[%s15716_s7 + $0x80] sm:$0xff] %v7739_v56 }
 0x867   : > { %7772 = vst [vmem:[%s15716_s7 + $0x88] sm:$0xff] %v7740_v27 }
 0x868   : > { %7773 = vst [vmem:[%s15716_s7 + $0x90] sm:$0xff] %v7741_v12 }
 0x869   : > { %7774 = vst [vmem:[%s15716_s7 + $0x98] sm:$0xff] %v7742_v5 }
 0x86a   : > { %7775 = vst [vmem:[%s15716_s7 + $0xa0] sm:$0xff] %v7743_v11 }
 0x86b   : > { %7776 = vst [vmem:[%s15716_s7 + $0xa8] sm:$0xff] %v7744_v38 }
 0x86c   : > { %7777 = vst [vmem:[%s15716_s7 + $0xb0] sm:$0xff] %v7745_v30 }
 0x86d   : > { %7778 = vst [vmem:[%s15716_s7 + $0xb8] sm:$0xff] %v7746_v20 }
 0x86e   : > { %7779 = vst [vmem:[%s15716_s7 + $0xc0] sm:$0xff] %v7747_v34 }
 0x86f   : > { %7780 = vst [vmem:[%s15716_s7 + $0xc8] sm:$0xff] %v7748_v22 }
 0x870   : > { %7781 = vst [vmem:[%s15716_s7 + $0xd0] sm:$0xff] %v7749_v60 }
 0x871   : > { %7782 = vst [vmem:[%s15716_s7 + $0xd8] sm:$0xff] %v7750_v31 }
 0x872   : > { %7783 = vst [vmem:[%s15716_s7 + $0xe0] sm:$0xff] %v7751_v54 }
 0x873   : > { %7784 = vst [vmem:[%s15716_s7 + $0xe8] sm:$0xff] %v7752_v41 }
 0x874   : > { %7785 = vst [vmem:[%s15716_s7 + $0xf0] sm:$0xff] %v7753_v17 }
 0x875   : > { %7786 = vst [vmem:[%s15716_s7 + $0xf8] sm:$0xff] %v7754_v15 }
 0x876 PF: > { %s17_s23 = sadd.s32 1, %s10651_s23  }
 0x877   : > { %p14_p4 = scmp.ge.s32.totalorder %s17_s23, 4  }
 0x879   :  { %16 = sbr.rel (!%p14_p4) target bundleno = 2 (0x2), region = 111 }

</bundles_post_ra>
